<compile_context>
chip_gen: v7x
topology: tpu7x:2x2x1
jax: 0.10.0
libtpu: 0.0.40
codegen_flags: <defaults>
</compile_context>

<pallas_src>
import functools
import math

import jax
import jax.numpy as jnp
from jax.experimental import pallas as pl
from jax.experimental.pallas import tpu as pltpu

# ----------------------------- small synthetic config -----------------------------
B_TEXT = 2                 # number of text examples
N_IMG = 2 * B_TEXT         # BLIP-NLVR: two images per text example, stacked on batch
IMG_C, IMG_H, IMG_W = 3, 16, 16
PATCH = 8
N_PATCH = (IMG_H // PATCH) * (IMG_W // PATCH)
T_IMG = N_PATCH + 1        # +cls token
VIS_WIDTH = 128
VIS_DEPTH = 2

HIDDEN = 128               # text hidden == encoder_width (as in BLIP-base)
N_HEADS = 4
HEAD_DIM = HIDDEN // N_HEADS
INTER = 4 * HIDDEN
TXT_LAYERS = 2
MERGE_START = 1            # real BLIP-NLVR uses concat-merge for layer_num >= 6 of 12
VOCAB = 64
MAX_POS = 32
SEQ = 8
ENC_TOKEN_ID = VOCAB - 1   # stands in for tokenizer.enc_token_id
LN_EPS_VIT = 1e-6
LN_EPS_BERT = 1e-12
NEG_MASK = -10000.0        # BERT extended-attention-mask fill value
PRED_PAD = 128             # lane-padded logits width (only [:, :2] is meaningful)


# ----------------------------- in-kernel math helpers -----------------------------
def _ln(x, g, b, eps):
    mu = jnp.mean(x, axis=-1, keepdims=True)
    xc = x - mu
    var = jnp.mean(xc * xc, axis=-1, keepdims=True)
    return xc * jax.lax.rsqrt(var + eps) * g + b


def _dot(a, w):
    """bf16 x bf16 MXU matmul with f32 accumulation (weights are stored in bf16)."""
    return jnp.dot(a.astype(jnp.bfloat16), w, preferred_element_type=jnp.float32)


def _gelu(x):
    # TODO(synk): PyTorch nn.GELU / BERT use erf-GELU; tanh approximation used here for
    # robust Mosaic lowering (difference ~1e-3).
    return jax.nn.gelu(x, approximate=True)


def _mha(q, k, v, bias, n_heads, scale):
    """Multi-head attention with full-128-lane MXU contractions (no per-head slices).

    q: (Lq, D) f32; k, v: (Lk, D) f32; bias: None or (Lq, Lk) f32 additive.
    Head h is isolated by multiplying K/V with a disjoint lane mask, so
        ctx = sum_h softmax(q @ (k*m_h)^T * scale + bias) @ (v*m_h)
    equals concat_h(softmax(q_h k_h^T)v_h) without any 32-lane relayouts.
    Returns ctx (Lq, D) f32; feed the output projection as one full matmul.
    """
    Lq, D = q.shape
    Lk = k.shape[0]
    dh = D // n_heads
    lane = jax.lax.broadcasted_iota(jnp.int32, (Lk, D), 1)   # hoisted out of head loop
    q_b = q.astype(jnp.bfloat16)
    ctx = jnp.zeros((Lq, D), jnp.float32)
    for h in range(n_heads):
        m = ((lane >= h * dh) & (lane < (h + 1) * dh)).astype(jnp.float32)
        k_h = (k * m).astype(jnp.bfloat16)
        v_h = (v * m).astype(jnp.bfloat16)
        s = jax.lax.dot_general(q_b, k_h, (((1,), (1,)), ((), ())),
                                preferred_element_type=jnp.float32) * scale
        if bias is not None:
            s = s + bias
        s = s - jnp.max(s, axis=-1, keepdims=True)
        p = jnp.exp(s)
        p = p * pl.reciprocal(jnp.sum(p, axis=-1, keepdims=True), approx=True)
        ctx = ctx + jnp.dot(p.astype(jnp.bfloat16), v_h,
                            preferred_element_type=jnp.float32)
    return ctx


# ----------------------------- Pallas kernels -----------------------------
def _patch_embed_kernel(x_ref, w_ref, b_ref, o_ref):
    o_ref[...] = (_dot(x_ref[...], w_ref[...]) + b_ref[...]).astype(o_ref.dtype)


def _vit_block_kernel(x_ref, g1_ref, b1_ref, wqkv_ref, bqkv_ref, wp_ref, bp_ref,
                      g2_ref, b2_ref, w1_ref, bf1_ref, w2_ref, bf2_ref, *rest,
                      eps, n_heads, scale, final_ln):
    """One full ViT block (pre-LN attention + pre-LN MLP) for one batch element."""
    if final_ln:
        gf_ref, bf_ref, o_ref = rest
    else:
        (o_ref,) = rest
    x = x_ref[0]                                                    # (T, D) f32
    D = x.shape[-1]
    # --- attention sub-block: x + Proj(MHSA(LN(x))) ---
    h = _ln(x, g1_ref[...], b1_ref[...], eps)
    qkv = _dot(h, wqkv_ref[...]) + bqkv_ref[...]
    ctx = _mha(qkv[:, :D], qkv[:, D:2 * D], qkv[:, 2 * D:], None, n_heads, scale)
    x = x + _dot(ctx, wp_ref[...]) + bp_ref[...]
    # --- MLP sub-block: x + FC2(GELU(FC1(LN(x)))) ---
    h = _ln(x, g2_ref[...], b2_ref[...], eps)
    h = _gelu(_dot(h, w1_ref[...]) + bf1_ref[...])
    x = x + _dot(h, w2_ref[...]) + bf2_ref[...]
    if final_ln:                                                    # folded final ViT LN
        x = _ln(x, gf_ref[...], bf_ref[...], eps)
    o_ref[0] = x.astype(o_ref.dtype)


def _bert_layer_kernel(x_ref, bias_ref, i0_ref, i1_ref, *rest,
                       eps, n_heads, scale, pre_ln, merge, has_cls):
    """One full BLIP-NLVR text layer (self-attn + twin cross-attn + merge + FFN),
    post-LN BERT style, for one text batch element.  Optionally fuses the embedding
    LayerNorm (first layer) and the cls head (last layer)."""
    rest = list(rest)

    def take(n):
        vals = rest[:n]
        del rest[:n]
        return vals

    if pre_ln:
        pg_ref, pb_ref = take(2)
    wqkv_ref, bqkv_ref, wso_ref, bso_ref, sg_ref, sb_ref = take(6)
    wq_ref, bq_ref, wkv_ref, bkv_ref, wco_ref, bco_ref = take(6)
    if merge:
        wm_ref, bm_ref = take(2)
    cg_ref, cb_ref = take(2)
    w1_ref, b1_ref, w2_ref, b2_ref, fg_ref, fb_ref = take(6)
    if has_cls:
        cw1_ref, cb1_ref, cw2_ref, cb2_ref = take(4)
    o_ref = rest[0]
    if has_cls:
        pred_ref = rest[1]

    x = x_ref[0]                                                    # (L, D) f32
    L, D = x.shape
    if pre_ln:
        x = _ln(x, pg_ref[...], pb_ref[...], eps)                   # embedding LayerNorm

    # --- self attention (with extended attention-mask bias), residual + LN ---
    qkv = _dot(x, wqkv_ref[...]) + bqkv_ref[...]
    bias = jnp.broadcast_to(bias_ref[0], (L, L))                    # hoisted once
    ctx = _mha(qkv[:, :D], qkv[:, D:2 * D], qkv[:, 2 * D:], bias, n_heads, scale)
    h1 = _ln(x + _dot(ctx, wso_ref[...]) + bso_ref[...], sg_ref[...], sb_ref[...], eps)

    # --- twin cross attention (shared weights, image_atts == ones -> zero bias omitted) ---
    q = _dot(h1, wq_ref[...]) + bq_ref[...]
    kv0 = _dot(i0_ref[0], wkv_ref[...]) + bkv_ref[...]
    kv1 = _dot(i1_ref[0], wkv_ref[...]) + bkv_ref[...]
    c0 = _dot(_mha(q, kv0[:, :D], kv0[:, D:], None, n_heads, scale), wco_ref[...]) + bco_ref[...]
    c1 = _dot(_mha(q, kv1[:, :D], kv1[:, D:], None, n_heads, scale), wco_ref[...]) + bco_ref[...]
    if merge:
        # concat([c0, c1], -1) @ Wm == c0 @ Wm[:D] + c1 @ Wm[D:]  (no lane concat needed)
        wm = wm_ref[...]
        cm = _dot(c0, wm[:D, :]) + _dot(c1, wm[D:, :]) + bm_ref[...]
    else:
        cm = (c0 + c1) * 0.5
    h2 = _ln(cm + h1, cg_ref[...], cb_ref[...], eps)

    # --- FFN, residual + LN ---
    f = _gelu(_dot(h2, w1_ref[...]) + b1_ref[...])
    h3 = _ln(h2 + _dot(f, w2_ref[...]) + b2_ref[...], fg_ref[...], fb_ref[...], eps)
    o_ref[0] = h3.astype(o_ref.dtype)

    if has_cls:
        # cls head on token 0: Linear -> ReLU -> Linear (lane-padded to 128-wide store)
        z = jnp.maximum(_dot(h3[0:1, :], cw1_ref[...]) + cb1_ref[...], 0.0)
        pred_ref[0] = (_dot(z, cw2_ref[...]) + cb2_ref[...]).astype(pred_ref.dtype)


# ----------------------------- pallas_call wrappers -----------------------------
def _wspec(shape):
    nd = len(shape)
    return pl.BlockSpec(shape, lambda i, nd=nd: (0,) * nd)


def _b2(b):
    return b.reshape(1, -1)


def patch_embed(patches, p):
    """patches: (M, K) f32 @ W: (K, N) bf16 -> (M, N) f32; 2-way row split (v7x)."""
    M, K = patches.shape
    N = p["w"].shape[1]
    tm = M // 2
    return pl.pallas_call(
        _patch_embed_kernel,
        out_shape=jax.ShapeDtypeStruct((M, N), jnp.float32),
        grid=(2,),
        in_specs=[pl.BlockSpec((tm, K), lambda i: (i, 0)),
                  _wspec((K, N)), _wspec((1, N))],
        out_specs=pl.BlockSpec((tm, N), lambda i: (i, 0)),
        compiler_params=pltpu.CompilerParams(dimension_semantics=("parallel",)),
    )(patches, p["w"], _b2(p["b"]))


def vit_block(x, blk, final_ln_params=None):
    N, T, D = x.shape
    final_ln = final_ln_params is not None
    in_specs = [pl.BlockSpec((1, T, D), lambda i: (i, 0, 0)),
                _wspec((1, D)), _wspec((1, D)),
                _wspec((D, 3 * D)), _wspec((1, 3 * D)),
                _wspec((D, D)), _wspec((1, D)),
                _wspec((1, D)), _wspec((1, D)),
                _wspec((D, 4 * D)), _wspec((1, 4 * D)),
                _wspec((4 * D, D)), _wspec((1, D))]
    args = [x,
            _b2(blk["ln1"]["g"]), _b2(blk["ln1"]["b"]),
            blk["qkv"]["w"], _b2(blk["qkv"]["b"]),
            blk["proj"]["w"], _b2(blk["proj"]["b"]),
            _b2(blk["ln2"]["g"]), _b2(blk["ln2"]["b"]),
            blk["fc1"]["w"], _b2(blk["fc1"]["b"]),
            blk["fc2"]["w"], _b2(blk["fc2"]["b"])]
    if final_ln:
        in_specs += [_wspec((1, D)), _wspec((1, D))]
        args += [_b2(final_ln_params["g"]), _b2(final_ln_params["b"])]
    return pl.pallas_call(
        functools.partial(_vit_block_kernel, eps=LN_EPS_VIT, n_heads=N_HEADS,
                          scale=1.0 / math.sqrt(D // N_HEADS), final_ln=final_ln),
        out_shape=jax.ShapeDtypeStruct((N, T, D), jnp.float32),
        grid=(N,),
        in_specs=in_specs,
        out_specs=pl.BlockSpec((1, T, D), lambda i: (i, 0, 0)),
        compiler_params=pltpu.CompilerParams(dimension_semantics=("parallel",)),
    )(*args)


def bert_layer(x, ext_bias, img0, img1, lw, *, pre_ln_params=None, merge=False,
               cls_params=None):
    B, L, D = x.shape
    Ti, VW = img0.shape[1], img0.shape[2]
    pre_ln = pre_ln_params is not None
    has_cls = cls_params is not None

    in_specs = [pl.BlockSpec((1, L, D), lambda i: (i, 0, 0)),
                pl.BlockSpec((1, 1, L), lambda i: (i, 0, 0)),
                pl.BlockSpec((1, Ti, VW), lambda i: (i, 0, 0)),
                pl.BlockSpec((1, Ti, VW), lambda i: (i, 0, 0))]
    args = [x, ext_bias, img0, img1]
    if pre_ln:
        in_specs += [_wspec((1, D)), _wspec((1, D))]
        args += [_b2(pre_ln_params["g"]), _b2(pre_ln_params["b"])]
    sa, ca = lw["self"], lw["cross"]
    in_specs += [_wspec((D, 3 * D)), _wspec((1, 3 * D)), _wspec((D, D)), _wspec((1, D)),
                 _wspec((1, D)), _wspec((1, D))]
    args += [sa["qkv"]["w"], _b2(sa["qkv"]["b"]), sa["out"]["w"], _b2(sa["out"]["b"]),
             _b2(sa["ln"]["g"]), _b2(sa["ln"]["b"])]
    in_specs += [_wspec((D, D)), _wspec((1, D)), _wspec((VW, 2 * D)), _wspec((1, 2 * D)),
                 _wspec((D, D)), _wspec((1, D))]
    args += [ca["q"]["w"], _b2(ca["q"]["b"]), ca["kv"]["w"], _b2(ca["kv"]["b"]),
             ca["out"]["w"], _b2(ca["out"]["b"])]
    if merge:
        in_specs += [_wspec((2 * D, D)), _wspec((1, D))]
        args += [ca["merge"]["w"], _b2(ca["merge"]["b"])]
    in_specs += [_wspec((1, D)), _wspec((1, D))]
    args += [_b2(ca["ln"]["g"]), _b2(ca["ln"]["b"])]
    in_specs += [_wspec((D, INTER)), _wspec((1, INTER)), _wspec((INTER, D)), _wspec((1, D)),
                 _wspec((1, D)), _wspec((1, D))]
    args += [lw["inter"]["w"], _b2(lw["inter"]["b"]), lw["out"]["w"], _b2(lw["out"]["b"]),
             _b2(lw["ffn_ln"]["g"]), _b2(lw["ffn_ln"]["b"])]
    if has_cls:
        in_specs += [_wspec((D, D)), _wspec((1, D)),
                     _wspec((D, PRED_PAD)), _wspec((1, PRED_PAD))]
        args += [cls_params["w1"]["w"], _b2(cls_params["w1"]["b"]),
                 cls_params["w2"]["w"], _b2(cls_params["w2"]["b"])]

    if has_cls:
        out_shape = (jax.ShapeDtypeStruct((B, L, D), jnp.float32),
                     jax.ShapeDtypeStruct((B, 1, PRED_PAD), jnp.float32))
        out_specs = (pl.BlockSpec((1, L, D), lambda i: (i, 0, 0)),
                     pl.BlockSpec((1, 1, PRED_PAD), lambda i: (i, 0, 0)))
    else:
        out_shape = jax.ShapeDtypeStruct((B, L, D), jnp.float32)
        out_specs = pl.BlockSpec((1, L, D), lambda i: (i, 0, 0))

    return pl.pallas_call(
        functools.partial(_bert_layer_kernel, eps=LN_EPS_BERT, n_heads=N_HEADS,
                          scale=1.0 / math.sqrt(HEAD_DIM), pre_ln=pre_ln,
                          merge=merge, has_cls=has_cls),
        out_shape=out_shape,
        grid=(B,),
        in_specs=in_specs,
        out_specs=out_specs,
        compiler_params=pltpu.CompilerParams(dimension_semantics=("parallel",)),
    )(*args)


# ----------------------------- model pieces -----------------------------
def vit_forward(p, image):
    """image: (N, C, H, W) float32 NCHW -> image_embeds (N, T_IMG, VIS_WIDTH)."""
    N, C, H, W = image.shape
    hp, wp = H // PATCH, W // PATCH
    # Patch extraction equivalent to Conv2d(kernel=stride=PATCH); flatten order (C, ph, pw)
    patches = image.reshape(N, C, hp, PATCH, wp, PATCH)
    patches = patches.transpose(0, 2, 4, 1, 3, 5).reshape(N * hp * wp, C * PATCH * PATCH)
    x = patch_embed(patches, p["patch"]).reshape(N, N_PATCH, VIS_WIDTH)
    cls = jnp.broadcast_to(p["cls_token"], (N, 1, VIS_WIDTH))
    x = jnp.concatenate([cls, x], axis=1) + p["pos_embed"]          # (N, T_IMG, W)
    for bi, blk in enumerate(p["blocks"]):
        last = bi == len(p["blocks"]) - 1
        x = vit_block(x, blk, final_ln_params=p["ln"] if last else None)
    return x


def blip_nlvr_forward(params, image, input_ids, attention_mask):
    # visual encoder
    image_embeds = vit_forward(params["vit"], image)                # (2B, T_IMG, VW)
    B = input_ids.shape[0]
    img0, img1 = image_embeds[:B], image_embeds[B:]
    L = input_ids.shape[1]

    # tokenizer glue: text.input_ids[:, 0] = enc_token_id
    input_ids = input_ids.at[:, 0].set(ENC_TOKEN_ID)

    txt = params["text"]
    # embeddings (word + position). The gather stays in plain JAX glue; the embedding
    # LayerNorm is folded into the first BERT layer kernel.
    emb = jnp.take(txt["word_emb"], input_ids, axis=0) + txt["pos_emb"][:L][None, :, :]

    # extended attention mask: (1 - mask) * -10000, (B, 1, L); cross-attn bias is zero
    # (image_atts == ones) and omitted entirely.
    ext_bias = ((1.0 - attention_mask.astype(jnp.float32)) * NEG_MASK).reshape(B, 1, L)

    x = emb
    pred_pad = None
    n = len(txt["layers"])
    for li, lw in enumerate(txt["layers"]):
        out = bert_layer(x, ext_bias, img0, img1, lw,
                         pre_ln_params=txt["emb_ln"] if li == 0 else None,
                         merge=(li >= MERGE_START),
                         cls_params=params["cls"] if li == n - 1 else None)
        if li == n - 1:
            x, pred_pad = out
        else:
            x = out

    # cls head (fused into the last layer) -> un-pad the lane-padded logits
    return pred_pad[:, 0, :2]                                       # (B, 2)


# ----------------------------- deterministic parameter init -----------------------------
def init_params(key):
    keys = iter(jax.random.split(key, 256))

    def dense(din, dout):
        w = jax.random.normal(next(keys), (din, dout), jnp.float32) * 0.02
        return {"w": w.astype(jnp.bfloat16), "b": jnp.zeros((dout,), jnp.float32)}

    def ln(d):
        return {"g": jnp.ones((d,), jnp.float32), "b": jnp.zeros((d,), jnp.float32)}

    def vit_block_params():
        return {"ln1": ln(VIS_WIDTH), "qkv": dense(VIS_WIDTH, 3 * VIS_WIDTH),
                "proj": dense(VIS_WIDTH, VIS_WIDTH), "ln2": ln(VIS_WIDTH),
                "fc1": dense(VIS_WIDTH, 4 * VIS_WIDTH), "fc2": dense(4 * VIS_WIDTH, VIS_WIDTH)}

    vit = {
        "patch": dense(IMG_C * PATCH * PATCH, VIS_WIDTH),
        "cls_token": jax.random.normal(next(keys), (1, 1, VIS_WIDTH), jnp.float32) * 0.02,
        "pos_embed": jax.random.normal(next(keys), (1, T_IMG, VIS_WIDTH), jnp.float32) * 0.02,
        "blocks": [vit_block_params() for _ in range(VIS_DEPTH)],
        "ln": ln(VIS_WIDTH),
    }

    def txt_layer(li):
        lw = {
            "self": {"qkv": dense(HIDDEN, 3 * HIDDEN), "out": dense(HIDDEN, HIDDEN),
                     "ln": ln(HIDDEN)},
            # shared twin cross-attention weights (the same crossattention module is
            # applied to both images in real BLIP-NLVR)
            "cross": {"q": dense(HIDDEN, HIDDEN), "kv": dense(VIS_WIDTH, 2 * HIDDEN),
                      "out": dense(HIDDEN, HIDDEN), "ln": ln(HIDDEN)},
            "inter": dense(HIDDEN, INTER), "out": dense(INTER, HIDDEN), "ffn_ln": ln(HIDDEN),
        }
        if li >= MERGE_START:
            lw["cross"]["merge"] = dense(2 * HIDDEN, HIDDEN)
        return lw

    text = {
        "word_emb": jax.random.normal(next(keys), (VOCAB, HIDDEN), jnp.float32) * 0.02,
        "pos_emb": jax.random.normal(next(keys), (MAX_POS, HIDDEN), jnp.float32) * 0.02,
        "emb_ln": ln(HIDDEN),
        "layers": [txt_layer(li) for li in range(TXT_LAYERS)],
    }

    # cls head: Linear(H,H) -> ReLU -> Linear(H,2); second weight lane-padded to 128 so
    # the fused prediction store in the last BERT layer is a dense 128-lane write.
    cls1 = dense(HIDDEN, HIDDEN)
    w2 = jax.random.normal(next(keys), (HIDDEN, 2), jnp.float32) * 0.02
    w2p = jnp.zeros((HIDDEN, PRED_PAD), jnp.float32).at[:, :2].set(w2).astype(jnp.bfloat16)
    cls = {"w1": cls1, "w2": {"w": w2p, "b": jnp.zeros((PRED_PAD,), jnp.float32)}}

    return {"vit": vit, "text": text, "cls": cls}


# ----------------------------- main -----------------------------
if __name__ == "__main__":
    root = jax.random.PRNGKey(0)
    k_params, k_img, k_ids = jax.random.split(root, 3)

    params = init_params(k_params)

    # inputs: 2*B_TEXT images (NCHW, float32), B_TEXT tokenized sentences
    image = jax.random.normal(k_img, (N_IMG, IMG_C, IMG_H, IMG_W), jnp.float32)
    input_ids = jax.random.randint(k_ids, (B_TEXT, SEQ), 1, VOCAB - 1, dtype=jnp.int32)
    # 'padding=longest' style mask: second sentence has 2 pad tokens
    attention_mask = jnp.array([[1] * SEQ, [1] * (SEQ - 2) + [0] * 2], jnp.int32)

    fwd = jax.jit(blip_nlvr_forward)
    prediction = fwd(params, image, input_ids, attention_mask)
    prediction = jax.block_until_ready(prediction)

    assert prediction.shape == (B_TEXT, 2), prediction.shape
    assert bool(jnp.all(jnp.isfinite(prediction)))
    print("KERNEL_OK")
</pallas_src>

<mosaic_0001>
module attributes {stable_mosaic.version = 11 : i64} {
  func.func @_vit_block_kernel(%arg0: i32, %arg1: memref<1x5x128xf32, #tpu.memory_space<vmem>>, %arg2: memref<1x128xf32, #tpu.memory_space<vmem>>, %arg3: memref<1x128xf32, #tpu.memory_space<vmem>>, %arg4: memref<128x384xbf16, #tpu.memory_space<vmem>>, %arg5: memref<1x384xf32, #tpu.memory_space<vmem>>, %arg6: memref<128x128xbf16, #tpu.memory_space<vmem>>, %arg7: memref<1x128xf32, #tpu.memory_space<vmem>>, %arg8: memref<1x128xf32, #tpu.memory_space<vmem>>, %arg9: memref<1x128xf32, #tpu.memory_space<vmem>>, %arg10: memref<128x512xbf16, #tpu.memory_space<vmem>>, %arg11: memref<1x512xf32, #tpu.memory_space<vmem>>, %arg12: memref<512x128xbf16, #tpu.memory_space<vmem>>, %arg13: memref<1x128xf32, #tpu.memory_space<vmem>>, %arg14: memref<1x5x128xf32, #tpu.memory_space<vmem>>) attributes {dimension_semantics = [#tpu.dimension_semantics<parallel>], iteration_bounds = array<i64: 4>, scalar_prefetch = 0 : i64, scratch_operands = 0 : i64, tpu.core_type = #tpu.core_type<tc>, window_params = [{transform_indices = @transform_0, window_bounds = array<i64: 1, 5, 128>}, {pipeline_mode = #tpu.pipeline_mode<synchronous>, transform_indices = @transform_1, window_bounds = array<i64: 1, 128>}, {pipeline_mode = #tpu.pipeline_mode<synchronous>, transform_indices = @transform_2, window_bounds = array<i64: 1, 128>}, {pipeline_mode = #tpu.pipeline_mode<synchronous>, transform_indices = @transform_3, window_bounds = array<i64: 128, 384>}, {pipeline_mode = #tpu.pipeline_mode<synchronous>, transform_indices = @transform_4, window_bounds = array<i64: 1, 384>}, {pipeline_mode = #tpu.pipeline_mode<synchronous>, transform_indices = @transform_5, window_bounds = array<i64: 128, 128>}, {pipeline_mode = #tpu.pipeline_mode<synchronous>, transform_indices = @transform_6, window_bounds = array<i64: 1, 128>}, {pipeline_mode = #tpu.pipeline_mode<synchronous>, transform_indices = @transform_7, window_bounds = array<i64: 1, 128>}, {pipeline_mode = #tpu.pipeline_mode<synchronous>, transform_indices = @transform_8, window_bounds = array<i64: 1, 128>}, {pipeline_mode = #tpu.pipeline_mode<synchronous>, transform_indices = @transform_9, window_bounds = array<i64: 128, 512>}, {pipeline_mode = #tpu.pipeline_mode<synchronous>, transform_indices = @transform_10, window_bounds = array<i64: 1, 512>}, {pipeline_mode = #tpu.pipeline_mode<synchronous>, transform_indices = @transform_11, window_bounds = array<i64: 512, 128>}, {pipeline_mode = #tpu.pipeline_mode<synchronous>, transform_indices = @transform_12, window_bounds = array<i64: 1, 128>}, {transform_indices = @transform_13, window_bounds = array<i64: 1, 5, 128>}]} {
    %c0 = arith.constant 0 : index
    %c0_0 = arith.constant 0 : index
    %c0_1 = arith.constant 0 : index
    %0 = vector.load %arg1[%c0, %c0_0, %c0_1] : memref<1x5x128xf32, #tpu.memory_space<vmem>>, vector<1x5x128xf32>
    %1 = vector.shape_cast %0 : vector<1x5x128xf32> to vector<5x128xf32>
    %c0_2 = arith.constant 0 : index
    %c0_3 = arith.constant 0 : index
    %2 = vector.load %arg2[%c0_2, %c0_3] : memref<1x128xf32, #tpu.memory_space<vmem>>, vector<1x128xf32>
    %c0_4 = arith.constant 0 : index
    %c0_5 = arith.constant 0 : index
    %3 = vector.load %arg3[%c0_4, %c0_5] : memref<1x128xf32, #tpu.memory_space<vmem>>, vector<1x128xf32>
    %cst = arith.constant dense<0.000000e+00> : vector<5xf32>
    %4 = vector.multi_reduction <add>, %1, %cst [1] : vector<5x128xf32> to vector<5xf32>
    %5 = vector.shape_cast %4 : vector<5xf32> to vector<5x1xf32>
    %cst_6 = arith.constant 1.280000e+02 : f32
    %6 = vector.broadcast %cst_6 : f32 to vector<5x1xf32>
    %7 = arith.divf %5, %6 : vector<5x1xf32>
    %8 = vector.broadcast %7 : vector<5x1xf32> to vector<5x128xf32>
    %9 = arith.subf %1, %8 : vector<5x128xf32>
    %10 = arith.mulf %9, %9 : vector<5x128xf32>
    %cst_7 = arith.constant dense<0.000000e+00> : vector<5xf32>
    %11 = vector.multi_reduction <add>, %10, %cst_7 [1] : vector<5x128xf32> to vector<5xf32>
    %12 = vector.shape_cast %11 : vector<5xf32> to vector<5x1xf32>
    %cst_8 = arith.constant 1.280000e+02 : f32
    %13 = vector.broadcast %cst_8 : f32 to vector<5x1xf32>
    %14 = arith.divf %12, %13 : vector<5x1xf32>
    %cst_9 = arith.constant 9.99999997E-7 : f32
    %15 = vector.broadcast %cst_9 : f32 to vector<5x1xf32>
    %16 = arith.addf %14, %15 : vector<5x1xf32>
    %17 = math.rsqrt %16 : vector<5x1xf32>
    %18 = vector.broadcast %17 : vector<5x1xf32> to vector<5x128xf32>
    %19 = arith.mulf %9, %18 : vector<5x128xf32>
    %20 = vector.broadcast %2 : vector<1x128xf32> to vector<5x128xf32>
    %21 = arith.mulf %19, %20 : vector<5x128xf32>
    %22 = vector.broadcast %3 : vector<1x128xf32> to vector<5x128xf32>
    %23 = arith.addf %21, %22 : vector<5x128xf32>
    %c0_10 = arith.constant 0 : index
    %c0_11 = arith.constant 0 : index
    %24 = vector.load %arg4[%c0_10, %c0_11] : memref<128x384xbf16, #tpu.memory_space<vmem>>, vector<128x384xbf16>
    %25 = arith.truncf %23 : vector<5x128xf32> to vector<5x128xbf16>
    %cst_12 = arith.constant dense<0.000000e+00> : vector<5x384xf32>
    %26 = tpu.matmul %25, %24, %cst_12 {dimension_numbers = #tpu.dot_dimension_numbers<[1], [0], [0], [1], [0, 0, 1, 1], [], []>} : vector<5x128xbf16>, vector<128x384xbf16>, vector<5x384xf32> -> vector<5x384xf32>
    %c0_13 = arith.constant 0 : index
    %c0_14 = arith.constant 0 : index
    %27 = vector.load %arg5[%c0_13, %c0_14] : memref<1x384xf32, #tpu.memory_space<vmem>>, vector<1x384xf32>
    %28 = vector.broadcast %27 : vector<1x384xf32> to vector<5x384xf32>
    %29 = arith.addf %26, %28 : vector<5x384xf32>
    %30 = vector.extract_strided_slice %29 {offsets = [0, 0], sizes = [5, 128], strides = [1, 1]} : vector<5x384xf32> to vector<5x128xf32>
    %31 = vector.extract_strided_slice %29 {offsets = [0, 128], sizes = [5, 128], strides = [1, 1]} : vector<5x384xf32> to vector<5x128xf32>
    %32 = vector.extract_strided_slice %29 {offsets = [0, 256], sizes = [5, 128], strides = [1, 1]} : vector<5x384xf32> to vector<5x128xf32>
    %33 = tpu.iota {dimensions = array<i32: 1>} : vector<5x128xi32>
    %34 = arith.truncf %30 : vector<5x128xf32> to vector<5x128xbf16>
    %cst_15 = arith.constant 0.000000e+00 : f32
    %35 = vector.broadcast %cst_15 : f32 to vector<5x128xf32>
    %c0_i32 = arith.constant 0 : i32
    %36 = vector.broadcast %c0_i32 : i32 to vector<5x128xi32>
    %37 = arith.cmpi sge, %33, %36 : vector<5x128xi32>
    %c32_i32 = arith.constant 32 : i32
    %38 = vector.broadcast %c32_i32 : i32 to vector<5x128xi32>
    %39 = arith.cmpi slt, %33, %38 : vector<5x128xi32>
    %40 = arith.andi %37, %39 : vector<5x128xi1>
    %41 = arith.extui %40 : vector<5x128xi1> to vector<5x128xi32>
    %42 = arith.sitofp %41 : vector<5x128xi32> to vector<5x128xf32>
    %43 = arith.mulf %31, %42 : vector<5x128xf32>
    %44 = arith.truncf %43 : vector<5x128xf32> to vector<5x128xbf16>
    %45 = arith.mulf %32, %42 : vector<5x128xf32>
    %46 = arith.truncf %45 : vector<5x128xf32> to vector<5x128xbf16>
    %cst_16 = arith.constant dense<0.000000e+00> : vector<5x5xf32>
    %47 = tpu.matmul %34, %44, %cst_16 {dimension_numbers = #tpu.dot_dimension_numbers<[1], [1], [0], [0], [0, 0, 1, 0], [], []>} : vector<5x128xbf16>, vector<5x128xbf16>, vector<5x5xf32> -> vector<5x5xf32>
    %cst_17 = arith.constant 0.176776692 : f32
    %48 = vector.broadcast %cst_17 : f32 to vector<5x5xf32>
    %49 = arith.mulf %47, %48 : vector<5x5xf32>
    %cst_18 = arith.constant dense<0xFF800000> : vector<5xf32>
    %50 = vector.multi_reduction <maximumf>, %49, %cst_18 [1] : vector<5x5xf32> to vector<5xf32>
    %51 = vector.shape_cast %50 : vector<5xf32> to vector<5x1xf32>
    %52 = vector.broadcast %51 : vector<5x1xf32> to vector<5x5xf32>
    %53 = arith.subf %49, %52 : vector<5x5xf32>
    %54 = math.exp %53 : vector<5x5xf32>
    %cst_19 = arith.constant dense<0.000000e+00> : vector<5xf32>
    %55 = vector.multi_reduction <add>, %54, %cst_19 [1] : vector<5x5xf32> to vector<5xf32>
    %56 = vector.shape_cast %55 : vector<5xf32> to vector<5x1xf32>
    %57 = tpu.reciprocal %56 {approx = true} : vector<5x1xf32> -> vector<5x1xf32>
    %58 = vector.broadcast %57 : vector<5x1xf32> to vector<5x5xf32>
    %59 = arith.mulf %54, %58 : vector<5x5xf32>
    %60 = arith.truncf %59 : vector<5x5xf32> to vector<5x5xbf16>
    %cst_20 = arith.constant dense<0.000000e+00> : vector<5x128xf32>
    %61 = tpu.matmul %60, %46, %cst_20 {dimension_numbers = #tpu.dot_dimension_numbers<[1], [0], [0], [1], [0, 0, 1, 1], [], []>} : vector<5x5xbf16>, vector<5x128xbf16>, vector<5x128xf32> -> vector<5x128xf32>
    %62 = arith.addf %35, %61 : vector<5x128xf32>
    %c32_i32_21 = arith.constant 32 : i32
    %63 = vector.broadcast %c32_i32_21 : i32 to vector<5x128xi32>
    %64 = arith.cmpi sge, %33, %63 : vector<5x128xi32>
    %c64_i32 = arith.constant 64 : i32
    %65 = vector.broadcast %c64_i32 : i32 to vector<5x128xi32>
    %66 = arith.cmpi slt, %33, %65 : vector<5x128xi32>
    %67 = arith.andi %64, %66 : vector<5x128xi1>
    %68 = arith.extui %67 : vector<5x128xi1> to vector<5x128xi32>
    %69 = arith.sitofp %68 : vector<5x128xi32> to vector<5x128xf32>
    %70 = arith.mulf %31, %69 : vector<5x128xf32>
    %71 = arith.truncf %70 : vector<5x128xf32> to vector<5x128xbf16>
    %72 = arith.mulf %32, %69 : vector<5x128xf32>
    %73 = arith.truncf %72 : vector<5x128xf32> to vector<5x128xbf16>
    %cst_22 = arith.constant dense<0.000000e+00> : vector<5x5xf32>
    %74 = tpu.matmul %34, %71, %cst_22 {dimension_numbers = #tpu.dot_dimension_numbers<[1], [1], [0], [0], [0, 0, 1, 0], [], []>} : vector<5x128xbf16>, vector<5x128xbf16>, vector<5x5xf32> -> vector<5x5xf32>
    %cst_23 = arith.constant 0.176776692 : f32
    %75 = vector.broadcast %cst_23 : f32 to vector<5x5xf32>
    %76 = arith.mulf %74, %75 : vector<5x5xf32>
    %cst_24 = arith.constant dense<0xFF800000> : vector<5xf32>
    %77 = vector.multi_reduction <maximumf>, %76, %cst_24 [1] : vector<5x5xf32> to vector<5xf32>
    %78 = vector.shape_cast %77 : vector<5xf32> to vector<5x1xf32>
    %79 = vector.broadcast %78 : vector<5x1xf32> to vector<5x5xf32>
    %80 = arith.subf %76, %79 : vector<5x5xf32>
    %81 = math.exp %80 : vector<5x5xf32>
    %cst_25 = arith.constant dense<0.000000e+00> : vector<5xf32>
    %82 = vector.multi_reduction <add>, %81, %cst_25 [1] : vector<5x5xf32> to vector<5xf32>
    %83 = vector.shape_cast %82 : vector<5xf32> to vector<5x1xf32>
    %84 = tpu.reciprocal %83 {approx = true} : vector<5x1xf32> -> vector<5x1xf32>
    %85 = vector.broadcast %84 : vector<5x1xf32> to vector<5x5xf32>
    %86 = arith.mulf %81, %85 : vector<5x5xf32>
    %87 = arith.truncf %86 : vector<5x5xf32> to vector<5x5xbf16>
    %cst_26 = arith.constant dense<0.000000e+00> : vector<5x128xf32>
    %88 = tpu.matmul %87, %73, %cst_26 {dimension_numbers = #tpu.dot_dimension_numbers<[1], [0], [0], [1], [0, 0, 1, 1], [], []>} : vector<5x5xbf16>, vector<5x128xbf16>, vector<5x128xf32> -> vector<5x128xf32>
    %89 = arith.addf %62, %88 : vector<5x128xf32>
    %c64_i32_27 = arith.constant 64 : i32
    %90 = vector.broadcast %c64_i32_27 : i32 to vector<5x128xi32>
    %91 = arith.cmpi sge, %33, %90 : vector<5x128xi32>
    %c96_i32 = arith.constant 96 : i32
    %92 = vector.broadcast %c96_i32 : i32 to vector<5x128xi32>
    %93 = arith.cmpi slt, %33, %92 : vector<5x128xi32>
    %94 = arith.andi %91, %93 : vector<5x128xi1>
    %95 = arith.extui %94 : vector<5x128xi1> to vector<5x128xi32>
    %96 = arith.sitofp %95 : vector<5x128xi32> to vector<5x128xf32>
    %97 = arith.mulf %31, %96 : vector<5x128xf32>
    %98 = arith.truncf %97 : vector<5x128xf32> to vector<5x128xbf16>
    %99 = arith.mulf %32, %96 : vector<5x128xf32>
    %100 = arith.truncf %99 : vector<5x128xf32> to vector<5x128xbf16>
    %cst_28 = arith.constant dense<0.000000e+00> : vector<5x5xf32>
    %101 = tpu.matmul %34, %98, %cst_28 {dimension_numbers = #tpu.dot_dimension_numbers<[1], [1], [0], [0], [0, 0, 1, 0], [], []>} : vector<5x128xbf16>, vector<5x128xbf16>, vector<5x5xf32> -> vector<5x5xf32>
    %cst_29 = arith.constant 0.176776692 : f32
    %102 = vector.broadcast %cst_29 : f32 to vector<5x5xf32>
    %103 = arith.mulf %101, %102 : vector<5x5xf32>
    %cst_30 = arith.constant dense<0xFF800000> : vector<5xf32>
    %104 = vector.multi_reduction <maximumf>, %103, %cst_30 [1] : vector<5x5xf32> to vector<5xf32>
    %105 = vector.shape_cast %104 : vector<5xf32> to vector<5x1xf32>
    %106 = vector.broadcast %105 : vector<5x1xf32> to vector<5x5xf32>
    %107 = arith.subf %103, %106 : vector<5x5xf32>
    %108 = math.exp %107 : vector<5x5xf32>
    %cst_31 = arith.constant dense<0.000000e+00> : vector<5xf32>
    %109 = vector.multi_reduction <add>, %108, %cst_31 [1] : vector<5x5xf32> to vector<5xf32>
    %110 = vector.shape_cast %109 : vector<5xf32> to vector<5x1xf32>
    %111 = tpu.reciprocal %110 {approx = true} : vector<5x1xf32> -> vector<5x1xf32>
    %112 = vector.broadcast %111 : vector<5x1xf32> to vector<5x5xf32>
    %113 = arith.mulf %108, %112 : vector<5x5xf32>
    %114 = arith.truncf %113 : vector<5x5xf32> to vector<5x5xbf16>
    %cst_32 = arith.constant dense<0.000000e+00> : vector<5x128xf32>
    %115 = tpu.matmul %114, %100, %cst_32 {dimension_numbers = #tpu.dot_dimension_numbers<[1], [0], [0], [1], [0, 0, 1, 1], [], []>} : vector<5x5xbf16>, vector<5x128xbf16>, vector<5x128xf32> -> vector<5x128xf32>
    %116 = arith.addf %89, %115 : vector<5x128xf32>
    %c96_i32_33 = arith.constant 96 : i32
    %117 = vector.broadcast %c96_i32_33 : i32 to vector<5x128xi32>
    %118 = arith.cmpi sge, %33, %117 : vector<5x128xi32>
    %c128_i32 = arith.constant 128 : i32
    %119 = vector.broadcast %c128_i32 : i32 to vector<5x128xi32>
    %120 = arith.cmpi slt, %33, %119 : vector<5x128xi32>
    %121 = arith.andi %118, %120 : vector<5x128xi1>
    %122 = arith.extui %121 : vector<5x128xi1> to vector<5x128xi32>
    %123 = arith.sitofp %122 : vector<5x128xi32> to vector<5x128xf32>
    %124 = arith.mulf %31, %123 : vector<5x128xf32>
    %125 = arith.truncf %124 : vector<5x128xf32> to vector<5x128xbf16>
    %126 = arith.mulf %32, %123 : vector<5x128xf32>
    %127 = arith.truncf %126 : vector<5x128xf32> to vector<5x128xbf16>
    %cst_34 = arith.constant dense<0.000000e+00> : vector<5x5xf32>
    %128 = tpu.matmul %34, %125, %cst_34 {dimension_numbers = #tpu.dot_dimension_numbers<[1], [1], [0], [0], [0, 0, 1, 0], [], []>} : vector<5x128xbf16>, vector<5x128xbf16>, vector<5x5xf32> -> vector<5x5xf32>
    %cst_35 = arith.constant 0.176776692 : f32
    %129 = vector.broadcast %cst_35 : f32 to vector<5x5xf32>
    %130 = arith.mulf %128, %129 : vector<5x5xf32>
    %cst_36 = arith.constant dense<0xFF800000> : vector<5xf32>
    %131 = vector.multi_reduction <maximumf>, %130, %cst_36 [1] : vector<5x5xf32> to vector<5xf32>
    %132 = vector.shape_cast %131 : vector<5xf32> to vector<5x1xf32>
    %133 = vector.broadcast %132 : vector<5x1xf32> to vector<5x5xf32>
    %134 = arith.subf %130, %133 : vector<5x5xf32>
    %135 = math.exp %134 : vector<5x5xf32>
    %cst_37 = arith.constant dense<0.000000e+00> : vector<5xf32>
    %136 = vector.multi_reduction <add>, %135, %cst_37 [1] : vector<5x5xf32> to vector<5xf32>
    %137 = vector.shape_cast %136 : vector<5xf32> to vector<5x1xf32>
    %138 = tpu.reciprocal %137 {approx = true} : vector<5x1xf32> -> vector<5x1xf32>
    %139 = vector.broadcast %138 : vector<5x1xf32> to vector<5x5xf32>
    %140 = arith.mulf %135, %139 : vector<5x5xf32>
    %141 = arith.truncf %140 : vector<5x5xf32> to vector<5x5xbf16>
    %cst_38 = arith.constant dense<0.000000e+00> : vector<5x128xf32>
    %142 = tpu.matmul %141, %127, %cst_38 {dimension_numbers = #tpu.dot_dimension_numbers<[1], [0], [0], [1], [0, 0, 1, 1], [], []>} : vector<5x5xbf16>, vector<5x128xbf16>, vector<5x128xf32> -> vector<5x128xf32>
    %143 = arith.addf %116, %142 : vector<5x128xf32>
    %c0_39 = arith.constant 0 : index
    %c0_40 = arith.constant 0 : index
    %144 = vector.load %arg6[%c0_39, %c0_40] : memref<128x128xbf16, #tpu.memory_space<vmem>>, vector<128x128xbf16>
    %145 = arith.truncf %143 : vector<5x128xf32> to vector<5x128xbf16>
    %cst_41 = arith.constant dense<0.000000e+00> : vector<5x128xf32>
    %146 = tpu.matmul %145, %144, %cst_41 {dimension_numbers = #tpu.dot_dimension_numbers<[1], [0], [0], [1], [0, 0, 1, 1], [], []>} : vector<5x128xbf16>, vector<128x128xbf16>, vector<5x128xf32> -> vector<5x128xf32>
    %147 = arith.addf %1, %146 : vector<5x128xf32>
    %c0_42 = arith.constant 0 : index
    %c0_43 = arith.constant 0 : index
    %148 = vector.load %arg7[%c0_42, %c0_43] : memref<1x128xf32, #tpu.memory_space<vmem>>, vector<1x128xf32>
    %149 = vector.broadcast %148 : vector<1x128xf32> to vector<5x128xf32>
    %150 = arith.addf %147, %149 : vector<5x128xf32>
    %c0_44 = arith.constant 0 : index
    %c0_45 = arith.constant 0 : index
    %151 = vector.load %arg8[%c0_44, %c0_45] : memref<1x128xf32, #tpu.memory_space<vmem>>, vector<1x128xf32>
    %c0_46 = arith.constant 0 : index
    %c0_47 = arith.constant 0 : index
    %152 = vector.load %arg9[%c0_46, %c0_47] : memref<1x128xf32, #tpu.memory_space<vmem>>, vector<1x128xf32>
    %cst_48 = arith.constant dense<0.000000e+00> : vector<5xf32>
    %153 = vector.multi_reduction <add>, %150, %cst_48 [1] : vector<5x128xf32> to vector<5xf32>
    %154 = vector.shape_cast %153 : vector<5xf32> to vector<5x1xf32>
    %cst_49 = arith.constant 1.280000e+02 : f32
    %155 = vector.broadcast %cst_49 : f32 to vector<5x1xf32>
    %156 = arith.divf %154, %155 : vector<5x1xf32>
    %157 = vector.broadcast %156 : vector<5x1xf32> to vector<5x128xf32>
    %158 = arith.subf %150, %157 : vector<5x128xf32>
    %159 = arith.mulf %158, %158 : vector<5x128xf32>
    %cst_50 = arith.constant dense<0.000000e+00> : vector<5xf32>
    %160 = vector.multi_reduction <add>, %159, %cst_50 [1] : vector<5x128xf32> to vector<5xf32>
    %161 = vector.shape_cast %160 : vector<5xf32> to vector<5x1xf32>
    %cst_51 = arith.constant 1.280000e+02 : f32
    %162 = vector.broadcast %cst_51 : f32 to vector<5x1xf32>
    %163 = arith.divf %161, %162 : vector<5x1xf32>
    %cst_52 = arith.constant 9.99999997E-7 : f32
    %164 = vector.broadcast %cst_52 : f32 to vector<5x1xf32>
    %165 = arith.addf %163, %164 : vector<5x1xf32>
    %166 = math.rsqrt %165 : vector<5x1xf32>
    %167 = vector.broadcast %166 : vector<5x1xf32> to vector<5x128xf32>
    %168 = arith.mulf %158, %167 : vector<5x128xf32>
    %169 = vector.broadcast %151 : vector<1x128xf32> to vector<5x128xf32>
    %170 = arith.mulf %168, %169 : vector<5x128xf32>
    %171 = vector.broadcast %152 : vector<1x128xf32> to vector<5x128xf32>
    %172 = arith.addf %170, %171 : vector<5x128xf32>
    %c0_53 = arith.constant 0 : index
    %c0_54 = arith.constant 0 : index
    %173 = vector.load %arg10[%c0_53, %c0_54] : memref<128x512xbf16, #tpu.memory_space<vmem>>, vector<128x512xbf16>
    %174 = arith.truncf %172 : vector<5x128xf32> to vector<5x128xbf16>
    %cst_55 = arith.constant dense<0.000000e+00> : vector<5x512xf32>
    %175 = tpu.matmul %174, %173, %cst_55 {dimension_numbers = #tpu.dot_dimension_numbers<[1], [0], [0], [1], [0, 0, 1, 1], [], []>} : vector<5x128xbf16>, vector<128x512xbf16>, vector<5x512xf32> -> vector<5x512xf32>
    %c0_56 = arith.constant 0 : index
    %c0_57 = arith.constant 0 : index
    %176 = vector.load %arg11[%c0_56, %c0_57] : memref<1x512xf32, #tpu.memory_space<vmem>>, vector<1x512xf32>
    %177 = vector.broadcast %176 : vector<1x512xf32> to vector<5x512xf32>
    %178 = arith.addf %175, %177 : vector<5x512xf32>
    %179 = arith.mulf %178, %178 : vector<5x512xf32>
    %180 = arith.mulf %178, %179 : vector<5x512xf32>
    %cst_58 = arith.constant 4.471500e-02 : f32
    %181 = vector.broadcast %cst_58 : f32 to vector<5x512xf32>
    %182 = arith.mulf %181, %180 : vector<5x512xf32>
    %183 = arith.addf %178, %182 : vector<5x512xf32>
    %cst_59 = arith.constant 0.797884583 : f32
    %184 = vector.broadcast %cst_59 : f32 to vector<5x512xf32>
    %185 = arith.mulf %184, %183 : vector<5x512xf32>
    %186 = math.tanh %185 : vector<5x512xf32>
    %cst_60 = arith.constant 1.000000e+00 : f32
    %187 = vector.broadcast %cst_60 : f32 to vector<5x512xf32>
    %188 = arith.addf %187, %186 : vector<5x512xf32>
    %cst_61 = arith.constant 5.000000e-01 : f32
    %189 = vector.broadcast %cst_61 : f32 to vector<5x512xf32>
    %190 = arith.mulf %189, %188 : vector<5x512xf32>
    %191 = arith.mulf %178, %190 : vector<5x512xf32>
    %c0_62 = arith.constant 0 : index
    %c0_63 = arith.constant 0 : index
    %192 = vector.load %arg12[%c0_62, %c0_63] : memref<512x128xbf16, #tpu.memory_space<vmem>>, vector<512x128xbf16>
    %193 = arith.truncf %191 : vector<5x512xf32> to vector<5x512xbf16>
    %cst_64 = arith.constant dense<0.000000e+00> : vector<5x128xf32>
    %194 = tpu.matmul %193, %192, %cst_64 {dimension_numbers = #tpu.dot_dimension_numbers<[1], [0], [0], [1], [0, 0, 1, 1], [], []>} : vector<5x512xbf16>, vector<512x128xbf16>, vector<5x128xf32> -> vector<5x128xf32>
    %195 = arith.addf %150, %194 : vector<5x128xf32>
    %c0_65 = arith.constant 0 : index
    %c0_66 = arith.constant 0 : index
    %196 = vector.load %arg13[%c0_65, %c0_66] : memref<1x128xf32, #tpu.memory_space<vmem>>, vector<1x128xf32>
    %197 = vector.broadcast %196 : vector<1x128xf32> to vector<5x128xf32>
    %198 = arith.addf %195, %197 : vector<5x128xf32>
    %c0_67 = arith.constant 0 : index
    %c0_68 = arith.constant 0 : index
    %c0_69 = arith.constant 0 : index
    %199 = vector.load %arg14[%c0_67, %c0_68, %c0_69] : memref<1x5x128xf32, #tpu.memory_space<vmem>>, vector<1x5x128xf32>
    %200 = vector.shape_cast %199 : vector<1x5x128xf32> to vector<5x128xf32>
    %201 = vector.shape_cast %198 : vector<5x128xf32> to vector<1x5x128xf32>
    tpu.vector_store %arg14[%c0_67, %c0_68, %c0_69], %201 {strides = array<i32>} : memref<1x5x128xf32, #tpu.memory_space<vmem>>, vector<1x5x128xf32>,
    return
  }
  func.func @transform_0(%arg0: i32) -> (i32, i32, i32) {
    %c0_i32 = arith.constant 0 : i32
    %c0_i32_0 = arith.constant 0 : i32
    %c0_i32_1 = arith.constant 0 : i32
    return %arg0, %c0_i32, %c0_i32_0 : i32, i32, i32
  }
  func.func @transform_1(%arg0: i32) -> (i32, i32) {
    %c0_i32 = arith.constant 0 : i32
    %c0_i32_0 = arith.constant 0 : i32
    %c0_i32_1 = arith.constant 0 : i32
    return %c0_i32, %c0_i32_0 : i32, i32
  }
  func.func @transform_2(%arg0: i32) -> (i32, i32) {
    %c0_i32 = arith.constant 0 : i32
    %c0_i32_0 = arith.constant 0 : i32
    %c0_i32_1 = arith.constant 0 : i32
    return %c0_i32, %c0_i32_0 : i32, i32
  }
  func.func @transform_3(%arg0: i32) -> (i32, i32) {
    %c0_i32 = arith.constant 0 : i32
    %c0_i32_0 = arith.constant 0 : i32
    %c0_i32_1 = arith.constant 0 : i32
    return %c0_i32, %c0_i32_0 : i32, i32
  }
  func.func @transform_4(%arg0: i32) -> (i32, i32) {
    %c0_i32 = arith.constant 0 : i32
    %c0_i32_0 = arith.constant 0 : i32
    %c0_i32_1 = arith.constant 0 : i32
    return %c0_i32, %c0_i32_0 : i32, i32
  }
  func.func @transform_5(%arg0: i32) -> (i32, i32) {
    %c0_i32 = arith.constant 0 : i32
    %c0_i32_0 = arith.constant 0 : i32
    %c0_i32_1 = arith.constant 0 : i32
    return %c0_i32, %c0_i32_0 : i32, i32
  }
  func.func @transform_6(%arg0: i32) -> (i32, i32) {
    %c0_i32 = arith.constant 0 : i32
    %c0_i32_0 = arith.constant 0 : i32
    %c0_i32_1 = arith.constant 0 : i32
    return %c0_i32, %c0_i32_0 : i32, i32
  }
  func.func @transform_7(%arg0: i32) -> (i32, i32) {
    %c0_i32 = arith.constant 0 : i32
    %c0_i32_0 = arith.constant 0 : i32
    %c0_i32_1 = arith.constant 0 : i32
    return %c0_i32, %c0_i32_0 : i32, i32
  }
  func.func @transform_8(%arg0: i32) -> (i32, i32) {
    %c0_i32 = arith.constant 0 : i32
    %c0_i32_0 = arith.constant 0 : i32
    %c0_i32_1 = arith.constant 0 : i32
    return %c0_i32, %c0_i32_0 : i32, i32
  }
  func.func @transform_9(%arg0: i32) -> (i32, i32) {
    %c0_i32 = arith.constant 0 : i32
    %c0_i32_0 = arith.constant 0 : i32
    %c0_i32_1 = arith.constant 0 : i32
    return %c0_i32, %c0_i32_0 : i32, i32
  }
  func.func @transform_10(%arg0: i32) -> (i32, i32) {
    %c0_i32 = arith.constant 0 : i32
    %c0_i32_0 = arith.constant 0 : i32
    %c0_i32_1 = arith.constant 0 : i32
    return %c0_i32, %c0_i32_0 : i32, i32
  }
  func.func @transform_11(%arg0: i32) -> (i32, i32) {
    %c0_i32 = arith.constant 0 : i32
    %c0_i32_0 = arith.constant 0 : i32
    %c0_i32_1 = arith.constant 0 : i32
    return %c0_i32, %c0_i32_0 : i32, i32
  }
  func.func @transform_12(%arg0: i32) -> (i32, i32) {
    %c0_i32 = arith.constant 0 : i32
    %c0_i32_0 = arith.constant 0 : i32
    %c0_i32_1 = arith.constant 0 : i32
    return %c0_i32, %c0_i32_0 : i32, i32
  }
  func.func @transform_13(%arg0: i32) -> (i32, i32, i32) {
    %c0_i32 = arith.constant 0 : i32
    %c0_i32_0 = arith.constant 0 : i32
    %c0_i32_1 = arith.constant 0 : i32
    return %arg0, %c0_i32, %c0_i32_0 : i32, i32, i32
  }
}

module attributes {stable_mosaic.version = 11 : i64} {
  func.func @_patch_embed_kernel(%arg0: i32, %arg1: memref<8x192xf32, #tpu.memory_space<vmem>>, %arg2: memref<192x128xbf16, #tpu.memory_space<vmem>>, %arg3: memref<1x128xf32, #tpu.memory_space<vmem>>, %arg4: memref<8x128xf32, #tpu.memory_space<vmem>>) attributes {dimension_semantics = [#tpu.dimension_semantics<parallel>], iteration_bounds = array<i64: 2>, scalar_prefetch = 0 : i64, scratch_operands = 0 : i64, tpu.core_type = #tpu.core_type<tc>, window_params = [{transform_indices = @transform_0, window_bounds = array<i64: 8, 192>}, {pipeline_mode = #tpu.pipeline_mode<synchronous>, transform_indices = @transform_1, window_bounds = array<i64: 192, 128>}, {pipeline_mode = #tpu.pipeline_mode<synchronous>, transform_indices = @transform_2, window_bounds = array<i64: 1, 128>}, {transform_indices = @transform_3, window_bounds = array<i64: 8, 128>}]} {
    %c0 = arith.constant 0 : index
    %c0_0 = arith.constant 0 : index
    %0 = vector.load %arg1[%c0, %c0_0] : memref<8x192xf32, #tpu.memory_space<vmem>>, vector<8x192xf32>
    %c0_1 = arith.constant 0 : index
    %c0_2 = arith.constant 0 : index
    %1 = vector.load %arg2[%c0_1, %c0_2] : memref<192x128xbf16, #tpu.memory_space<vmem>>, vector<192x128xbf16>
    %2 = arith.truncf %0 : vector<8x192xf32> to vector<8x192xbf16>
    %cst = arith.constant dense<0.000000e+00> : vector<8x128xf32>
    %3 = tpu.matmul %2, %1, %cst {dimension_numbers = #tpu.dot_dimension_numbers<[1], [0], [0], [1], [0, 0, 1, 1], [], []>} : vector<8x192xbf16>, vector<192x128xbf16>, vector<8x128xf32> -> vector<8x128xf32>
    %c0_3 = arith.constant 0 : index
    %c0_4 = arith.constant 0 : index
    %4 = vector.load %arg3[%c0_3, %c0_4] : memref<1x128xf32, #tpu.memory_space<vmem>>, vector<1x128xf32>
    %5 = vector.broadcast %4 : vector<1x128xf32> to vector<8x128xf32>
    %6 = arith.addf %3, %5 : vector<8x128xf32>
    %c0_5 = arith.constant 0 : index
    %c0_6 = arith.constant 0 : index
    %7 = vector.load %arg4[%c0_5, %c0_6] : memref<8x128xf32, #tpu.memory_space<vmem>>, vector<8x128xf32>
    tpu.vector_store %arg4[%c0_5, %c0_6], %6 {strides = array<i32>} : memref<8x128xf32, #tpu.memory_space<vmem>>, vector<8x128xf32>,
    return
  }
  func.func @transform_0(%arg0: i32) -> (i32, i32) {
    %c0_i32 = arith.constant 0 : i32
    %c0_i32_0 = arith.constant 0 : i32
    return %arg0, %c0_i32 : i32, i32
  }
  func.func @transform_1(%arg0: i32) -> (i32, i32) {
    %c0_i32 = arith.constant 0 : i32
    %c0_i32_0 = arith.constant 0 : i32
    %c0_i32_1 = arith.constant 0 : i32
    return %c0_i32, %c0_i32_0 : i32, i32
  }
  func.func @transform_2(%arg0: i32) -> (i32, i32) {
    %c0_i32 = arith.constant 0 : i32
    %c0_i32_0 = arith.constant 0 : i32
    %c0_i32_1 = arith.constant 0 : i32
    return %c0_i32, %c0_i32_0 : i32, i32
  }
  func.func @transform_3(%arg0: i32) -> (i32, i32) {
    %c0_i32 = arith.constant 0 : i32
    %c0_i32_0 = arith.constant 0 : i32
    return %arg0, %c0_i32 : i32, i32
  }
}

module attributes {stable_mosaic.version = 11 : i64} {
  func.func @_vit_block_kernel(%arg0: i32, %arg1: memref<1x5x128xf32, #tpu.memory_space<vmem>>, %arg2: memref<1x128xf32, #tpu.memory_space<vmem>>, %arg3: memref<1x128xf32, #tpu.memory_space<vmem>>, %arg4: memref<128x384xbf16, #tpu.memory_space<vmem>>, %arg5: memref<1x384xf32, #tpu.memory_space<vmem>>, %arg6: memref<128x128xbf16, #tpu.memory_space<vmem>>, %arg7: memref<1x128xf32, #tpu.memory_space<vmem>>, %arg8: memref<1x128xf32, #tpu.memory_space<vmem>>, %arg9: memref<1x128xf32, #tpu.memory_space<vmem>>, %arg10: memref<128x512xbf16, #tpu.memory_space<vmem>>, %arg11: memref<1x512xf32, #tpu.memory_space<vmem>>, %arg12: memref<512x128xbf16, #tpu.memory_space<vmem>>, %arg13: memref<1x128xf32, #tpu.memory_space<vmem>>, %arg14: memref<1x128xf32, #tpu.memory_space<vmem>>, %arg15: memref<1x128xf32, #tpu.memory_space<vmem>>, %arg16: memref<1x5x128xf32, #tpu.memory_space<vmem>>) attributes {dimension_semantics = [#tpu.dimension_semantics<parallel>], iteration_bounds = array<i64: 4>, scalar_prefetch = 0 : i64, scratch_operands = 0 : i64, tpu.core_type = #tpu.core_type<tc>, window_params = [{transform_indices = @transform_0, window_bounds = array<i64: 1, 5, 128>}, {pipeline_mode = #tpu.pipeline_mode<synchronous>, transform_indices = @transform_1, window_bounds = array<i64: 1, 128>}, {pipeline_mode = #tpu.pipeline_mode<synchronous>, transform_indices = @transform_2, window_bounds = array<i64: 1, 128>}, {pipeline_mode = #tpu.pipeline_mode<synchronous>, transform_indices = @transform_3, window_bounds = array<i64: 128, 384>}, {pipeline_mode = #tpu.pipeline_mode<synchronous>, transform_indices = @transform_4, window_bounds = array<i64: 1, 384>}, {pipeline_mode = #tpu.pipeline_mode<synchronous>, transform_indices = @transform_5, window_bounds = array<i64: 128, 128>}, {pipeline_mode = #tpu.pipeline_mode<synchronous>, transform_indices = @transform_6, window_bounds = array<i64: 1, 128>}, {pipeline_mode = #tpu.pipeline_mode<synchronous>, transform_indices = @transform_7, window_bounds = array<i64: 1, 128>}, {pipeline_mode = #tpu.pipeline_mode<synchronous>, transform_indices = @transform_8, window_bounds = array<i64: 1, 128>}, {pipeline_mode = #tpu.pipeline_mode<synchronous>, transform_indices = @transform_9, window_bounds = array<i64: 128, 512>}, {pipeline_mode = #tpu.pipeline_mode<synchronous>, transform_indices = @transform_10, window_bounds = array<i64: 1, 512>}, {pipeline_mode = #tpu.pipeline_mode<synchronous>, transform_indices = @transform_11, window_bounds = array<i64: 512, 128>}, {pipeline_mode = #tpu.pipeline_mode<synchronous>, transform_indices = @transform_12, window_bounds = array<i64: 1, 128>}, {pipeline_mode = #tpu.pipeline_mode<synchronous>, transform_indices = @transform_13, window_bounds = array<i64: 1, 128>}, {pipeline_mode = #tpu.pipeline_mode<synchronous>, transform_indices = @transform_14, window_bounds = array<i64: 1, 128>}, {transform_indices = @transform_15, window_bounds = array<i64: 1, 5, 128>}]} {
    %c0 = arith.constant 0 : index
    %c0_0 = arith.constant 0 : index
    %c0_1 = arith.constant 0 : index
    %0 = vector.load %arg1[%c0, %c0_0, %c0_1] : memref<1x5x128xf32, #tpu.memory_space<vmem>>, vector<1x5x128xf32>
    %1 = vector.shape_cast %0 : vector<1x5x128xf32> to vector<5x128xf32>
    %c0_2 = arith.constant 0 : index
    %c0_3 = arith.constant 0 : index
    %2 = vector.load %arg2[%c0_2, %c0_3] : memref<1x128xf32, #tpu.memory_space<vmem>>, vector<1x128xf32>
    %c0_4 = arith.constant 0 : index
    %c0_5 = arith.constant 0 : index
    %3 = vector.load %arg3[%c0_4, %c0_5] : memref<1x128xf32, #tpu.memory_space<vmem>>, vector<1x128xf32>
    %cst = arith.constant dense<0.000000e+00> : vector<5xf32>
    %4 = vector.multi_reduction <add>, %1, %cst [1] : vector<5x128xf32> to vector<5xf32>
    %5 = vector.shape_cast %4 : vector<5xf32> to vector<5x1xf32>
    %cst_6 = arith.constant 1.280000e+02 : f32
    %6 = vector.broadcast %cst_6 : f32 to vector<5x1xf32>
    %7 = arith.divf %5, %6 : vector<5x1xf32>
    %8 = vector.broadcast %7 : vector<5x1xf32> to vector<5x128xf32>
    %9 = arith.subf %1, %8 : vector<5x128xf32>
    %10 = arith.mulf %9, %9 : vector<5x128xf32>
    %cst_7 = arith.constant dense<0.000000e+00> : vector<5xf32>
    %11 = vector.multi_reduction <add>, %10, %cst_7 [1] : vector<5x128xf32> to vector<5xf32>
    %12 = vector.shape_cast %11 : vector<5xf32> to vector<5x1xf32>
    %cst_8 = arith.constant 1.280000e+02 : f32
    %13 = vector.broadcast %cst_8 : f32 to vector<5x1xf32>
    %14 = arith.divf %12, %13 : vector<5x1xf32>
    %cst_9 = arith.constant 9.99999997E-7 : f32
    %15 = vector.broadcast %cst_9 : f32 to vector<5x1xf32>
    %16 = arith.addf %14, %15 : vector<5x1xf32>
    %17 = math.rsqrt %16 : vector<5x1xf32>
    %18 = vector.broadcast %17 : vector<5x1xf32> to vector<5x128xf32>
    %19 = arith.mulf %9, %18 : vector<5x128xf32>
    %20 = vector.broadcast %2 : vector<1x128xf32> to vector<5x128xf32>
    %21 = arith.mulf %19, %20 : vector<5x128xf32>
    %22 = vector.broadcast %3 : vector<1x128xf32> to vector<5x128xf32>
    %23 = arith.addf %21, %22 : vector<5x128xf32>
    %c0_10 = arith.constant 0 : index
    %c0_11 = arith.constant 0 : index
    %24 = vector.load %arg4[%c0_10, %c0_11] : memref<128x384xbf16, #tpu.memory_space<vmem>>, vector<128x384xbf16>
    %25 = arith.truncf %23 : vector<5x128xf32> to vector<5x128xbf16>
    %cst_12 = arith.constant dense<0.000000e+00> : vector<5x384xf32>
    %26 = tpu.matmul %25, %24, %cst_12 {dimension_numbers = #tpu.dot_dimension_numbers<[1], [0], [0], [1], [0, 0, 1, 1], [], []>} : vector<5x128xbf16>, vector<128x384xbf16>, vector<5x384xf32> -> vector<5x384xf32>
    %c0_13 = arith.constant 0 : index
    %c0_14 = arith.constant 0 : index
    %27 = vector.load %arg5[%c0_13, %c0_14] : memref<1x384xf32, #tpu.memory_space<vmem>>, vector<1x384xf32>
    %28 = vector.broadcast %27 : vector<1x384xf32> to vector<5x384xf32>
    %29 = arith.addf %26, %28 : vector<5x384xf32>
    %30 = vector.extract_strided_slice %29 {offsets = [0, 0], sizes = [5, 128], strides = [1, 1]} : vector<5x384xf32> to vector<5x128xf32>
    %31 = vector.extract_strided_slice %29 {offsets = [0, 128], sizes = [5, 128], strides = [1, 1]} : vector<5x384xf32> to vector<5x128xf32>
    %32 = vector.extract_strided_slice %29 {offsets = [0, 256], sizes = [5, 128], strides = [1, 1]} : vector<5x384xf32> to vector<5x128xf32>
    %33 = tpu.iota {dimensions = array<i32: 1>} : vector<5x128xi32>
    %34 = arith.truncf %30 : vector<5x128xf32> to vector<5x128xbf16>
    %cst_15 = arith.constant 0.000000e+00 : f32
    %35 = vector.broadcast %cst_15 : f32 to vector<5x128xf32>
    %c0_i32 = arith.constant 0 : i32
    %36 = vector.broadcast %c0_i32 : i32 to vector<5x128xi32>
    %37 = arith.cmpi sge, %33, %36 : vector<5x128xi32>
    %c32_i32 = arith.constant 32 : i32
    %38 = vector.broadcast %c32_i32 : i32 to vector<5x128xi32>
    %39 = arith.cmpi slt, %33, %38 : vector<5x128xi32>
    %40 = arith.andi %37, %39 : vector<5x128xi1>
    %41 = arith.extui %40 : vector<5x128xi1> to vector<5x128xi32>
    %42 = arith.sitofp %41 : vector<5x128xi32> to vector<5x128xf32>
    %43 = arith.mulf %31, %42 : vector<5x128xf32>
    %44 = arith.truncf %43 : vector<5x128xf32> to vector<5x128xbf16>
    %45 = arith.mulf %32, %42 : vector<5x128xf32>
    %46 = arith.truncf %45 : vector<5x128xf32> to vector<5x128xbf16>
    %cst_16 = arith.constant dense<0.000000e+00> : vector<5x5xf32>
    %47 = tpu.matmul %34, %44, %cst_16 {dimension_numbers = #tpu.dot_dimension_numbers<[1], [1], [0], [0], [0, 0, 1, 0], [], []>} : vector<5x128xbf16>, vector<5x128xbf16>, vector<5x5xf32> -> vector<5x5xf32>
    %cst_17 = arith.constant 0.176776692 : f32
    %48 = vector.broadcast %cst_17 : f32 to vector<5x5xf32>
    %49 = arith.mulf %47, %48 : vector<5x5xf32>
    %cst_18 = arith.constant dense<0xFF800000> : vector<5xf32>
    %50 = vector.multi_reduction <maximumf>, %49, %cst_18 [1] : vector<5x5xf32> to vector<5xf32>
    %51 = vector.shape_cast %50 : vector<5xf32> to vector<5x1xf32>
    %52 = vector.broadcast %51 : vector<5x1xf32> to vector<5x5xf32>
    %53 = arith.subf %49, %52 : vector<5x5xf32>
    %54 = math.exp %53 : vector<5x5xf32>
    %cst_19 = arith.constant dense<0.000000e+00> : vector<5xf32>
    %55 = vector.multi_reduction <add>, %54, %cst_19 [1] : vector<5x5xf32> to vector<5xf32>
    %56 = vector.shape_cast %55 : vector<5xf32> to vector<5x1xf32>
    %57 = tpu.reciprocal %56 {approx = true} : vector<5x1xf32> -> vector<5x1xf32>
    %58 = vector.broadcast %57 : vector<5x1xf32> to vector<5x5xf32>
    %59 = arith.mulf %54, %58 : vector<5x5xf32>
    %60 = arith.truncf %59 : vector<5x5xf32> to vector<5x5xbf16>
    %cst_20 = arith.constant dense<0.000000e+00> : vector<5x128xf32>
    %61 = tpu.matmul %60, %46, %cst_20 {dimension_numbers = #tpu.dot_dimension_numbers<[1], [0], [0], [1], [0, 0, 1, 1], [], []>} : vector<5x5xbf16>, vector<5x128xbf16>, vector<5x128xf32> -> vector<5x128xf32>
    %62 = arith.addf %35, %61 : vector<5x128xf32>
    %c32_i32_21 = arith.constant 32 : i32
    %63 = vector.broadcast %c32_i32_21 : i32 to vector<5x128xi32>
    %64 = arith.cmpi sge, %33, %63 : vector<5x128xi32>
    %c64_i32 = arith.constant 64 : i32
    %65 = vector.broadcast %c64_i32 : i32 to vector<5x128xi32>
    %66 = arith.cmpi slt, %33, %65 : vector<5x128xi32>
    %67 = arith.andi %64, %66 : vector<5x128xi1>
    %68 = arith.extui %67 : vector<5x128xi1> to vector<5x128xi32>
    %69 = arith.sitofp %68 : vector<5x128xi32> to vector<5x128xf32>
    %70 = arith.mulf %31, %69 : vector<5x128xf32>
    %71 = arith.truncf %70 : vector<5x128xf32> to vector<5x128xbf16>
    %72 = arith.mulf %32, %69 : vector<5x128xf32>
    %73 = arith.truncf %72 : vector<5x128xf32> to vector<5x128xbf16>
    %cst_22 = arith.constant dense<0.000000e+00> : vector<5x5xf32>
    %74 = tpu.matmul %34, %71, %cst_22 {dimension_numbers = #tpu.dot_dimension_numbers<[1], [1], [0], [0], [0, 0, 1, 0], [], []>} : vector<5x128xbf16>, vector<5x128xbf16>, vector<5x5xf32> -> vector<5x5xf32>
    %cst_23 = arith.constant 0.176776692 : f32
    %75 = vector.broadcast %cst_23 : f32 to vector<5x5xf32>
    %76 = arith.mulf %74, %75 : vector<5x5xf32>
    %cst_24 = arith.constant dense<0xFF800000> : vector<5xf32>
    %77 = vector.multi_reduction <maximumf>, %76, %cst_24 [1] : vector<5x5xf32> to vector<5xf32>
    %78 = vector.shape_cast %77 : vector<5xf32> to vector<5x1xf32>
    %79 = vector.broadcast %78 : vector<5x1xf32> to vector<5x5xf32>
    %80 = arith.subf %76, %79 : vector<5x5xf32>
    %81 = math.exp %80 : vector<5x5xf32>
    %cst_25 = arith.constant dense<0.000000e+00> : vector<5xf32>
    %82 = vector.multi_reduction <add>, %81, %cst_25 [1] : vector<5x5xf32> to vector<5xf32>
    %83 = vector.shape_cast %82 : vector<5xf32> to vector<5x1xf32>
    %84 = tpu.reciprocal %83 {approx = true} : vector<5x1xf32> -> vector<5x1xf32>
    %85 = vector.broadcast %84 : vector<5x1xf32> to vector<5x5xf32>
    %86 = arith.mulf %81, %85 : vector<5x5xf32>
    %87 = arith.truncf %86 : vector<5x5xf32> to vector<5x5xbf16>
    %cst_26 = arith.constant dense<0.000000e+00> : vector<5x128xf32>
    %88 = tpu.matmul %87, %73, %cst_26 {dimension_numbers = #tpu.dot_dimension_numbers<[1], [0], [0], [1], [0, 0, 1, 1], [], []>} : vector<5x5xbf16>, vector<5x128xbf16>, vector<5x128xf32> -> vector<5x128xf32>
    %89 = arith.addf %62, %88 : vector<5x128xf32>
    %c64_i32_27 = arith.constant 64 : i32
    %90 = vector.broadcast %c64_i32_27 : i32 to vector<5x128xi32>
    %91 = arith.cmpi sge, %33, %90 : vector<5x128xi32>
    %c96_i32 = arith.constant 96 : i32
    %92 = vector.broadcast %c96_i32 : i32 to vector<5x128xi32>
    %93 = arith.cmpi slt, %33, %92 : vector<5x128xi32>
    %94 = arith.andi %91, %93 : vector<5x128xi1>
    %95 = arith.extui %94 : vector<5x128xi1> to vector<5x128xi32>
    %96 = arith.sitofp %95 : vector<5x128xi32> to vector<5x128xf32>
    %97 = arith.mulf %31, %96 : vector<5x128xf32>
    %98 = arith.truncf %97 : vector<5x128xf32> to vector<5x128xbf16>
    %99 = arith.mulf %32, %96 : vector<5x128xf32>
    %100 = arith.truncf %99 : vector<5x128xf32> to vector<5x128xbf16>
    %cst_28 = arith.constant dense<0.000000e+00> : vector<5x5xf32>
    %101 = tpu.matmul %34, %98, %cst_28 {dimension_numbers = #tpu.dot_dimension_numbers<[1], [1], [0], [0], [0, 0, 1, 0], [], []>} : vector<5x128xbf16>, vector<5x128xbf16>, vector<5x5xf32> -> vector<5x5xf32>
    %cst_29 = arith.constant 0.176776692 : f32
    %102 = vector.broadcast %cst_29 : f32 to vector<5x5xf32>
    %103 = arith.mulf %101, %102 : vector<5x5xf32>
    %cst_30 = arith.constant dense<0xFF800000> : vector<5xf32>
    %104 = vector.multi_reduction <maximumf>, %103, %cst_30 [1] : vector<5x5xf32> to vector<5xf32>
    %105 = vector.shape_cast %104 : vector<5xf32> to vector<5x1xf32>
    %106 = vector.broadcast %105 : vector<5x1xf32> to vector<5x5xf32>
    %107 = arith.subf %103, %106 : vector<5x5xf32>
    %108 = math.exp %107 : vector<5x5xf32>
    %cst_31 = arith.constant dense<0.000000e+00> : vector<5xf32>
    %109 = vector.multi_reduction <add>, %108, %cst_31 [1] : vector<5x5xf32> to vector<5xf32>
    %110 = vector.shape_cast %109 : vector<5xf32> to vector<5x1xf32>
    %111 = tpu.reciprocal %110 {approx = true} : vector<5x1xf32> -> vector<5x1xf32>
    %112 = vector.broadcast %111 : vector<5x1xf32> to vector<5x5xf32>
    %113 = arith.mulf %108, %112 : vector<5x5xf32>
    %114 = arith.truncf %113 : vector<5x5xf32> to vector<5x5xbf16>
    %cst_32 = arith.constant dense<0.000000e+00> : vector<5x128xf32>
    %115 = tpu.matmul %114, %100, %cst_32 {dimension_numbers = #tpu.dot_dimension_numbers<[1], [0], [0], [1], [0, 0, 1, 1], [], []>} : vector<5x5xbf16>, vector<5x128xbf16>, vector<5x128xf32> -> vector<5x128xf32>
    %116 = arith.addf %89, %115 : vector<5x128xf32>
    %c96_i32_33 = arith.constant 96 : i32
    %117 = vector.broadcast %c96_i32_33 : i32 to vector<5x128xi32>
    %118 = arith.cmpi sge, %33, %117 : vector<5x128xi32>
    %c128_i32 = arith.constant 128 : i32
    %119 = vector.broadcast %c128_i32 : i32 to vector<5x128xi32>
    %120 = arith.cmpi slt, %33, %119 : vector<5x128xi32>
    %121 = arith.andi %118, %120 : vector<5x128xi1>
    %122 = arith.extui %121 : vector<5x128xi1> to vector<5x128xi32>
    %123 = arith.sitofp %122 : vector<5x128xi32> to vector<5x128xf32>
    %124 = arith.mulf %31, %123 : vector<5x128xf32>
    %125 = arith.truncf %124 : vector<5x128xf32> to vector<5x128xbf16>
    %126 = arith.mulf %32, %123 : vector<5x128xf32>
    %127 = arith.truncf %126 : vector<5x128xf32> to vector<5x128xbf16>
    %cst_34 = arith.constant dense<0.000000e+00> : vector<5x5xf32>
    %128 = tpu.matmul %34, %125, %cst_34 {dimension_numbers = #tpu.dot_dimension_numbers<[1], [1], [0], [0], [0, 0, 1, 0], [], []>} : vector<5x128xbf16>, vector<5x128xbf16>, vector<5x5xf32> -> vector<5x5xf32>
    %cst_35 = arith.constant 0.176776692 : f32
    %129 = vector.broadcast %cst_35 : f32 to vector<5x5xf32>
    %130 = arith.mulf %128, %129 : vector<5x5xf32>
    %cst_36 = arith.constant dense<0xFF800000> : vector<5xf32>
    %131 = vector.multi_reduction <maximumf>, %130, %cst_36 [1] : vector<5x5xf32> to vector<5xf32>
    %132 = vector.shape_cast %131 : vector<5xf32> to vector<5x1xf32>
    %133 = vector.broadcast %132 : vector<5x1xf32> to vector<5x5xf32>
    %134 = arith.subf %130, %133 : vector<5x5xf32>
    %135 = math.exp %134 : vector<5x5xf32>
    %cst_37 = arith.constant dense<0.000000e+00> : vector<5xf32>
    %136 = vector.multi_reduction <add>, %135, %cst_37 [1] : vector<5x5xf32> to vector<5xf32>
    %137 = vector.shape_cast %136 : vector<5xf32> to vector<5x1xf32>
    %138 = tpu.reciprocal %137 {approx = true} : vector<5x1xf32> -> vector<5x1xf32>
    %139 = vector.broadcast %138 : vector<5x1xf32> to vector<5x5xf32>
    %140 = arith.mulf %135, %139 : vector<5x5xf32>
    %141 = arith.truncf %140 : vector<5x5xf32> to vector<5x5xbf16>
    %cst_38 = arith.constant dense<0.000000e+00> : vector<5x128xf32>
    %142 = tpu.matmul %141, %127, %cst_38 {dimension_numbers = #tpu.dot_dimension_numbers<[1], [0], [0], [1], [0, 0, 1, 1], [], []>} : vector<5x5xbf16>, vector<5x128xbf16>, vector<5x128xf32> -> vector<5x128xf32>
    %143 = arith.addf %116, %142 : vector<5x128xf32>
    %c0_39 = arith.constant 0 : index
    %c0_40 = arith.constant 0 : index
    %144 = vector.load %arg6[%c0_39, %c0_40] : memref<128x128xbf16, #tpu.memory_space<vmem>>, vector<128x128xbf16>
    %145 = arith.truncf %143 : vector<5x128xf32> to vector<5x128xbf16>
    %cst_41 = arith.constant dense<0.000000e+00> : vector<5x128xf32>
    %146 = tpu.matmul %145, %144, %cst_41 {dimension_numbers = #tpu.dot_dimension_numbers<[1], [0], [0], [1], [0, 0, 1, 1], [], []>} : vector<5x128xbf16>, vector<128x128xbf16>, vector<5x128xf32> -> vector<5x128xf32>
    %147 = arith.addf %1, %146 : vector<5x128xf32>
    %c0_42 = arith.constant 0 : index
    %c0_43 = arith.constant 0 : index
    %148 = vector.load %arg7[%c0_42, %c0_43] : memref<1x128xf32, #tpu.memory_space<vmem>>, vector<1x128xf32>
    %149 = vector.broadcast %148 : vector<1x128xf32> to vector<5x128xf32>
    %150 = arith.addf %147, %149 : vector<5x128xf32>
    %c0_44 = arith.constant 0 : index
    %c0_45 = arith.constant 0 : index
    %151 = vector.load %arg8[%c0_44, %c0_45] : memref<1x128xf32, #tpu.memory_space<vmem>>, vector<1x128xf32>
    %c0_46 = arith.constant 0 : index
    %c0_47 = arith.constant 0 : index
    %152 = vector.load %arg9[%c0_46, %c0_47] : memref<1x128xf32, #tpu.memory_space<vmem>>, vector<1x128xf32>
    %cst_48 = arith.constant dense<0.000000e+00> : vector<5xf32>
    %153 = vector.multi_reduction <add>, %150, %cst_48 [1] : vector<5x128xf32> to vector<5xf32>
    %154 = vector.shape_cast %153 : vector<5xf32> to vector<5x1xf32>
    %cst_49 = arith.constant 1.280000e+02 : f32
    %155 = vector.broadcast %cst_49 : f32 to vector<5x1xf32>
    %156 = arith.divf %154, %155 : vector<5x1xf32>
    %157 = vector.broadcast %156 : vector<5x1xf32> to vector<5x128xf32>
    %158 = arith.subf %150, %157 : vector<5x128xf32>
    %159 = arith.mulf %158, %158 : vector<5x128xf32>
    %cst_50 = arith.constant dense<0.000000e+00> : vector<5xf32>
    %160 = vector.multi_reduction <add>, %159, %cst_50 [1] : vector<5x128xf32> to vector<5xf32>
    %161 = vector.shape_cast %160 : vector<5xf32> to vector<5x1xf32>
    %cst_51 = arith.constant 1.280000e+02 : f32
    %162 = vector.broadcast %cst_51 : f32 to vector<5x1xf32>
    %163 = arith.divf %161, %162 : vector<5x1xf32>
    %cst_52 = arith.constant 9.99999997E-7 : f32
    %164 = vector.broadcast %cst_52 : f32 to vector<5x1xf32>
    %165 = arith.addf %163, %164 : vector<5x1xf32>
    %166 = math.rsqrt %165 : vector<5x1xf32>
    %167 = vector.broadcast %166 : vector<5x1xf32> to vector<5x128xf32>
    %168 = arith.mulf %158, %167 : vector<5x128xf32>
    %169 = vector.broadcast %151 : vector<1x128xf32> to vector<5x128xf32>
    %170 = arith.mulf %168, %169 : vector<5x128xf32>
    %171 = vector.broadcast %152 : vector<1x128xf32> to vector<5x128xf32>
    %172 = arith.addf %170, %171 : vector<5x128xf32>
    %c0_53 = arith.constant 0 : index
    %c0_54 = arith.constant 0 : index
    %173 = vector.load %arg10[%c0_53, %c0_54] : memref<128x512xbf16, #tpu.memory_space<vmem>>, vector<128x512xbf16>
    %174 = arith.truncf %172 : vector<5x128xf32> to vector<5x128xbf16>
    %cst_55 = arith.constant dense<0.000000e+00> : vector<5x512xf32>
    %175 = tpu.matmul %174, %173, %cst_55 {dimension_numbers = #tpu.dot_dimension_numbers<[1], [0], [0], [1], [0, 0, 1, 1], [], []>} : vector<5x128xbf16>, vector<128x512xbf16>, vector<5x512xf32> -> vector<5x512xf32>
    %c0_56 = arith.constant 0 : index
    %c0_57 = arith.constant 0 : index
    %176 = vector.load %arg11[%c0_56, %c0_57] : memref<1x512xf32, #tpu.memory_space<vmem>>, vector<1x512xf32>
    %177 = vector.broadcast %176 : vector<1x512xf32> to vector<5x512xf32>
    %178 = arith.addf %175, %177 : vector<5x512xf32>
    %179 = arith.mulf %178, %178 : vector<5x512xf32>
    %180 = arith.mulf %178, %179 : vector<5x512xf32>
    %cst_58 = arith.constant 4.471500e-02 : f32
    %181 = vector.broadcast %cst_58 : f32 to vector<5x512xf32>
    %182 = arith.mulf %181, %180 : vector<5x512xf32>
    %183 = arith.addf %178, %182 : vector<5x512xf32>
    %cst_59 = arith.constant 0.797884583 : f32
    %184 = vector.broadcast %cst_59 : f32 to vector<5x512xf32>
    %185 = arith.mulf %184, %183 : vector<5x512xf32>
    %186 = math.tanh %185 : vector<5x512xf32>
    %cst_60 = arith.constant 1.000000e+00 : f32
    %187 = vector.broadcast %cst_60 : f32 to vector<5x512xf32>
    %188 = arith.addf %187, %186 : vector<5x512xf32>
    %cst_61 = arith.constant 5.000000e-01 : f32
    %189 = vector.broadcast %cst_61 : f32 to vector<5x512xf32>
    %190 = arith.mulf %189, %188 : vector<5x512xf32>
    %191 = arith.mulf %178, %190 : vector<5x512xf32>
    %c0_62 = arith.constant 0 : index
    %c0_63 = arith.constant 0 : index
    %192 = vector.load %arg12[%c0_62, %c0_63] : memref<512x128xbf16, #tpu.memory_space<vmem>>, vector<512x128xbf16>
    %193 = arith.truncf %191 : vector<5x512xf32> to vector<5x512xbf16>
    %cst_64 = arith.constant dense<0.000000e+00> : vector<5x128xf32>
    %194 = tpu.matmul %193, %192, %cst_64 {dimension_numbers = #tpu.dot_dimension_numbers<[1], [0], [0], [1], [0, 0, 1, 1], [], []>} : vector<5x512xbf16>, vector<512x128xbf16>, vector<5x128xf32> -> vector<5x128xf32>
    %195 = arith.addf %150, %194 : vector<5x128xf32>
    %c0_65 = arith.constant 0 : index
    %c0_66 = arith.constant 0 : index
    %196 = vector.load %arg13[%c0_65, %c0_66] : memref<1x128xf32, #tpu.memory_space<vmem>>, vector<1x128xf32>
    %197 = vector.broadcast %196 : vector<1x128xf32> to vector<5x128xf32>
    %198 = arith.addf %195, %197 : vector<5x128xf32>
    %c0_67 = arith.constant 0 : index
    %c0_68 = arith.constant 0 : index
    %199 = vector.load %arg14[%c0_67, %c0_68] : memref<1x128xf32, #tpu.memory_space<vmem>>, vector<1x128xf32>
    %c0_69 = arith.constant 0 : index
    %c0_70 = arith.constant 0 : index
    %200 = vector.load %arg15[%c0_69, %c0_70] : memref<1x128xf32, #tpu.memory_space<vmem>>, vector<1x128xf32>
    %cst_71 = arith.constant dense<0.000000e+00> : vector<5xf32>
    %201 = vector.multi_reduction <add>, %198, %cst_71 [1] : vector<5x128xf32> to vector<5xf32>
    %202 = vector.shape_cast %201 : vector<5xf32> to vector<5x1xf32>
    %cst_72 = arith.constant 1.280000e+02 : f32
    %203 = vector.broadcast %cst_72 : f32 to vector<5x1xf32>
    %204 = arith.divf %202, %203 : vector<5x1xf32>
    %205 = vector.broadcast %204 : vector<5x1xf32> to vector<5x128xf32>
    %206 = arith.subf %198, %205 : vector<5x128xf32>
    %207 = arith.mulf %206, %206 : vector<5x128xf32>
    %cst_73 = arith.constant dense<0.000000e+00> : vector<5xf32>
    %208 = vector.multi_reduction <add>, %207, %cst_73 [1] : vector<5x128xf32> to vector<5xf32>
    %209 = vector.shape_cast %208 : vector<5xf32> to vector<5x1xf32>
    %cst_74 = arith.constant 1.280000e+02 : f32
    %210 = vector.broadcast %cst_74 : f32 to vector<5x1xf32>
    %211 = arith.divf %209, %210 : vector<5x1xf32>
    %cst_75 = arith.constant 9.99999997E-7 : f32
    %212 = vector.broadcast %cst_75 : f32 to vector<5x1xf32>
    %213 = arith.addf %211, %212 : vector<5x1xf32>
    %214 = math.rsqrt %213 : vector<5x1xf32>
    %215 = vector.broadcast %214 : vector<5x1xf32> to vector<5x128xf32>
    %216 = arith.mulf %206, %215 : vector<5x128xf32>
    %217 = vector.broadcast %199 : vector<1x128xf32> to vector<5x128xf32>
    %218 = arith.mulf %216, %217 : vector<5x128xf32>
    %219 = vector.broadcast %200 : vector<1x128xf32> to vector<5x128xf32>
    %220 = arith.addf %218, %219 : vector<5x128xf32>
    %c0_76 = arith.constant 0 : index
    %c0_77 = arith.constant 0 : index
    %c0_78 = arith.constant 0 : index
    %221 = vector.load %arg16[%c0_76, %c0_77, %c0_78] : memref<1x5x128xf32, #tpu.memory_space<vmem>>, vector<1x5x128xf32>
    %222 = vector.shape_cast %221 : vector<1x5x128xf32> to vector<5x128xf32>
    %223 = vector.shape_cast %220 : vector<5x128xf32> to vector<1x5x128xf32>
    tpu.vector_store %arg16[%c0_76, %c0_77, %c0_78], %223 {strides = array<i32>} : memref<1x5x128xf32, #tpu.memory_space<vmem>>, vector<1x5x128xf32>,
    return
  }
  func.func @transform_0(%arg0: i32) -> (i32, i32, i32) {
    %c0_i32 = arith.constant 0 : i32
    %c0_i32_0 = arith.constant 0 : i32
    %c0_i32_1 = arith.constant 0 : i32
    return %arg0, %c0_i32, %c0_i32_0 : i32, i32, i32
  }
  func.func @transform_1(%arg0: i32) -> (i32, i32) {
    %c0_i32 = arith.constant 0 : i32
    %c0_i32_0 = arith.constant 0 : i32
    %c0_i32_1 = arith.constant 0 : i32
    return %c0_i32, %c0_i32_0 : i32, i32
  }
  func.func @transform_2(%arg0: i32) -> (i32, i32) {
    %c0_i32 = arith.constant 0 : i32
    %c0_i32_0 = arith.constant 0 : i32
    %c0_i32_1 = arith.constant 0 : i32
    return %c0_i32, %c0_i32_0 : i32, i32
  }
  func.func @transform_3(%arg0: i32) -> (i32, i32) {
    %c0_i32 = arith.constant 0 : i32
    %c0_i32_0 = arith.constant 0 : i32
    %c0_i32_1 = arith.constant 0 : i32
    return %c0_i32, %c0_i32_0 : i32, i32
  }
  func.func @transform_4(%arg0: i32) -> (i32, i32) {
    %c0_i32 = arith.constant 0 : i32
    %c0_i32_0 = arith.constant 0 : i32
    %c0_i32_1 = arith.constant 0 : i32
    return %c0_i32, %c0_i32_0 : i32, i32
  }
  func.func @transform_5(%arg0: i32) -> (i32, i32) {
    %c0_i32 = arith.constant 0 : i32
    %c0_i32_0 = arith.constant 0 : i32
    %c0_i32_1 = arith.constant 0 : i32
    return %c0_i32, %c0_i32_0 : i32, i32
  }
  func.func @transform_6(%arg0: i32) -> (i32, i32) {
    %c0_i32 = arith.constant 0 : i32
    %c0_i32_0 = arith.constant 0 : i32
    %c0_i32_1 = arith.constant 0 : i32
    return %c0_i32, %c0_i32_0 : i32, i32
  }
  func.func @transform_7(%arg0: i32) -> (i32, i32) {
    %c0_i32 = arith.constant 0 : i32
    %c0_i32_0 = arith.constant 0 : i32
    %c0_i32_1 = arith.constant 0 : i32
    return %c0_i32, %c0_i32_0 : i32, i32
  }
  func.func @transform_8(%arg0: i32) -> (i32, i32) {
    %c0_i32 = arith.constant 0 : i32
    %c0_i32_0 = arith.constant 0 : i32
    %c0_i32_1 = arith.constant 0 : i32
    return %c0_i32, %c0_i32_0 : i32, i32
  }
  func.func @transform_9(%arg0: i32) -> (i32, i32) {
    %c0_i32 = arith.constant 0 : i32
    %c0_i32_0 = arith.constant 0 : i32
    %c0_i32_1 = arith.constant 0 : i32
    return %c0_i32, %c0_i32_0 : i32, i32
  }
  func.func @transform_10(%arg0: i32) -> (i32, i32) {
    %c0_i32 = arith.constant 0 : i32
    %c0_i32_0 = arith.constant 0 : i32
    %c0_i32_1 = arith.constant 0 : i32
    return %c0_i32, %c0_i32_0 : i32, i32
  }
  func.func @transform_11(%arg0: i32) -> (i32, i32) {
    %c0_i32 = arith.constant 0 : i32
    %c0_i32_0 = arith.constant 0 : i32
    %c0_i32_1 = arith.constant 0 : i32
    return %c0_i32, %c0_i32_0 : i32, i32
  }
  func.func @transform_12(%arg0: i32) -> (i32, i32) {
    %c0_i32 = arith.constant 0 : i32
    %c0_i32_0 = arith.constant 0 : i32
    %c0_i32_1 = arith.constant 0 : i32
    return %c0_i32, %c0_i32_0 : i32, i32
  }
  func.func @transform_13(%arg0: i32) -> (i32, i32) {
    %c0_i32 = arith.constant 0 : i32
    %c0_i32_0 = arith.constant 0 : i32
    %c0_i32_1 = arith.constant 0 : i32
    return %c0_i32, %c0_i32_0 : i32, i32
  }
  func.func @transform_14(%arg0: i32) -> (i32, i32) {
    %c0_i32 = arith.constant 0 : i32
    %c0_i32_0 = arith.constant 0 : i32
    %c0_i32_1 = arith.constant 0 : i32
    return %c0_i32, %c0_i32_0 : i32, i32
  }
  func.func @transform_15(%arg0: i32) -> (i32, i32, i32) {
    %c0_i32 = arith.constant 0 : i32
    %c0_i32_0 = arith.constant 0 : i32
    %c0_i32_1 = arith.constant 0 : i32
    return %arg0, %c0_i32, %c0_i32_0 : i32, i32, i32
  }
}

module attributes {stable_mosaic.version = 11 : i64} {
  func.func @_bert_layer_kernel(%arg0: i32, %arg1: memref<1x8x128xf32, #tpu.memory_space<vmem>>, %arg2: memref<1x1x8xf32, #tpu.memory_space<vmem>>, %arg3: memref<1x5x128xf32, #tpu.memory_space<vmem>>, %arg4: memref<1x5x128xf32, #tpu.memory_space<vmem>>, %arg5: memref<1x128xf32, #tpu.memory_space<vmem>>, %arg6: memref<1x128xf32, #tpu.memory_space<vmem>>, %arg7: memref<128x384xbf16, #tpu.memory_space<vmem>>, %arg8: memref<1x384xf32, #tpu.memory_space<vmem>>, %arg9: memref<128x128xbf16, #tpu.memory_space<vmem>>, %arg10: memref<1x128xf32, #tpu.memory_space<vmem>>, %arg11: memref<1x128xf32, #tpu.memory_space<vmem>>, %arg12: memref<1x128xf32, #tpu.memory_space<vmem>>, %arg13: memref<128x128xbf16, #tpu.memory_space<vmem>>, %arg14: memref<1x128xf32, #tpu.memory_space<vmem>>, %arg15: memref<128x256xbf16, #tpu.memory_space<vmem>>, %arg16: memref<1x256xf32, #tpu.memory_space<vmem>>, %arg17: memref<128x128xbf16, #tpu.memory_space<vmem>>, %arg18: memref<1x128xf32, #tpu.memory_space<vmem>>, %arg19: memref<1x128xf32, #tpu.memory_space<vmem>>, %arg20: memref<1x128xf32, #tpu.memory_space<vmem>>, %arg21: memref<128x512xbf16, #tpu.memory_space<vmem>>, %arg22: memref<1x512xf32, #tpu.memory_space<vmem>>, %arg23: memref<512x128xbf16, #tpu.memory_space<vmem>>, %arg24: memref<1x128xf32, #tpu.memory_space<vmem>>, %arg25: memref<1x128xf32, #tpu.memory_space<vmem>>, %arg26: memref<1x128xf32, #tpu.memory_space<vmem>>, %arg27: memref<1x8x128xf32, #tpu.memory_space<vmem>>) attributes {dimension_semantics = [#tpu.dimension_semantics<parallel>], iteration_bounds = array<i64: 2>, scalar_prefetch = 0 : i64, scratch_operands = 0 : i64, tpu.core_type = #tpu.core_type<tc>, window_params = [{transform_indices = @transform_0, window_bounds = array<i64: 1, 8, 128>}, {transform_indices = @transform_1, window_bounds = array<i64: 1, 1, 8>}, {transform_indices = @transform_2, window_bounds = array<i64: 1, 5, 128>}, {transform_indices = @transform_3, window_bounds = array<i64: 1, 5, 128>}, {pipeline_mode = #tpu.pipeline_mode<synchronous>, transform_indices = @transform_4, window_bounds = array<i64: 1, 128>}, {pipeline_mode = #tpu.pipeline_mode<synchronous>, transform_indices = @transform_5, window_bounds = array<i64: 1, 128>}, {pipeline_mode = #tpu.pipeline_mode<synchronous>, transform_indices = @transform_6, window_bounds = array<i64: 128, 384>}, {pipeline_mode = #tpu.pipeline_mode<synchronous>, transform_indices = @transform_7, window_bounds = array<i64: 1, 384>}, {pipeline_mode = #tpu.pipeline_mode<synchronous>, transform_indices = @transform_8, window_bounds = array<i64: 128, 128>}, {pipeline_mode = #tpu.pipeline_mode<synchronous>, transform_indices = @transform_9, window_bounds = array<i64: 1, 128>}, {pipeline_mode = #tpu.pipeline_mode<synchronous>, transform_indices = @transform_10, window_bounds = array<i64: 1, 128>}, {pipeline_mode = #tpu.pipeline_mode<synchronous>, transform_indices = @transform_11, window_bounds = array<i64: 1, 128>}, {pipeline_mode = #tpu.pipeline_mode<synchronous>, transform_indices = @transform_12, window_bounds = array<i64: 128, 128>}, {pipeline_mode = #tpu.pipeline_mode<synchronous>, transform_indices = @transform_13, window_bounds = array<i64: 1, 128>}, {pipeline_mode = #tpu.pipeline_mode<synchronous>, transform_indices = @transform_14, window_bounds = array<i64: 128, 256>}, {pipeline_mode = #tpu.pipeline_mode<synchronous>, transform_indices = @transform_15, window_bounds = array<i64: 1, 256>}, {pipeline_mode = #tpu.pipeline_mode<synchronous>, transform_indices = @transform_16, window_bounds = array<i64: 128, 128>}, {pipeline_mode = #tpu.pipeline_mode<synchronous>, transform_indices = @transform_17, window_bounds = array<i64: 1, 128>}, {pipeline_mode = #tpu.pipeline_mode<synchronous>, transform_indices = @transform_18, window_bounds = array<i64: 1, 128>}, {pipeline_mode = #tpu.pipeline_mode<synchronous>, transform_indices = @transform_19, window_bounds = array<i64: 1, 128>}, {pipeline_mode = #tpu.pipeline_mode<synchronous>, transform_indices = @transform_20, window_bounds = array<i64: 128, 512>}, {pipeline_mode = #tpu.pipeline_mode<synchronous>, transform_indices = @transform_21, window_bounds = array<i64: 1, 512>}, {pipeline_mode = #tpu.pipeline_mode<synchronous>, transform_indices = @transform_22, window_bounds = array<i64: 512, 128>}, {pipeline_mode = #tpu.pipeline_mode<synchronous>, transform_indices = @transform_23, window_bounds = array<i64: 1, 128>}, {pipeline_mode = #tpu.pipeline_mode<synchronous>, transform_indices = @transform_24, window_bounds = array<i64: 1, 128>}, {pipeline_mode = #tpu.pipeline_mode<synchronous>, transform_indices = @transform_25, window_bounds = array<i64: 1, 128>}, {transform_indices = @transform_26, window_bounds = array<i64: 1, 8, 128>}]} {
    %c0 = arith.constant 0 : index
    %c0_0 = arith.constant 0 : index
    %c0_1 = arith.constant 0 : index
    %0 = vector.load %arg1[%c0, %c0_0, %c0_1] : memref<1x8x128xf32, #tpu.memory_space<vmem>>, vector<1x8x128xf32>
    %1 = vector.shape_cast %0 : vector<1x8x128xf32> to vector<8x128xf32>
    %c0_2 = arith.constant 0 : index
    %c0_3 = arith.constant 0 : index
    %2 = vector.load %arg5[%c0_2, %c0_3] : memref<1x128xf32, #tpu.memory_space<vmem>>, vector<1x128xf32>
    %c0_4 = arith.constant 0 : index
    %c0_5 = arith.constant 0 : index
    %3 = vector.load %arg6[%c0_4, %c0_5] : memref<1x128xf32, #tpu.memory_space<vmem>>, vector<1x128xf32>
    %cst = arith.constant dense<0.000000e+00> : vector<8xf32>
    %4 = vector.multi_reduction <add>, %1, %cst [1] : vector<8x128xf32> to vector<8xf32>
    %5 = vector.shape_cast %4 : vector<8xf32> to vector<8x1xf32>
    %cst_6 = arith.constant 1.280000e+02 : f32
    %6 = vector.broadcast %cst_6 : f32 to vector<8x1xf32>
    %7 = arith.divf %5, %6 : vector<8x1xf32>
    %8 = vector.broadcast %7 : vector<8x1xf32> to vector<8x128xf32>
    %9 = arith.subf %1, %8 : vector<8x128xf32>
    %10 = arith.mulf %9, %9 : vector<8x128xf32>
    %cst_7 = arith.constant dense<0.000000e+00> : vector<8xf32>
    %11 = vector.multi_reduction <add>, %10, %cst_7 [1] : vector<8x128xf32> to vector<8xf32>
    %12 = vector.shape_cast %11 : vector<8xf32> to vector<8x1xf32>
    %cst_8 = arith.constant 1.280000e+02 : f32
    %13 = vector.broadcast %cst_8 : f32 to vector<8x1xf32>
    %14 = arith.divf %12, %13 : vector<8x1xf32>
    %cst_9 = arith.constant 9.99999996E-13 : f32
    %15 = vector.broadcast %cst_9 : f32 to vector<8x1xf32>
    %16 = arith.addf %14, %15 : vector<8x1xf32>
    %17 = math.rsqrt %16 : vector<8x1xf32>
    %18 = vector.broadcast %17 : vector<8x1xf32> to vector<8x128xf32>
    %19 = arith.mulf %9, %18 : vector<8x128xf32>
    %20 = vector.broadcast %2 : vector<1x128xf32> to vector<8x128xf32>
    %21 = arith.mulf %19, %20 : vector<8x128xf32>
    %22 = vector.broadcast %3 : vector<1x128xf32> to vector<8x128xf32>
    %23 = arith.addf %21, %22 : vector<8x128xf32>
    %c0_10 = arith.constant 0 : index
    %c0_11 = arith.constant 0 : index
    %24 = vector.load %arg7[%c0_10, %c0_11] : memref<128x384xbf16, #tpu.memory_space<vmem>>, vector<128x384xbf16>
    %25 = arith.truncf %23 : vector<8x128xf32> to vector<8x128xbf16>
    %cst_12 = arith.constant dense<0.000000e+00> : vector<8x384xf32>
    %26 = tpu.matmul %25, %24, %cst_12 {dimension_numbers = #tpu.dot_dimension_numbers<[1], [0], [0], [1], [0, 0, 1, 1], [], []>} : vector<8x128xbf16>, vector<128x384xbf16>, vector<8x384xf32> -> vector<8x384xf32>
    %c0_13 = arith.constant 0 : index
    %c0_14 = arith.constant 0 : index
    %27 = vector.load %arg8[%c0_13, %c0_14] : memref<1x384xf32, #tpu.memory_space<vmem>>, vector<1x384xf32>
    %28 = vector.broadcast %27 : vector<1x384xf32> to vector<8x384xf32>
    %29 = arith.addf %26, %28 : vector<8x384xf32>
    %c0_15 = arith.constant 0 : index
    %c0_16 = arith.constant 0 : index
    %c0_17 = arith.constant 0 : index
    %30 = vector.load %arg2[%c0_15, %c0_16, %c0_17] : memref<1x1x8xf32, #tpu.memory_space<vmem>>, vector<1x1x8xf32>
    %31 = vector.shape_cast %30 : vector<1x1x8xf32> to vector<1x8xf32>
    %32 = vector.shape_cast %31 : vector<1x8xf32> to vector<1x8xf32>
    %33 = vector.broadcast %32 : vector<1x8xf32> to vector<8x8xf32>
    %34 = vector.extract_strided_slice %29 {offsets = [0, 0], sizes = [8, 128], strides = [1, 1]} : vector<8x384xf32> to vector<8x128xf32>
    %35 = vector.extract_strided_slice %29 {offsets = [0, 128], sizes = [8, 128], strides = [1, 1]} : vector<8x384xf32> to vector<8x128xf32>
    %36 = vector.extract_strided_slice %29 {offsets = [0, 256], sizes = [8, 128], strides = [1, 1]} : vector<8x384xf32> to vector<8x128xf32>
    %37 = tpu.iota {dimensions = array<i32: 1>} : vector<8x128xi32>
    %38 = arith.truncf %34 : vector<8x128xf32> to vector<8x128xbf16>
    %cst_18 = arith.constant 0.000000e+00 : f32
    %39 = vector.broadcast %cst_18 : f32 to vector<8x128xf32>
    %c0_i32 = arith.constant 0 : i32
    %40 = vector.broadcast %c0_i32 : i32 to vector<8x128xi32>
    %41 = arith.cmpi sge, %37, %40 : vector<8x128xi32>
    %c32_i32 = arith.constant 32 : i32
    %42 = vector.broadcast %c32_i32 : i32 to vector<8x128xi32>
    %43 = arith.cmpi slt, %37, %42 : vector<8x128xi32>
    %44 = arith.andi %41, %43 : vector<8x128xi1>
    %45 = arith.extui %44 : vector<8x128xi1> to vector<8x128xi32>
    %46 = arith.sitofp %45 : vector<8x128xi32> to vector<8x128xf32>
    %47 = arith.mulf %35, %46 : vector<8x128xf32>
    %48 = arith.truncf %47 : vector<8x128xf32> to vector<8x128xbf16>
    %49 = arith.mulf %36, %46 : vector<8x128xf32>
    %50 = arith.truncf %49 : vector<8x128xf32> to vector<8x128xbf16>
    %cst_19 = arith.constant dense<0.000000e+00> : vector<8x8xf32>
    %51 = tpu.matmul %38, %48, %cst_19 {dimension_numbers = #tpu.dot_dimension_numbers<[1], [1], [0], [0], [0, 0, 1, 0], [], []>} : vector<8x128xbf16>, vector<8x128xbf16>, vector<8x8xf32> -> vector<8x8xf32>
    %cst_20 = arith.constant 0.176776692 : f32
    %52 = vector.broadcast %cst_20 : f32 to vector<8x8xf32>
    %53 = arith.mulf %51, %52 : vector<8x8xf32>
    %54 = arith.addf %53, %33 : vector<8x8xf32>
    %cst_21 = arith.constant dense<0xFF800000> : vector<8xf32>
    %55 = vector.multi_reduction <maximumf>, %54, %cst_21 [1] : vector<8x8xf32> to vector<8xf32>
    %56 = vector.shape_cast %55 : vector<8xf32> to vector<8x1xf32>
    %57 = vector.broadcast %56 : vector<8x1xf32> to vector<8x8xf32>
    %58 = arith.subf %54, %57 : vector<8x8xf32>
    %59 = math.exp %58 : vector<8x8xf32>
    %cst_22 = arith.constant dense<0.000000e+00> : vector<8xf32>
    %60 = vector.multi_reduction <add>, %59, %cst_22 [1] : vector<8x8xf32> to vector<8xf32>
    %61 = vector.shape_cast %60 : vector<8xf32> to vector<8x1xf32>
    %62 = tpu.reciprocal %61 {approx = true} : vector<8x1xf32> -> vector<8x1xf32>
    %63 = vector.broadcast %62 : vector<8x1xf32> to vector<8x8xf32>
    %64 = arith.mulf %59, %63 : vector<8x8xf32>
    %65 = arith.truncf %64 : vector<8x8xf32> to vector<8x8xbf16>
    %cst_23 = arith.constant dense<0.000000e+00> : vector<8x128xf32>
    %66 = tpu.matmul %65, %50, %cst_23 {dimension_numbers = #tpu.dot_dimension_numbers<[1], [0], [0], [1], [0, 0, 1, 1], [], []>} : vector<8x8xbf16>, vector<8x128xbf16>, vector<8x128xf32> -> vector<8x128xf32>
    %67 = arith.addf %39, %66 : vector<8x128xf32>
    %c32_i32_24 = arith.constant 32 : i32
    %68 = vector.broadcast %c32_i32_24 : i32 to vector<8x128xi32>
    %69 = arith.cmpi sge, %37, %68 : vector<8x128xi32>
    %c64_i32 = arith.constant 64 : i32
    %70 = vector.broadcast %c64_i32 : i32 to vector<8x128xi32>
    %71 = arith.cmpi slt, %37, %70 : vector<8x128xi32>
    %72 = arith.andi %69, %71 : vector<8x128xi1>
    %73 = arith.extui %72 : vector<8x128xi1> to vector<8x128xi32>
    %74 = arith.sitofp %73 : vector<8x128xi32> to vector<8x128xf32>
    %75 = arith.mulf %35, %74 : vector<8x128xf32>
    %76 = arith.truncf %75 : vector<8x128xf32> to vector<8x128xbf16>
    %77 = arith.mulf %36, %74 : vector<8x128xf32>
    %78 = arith.truncf %77 : vector<8x128xf32> to vector<8x128xbf16>
    %cst_25 = arith.constant dense<0.000000e+00> : vector<8x8xf32>
    %79 = tpu.matmul %38, %76, %cst_25 {dimension_numbers = #tpu.dot_dimension_numbers<[1], [1], [0], [0], [0, 0, 1, 0], [], []>} : vector<8x128xbf16>, vector<8x128xbf16>, vector<8x8xf32> -> vector<8x8xf32>
    %cst_26 = arith.constant 0.176776692 : f32
    %80 = vector.broadcast %cst_26 : f32 to vector<8x8xf32>
    %81 = arith.mulf %79, %80 : vector<8x8xf32>
    %82 = arith.addf %81, %33 : vector<8x8xf32>
    %cst_27 = arith.constant dense<0xFF800000> : vector<8xf32>
    %83 = vector.multi_reduction <maximumf>, %82, %cst_27 [1] : vector<8x8xf32> to vector<8xf32>
    %84 = vector.shape_cast %83 : vector<8xf32> to vector<8x1xf32>
    %85 = vector.broadcast %84 : vector<8x1xf32> to vector<8x8xf32>
    %86 = arith.subf %82, %85 : vector<8x8xf32>
    %87 = math.exp %86 : vector<8x8xf32>
    %cst_28 = arith.constant dense<0.000000e+00> : vector<8xf32>
    %88 = vector.multi_reduction <add>, %87, %cst_28 [1] : vector<8x8xf32> to vector<8xf32>
    %89 = vector.shape_cast %88 : vector<8xf32> to vector<8x1xf32>
    %90 = tpu.reciprocal %89 {approx = true} : vector<8x1xf32> -> vector<8x1xf32>
    %91 = vector.broadcast %90 : vector<8x1xf32> to vector<8x8xf32>
    %92 = arith.mulf %87, %91 : vector<8x8xf32>
    %93 = arith.truncf %92 : vector<8x8xf32> to vector<8x8xbf16>
    %cst_29 = arith.constant dense<0.000000e+00> : vector<8x128xf32>
    %94 = tpu.matmul %93, %78, %cst_29 {dimension_numbers = #tpu.dot_dimension_numbers<[1], [0], [0], [1], [0, 0, 1, 1], [], []>} : vector<8x8xbf16>, vector<8x128xbf16>, vector<8x128xf32> -> vector<8x128xf32>
    %95 = arith.addf %67, %94 : vector<8x128xf32>
    %c64_i32_30 = arith.constant 64 : i32
    %96 = vector.broadcast %c64_i32_30 : i32 to vector<8x128xi32>
    %97 = arith.cmpi sge, %37, %96 : vector<8x128xi32>
    %c96_i32 = arith.constant 96 : i32
    %98 = vector.broadcast %c96_i32 : i32 to vector<8x128xi32>
    %99 = arith.cmpi slt, %37, %98 : vector<8x128xi32>
    %100 = arith.andi %97, %99 : vector<8x128xi1>
    %101 = arith.extui %100 : vector<8x128xi1> to vector<8x128xi32>
    %102 = arith.sitofp %101 : vector<8x128xi32> to vector<8x128xf32>
    %103 = arith.mulf %35, %102 : vector<8x128xf32>
    %104 = arith.truncf %103 : vector<8x128xf32> to vector<8x128xbf16>
    %105 = arith.mulf %36, %102 : vector<8x128xf32>
    %106 = arith.truncf %105 : vector<8x128xf32> to vector<8x128xbf16>
    %cst_31 = arith.constant dense<0.000000e+00> : vector<8x8xf32>
    %107 = tpu.matmul %38, %104, %cst_31 {dimension_numbers = #tpu.dot_dimension_numbers<[1], [1], [0], [0], [0, 0, 1, 0], [], []>} : vector<8x128xbf16>, vector<8x128xbf16>, vector<8x8xf32> -> vector<8x8xf32>
    %cst_32 = arith.constant 0.176776692 : f32
    %108 = vector.broadcast %cst_32 : f32 to vector<8x8xf32>
    %109 = arith.mulf %107, %108 : vector<8x8xf32>
    %110 = arith.addf %109, %33 : vector<8x8xf32>
    %cst_33 = arith.constant dense<0xFF800000> : vector<8xf32>
    %111 = vector.multi_reduction <maximumf>, %110, %cst_33 [1] : vector<8x8xf32> to vector<8xf32>
    %112 = vector.shape_cast %111 : vector<8xf32> to vector<8x1xf32>
    %113 = vector.broadcast %112 : vector<8x1xf32> to vector<8x8xf32>
    %114 = arith.subf %110, %113 : vector<8x8xf32>
    %115 = math.exp %114 : vector<8x8xf32>
    %cst_34 = arith.constant dense<0.000000e+00> : vector<8xf32>
    %116 = vector.multi_reduction <add>, %115, %cst_34 [1] : vector<8x8xf32> to vector<8xf32>
    %117 = vector.shape_cast %116 : vector<8xf32> to vector<8x1xf32>
    %118 = tpu.reciprocal %117 {approx = true} : vector<8x1xf32> -> vector<8x1xf32>
    %119 = vector.broadcast %118 : vector<8x1xf32> to vector<8x8xf32>
    %120 = arith.mulf %115, %119 : vector<8x8xf32>
    %121 = arith.truncf %120 : vector<8x8xf32> to vector<8x8xbf16>
    %cst_35 = arith.constant dense<0.000000e+00> : vector<8x128xf32>
    %122 = tpu.matmul %121, %106, %cst_35 {dimension_numbers = #tpu.dot_dimension_numbers<[1], [0], [0], [1], [0, 0, 1, 1], [], []>} : vector<8x8xbf16>, vector<8x128xbf16>, vector<8x128xf32> -> vector<8x128xf32>
    %123 = arith.addf %95, %122 : vector<8x128xf32>
    %c96_i32_36 = arith.constant 96 : i32
    %124 = vector.broadcast %c96_i32_36 : i32 to vector<8x128xi32>
    %125 = arith.cmpi sge, %37, %124 : vector<8x128xi32>
    %c128_i32 = arith.constant 128 : i32
    %126 = vector.broadcast %c128_i32 : i32 to vector<8x128xi32>
    %127 = arith.cmpi slt, %37, %126 : vector<8x128xi32>
    %128 = arith.andi %125, %127 : vector<8x128xi1>
    %129 = arith.extui %128 : vector<8x128xi1> to vector<8x128xi32>
    %130 = arith.sitofp %129 : vector<8x128xi32> to vector<8x128xf32>
    %131 = arith.mulf %35, %130 : vector<8x128xf32>
    %132 = arith.truncf %131 : vector<8x128xf32> to vector<8x128xbf16>
    %133 = arith.mulf %36, %130 : vector<8x128xf32>
    %134 = arith.truncf %133 : vector<8x128xf32> to vector<8x128xbf16>
    %cst_37 = arith.constant dense<0.000000e+00> : vector<8x8xf32>
    %135 = tpu.matmul %38, %132, %cst_37 {dimension_numbers = #tpu.dot_dimension_numbers<[1], [1], [0], [0], [0, 0, 1, 0], [], []>} : vector<8x128xbf16>, vector<8x128xbf16>, vector<8x8xf32> -> vector<8x8xf32>
    %cst_38 = arith.constant 0.176776692 : f32
    %136 = vector.broadcast %cst_38 : f32 to vector<8x8xf32>
    %137 = arith.mulf %135, %136 : vector<8x8xf32>
    %138 = arith.addf %137, %33 : vector<8x8xf32>
    %cst_39 = arith.constant dense<0xFF800000> : vector<8xf32>
    %139 = vector.multi_reduction <maximumf>, %138, %cst_39 [1] : vector<8x8xf32> to vector<8xf32>
    %140 = vector.shape_cast %139 : vector<8xf32> to vector<8x1xf32>
    %141 = vector.broadcast %140 : vector<8x1xf32> to vector<8x8xf32>
    %142 = arith.subf %138, %141 : vector<8x8xf32>
    %143 = math.exp %142 : vector<8x8xf32>
    %cst_40 = arith.constant dense<0.000000e+00> : vector<8xf32>
    %144 = vector.multi_reduction <add>, %143, %cst_40 [1] : vector<8x8xf32> to vector<8xf32>
    %145 = vector.shape_cast %144 : vector<8xf32> to vector<8x1xf32>
    %146 = tpu.reciprocal %145 {approx = true} : vector<8x1xf32> -> vector<8x1xf32>
    %147 = vector.broadcast %146 : vector<8x1xf32> to vector<8x8xf32>
    %148 = arith.mulf %143, %147 : vector<8x8xf32>
    %149 = arith.truncf %148 : vector<8x8xf32> to vector<8x8xbf16>
    %cst_41 = arith.constant dense<0.000000e+00> : vector<8x128xf32>
    %150 = tpu.matmul %149, %134, %cst_41 {dimension_numbers = #tpu.dot_dimension_numbers<[1], [0], [0], [1], [0, 0, 1, 1], [], []>} : vector<8x8xbf16>, vector<8x128xbf16>, vector<8x128xf32> -> vector<8x128xf32>
    %151 = arith.addf %123, %150 : vector<8x128xf32>
    %c0_42 = arith.constant 0 : index
    %c0_43 = arith.constant 0 : index
    %152 = vector.load %arg9[%c0_42, %c0_43] : memref<128x128xbf16, #tpu.memory_space<vmem>>, vector<128x128xbf16>
    %153 = arith.truncf %151 : vector<8x128xf32> to vector<8x128xbf16>
    %cst_44 = arith.constant dense<0.000000e+00> : vector<8x128xf32>
    %154 = tpu.matmul %153, %152, %cst_44 {dimension_numbers = #tpu.dot_dimension_numbers<[1], [0], [0], [1], [0, 0, 1, 1], [], []>} : vector<8x128xbf16>, vector<128x128xbf16>, vector<8x128xf32> -> vector<8x128xf32>
    %155 = arith.addf %23, %154 : vector<8x128xf32>
    %c0_45 = arith.constant 0 : index
    %c0_46 = arith.constant 0 : index
    %156 = vector.load %arg10[%c0_45, %c0_46] : memref<1x128xf32, #tpu.memory_space<vmem>>, vector<1x128xf32>
    %157 = vector.broadcast %156 : vector<1x128xf32> to vector<8x128xf32>
    %158 = arith.addf %155, %157 : vector<8x128xf32>
    %c0_47 = arith.constant 0 : index
    %c0_48 = arith.constant 0 : index
    %159 = vector.load %arg11[%c0_47, %c0_48] : memref<1x128xf32, #tpu.memory_space<vmem>>, vector<1x128xf32>
    %c0_49 = arith.constant 0 : index
    %c0_50 = arith.constant 0 : index
    %160 = vector.load %arg12[%c0_49, %c0_50] : memref<1x128xf32, #tpu.memory_space<vmem>>, vector<1x128xf32>
    %cst_51 = arith.constant dense<0.000000e+00> : vector<8xf32>
    %161 = vector.multi_reduction <add>, %158, %cst_51 [1] : vector<8x128xf32> to vector<8xf32>
    %162 = vector.shape_cast %161 : vector<8xf32> to vector<8x1xf32>
    %cst_52 = arith.constant 1.280000e+02 : f32
    %163 = vector.broadcast %cst_52 : f32 to vector<8x1xf32>
    %164 = arith.divf %162, %163 : vector<8x1xf32>
    %165 = vector.broadcast %164 : vector<8x1xf32> to vector<8x128xf32>
    %166 = arith.subf %158, %165 : vector<8x128xf32>
    %167 = arith.mulf %166, %166 : vector<8x128xf32>
    %cst_53 = arith.constant dense<0.000000e+00> : vector<8xf32>
    %168 = vector.multi_reduction <add>, %167, %cst_53 [1] : vector<8x128xf32> to vector<8xf32>
    %169 = vector.shape_cast %168 : vector<8xf32> to vector<8x1xf32>
    %cst_54 = arith.constant 1.280000e+02 : f32
    %170 = vector.broadcast %cst_54 : f32 to vector<8x1xf32>
    %171 = arith.divf %169, %170 : vector<8x1xf32>
    %cst_55 = arith.constant 9.99999996E-13 : f32
    %172 = vector.broadcast %cst_55 : f32 to vector<8x1xf32>
    %173 = arith.addf %171, %172 : vector<8x1xf32>
    %174 = math.rsqrt %173 : vector<8x1xf32>
    %175 = vector.broadcast %174 : vector<8x1xf32> to vector<8x128xf32>
    %176 = arith.mulf %166, %175 : vector<8x128xf32>
    %177 = vector.broadcast %159 : vector<1x128xf32> to vector<8x128xf32>
    %178 = arith.mulf %176, %177 : vector<8x128xf32>
    %179 = vector.broadcast %160 : vector<1x128xf32> to vector<8x128xf32>
    %180 = arith.addf %178, %179 : vector<8x128xf32>
    %c0_56 = arith.constant 0 : index
    %c0_57 = arith.constant 0 : index
    %181 = vector.load %arg13[%c0_56, %c0_57] : memref<128x128xbf16, #tpu.memory_space<vmem>>, vector<128x128xbf16>
    %182 = arith.truncf %180 : vector<8x128xf32> to vector<8x128xbf16>
    %cst_58 = arith.constant dense<0.000000e+00> : vector<8x128xf32>
    %183 = tpu.matmul %182, %181, %cst_58 {dimension_numbers = #tpu.dot_dimension_numbers<[1], [0], [0], [1], [0, 0, 1, 1], [], []>} : vector<8x128xbf16>, vector<128x128xbf16>, vector<8x128xf32> -> vector<8x128xf32>
    %c0_59 = arith.constant 0 : index
    %c0_60 = arith.constant 0 : index
    %184 = vector.load %arg14[%c0_59, %c0_60] : memref<1x128xf32, #tpu.memory_space<vmem>>, vector<1x128xf32>
    %185 = vector.broadcast %184 : vector<1x128xf32> to vector<8x128xf32>
    %186 = arith.addf %183, %185 : vector<8x128xf32>
    %c0_61 = arith.constant 0 : index
    %c0_62 = arith.constant 0 : index
    %c0_63 = arith.constant 0 : index
    %187 = vector.load %arg3[%c0_61, %c0_62, %c0_63] : memref<1x5x128xf32, #tpu.memory_space<vmem>>, vector<1x5x128xf32>
    %188 = vector.shape_cast %187 : vector<1x5x128xf32> to vector<5x128xf32>
    %c0_64 = arith.constant 0 : index
    %c0_65 = arith.constant 0 : index
    %189 = vector.load %arg15[%c0_64, %c0_65] : memref<128x256xbf16, #tpu.memory_space<vmem>>, vector<128x256xbf16>
    %190 = arith.truncf %188 : vector<5x128xf32> to vector<5x128xbf16>
    %cst_66 = arith.constant dense<0.000000e+00> : vector<5x256xf32>
    %191 = tpu.matmul %190, %189, %cst_66 {dimension_numbers = #tpu.dot_dimension_numbers<[1], [0], [0], [1], [0, 0, 1, 1], [], []>} : vector<5x128xbf16>, vector<128x256xbf16>, vector<5x256xf32> -> vector<5x256xf32>
    %c0_67 = arith.constant 0 : index
    %c0_68 = arith.constant 0 : index
    %192 = vector.load %arg16[%c0_67, %c0_68] : memref<1x256xf32, #tpu.memory_space<vmem>>, vector<1x256xf32>
    %193 = vector.broadcast %192 : vector<1x256xf32> to vector<5x256xf32>
    %194 = arith.addf %191, %193 : vector<5x256xf32>
    %c0_69 = arith.constant 0 : index
    %c0_70 = arith.constant 0 : index
    %c0_71 = arith.constant 0 : index
    %195 = vector.load %arg4[%c0_69, %c0_70, %c0_71] : memref<1x5x128xf32, #tpu.memory_space<vmem>>, vector<1x5x128xf32>
    %196 = vector.shape_cast %195 : vector<1x5x128xf32> to vector<5x128xf32>
    %c0_72 = arith.constant 0 : index
    %c0_73 = arith.constant 0 : index
    %197 = vector.load %arg15[%c0_72, %c0_73] : memref<128x256xbf16, #tpu.memory_space<vmem>>, vector<128x256xbf16>
    %198 = arith.truncf %196 : vector<5x128xf32> to vector<5x128xbf16>
    %cst_74 = arith.constant dense<0.000000e+00> : vector<5x256xf32>
    %199 = tpu.matmul %198, %197, %cst_74 {dimension_numbers = #tpu.dot_dimension_numbers<[1], [0], [0], [1], [0, 0, 1, 1], [], []>} : vector<5x128xbf16>, vector<128x256xbf16>, vector<5x256xf32> -> vector<5x256xf32>
    %c0_75 = arith.constant 0 : index
    %c0_76 = arith.constant 0 : index
    %200 = vector.load %arg16[%c0_75, %c0_76] : memref<1x256xf32, #tpu.memory_space<vmem>>, vector<1x256xf32>
    %201 = vector.broadcast %200 : vector<1x256xf32> to vector<5x256xf32>
    %202 = arith.addf %199, %201 : vector<5x256xf32>
    %203 = vector.extract_strided_slice %194 {offsets = [0, 0], sizes = [5, 128], strides = [1, 1]} : vector<5x256xf32> to vector<5x128xf32>
    %204 = vector.extract_strided_slice %194 {offsets = [0, 128], sizes = [5, 128], strides = [1, 1]} : vector<5x256xf32> to vector<5x128xf32>
    %205 = tpu.iota {dimensions = array<i32: 1>} : vector<5x128xi32>
    %206 = arith.truncf %186 : vector<8x128xf32> to vector<8x128xbf16>
    %cst_77 = arith.constant 0.000000e+00 : f32
    %207 = vector.broadcast %cst_77 : f32 to vector<8x128xf32>
    %c0_i32_78 = arith.constant 0 : i32
    %208 = vector.broadcast %c0_i32_78 : i32 to vector<5x128xi32>
    %209 = arith.cmpi sge, %205, %208 : vector<5x128xi32>
    %c32_i32_79 = arith.constant 32 : i32
    %210 = vector.broadcast %c32_i32_79 : i32 to vector<5x128xi32>
    %211 = arith.cmpi slt, %205, %210 : vector<5x128xi32>
    %212 = arith.andi %209, %211 : vector<5x128xi1>
    %213 = arith.extui %212 : vector<5x128xi1> to vector<5x128xi32>
    %214 = arith.sitofp %213 : vector<5x128xi32> to vector<5x128xf32>
    %215 = arith.mulf %203, %214 : vector<5x128xf32>
    %216 = arith.truncf %215 : vector<5x128xf32> to vector<5x128xbf16>
    %217 = arith.mulf %204, %214 : vector<5x128xf32>
    %218 = arith.truncf %217 : vector<5x128xf32> to vector<5x128xbf16>
    %cst_80 = arith.constant dense<0.000000e+00> : vector<8x5xf32>
    %219 = tpu.matmul %206, %216, %cst_80 {dimension_numbers = #tpu.dot_dimension_numbers<[1], [1], [0], [0], [0, 0, 1, 0], [], []>} : vector<8x128xbf16>, vector<5x128xbf16>, vector<8x5xf32> -> vector<8x5xf32>
    %cst_81 = arith.constant 0.176776692 : f32
    %220 = vector.broadcast %cst_81 : f32 to vector<8x5xf32>
    %221 = arith.mulf %219, %220 : vector<8x5xf32>
    %cst_82 = arith.constant dense<0xFF800000> : vector<8xf32>
    %222 = vector.multi_reduction <maximumf>, %221, %cst_82 [1] : vector<8x5xf32> to vector<8xf32>
    %223 = vector.shape_cast %222 : vector<8xf32> to vector<8x1xf32>
    %224 = vector.broadcast %223 : vector<8x1xf32> to vector<8x5xf32>
    %225 = arith.subf %221, %224 : vector<8x5xf32>
    %226 = math.exp %225 : vector<8x5xf32>
    %cst_83 = arith.constant dense<0.000000e+00> : vector<8xf32>
    %227 = vector.multi_reduction <add>, %226, %cst_83 [1] : vector<8x5xf32> to vector<8xf32>
    %228 = vector.shape_cast %227 : vector<8xf32> to vector<8x1xf32>
    %229 = tpu.reciprocal %228 {approx = true} : vector<8x1xf32> -> vector<8x1xf32>
    %230 = vector.broadcast %229 : vector<8x1xf32> to vector<8x5xf32>
    %231 = arith.mulf %226, %230 : vector<8x5xf32>
    %232 = arith.truncf %231 : vector<8x5xf32> to vector<8x5xbf16>
    %cst_84 = arith.constant dense<0.000000e+00> : vector<8x128xf32>
    %233 = tpu.matmul %232, %218, %cst_84 {dimension_numbers = #tpu.dot_dimension_numbers<[1], [0], [0], [1], [0, 0, 1, 1], [], []>} : vector<8x5xbf16>, vector<5x128xbf16>, vector<8x128xf32> -> vector<8x128xf32>
    %234 = arith.addf %207, %233 : vector<8x128xf32>
    %c32_i32_85 = arith.constant 32 : i32
    %235 = vector.broadcast %c32_i32_85 : i32 to vector<5x128xi32>
    %236 = arith.cmpi sge, %205, %235 : vector<5x128xi32>
    %c64_i32_86 = arith.constant 64 : i32
    %237 = vector.broadcast %c64_i32_86 : i32 to vector<5x128xi32>
    %238 = arith.cmpi slt, %205, %237 : vector<5x128xi32>
    %239 = arith.andi %236, %238 : vector<5x128xi1>
    %240 = arith.extui %239 : vector<5x128xi1> to vector<5x128xi32>
    %241 = arith.sitofp %240 : vector<5x128xi32> to vector<5x128xf32>
    %242 = arith.mulf %203, %241 : vector<5x128xf32>
    %243 = arith.truncf %242 : vector<5x128xf32> to vector<5x128xbf16>
    %244 = arith.mulf %204, %241 : vector<5x128xf32>
    %245 = arith.truncf %244 : vector<5x128xf32> to vector<5x128xbf16>
    %cst_87 = arith.constant dense<0.000000e+00> : vector<8x5xf32>
    %246 = tpu.matmul %206, %243, %cst_87 {dimension_numbers = #tpu.dot_dimension_numbers<[1], [1], [0], [0], [0, 0, 1, 0], [], []>} : vector<8x128xbf16>, vector<5x128xbf16>, vector<8x5xf32> -> vector<8x5xf32>
    %cst_88 = arith.constant 0.176776692 : f32
    %247 = vector.broadcast %cst_88 : f32 to vector<8x5xf32>
    %248 = arith.mulf %246, %247 : vector<8x5xf32>
    %cst_89 = arith.constant dense<0xFF800000> : vector<8xf32>
    %249 = vector.multi_reduction <maximumf>, %248, %cst_89 [1] : vector<8x5xf32> to vector<8xf32>
    %250 = vector.shape_cast %249 : vector<8xf32> to vector<8x1xf32>
    %251 = vector.broadcast %250 : vector<8x1xf32> to vector<8x5xf32>
    %252 = arith.subf %248, %251 : vector<8x5xf32>
    %253 = math.exp %252 : vector<8x5xf32>
    %cst_90 = arith.constant dense<0.000000e+00> : vector<8xf32>
    %254 = vector.multi_reduction <add>, %253, %cst_90 [1] : vector<8x5xf32> to vector<8xf32>
    %255 = vector.shape_cast %254 : vector<8xf32> to vector<8x1xf32>
    %256 = tpu.reciprocal %255 {approx = true} : vector<8x1xf32> -> vector<8x1xf32>
    %257 = vector.broadcast %256 : vector<8x1xf32> to vector<8x5xf32>
    %258 = arith.mulf %253, %257 : vector<8x5xf32>
    %259 = arith.truncf %258 : vector<8x5xf32> to vector<8x5xbf16>
    %cst_91 = arith.constant dense<0.000000e+00> : vector<8x128xf32>
    %260 = tpu.matmul %259, %245, %cst_91 {dimension_numbers = #tpu.dot_dimension_numbers<[1], [0], [0], [1], [0, 0, 1, 1], [], []>} : vector<8x5xbf16>, vector<5x128xbf16>, vector<8x128xf32> -> vector<8x128xf32>
    %261 = arith.addf %234, %260 : vector<8x128xf32>
    %c64_i32_92 = arith.constant 64 : i32
    %262 = vector.broadcast %c64_i32_92 : i32 to vector<5x128xi32>
    %263 = arith.cmpi sge, %205, %262 : vector<5x128xi32>
    %c96_i32_93 = arith.constant 96 : i32
    %264 = vector.broadcast %c96_i32_93 : i32 to vector<5x128xi32>
    %265 = arith.cmpi slt, %205, %264 : vector<5x128xi32>
    %266 = arith.andi %263, %265 : vector<5x128xi1>
    %267 = arith.extui %266 : vector<5x128xi1> to vector<5x128xi32>
    %268 = arith.sitofp %267 : vector<5x128xi32> to vector<5x128xf32>
    %269 = arith.mulf %203, %268 : vector<5x128xf32>
    %270 = arith.truncf %269 : vector<5x128xf32> to vector<5x128xbf16>
    %271 = arith.mulf %204, %268 : vector<5x128xf32>
    %272 = arith.truncf %271 : vector<5x128xf32> to vector<5x128xbf16>
    %cst_94 = arith.constant dense<0.000000e+00> : vector<8x5xf32>
    %273 = tpu.matmul %206, %270, %cst_94 {dimension_numbers = #tpu.dot_dimension_numbers<[1], [1], [0], [0], [0, 0, 1, 0], [], []>} : vector<8x128xbf16>, vector<5x128xbf16>, vector<8x5xf32> -> vector<8x5xf32>
    %cst_95 = arith.constant 0.176776692 : f32
    %274 = vector.broadcast %cst_95 : f32 to vector<8x5xf32>
    %275 = arith.mulf %273, %274 : vector<8x5xf32>
    %cst_96 = arith.constant dense<0xFF800000> : vector<8xf32>
    %276 = vector.multi_reduction <maximumf>, %275, %cst_96 [1] : vector<8x5xf32> to vector<8xf32>
    %277 = vector.shape_cast %276 : vector<8xf32> to vector<8x1xf32>
    %278 = vector.broadcast %277 : vector<8x1xf32> to vector<8x5xf32>
    %279 = arith.subf %275, %278 : vector<8x5xf32>
    %280 = math.exp %279 : vector<8x5xf32>
    %cst_97 = arith.constant dense<0.000000e+00> : vector<8xf32>
    %281 = vector.multi_reduction <add>, %280, %cst_97 [1] : vector<8x5xf32> to vector<8xf32>
    %282 = vector.shape_cast %281 : vector<8xf32> to vector<8x1xf32>
    %283 = tpu.reciprocal %282 {approx = true} : vector<8x1xf32> -> vector<8x1xf32>
    %284 = vector.broadcast %283 : vector<8x1xf32> to vector<8x5xf32>
    %285 = arith.mulf %280, %284 : vector<8x5xf32>
    %286 = arith.truncf %285 : vector<8x5xf32> to vector<8x5xbf16>
    %cst_98 = arith.constant dense<0.000000e+00> : vector<8x128xf32>
    %287 = tpu.matmul %286, %272, %cst_98 {dimension_numbers = #tpu.dot_dimension_numbers<[1], [0], [0], [1], [0, 0, 1, 1], [], []>} : vector<8x5xbf16>, vector<5x128xbf16>, vector<8x128xf32> -> vector<8x128xf32>
    %288 = arith.addf %261, %287 : vector<8x128xf32>
    %c96_i32_99 = arith.constant 96 : i32
    %289 = vector.broadcast %c96_i32_99 : i32 to vector<5x128xi32>
    %290 = arith.cmpi sge, %205, %289 : vector<5x128xi32>
    %c128_i32_100 = arith.constant 128 : i32
    %291 = vector.broadcast %c128_i32_100 : i32 to vector<5x128xi32>
    %292 = arith.cmpi slt, %205, %291 : vector<5x128xi32>
    %293 = arith.andi %290, %292 : vector<5x128xi1>
    %294 = arith.extui %293 : vector<5x128xi1> to vector<5x128xi32>
    %295 = arith.sitofp %294 : vector<5x128xi32> to vector<5x128xf32>
    %296 = arith.mulf %203, %295 : vector<5x128xf32>
    %297 = arith.truncf %296 : vector<5x128xf32> to vector<5x128xbf16>
    %298 = arith.mulf %204, %295 : vector<5x128xf32>
    %299 = arith.truncf %298 : vector<5x128xf32> to vector<5x128xbf16>
    %cst_101 = arith.constant dense<0.000000e+00> : vector<8x5xf32>
    %300 = tpu.matmul %206, %297, %cst_101 {dimension_numbers = #tpu.dot_dimension_numbers<[1], [1], [0], [0], [0, 0, 1, 0], [], []>} : vector<8x128xbf16>, vector<5x128xbf16>, vector<8x5xf32> -> vector<8x5xf32>
    %cst_102 = arith.constant 0.176776692 : f32
    %301 = vector.broadcast %cst_102 : f32 to vector<8x5xf32>
    %302 = arith.mulf %300, %301 : vector<8x5xf32>
    %cst_103 = arith.constant dense<0xFF800000> : vector<8xf32>
    %303 = vector.multi_reduction <maximumf>, %302, %cst_103 [1] : vector<8x5xf32> to vector<8xf32>
    %304 = vector.shape_cast %303 : vector<8xf32> to vector<8x1xf32>
    %305 = vector.broadcast %304 : vector<8x1xf32> to vector<8x5xf32>
    %306 = arith.subf %302, %305 : vector<8x5xf32>
    %307 = math.exp %306 : vector<8x5xf32>
    %cst_104 = arith.constant dense<0.000000e+00> : vector<8xf32>
    %308 = vector.multi_reduction <add>, %307, %cst_104 [1] : vector<8x5xf32> to vector<8xf32>
    %309 = vector.shape_cast %308 : vector<8xf32> to vector<8x1xf32>
    %310 = tpu.reciprocal %309 {approx = true} : vector<8x1xf32> -> vector<8x1xf32>
    %311 = vector.broadcast %310 : vector<8x1xf32> to vector<8x5xf32>
    %312 = arith.mulf %307, %311 : vector<8x5xf32>
    %313 = arith.truncf %312 : vector<8x5xf32> to vector<8x5xbf16>
    %cst_105 = arith.constant dense<0.000000e+00> : vector<8x128xf32>
    %314 = tpu.matmul %313, %299, %cst_105 {dimension_numbers = #tpu.dot_dimension_numbers<[1], [0], [0], [1], [0, 0, 1, 1], [], []>} : vector<8x5xbf16>, vector<5x128xbf16>, vector<8x128xf32> -> vector<8x128xf32>
    %315 = arith.addf %288, %314 : vector<8x128xf32>
    %c0_106 = arith.constant 0 : index
    %c0_107 = arith.constant 0 : index
    %316 = vector.load %arg17[%c0_106, %c0_107] : memref<128x128xbf16, #tpu.memory_space<vmem>>, vector<128x128xbf16>
    %317 = arith.truncf %315 : vector<8x128xf32> to vector<8x128xbf16>
    %cst_108 = arith.constant dense<0.000000e+00> : vector<8x128xf32>
    %318 = tpu.matmul %317, %316, %cst_108 {dimension_numbers = #tpu.dot_dimension_numbers<[1], [0], [0], [1], [0, 0, 1, 1], [], []>} : vector<8x128xbf16>, vector<128x128xbf16>, vector<8x128xf32> -> vector<8x128xf32>
    %c0_109 = arith.constant 0 : index
    %c0_110 = arith.constant 0 : index
    %319 = vector.load %arg18[%c0_109, %c0_110] : memref<1x128xf32, #tpu.memory_space<vmem>>, vector<1x128xf32>
    %320 = vector.broadcast %319 : vector<1x128xf32> to vector<8x128xf32>
    %321 = arith.addf %318, %320 : vector<8x128xf32>
    %322 = vector.extract_strided_slice %202 {offsets = [0, 0], sizes = [5, 128], strides = [1, 1]} : vector<5x256xf32> to vector<5x128xf32>
    %323 = vector.extract_strided_slice %202 {offsets = [0, 128], sizes = [5, 128], strides = [1, 1]} : vector<5x256xf32> to vector<5x128xf32>
    %324 = tpu.iota {dimensions = array<i32: 1>} : vector<5x128xi32>
    %325 = arith.truncf %186 : vector<8x128xf32> to vector<8x128xbf16>
    %cst_111 = arith.constant 0.000000e+00 : f32
    %326 = vector.broadcast %cst_111 : f32 to vector<8x128xf32>
    %c0_i32_112 = arith.constant 0 : i32
    %327 = vector.broadcast %c0_i32_112 : i32 to vector<5x128xi32>
    %328 = arith.cmpi sge, %324, %327 : vector<5x128xi32>
    %c32_i32_113 = arith.constant 32 : i32
    %329 = vector.broadcast %c32_i32_113 : i32 to vector<5x128xi32>
    %330 = arith.cmpi slt, %324, %329 : vector<5x128xi32>
    %331 = arith.andi %328, %330 : vector<5x128xi1>
    %332 = arith.extui %331 : vector<5x128xi1> to vector<5x128xi32>
    %333 = arith.sitofp %332 : vector<5x128xi32> to vector<5x128xf32>
    %334 = arith.mulf %322, %333 : vector<5x128xf32>
    %335 = arith.truncf %334 : vector<5x128xf32> to vector<5x128xbf16>
    %336 = arith.mulf %323, %333 : vector<5x128xf32>
    %337 = arith.truncf %336 : vector<5x128xf32> to vector<5x128xbf16>
    %cst_114 = arith.constant dense<0.000000e+00> : vector<8x5xf32>
    %338 = tpu.matmul %325, %335, %cst_114 {dimension_numbers = #tpu.dot_dimension_numbers<[1], [1], [0], [0], [0, 0, 1, 0], [], []>} : vector<8x128xbf16>, vector<5x128xbf16>, vector<8x5xf32> -> vector<8x5xf32>
    %cst_115 = arith.constant 0.176776692 : f32
    %339 = vector.broadcast %cst_115 : f32 to vector<8x5xf32>
    %340 = arith.mulf %338, %339 : vector<8x5xf32>
    %cst_116 = arith.constant dense<0xFF800000> : vector<8xf32>
    %341 = vector.multi_reduction <maximumf>, %340, %cst_116 [1] : vector<8x5xf32> to vector<8xf32>
    %342 = vector.shape_cast %341 : vector<8xf32> to vector<8x1xf32>
    %343 = vector.broadcast %342 : vector<8x1xf32> to vector<8x5xf32>
    %344 = arith.subf %340, %343 : vector<8x5xf32>
    %345 = math.exp %344 : vector<8x5xf32>
    %cst_117 = arith.constant dense<0.000000e+00> : vector<8xf32>
    %346 = vector.multi_reduction <add>, %345, %cst_117 [1] : vector<8x5xf32> to vector<8xf32>
    %347 = vector.shape_cast %346 : vector<8xf32> to vector<8x1xf32>
    %348 = tpu.reciprocal %347 {approx = true} : vector<8x1xf32> -> vector<8x1xf32>
    %349 = vector.broadcast %348 : vector<8x1xf32> to vector<8x5xf32>
    %350 = arith.mulf %345, %349 : vector<8x5xf32>
    %351 = arith.truncf %350 : vector<8x5xf32> to vector<8x5xbf16>
    %cst_118 = arith.constant dense<0.000000e+00> : vector<8x128xf32>
    %352 = tpu.matmul %351, %337, %cst_118 {dimension_numbers = #tpu.dot_dimension_numbers<[1], [0], [0], [1], [0, 0, 1, 1], [], []>} : vector<8x5xbf16>, vector<5x128xbf16>, vector<8x128xf32> -> vector<8x128xf32>
    %353 = arith.addf %326, %352 : vector<8x128xf32>
    %c32_i32_119 = arith.constant 32 : i32
    %354 = vector.broadcast %c32_i32_119 : i32 to vector<5x128xi32>
    %355 = arith.cmpi sge, %324, %354 : vector<5x128xi32>
    %c64_i32_120 = arith.constant 64 : i32
    %356 = vector.broadcast %c64_i32_120 : i32 to vector<5x128xi32>
    %357 = arith.cmpi slt, %324, %356 : vector<5x128xi32>
    %358 = arith.andi %355, %357 : vector<5x128xi1>
    %359 = arith.extui %358 : vector<5x128xi1> to vector<5x128xi32>
    %360 = arith.sitofp %359 : vector<5x128xi32> to vector<5x128xf32>
    %361 = arith.mulf %322, %360 : vector<5x128xf32>
    %362 = arith.truncf %361 : vector<5x128xf32> to vector<5x128xbf16>
    %363 = arith.mulf %323, %360 : vector<5x128xf32>
    %364 = arith.truncf %363 : vector<5x128xf32> to vector<5x128xbf16>
    %cst_121 = arith.constant dense<0.000000e+00> : vector<8x5xf32>
    %365 = tpu.matmul %325, %362, %cst_121 {dimension_numbers = #tpu.dot_dimension_numbers<[1], [1], [0], [0], [0, 0, 1, 0], [], []>} : vector<8x128xbf16>, vector<5x128xbf16>, vector<8x5xf32> -> vector<8x5xf32>
    %cst_122 = arith.constant 0.176776692 : f32
    %366 = vector.broadcast %cst_122 : f32 to vector<8x5xf32>
    %367 = arith.mulf %365, %366 : vector<8x5xf32>
    %cst_123 = arith.constant dense<0xFF800000> : vector<8xf32>
    %368 = vector.multi_reduction <maximumf>, %367, %cst_123 [1] : vector<8x5xf32> to vector<8xf32>
    %369 = vector.shape_cast %368 : vector<8xf32> to vector<8x1xf32>
    %370 = vector.broadcast %369 : vector<8x1xf32> to vector<8x5xf32>
    %371 = arith.subf %367, %370 : vector<8x5xf32>
    %372 = math.exp %371 : vector<8x5xf32>
    %cst_124 = arith.constant dense<0.000000e+00> : vector<8xf32>
    %373 = vector.multi_reduction <add>, %372, %cst_124 [1] : vector<8x5xf32> to vector<8xf32>
    %374 = vector.shape_cast %373 : vector<8xf32> to vector<8x1xf32>
    %375 = tpu.reciprocal %374 {approx = true} : vector<8x1xf32> -> vector<8x1xf32>
    %376 = vector.broadcast %375 : vector<8x1xf32> to vector<8x5xf32>
    %377 = arith.mulf %372, %376 : vector<8x5xf32>
    %378 = arith.truncf %377 : vector<8x5xf32> to vector<8x5xbf16>
    %cst_125 = arith.constant dense<0.000000e+00> : vector<8x128xf32>
    %379 = tpu.matmul %378, %364, %cst_125 {dimension_numbers = #tpu.dot_dimension_numbers<[1], [0], [0], [1], [0, 0, 1, 1], [], []>} : vector<8x5xbf16>, vector<5x128xbf16>, vector<8x128xf32> -> vector<8x128xf32>
    %380 = arith.addf %353, %379 : vector<8x128xf32>
    %c64_i32_126 = arith.constant 64 : i32
    %381 = vector.broadcast %c64_i32_126 : i32 to vector<5x128xi32>
    %382 = arith.cmpi sge, %324, %381 : vector<5x128xi32>
    %c96_i32_127 = arith.constant 96 : i32
    %383 = vector.broadcast %c96_i32_127 : i32 to vector<5x128xi32>
    %384 = arith.cmpi slt, %324, %383 : vector<5x128xi32>
    %385 = arith.andi %382, %384 : vector<5x128xi1>
    %386 = arith.extui %385 : vector<5x128xi1> to vector<5x128xi32>
    %387 = arith.sitofp %386 : vector<5x128xi32> to vector<5x128xf32>
    %388 = arith.mulf %322, %387 : vector<5x128xf32>
    %389 = arith.truncf %388 : vector<5x128xf32> to vector<5x128xbf16>
    %390 = arith.mulf %323, %387 : vector<5x128xf32>
    %391 = arith.truncf %390 : vector<5x128xf32> to vector<5x128xbf16>
    %cst_128 = arith.constant dense<0.000000e+00> : vector<8x5xf32>
    %392 = tpu.matmul %325, %389, %cst_128 {dimension_numbers = #tpu.dot_dimension_numbers<[1], [1], [0], [0], [0, 0, 1, 0], [], []>} : vector<8x128xbf16>, vector<5x128xbf16>, vector<8x5xf32> -> vector<8x5xf32>
    %cst_129 = arith.constant 0.176776692 : f32
    %393 = vector.broadcast %cst_129 : f32 to vector<8x5xf32>
    %394 = arith.mulf %392, %393 : vector<8x5xf32>
    %cst_130 = arith.constant dense<0xFF800000> : vector<8xf32>
    %395 = vector.multi_reduction <maximumf>, %394, %cst_130 [1] : vector<8x5xf32> to vector<8xf32>
    %396 = vector.shape_cast %395 : vector<8xf32> to vector<8x1xf32>
    %397 = vector.broadcast %396 : vector<8x1xf32> to vector<8x5xf32>
    %398 = arith.subf %394, %397 : vector<8x5xf32>
    %399 = math.exp %398 : vector<8x5xf32>
    %cst_131 = arith.constant dense<0.000000e+00> : vector<8xf32>
    %400 = vector.multi_reduction <add>, %399, %cst_131 [1] : vector<8x5xf32> to vector<8xf32>
    %401 = vector.shape_cast %400 : vector<8xf32> to vector<8x1xf32>
    %402 = tpu.reciprocal %401 {approx = true} : vector<8x1xf32> -> vector<8x1xf32>
    %403 = vector.broadcast %402 : vector<8x1xf32> to vector<8x5xf32>
    %404 = arith.mulf %399, %403 : vector<8x5xf32>
    %405 = arith.truncf %404 : vector<8x5xf32> to vector<8x5xbf16>
    %cst_132 = arith.constant dense<0.000000e+00> : vector<8x128xf32>
    %406 = tpu.matmul %405, %391, %cst_132 {dimension_numbers = #tpu.dot_dimension_numbers<[1], [0], [0], [1], [0, 0, 1, 1], [], []>} : vector<8x5xbf16>, vector<5x128xbf16>, vector<8x128xf32> -> vector<8x128xf32>
    %407 = arith.addf %380, %406 : vector<8x128xf32>
    %c96_i32_133 = arith.constant 96 : i32
    %408 = vector.broadcast %c96_i32_133 : i32 to vector<5x128xi32>
    %409 = arith.cmpi sge, %324, %408 : vector<5x128xi32>
    %c128_i32_134 = arith.constant 128 : i32
    %410 = vector.broadcast %c128_i32_134 : i32 to vector<5x128xi32>
    %411 = arith.cmpi slt, %324, %410 : vector<5x128xi32>
    %412 = arith.andi %409, %411 : vector<5x128xi1>
    %413 = arith.extui %412 : vector<5x128xi1> to vector<5x128xi32>
    %414 = arith.sitofp %413 : vector<5x128xi32> to vector<5x128xf32>
    %415 = arith.mulf %322, %414 : vector<5x128xf32>
    %416 = arith.truncf %415 : vector<5x128xf32> to vector<5x128xbf16>
    %417 = arith.mulf %323, %414 : vector<5x128xf32>
    %418 = arith.truncf %417 : vector<5x128xf32> to vector<5x128xbf16>
    %cst_135 = arith.constant dense<0.000000e+00> : vector<8x5xf32>
    %419 = tpu.matmul %325, %416, %cst_135 {dimension_numbers = #tpu.dot_dimension_numbers<[1], [1], [0], [0], [0, 0, 1, 0], [], []>} : vector<8x128xbf16>, vector<5x128xbf16>, vector<8x5xf32> -> vector<8x5xf32>
    %cst_136 = arith.constant 0.176776692 : f32
    %420 = vector.broadcast %cst_136 : f32 to vector<8x5xf32>
    %421 = arith.mulf %419, %420 : vector<8x5xf32>
    %cst_137 = arith.constant dense<0xFF800000> : vector<8xf32>
    %422 = vector.multi_reduction <maximumf>, %421, %cst_137 [1] : vector<8x5xf32> to vector<8xf32>
    %423 = vector.shape_cast %422 : vector<8xf32> to vector<8x1xf32>
    %424 = vector.broadcast %423 : vector<8x1xf32> to vector<8x5xf32>
    %425 = arith.subf %421, %424 : vector<8x5xf32>
    %426 = math.exp %425 : vector<8x5xf32>
    %cst_138 = arith.constant dense<0.000000e+00> : vector<8xf32>
    %427 = vector.multi_reduction <add>, %426, %cst_138 [1] : vector<8x5xf32> to vector<8xf32>
    %428 = vector.shape_cast %427 : vector<8xf32> to vector<8x1xf32>
    %429 = tpu.reciprocal %428 {approx = true} : vector<8x1xf32> -> vector<8x1xf32>
    %430 = vector.broadcast %429 : vector<8x1xf32> to vector<8x5xf32>
    %431 = arith.mulf %426, %430 : vector<8x5xf32>
    %432 = arith.truncf %431 : vector<8x5xf32> to vector<8x5xbf16>
    %cst_139 = arith.constant dense<0.000000e+00> : vector<8x128xf32>
    %433 = tpu.matmul %432, %418, %cst_139 {dimension_numbers = #tpu.dot_dimension_numbers<[1], [0], [0], [1], [0, 0, 1, 1], [], []>} : vector<8x5xbf16>, vector<5x128xbf16>, vector<8x128xf32> -> vector<8x128xf32>
    %434 = arith.addf %407, %433 : vector<8x128xf32>
    %c0_140 = arith.constant 0 : index
    %c0_141 = arith.constant 0 : index
    %435 = vector.load %arg17[%c0_140, %c0_141] : memref<128x128xbf16, #tpu.memory_space<vmem>>, vector<128x128xbf16>
    %436 = arith.truncf %434 : vector<8x128xf32> to vector<8x128xbf16>
    %cst_142 = arith.constant dense<0.000000e+00> : vector<8x128xf32>
    %437 = tpu.matmul %436, %435, %cst_142 {dimension_numbers = #tpu.dot_dimension_numbers<[1], [0], [0], [1], [0, 0, 1, 1], [], []>} : vector<8x128xbf16>, vector<128x128xbf16>, vector<8x128xf32> -> vector<8x128xf32>
    %c0_143 = arith.constant 0 : index
    %c0_144 = arith.constant 0 : index
    %438 = vector.load %arg18[%c0_143, %c0_144] : memref<1x128xf32, #tpu.memory_space<vmem>>, vector<1x128xf32>
    %439 = vector.broadcast %438 : vector<1x128xf32> to vector<8x128xf32>
    %440 = arith.addf %437, %439 : vector<8x128xf32>
    %441 = arith.addf %321, %440 : vector<8x128xf32>
    %cst_145 = arith.constant 5.000000e-01 : f32
    %442 = vector.broadcast %cst_145 : f32 to vector<8x128xf32>
    %443 = arith.mulf %441, %442 : vector<8x128xf32>
    %444 = arith.addf %443, %180 : vector<8x128xf32>
    %c0_146 = arith.constant 0 : index
    %c0_147 = arith.constant 0 : index
    %445 = vector.load %arg19[%c0_146, %c0_147] : memref<1x128xf32, #tpu.memory_space<vmem>>, vector<1x128xf32>
    %c0_148 = arith.constant 0 : index
    %c0_149 = arith.constant 0 : index
    %446 = vector.load %arg20[%c0_148, %c0_149] : memref<1x128xf32, #tpu.memory_space<vmem>>, vector<1x128xf32>
    %cst_150 = arith.constant dense<0.000000e+00> : vector<8xf32>
    %447 = vector.multi_reduction <add>, %444, %cst_150 [1] : vector<8x128xf32> to vector<8xf32>
    %448 = vector.shape_cast %447 : vector<8xf32> to vector<8x1xf32>
    %cst_151 = arith.constant 1.280000e+02 : f32
    %449 = vector.broadcast %cst_151 : f32 to vector<8x1xf32>
    %450 = arith.divf %448, %449 : vector<8x1xf32>
    %451 = vector.broadcast %450 : vector<8x1xf32> to vector<8x128xf32>
    %452 = arith.subf %444, %451 : vector<8x128xf32>
    %453 = arith.mulf %452, %452 : vector<8x128xf32>
    %cst_152 = arith.constant dense<0.000000e+00> : vector<8xf32>
    %454 = vector.multi_reduction <add>, %453, %cst_152 [1] : vector<8x128xf32> to vector<8xf32>
    %455 = vector.shape_cast %454 : vector<8xf32> to vector<8x1xf32>
    %cst_153 = arith.constant 1.280000e+02 : f32
    %456 = vector.broadcast %cst_153 : f32 to vector<8x1xf32>
    %457 = arith.divf %455, %456 : vector<8x1xf32>
    %cst_154 = arith.constant 9.99999996E-13 : f32
    %458 = vector.broadcast %cst_154 : f32 to vector<8x1xf32>
    %459 = arith.addf %457, %458 : vector<8x1xf32>
    %460 = math.rsqrt %459 : vector<8x1xf32>
    %461 = vector.broadcast %460 : vector<8x1xf32> to vector<8x128xf32>
    %462 = arith.mulf %452, %461 : vector<8x128xf32>
    %463 = vector.broadcast %445 : vector<1x128xf32> to vector<8x128xf32>
    %464 = arith.mulf %462, %463 : vector<8x128xf32>
    %465 = vector.broadcast %446 : vector<1x128xf32> to vector<8x128xf32>
    %466 = arith.addf %464, %465 : vector<8x128xf32>
    %c0_155 = arith.constant 0 : index
    %c0_156 = arith.constant 0 : index
    %467 = vector.load %arg21[%c0_155, %c0_156] : memref<128x512xbf16, #tpu.memory_space<vmem>>, vector<128x512xbf16>
    %468 = arith.truncf %466 : vector<8x128xf32> to vector<8x128xbf16>
    %cst_157 = arith.constant dense<0.000000e+00> : vector<8x512xf32>
    %469 = tpu.matmul %468, %467, %cst_157 {dimension_numbers = #tpu.dot_dimension_numbers<[1], [0], [0], [1], [0, 0, 1, 1], [], []>} : vector<8x128xbf16>, vector<128x512xbf16>, vector<8x512xf32> -> vector<8x512xf32>
    %c0_158 = arith.constant 0 : index
    %c0_159 = arith.constant 0 : index
    %470 = vector.load %arg22[%c0_158, %c0_159] : memref<1x512xf32, #tpu.memory_space<vmem>>, vector<1x512xf32>
    %471 = vector.broadcast %470 : vector<1x512xf32> to vector<8x512xf32>
    %472 = arith.addf %469, %471 : vector<8x512xf32>
    %473 = arith.mulf %472, %472 : vector<8x512xf32>
    %474 = arith.mulf %472, %473 : vector<8x512xf32>
    %cst_160 = arith.constant 4.471500e-02 : f32
    %475 = vector.broadcast %cst_160 : f32 to vector<8x512xf32>
    %476 = arith.mulf %475, %474 : vector<8x512xf32>
    %477 = arith.addf %472, %476 : vector<8x512xf32>
    %cst_161 = arith.constant 0.797884583 : f32
    %478 = vector.broadcast %cst_161 : f32 to vector<8x512xf32>
    %479 = arith.mulf %478, %477 : vector<8x512xf32>
    %480 = math.tanh %479 : vector<8x512xf32>
    %cst_162 = arith.constant 1.000000e+00 : f32
    %481 = vector.broadcast %cst_162 : f32 to vector<8x512xf32>
    %482 = arith.addf %481, %480 : vector<8x512xf32>
    %cst_163 = arith.constant 5.000000e-01 : f32
    %483 = vector.broadcast %cst_163 : f32 to vector<8x512xf32>
    %484 = arith.mulf %483, %482 : vector<8x512xf32>
    %485 = arith.mulf %472, %484 : vector<8x512xf32>
    %c0_164 = arith.constant 0 : index
    %c0_165 = arith.constant 0 : index
    %486 = vector.load %arg23[%c0_164, %c0_165] : memref<512x128xbf16, #tpu.memory_space<vmem>>, vector<512x128xbf16>
    %487 = arith.truncf %485 : vector<8x512xf32> to vector<8x512xbf16>
    %cst_166 = arith.constant dense<0.000000e+00> : vector<8x128xf32>
    %488 = tpu.matmul %487, %486, %cst_166 {dimension_numbers = #tpu.dot_dimension_numbers<[1], [0], [0], [1], [0, 0, 1, 1], [], []>} : vector<8x512xbf16>, vector<512x128xbf16>, vector<8x128xf32> -> vector<8x128xf32>
    %489 = arith.addf %466, %488 : vector<8x128xf32>
    %c0_167 = arith.constant 0 : index
    %c0_168 = arith.constant 0 : index
    %490 = vector.load %arg24[%c0_167, %c0_168] : memref<1x128xf32, #tpu.memory_space<vmem>>, vector<1x128xf32>
    %491 = vector.broadcast %490 : vector<1x128xf32> to vector<8x128xf32>
    %492 = arith.addf %489, %491 : vector<8x128xf32>
    %c0_169 = arith.constant 0 : index
    %c0_170 = arith.constant 0 : index
    %493 = vector.load %arg25[%c0_169, %c0_170] : memref<1x128xf32, #tpu.memory_space<vmem>>, vector<1x128xf32>
    %c0_171 = arith.constant 0 : index
    %c0_172 = arith.constant 0 : index
    %494 = vector.load %arg26[%c0_171, %c0_172] : memref<1x128xf32, #tpu.memory_space<vmem>>, vector<1x128xf32>
    %cst_173 = arith.constant dense<0.000000e+00> : vector<8xf32>
    %495 = vector.multi_reduction <add>, %492, %cst_173 [1] : vector<8x128xf32> to vector<8xf32>
    %496 = vector.shape_cast %495 : vector<8xf32> to vector<8x1xf32>
    %cst_174 = arith.constant 1.280000e+02 : f32
    %497 = vector.broadcast %cst_174 : f32 to vector<8x1xf32>
    %498 = arith.divf %496, %497 : vector<8x1xf32>
    %499 = vector.broadcast %498 : vector<8x1xf32> to vector<8x128xf32>
    %500 = arith.subf %492, %499 : vector<8x128xf32>
    %501 = arith.mulf %500, %500 : vector<8x128xf32>
    %cst_175 = arith.constant dense<0.000000e+00> : vector<8xf32>
    %502 = vector.multi_reduction <add>, %501, %cst_175 [1] : vector<8x128xf32> to vector<8xf32>
    %503 = vector.shape_cast %502 : vector<8xf32> to vector<8x1xf32>
    %cst_176 = arith.constant 1.280000e+02 : f32
    %504 = vector.broadcast %cst_176 : f32 to vector<8x1xf32>
    %505 = arith.divf %503, %504 : vector<8x1xf32>
    %cst_177 = arith.constant 9.99999996E-13 : f32
    %506 = vector.broadcast %cst_177 : f32 to vector<8x1xf32>
    %507 = arith.addf %505, %506 : vector<8x1xf32>
    %508 = math.rsqrt %507 : vector<8x1xf32>
    %509 = vector.broadcast %508 : vector<8x1xf32> to vector<8x128xf32>
    %510 = arith.mulf %500, %509 : vector<8x128xf32>
    %511 = vector.broadcast %493 : vector<1x128xf32> to vector<8x128xf32>
    %512 = arith.mulf %510, %511 : vector<8x128xf32>
    %513 = vector.broadcast %494 : vector<1x128xf32> to vector<8x128xf32>
    %514 = arith.addf %512, %513 : vector<8x128xf32>
    %c0_178 = arith.constant 0 : index
    %c0_179 = arith.constant 0 : index
    %c0_180 = arith.constant 0 : index
    %515 = vector.load %arg27[%c0_178, %c0_179, %c0_180] : memref<1x8x128xf32, #tpu.memory_space<vmem>>, vector<1x8x128xf32>
    %516 = vector.shape_cast %515 : vector<1x8x128xf32> to vector<8x128xf32>
    %517 = vector.shape_cast %514 : vector<8x128xf32> to vector<1x8x128xf32>
    tpu.vector_store %arg27[%c0_178, %c0_179, %c0_180], %517 {strides = array<i32>} : memref<1x8x128xf32, #tpu.memory_space<vmem>>, vector<1x8x128xf32>,
    return
  }
  func.func @transform_0(%arg0: i32) -> (i32, i32, i32) {
    %c0_i32 = arith.constant 0 : i32
    %c0_i32_0 = arith.constant 0 : i32
    %c0_i32_1 = arith.constant 0 : i32
    return %arg0, %c0_i32, %c0_i32_0 : i32, i32, i32
  }
  func.func @transform_1(%arg0: i32) -> (i32, i32, i32) {
    %c0_i32 = arith.constant 0 : i32
    %c0_i32_0 = arith.constant 0 : i32
    %c0_i32_1 = arith.constant 0 : i32
    return %arg0, %c0_i32, %c0_i32_0 : i32, i32, i32
  }
  func.func @transform_2(%arg0: i32) -> (i32, i32, i32) {
    %c0_i32 = arith.constant 0 : i32
    %c0_i32_0 = arith.constant 0 : i32
    %c0_i32_1 = arith.constant 0 : i32
    return %arg0, %c0_i32, %c0_i32_0 : i32, i32, i32
  }
  func.func @transform_3(%arg0: i32) -> (i32, i32, i32) {
    %c0_i32 = arith.constant 0 : i32
    %c0_i32_0 = arith.constant 0 : i32
    %c0_i32_1 = arith.constant 0 : i32
    return %arg0, %c0_i32, %c0_i32_0 : i32, i32, i32
  }
  func.func @transform_4(%arg0: i32) -> (i32, i32) {
    %c0_i32 = arith.constant 0 : i32
    %c0_i32_0 = arith.constant 0 : i32
    %c0_i32_1 = arith.constant 0 : i32
    return %c0_i32, %c0_i32_0 : i32, i32
  }
  func.func @transform_5(%arg0: i32) -> (i32, i32) {
    %c0_i32 = arith.constant 0 : i32
    %c0_i32_0 = arith.constant 0 : i32
    %c0_i32_1 = arith.constant 0 : i32
    return %c0_i32, %c0_i32_0 : i32, i32
  }
  func.func @transform_6(%arg0: i32) -> (i32, i32) {
    %c0_i32 = arith.constant 0 : i32
    %c0_i32_0 = arith.constant 0 : i32
    %c0_i32_1 = arith.constant 0 : i32
    return %c0_i32, %c0_i32_0 : i32, i32
  }
  func.func @transform_7(%arg0: i32) -> (i32, i32) {
    %c0_i32 = arith.constant 0 : i32
    %c0_i32_0 = arith.constant 0 : i32
    %c0_i32_1 = arith.constant 0 : i32
    return %c0_i32, %c0_i32_0 : i32, i32
  }
  func.func @transform_8(%arg0: i32) -> (i32, i32) {
    %c0_i32 = arith.constant 0 : i32
    %c0_i32_0 = arith.constant 0 : i32
    %c0_i32_1 = arith.constant 0 : i32
    return %c0_i32, %c0_i32_0 : i32, i32
  }
  func.func @transform_9(%arg0: i32) -> (i32, i32) {
    %c0_i32 = arith.constant 0 : i32
    %c0_i32_0 = arith.constant 0 : i32
    %c0_i32_1 = arith.constant 0 : i32
    return %c0_i32, %c0_i32_0 : i32, i32
  }
  func.func @transform_10(%arg0: i32) -> (i32, i32) {
    %c0_i32 = arith.constant 0 : i32
    %c0_i32_0 = arith.constant 0 : i32
    %c0_i32_1 = arith.constant 0 : i32
    return %c0_i32, %c0_i32_0 : i32, i32
  }
  func.func @transform_11(%arg0: i32) -> (i32, i32) {
    %c0_i32 = arith.constant 0 : i32
    %c0_i32_0 = arith.constant 0 : i32
    %c0_i32_1 = arith.constant 0 : i32
    return %c0_i32, %c0_i32_0 : i32, i32
  }
  func.func @transform_12(%arg0: i32) -> (i32, i32) {
    %c0_i32 = arith.constant 0 : i32
    %c0_i32_0 = arith.constant 0 : i32
    %c0_i32_1 = arith.constant 0 : i32
    return %c0_i32, %c0_i32_0 : i32, i32
  }
  func.func @transform_13(%arg0: i32) -> (i32, i32) {
    %c0_i32 = arith.constant 0 : i32
    %c0_i32_0 = arith.constant 0 : i32
    %c0_i32_1 = arith.constant 0 : i32
    return %c0_i32, %c0_i32_0 : i32, i32
  }
  func.func @transform_14(%arg0: i32) -> (i32, i32) {
    %c0_i32 = arith.constant 0 : i32
    %c0_i32_0 = arith.constant 0 : i32
    %c0_i32_1 = arith.constant 0 : i32
    return %c0_i32, %c0_i32_0 : i32, i32
  }
  func.func @transform_15(%arg0: i32) -> (i32, i32) {
    %c0_i32 = arith.constant 0 : i32
    %c0_i32_0 = arith.constant 0 : i32
    %c0_i32_1 = arith.constant 0 : i32
    return %c0_i32, %c0_i32_0 : i32, i32
  }
  func.func @transform_16(%arg0: i32) -> (i32, i32) {
    %c0_i32 = arith.constant 0 : i32
    %c0_i32_0 = arith.constant 0 : i32
    %c0_i32_1 = arith.constant 0 : i32
    return %c0_i32, %c0_i32_0 : i32, i32
  }
  func.func @transform_17(%arg0: i32) -> (i32, i32) {
    %c0_i32 = arith.constant 0 : i32
    %c0_i32_0 = arith.constant 0 : i32
    %c0_i32_1 = arith.constant 0 : i32
    return %c0_i32, %c0_i32_0 : i32, i32
  }
  func.func @transform_18(%arg0: i32) -> (i32, i32) {
    %c0_i32 = arith.constant 0 : i32
    %c0_i32_0 = arith.constant 0 : i32
    %c0_i32_1 = arith.constant 0 : i32
    return %c0_i32, %c0_i32_0 : i32, i32
  }
  func.func @transform_19(%arg0: i32) -> (i32, i32) {
    %c0_i32 = arith.constant 0 : i32
    %c0_i32_0 = arith.constant 0 : i32
    %c0_i32_1 = arith.constant 0 : i32
    return %c0_i32, %c0_i32_0 : i32, i32
  }
  func.func @transform_20(%arg0: i32) -> (i32, i32) {
    %c0_i32 = arith.constant 0 : i32
    %c0_i32_0 = arith.constant 0 : i32
    %c0_i32_1 = arith.constant 0 : i32
    return %c0_i32, %c0_i32_0 : i32, i32
  }
  func.func @transform_21(%arg0: i32) -> (i32, i32) {
    %c0_i32 = arith.constant 0 : i32
    %c0_i32_0 = arith.constant 0 : i32
    %c0_i32_1 = arith.constant 0 : i32
    return %c0_i32, %c0_i32_0 : i32, i32
  }
  func.func @transform_22(%arg0: i32) -> (i32, i32) {
    %c0_i32 = arith.constant 0 : i32
    %c0_i32_0 = arith.constant 0 : i32
    %c0_i32_1 = arith.constant 0 : i32
    return %c0_i32, %c0_i32_0 : i32, i32
  }
  func.func @transform_23(%arg0: i32) -> (i32, i32) {
    %c0_i32 = arith.constant 0 : i32
    %c0_i32_0 = arith.constant 0 : i32
    %c0_i32_1 = arith.constant 0 : i32
    return %c0_i32, %c0_i32_0 : i32, i32
  }
  func.func @transform_24(%arg0: i32) -> (i32, i32) {
    %c0_i32 = arith.constant 0 : i32
    %c0_i32_0 = arith.constant 0 : i32
    %c0_i32_1 = arith.constant 0 : i32
    return %c0_i32, %c0_i32_0 : i32, i32
  }
  func.func @transform_25(%arg0: i32) -> (i32, i32) {
    %c0_i32 = arith.constant 0 : i32
    %c0_i32_0 = arith.constant 0 : i32
    %c0_i32_1 = arith.constant 0 : i32
    return %c0_i32, %c0_i32_0 : i32, i32
  }
  func.func @transform_26(%arg0: i32) -> (i32, i32, i32) {
    %c0_i32 = arith.constant 0 : i32
    %c0_i32_0 = arith.constant 0 : i32
    %c0_i32_1 = arith.constant 0 : i32
    return %arg0, %c0_i32, %c0_i32_0 : i32, i32, i32
  }
}

module attributes {stable_mosaic.version = 11 : i64} {
  func.func @_bert_layer_kernel(%arg0: i32, %arg1: memref<1x8x128xf32, #tpu.memory_space<vmem>>, %arg2: memref<1x1x8xf32, #tpu.memory_space<vmem>>, %arg3: memref<1x5x128xf32, #tpu.memory_space<vmem>>, %arg4: memref<1x5x128xf32, #tpu.memory_space<vmem>>, %arg5: memref<128x384xbf16, #tpu.memory_space<vmem>>, %arg6: memref<1x384xf32, #tpu.memory_space<vmem>>, %arg7: memref<128x128xbf16, #tpu.memory_space<vmem>>, %arg8: memref<1x128xf32, #tpu.memory_space<vmem>>, %arg9: memref<1x128xf32, #tpu.memory_space<vmem>>, %arg10: memref<1x128xf32, #tpu.memory_space<vmem>>, %arg11: memref<128x128xbf16, #tpu.memory_space<vmem>>, %arg12: memref<1x128xf32, #tpu.memory_space<vmem>>, %arg13: memref<128x256xbf16, #tpu.memory_space<vmem>>, %arg14: memref<1x256xf32, #tpu.memory_space<vmem>>, %arg15: memref<128x128xbf16, #tpu.memory_space<vmem>>, %arg16: memref<1x128xf32, #tpu.memory_space<vmem>>, %arg17: memref<256x128xbf16, #tpu.memory_space<vmem>>, %arg18: memref<1x128xf32, #tpu.memory_space<vmem>>, %arg19: memref<1x128xf32, #tpu.memory_space<vmem>>, %arg20: memref<1x128xf32, #tpu.memory_space<vmem>>, %arg21: memref<128x512xbf16, #tpu.memory_space<vmem>>, %arg22: memref<1x512xf32, #tpu.memory_space<vmem>>, %arg23: memref<512x128xbf16, #tpu.memory_space<vmem>>, %arg24: memref<1x128xf32, #tpu.memory_space<vmem>>, %arg25: memref<1x128xf32, #tpu.memory_space<vmem>>, %arg26: memref<1x128xf32, #tpu.memory_space<vmem>>, %arg27: memref<128x128xbf16, #tpu.memory_space<vmem>>, %arg28: memref<1x128xf32, #tpu.memory_space<vmem>>, %arg29: memref<128x128xbf16, #tpu.memory_space<vmem>>, %arg30: memref<1x128xf32, #tpu.memory_space<vmem>>, %arg31: memref<1x8x128xf32, #tpu.memory_space<vmem>>, %arg32: memref<1x1x128xf32, #tpu.memory_space<vmem>>) attributes {dimension_semantics = [#tpu.dimension_semantics<parallel>], iteration_bounds = array<i64: 2>, scalar_prefetch = 0 : i64, scratch_operands = 0 : i64, tpu.core_type = #tpu.core_type<tc>, window_params = [{transform_indices = @transform_0, window_bounds = array<i64: 1, 8, 128>}, {transform_indices = @transform_1, window_bounds = array<i64: 1, 1, 8>}, {transform_indices = @transform_2, window_bounds = array<i64: 1, 5, 128>}, {transform_indices = @transform_3, window_bounds = array<i64: 1, 5, 128>}, {pipeline_mode = #tpu.pipeline_mode<synchronous>, transform_indices = @transform_4, window_bounds = array<i64: 128, 384>}, {pipeline_mode = #tpu.pipeline_mode<synchronous>, transform_indices = @transform_5, window_bounds = array<i64: 1, 384>}, {pipeline_mode = #tpu.pipeline_mode<synchronous>, transform_indices = @transform_6, window_bounds = array<i64: 128, 128>}, {pipeline_mode = #tpu.pipeline_mode<synchronous>, transform_indices = @transform_7, window_bounds = array<i64: 1, 128>}, {pipeline_mode = #tpu.pipeline_mode<synchronous>, transform_indices = @transform_8, window_bounds = array<i64: 1, 128>}, {pipeline_mode = #tpu.pipeline_mode<synchronous>, transform_indices = @transform_9, window_bounds = array<i64: 1, 128>}, {pipeline_mode = #tpu.pipeline_mode<synchronous>, transform_indices = @transform_10, window_bounds = array<i64: 128, 128>}, {pipeline_mode = #tpu.pipeline_mode<synchronous>, transform_indices = @transform_11, window_bounds = array<i64: 1, 128>}, {pipeline_mode = #tpu.pipeline_mode<synchronous>, transform_indices = @transform_12, window_bounds = array<i64: 128, 256>}, {pipeline_mode = #tpu.pipeline_mode<synchronous>, transform_indices = @transform_13, window_bounds = array<i64: 1, 256>}, {pipeline_mode = #tpu.pipeline_mode<synchronous>, transform_indices = @transform_14, window_bounds = array<i64: 128, 128>}, {pipeline_mode = #tpu.pipeline_mode<synchronous>, transform_indices = @transform_15, window_bounds = array<i64: 1, 128>}, {pipeline_mode = #tpu.pipeline_mode<synchronous>, transform_indices = @transform_16, window_bounds = array<i64: 256, 128>}, {pipeline_mode = #tpu.pipeline_mode<synchronous>, transform_indices = @transform_17, window_bounds = array<i64: 1, 128>}, {pipeline_mode = #tpu.pipeline_mode<synchronous>, transform_indices = @transform_18, window_bounds = array<i64: 1, 128>}, {pipeline_mode = #tpu.pipeline_mode<synchronous>, transform_indices = @transform_19, window_bounds = array<i64: 1, 128>}, {pipeline_mode = #tpu.pipeline_mode<synchronous>, transform_indices = @transform_20, window_bounds = array<i64: 128, 512>}, {pipeline_mode = #tpu.pipeline_mode<synchronous>, transform_indices = @transform_21, window_bounds = array<i64: 1, 512>}, {pipeline_mode = #tpu.pipeline_mode<synchronous>, transform_indices = @transform_22, window_bounds = array<i64: 512, 128>}, {pipeline_mode = #tpu.pipeline_mode<synchronous>, transform_indices = @transform_23, window_bounds = array<i64: 1, 128>}, {pipeline_mode = #tpu.pipeline_mode<synchronous>, transform_indices = @transform_24, window_bounds = array<i64: 1, 128>}, {pipeline_mode = #tpu.pipeline_mode<synchronous>, transform_indices = @transform_25, window_bounds = array<i64: 1, 128>}, {pipeline_mode = #tpu.pipeline_mode<synchronous>, transform_indices = @transform_26, window_bounds = array<i64: 128, 128>}, {pipeline_mode = #tpu.pipeline_mode<synchronous>, transform_indices = @transform_27, window_bounds = array<i64: 1, 128>}, {pipeline_mode = #tpu.pipeline_mode<synchronous>, transform_indices = @transform_28, window_bounds = array<i64: 128, 128>}, {pipeline_mode = #tpu.pipeline_mode<synchronous>, transform_indices = @transform_29, window_bounds = array<i64: 1, 128>}, {transform_indices = @transform_30, window_bounds = array<i64: 1, 8, 128>}, {transform_indices = @transform_31, window_bounds = array<i64: 1, 1, 128>}]} {
    %c0 = arith.constant 0 : index
    %c0_0 = arith.constant 0 : index
    %c0_1 = arith.constant 0 : index
    %0 = vector.load %arg1[%c0, %c0_0, %c0_1] : memref<1x8x128xf32, #tpu.memory_space<vmem>>, vector<1x8x128xf32>
    %1 = vector.shape_cast %0 : vector<1x8x128xf32> to vector<8x128xf32>
    %c0_2 = arith.constant 0 : index
    %c0_3 = arith.constant 0 : index
    %2 = vector.load %arg5[%c0_2, %c0_3] : memref<128x384xbf16, #tpu.memory_space<vmem>>, vector<128x384xbf16>
    %3 = arith.truncf %1 : vector<8x128xf32> to vector<8x128xbf16>
    %cst = arith.constant dense<0.000000e+00> : vector<8x384xf32>
    %4 = tpu.matmul %3, %2, %cst {dimension_numbers = #tpu.dot_dimension_numbers<[1], [0], [0], [1], [0, 0, 1, 1], [], []>} : vector<8x128xbf16>, vector<128x384xbf16>, vector<8x384xf32> -> vector<8x384xf32>
    %c0_4 = arith.constant 0 : index
    %c0_5 = arith.constant 0 : index
    %5 = vector.load %arg6[%c0_4, %c0_5] : memref<1x384xf32, #tpu.memory_space<vmem>>, vector<1x384xf32>
    %6 = vector.broadcast %5 : vector<1x384xf32> to vector<8x384xf32>
    %7 = arith.addf %4, %6 : vector<8x384xf32>
    %c0_6 = arith.constant 0 : index
    %c0_7 = arith.constant 0 : index
    %c0_8 = arith.constant 0 : index
    %8 = vector.load %arg2[%c0_6, %c0_7, %c0_8] : memref<1x1x8xf32, #tpu.memory_space<vmem>>, vector<1x1x8xf32>
    %9 = vector.shape_cast %8 : vector<1x1x8xf32> to vector<1x8xf32>
    %10 = vector.shape_cast %9 : vector<1x8xf32> to vector<1x8xf32>
    %11 = vector.broadcast %10 : vector<1x8xf32> to vector<8x8xf32>
    %12 = vector.extract_strided_slice %7 {offsets = [0, 0], sizes = [8, 128], strides = [1, 1]} : vector<8x384xf32> to vector<8x128xf32>
    %13 = vector.extract_strided_slice %7 {offsets = [0, 128], sizes = [8, 128], strides = [1, 1]} : vector<8x384xf32> to vector<8x128xf32>
    %14 = vector.extract_strided_slice %7 {offsets = [0, 256], sizes = [8, 128], strides = [1, 1]} : vector<8x384xf32> to vector<8x128xf32>
    %15 = tpu.iota {dimensions = array<i32: 1>} : vector<8x128xi32>
    %16 = arith.truncf %12 : vector<8x128xf32> to vector<8x128xbf16>
    %cst_9 = arith.constant 0.000000e+00 : f32
    %17 = vector.broadcast %cst_9 : f32 to vector<8x128xf32>
    %c0_i32 = arith.constant 0 : i32
    %18 = vector.broadcast %c0_i32 : i32 to vector<8x128xi32>
    %19 = arith.cmpi sge, %15, %18 : vector<8x128xi32>
    %c32_i32 = arith.constant 32 : i32
    %20 = vector.broadcast %c32_i32 : i32 to vector<8x128xi32>
    %21 = arith.cmpi slt, %15, %20 : vector<8x128xi32>
    %22 = arith.andi %19, %21 : vector<8x128xi1>
    %23 = arith.extui %22 : vector<8x128xi1> to vector<8x128xi32>
    %24 = arith.sitofp %23 : vector<8x128xi32> to vector<8x128xf32>
    %25 = arith.mulf %13, %24 : vector<8x128xf32>
    %26 = arith.truncf %25 : vector<8x128xf32> to vector<8x128xbf16>
    %27 = arith.mulf %14, %24 : vector<8x128xf32>
    %28 = arith.truncf %27 : vector<8x128xf32> to vector<8x128xbf16>
    %cst_10 = arith.constant dense<0.000000e+00> : vector<8x8xf32>
    %29 = tpu.matmul %16, %26, %cst_10 {dimension_numbers = #tpu.dot_dimension_numbers<[1], [1], [0], [0], [0, 0, 1, 0], [], []>} : vector<8x128xbf16>, vector<8x128xbf16>, vector<8x8xf32> -> vector<8x8xf32>
    %cst_11 = arith.constant 0.176776692 : f32
    %30 = vector.broadcast %cst_11 : f32 to vector<8x8xf32>
    %31 = arith.mulf %29, %30 : vector<8x8xf32>
    %32 = arith.addf %31, %11 : vector<8x8xf32>
    %cst_12 = arith.constant dense<0xFF800000> : vector<8xf32>
    %33 = vector.multi_reduction <maximumf>, %32, %cst_12 [1] : vector<8x8xf32> to vector<8xf32>
    %34 = vector.shape_cast %33 : vector<8xf32> to vector<8x1xf32>
    %35 = vector.broadcast %34 : vector<8x1xf32> to vector<8x8xf32>
    %36 = arith.subf %32, %35 : vector<8x8xf32>
    %37 = math.exp %36 : vector<8x8xf32>
    %cst_13 = arith.constant dense<0.000000e+00> : vector<8xf32>
    %38 = vector.multi_reduction <add>, %37, %cst_13 [1] : vector<8x8xf32> to vector<8xf32>
    %39 = vector.shape_cast %38 : vector<8xf32> to vector<8x1xf32>
    %40 = tpu.reciprocal %39 {approx = true} : vector<8x1xf32> -> vector<8x1xf32>
    %41 = vector.broadcast %40 : vector<8x1xf32> to vector<8x8xf32>
    %42 = arith.mulf %37, %41 : vector<8x8xf32>
    %43 = arith.truncf %42 : vector<8x8xf32> to vector<8x8xbf16>
    %cst_14 = arith.constant dense<0.000000e+00> : vector<8x128xf32>
    %44 = tpu.matmul %43, %28, %cst_14 {dimension_numbers = #tpu.dot_dimension_numbers<[1], [0], [0], [1], [0, 0, 1, 1], [], []>} : vector<8x8xbf16>, vector<8x128xbf16>, vector<8x128xf32> -> vector<8x128xf32>
    %45 = arith.addf %17, %44 : vector<8x128xf32>
    %c32_i32_15 = arith.constant 32 : i32
    %46 = vector.broadcast %c32_i32_15 : i32 to vector<8x128xi32>
    %47 = arith.cmpi sge, %15, %46 : vector<8x128xi32>
    %c64_i32 = arith.constant 64 : i32
    %48 = vector.broadcast %c64_i32 : i32 to vector<8x128xi32>
    %49 = arith.cmpi slt, %15, %48 : vector<8x128xi32>
    %50 = arith.andi %47, %49 : vector<8x128xi1>
    %51 = arith.extui %50 : vector<8x128xi1> to vector<8x128xi32>
    %52 = arith.sitofp %51 : vector<8x128xi32> to vector<8x128xf32>
    %53 = arith.mulf %13, %52 : vector<8x128xf32>
    %54 = arith.truncf %53 : vector<8x128xf32> to vector<8x128xbf16>
    %55 = arith.mulf %14, %52 : vector<8x128xf32>
    %56 = arith.truncf %55 : vector<8x128xf32> to vector<8x128xbf16>
    %cst_16 = arith.constant dense<0.000000e+00> : vector<8x8xf32>
    %57 = tpu.matmul %16, %54, %cst_16 {dimension_numbers = #tpu.dot_dimension_numbers<[1], [1], [0], [0], [0, 0, 1, 0], [], []>} : vector<8x128xbf16>, vector<8x128xbf16>, vector<8x8xf32> -> vector<8x8xf32>
    %cst_17 = arith.constant 0.176776692 : f32
    %58 = vector.broadcast %cst_17 : f32 to vector<8x8xf32>
    %59 = arith.mulf %57, %58 : vector<8x8xf32>
    %60 = arith.addf %59, %11 : vector<8x8xf32>
    %cst_18 = arith.constant dense<0xFF800000> : vector<8xf32>
    %61 = vector.multi_reduction <maximumf>, %60, %cst_18 [1] : vector<8x8xf32> to vector<8xf32>
    %62 = vector.shape_cast %61 : vector<8xf32> to vector<8x1xf32>
    %63 = vector.broadcast %62 : vector<8x1xf32> to vector<8x8xf32>
    %64 = arith.subf %60, %63 : vector<8x8xf32>
    %65 = math.exp %64 : vector<8x8xf32>
    %cst_19 = arith.constant dense<0.000000e+00> : vector<8xf32>
    %66 = vector.multi_reduction <add>, %65, %cst_19 [1] : vector<8x8xf32> to vector<8xf32>
    %67 = vector.shape_cast %66 : vector<8xf32> to vector<8x1xf32>
    %68 = tpu.reciprocal %67 {approx = true} : vector<8x1xf32> -> vector<8x1xf32>
    %69 = vector.broadcast %68 : vector<8x1xf32> to vector<8x8xf32>
    %70 = arith.mulf %65, %69 : vector<8x8xf32>
    %71 = arith.truncf %70 : vector<8x8xf32> to vector<8x8xbf16>
    %cst_20 = arith.constant dense<0.000000e+00> : vector<8x128xf32>
    %72 = tpu.matmul %71, %56, %cst_20 {dimension_numbers = #tpu.dot_dimension_numbers<[1], [0], [0], [1], [0, 0, 1, 1], [], []>} : vector<8x8xbf16>, vector<8x128xbf16>, vector<8x128xf32> -> vector<8x128xf32>
    %73 = arith.addf %45, %72 : vector<8x128xf32>
    %c64_i32_21 = arith.constant 64 : i32
    %74 = vector.broadcast %c64_i32_21 : i32 to vector<8x128xi32>
    %75 = arith.cmpi sge, %15, %74 : vector<8x128xi32>
    %c96_i32 = arith.constant 96 : i32
    %76 = vector.broadcast %c96_i32 : i32 to vector<8x128xi32>
    %77 = arith.cmpi slt, %15, %76 : vector<8x128xi32>
    %78 = arith.andi %75, %77 : vector<8x128xi1>
    %79 = arith.extui %78 : vector<8x128xi1> to vector<8x128xi32>
    %80 = arith.sitofp %79 : vector<8x128xi32> to vector<8x128xf32>
    %81 = arith.mulf %13, %80 : vector<8x128xf32>
    %82 = arith.truncf %81 : vector<8x128xf32> to vector<8x128xbf16>
    %83 = arith.mulf %14, %80 : vector<8x128xf32>
    %84 = arith.truncf %83 : vector<8x128xf32> to vector<8x128xbf16>
    %cst_22 = arith.constant dense<0.000000e+00> : vector<8x8xf32>
    %85 = tpu.matmul %16, %82, %cst_22 {dimension_numbers = #tpu.dot_dimension_numbers<[1], [1], [0], [0], [0, 0, 1, 0], [], []>} : vector<8x128xbf16>, vector<8x128xbf16>, vector<8x8xf32> -> vector<8x8xf32>
    %cst_23 = arith.constant 0.176776692 : f32
    %86 = vector.broadcast %cst_23 : f32 to vector<8x8xf32>
    %87 = arith.mulf %85, %86 : vector<8x8xf32>
    %88 = arith.addf %87, %11 : vector<8x8xf32>
    %cst_24 = arith.constant dense<0xFF800000> : vector<8xf32>
    %89 = vector.multi_reduction <maximumf>, %88, %cst_24 [1] : vector<8x8xf32> to vector<8xf32>
    %90 = vector.shape_cast %89 : vector<8xf32> to vector<8x1xf32>
    %91 = vector.broadcast %90 : vector<8x1xf32> to vector<8x8xf32>
    %92 = arith.subf %88, %91 : vector<8x8xf32>
    %93 = math.exp %92 : vector<8x8xf32>
    %cst_25 = arith.constant dense<0.000000e+00> : vector<8xf32>
    %94 = vector.multi_reduction <add>, %93, %cst_25 [1] : vector<8x8xf32> to vector<8xf32>
    %95 = vector.shape_cast %94 : vector<8xf32> to vector<8x1xf32>
    %96 = tpu.reciprocal %95 {approx = true} : vector<8x1xf32> -> vector<8x1xf32>
    %97 = vector.broadcast %96 : vector<8x1xf32> to vector<8x8xf32>
    %98 = arith.mulf %93, %97 : vector<8x8xf32>
    %99 = arith.truncf %98 : vector<8x8xf32> to vector<8x8xbf16>
    %cst_26 = arith.constant dense<0.000000e+00> : vector<8x128xf32>
    %100 = tpu.matmul %99, %84, %cst_26 {dimension_numbers = #tpu.dot_dimension_numbers<[1], [0], [0], [1], [0, 0, 1, 1], [], []>} : vector<8x8xbf16>, vector<8x128xbf16>, vector<8x128xf32> -> vector<8x128xf32>
    %101 = arith.addf %73, %100 : vector<8x128xf32>
    %c96_i32_27 = arith.constant 96 : i32
    %102 = vector.broadcast %c96_i32_27 : i32 to vector<8x128xi32>
    %103 = arith.cmpi sge, %15, %102 : vector<8x128xi32>
    %c128_i32 = arith.constant 128 : i32
    %104 = vector.broadcast %c128_i32 : i32 to vector<8x128xi32>
    %105 = arith.cmpi slt, %15, %104 : vector<8x128xi32>
    %106 = arith.andi %103, %105 : vector<8x128xi1>
    %107 = arith.extui %106 : vector<8x128xi1> to vector<8x128xi32>
    %108 = arith.sitofp %107 : vector<8x128xi32> to vector<8x128xf32>
    %109 = arith.mulf %13, %108 : vector<8x128xf32>
    %110 = arith.truncf %109 : vector<8x128xf32> to vector<8x128xbf16>
    %111 = arith.mulf %14, %108 : vector<8x128xf32>
    %112 = arith.truncf %111 : vector<8x128xf32> to vector<8x128xbf16>
    %cst_28 = arith.constant dense<0.000000e+00> : vector<8x8xf32>
    %113 = tpu.matmul %16, %110, %cst_28 {dimension_numbers = #tpu.dot_dimension_numbers<[1], [1], [0], [0], [0, 0, 1, 0], [], []>} : vector<8x128xbf16>, vector<8x128xbf16>, vector<8x8xf32> -> vector<8x8xf32>
    %cst_29 = arith.constant 0.176776692 : f32
    %114 = vector.broadcast %cst_29 : f32 to vector<8x8xf32>
    %115 = arith.mulf %113, %114 : vector<8x8xf32>
    %116 = arith.addf %115, %11 : vector<8x8xf32>
    %cst_30 = arith.constant dense<0xFF800000> : vector<8xf32>
    %117 = vector.multi_reduction <maximumf>, %116, %cst_30 [1] : vector<8x8xf32> to vector<8xf32>
    %118 = vector.shape_cast %117 : vector<8xf32> to vector<8x1xf32>
    %119 = vector.broadcast %118 : vector<8x1xf32> to vector<8x8xf32>
    %120 = arith.subf %116, %119 : vector<8x8xf32>
    %121 = math.exp %120 : vector<8x8xf32>
    %cst_31 = arith.constant dense<0.000000e+00> : vector<8xf32>
    %122 = vector.multi_reduction <add>, %121, %cst_31 [1] : vector<8x8xf32> to vector<8xf32>
    %123 = vector.shape_cast %122 : vector<8xf32> to vector<8x1xf32>
    %124 = tpu.reciprocal %123 {approx = true} : vector<8x1xf32> -> vector<8x1xf32>
    %125 = vector.broadcast %124 : vector<8x1xf32> to vector<8x8xf32>
    %126 = arith.mulf %121, %125 : vector<8x8xf32>
    %127 = arith.truncf %126 : vector<8x8xf32> to vector<8x8xbf16>
    %cst_32 = arith.constant dense<0.000000e+00> : vector<8x128xf32>
    %128 = tpu.matmul %127, %112, %cst_32 {dimension_numbers = #tpu.dot_dimension_numbers<[1], [0], [0], [1], [0, 0, 1, 1], [], []>} : vector<8x8xbf16>, vector<8x128xbf16>, vector<8x128xf32> -> vector<8x128xf32>
    %129 = arith.addf %101, %128 : vector<8x128xf32>
    %c0_33 = arith.constant 0 : index
    %c0_34 = arith.constant 0 : index
    %130 = vector.load %arg7[%c0_33, %c0_34] : memref<128x128xbf16, #tpu.memory_space<vmem>>, vector<128x128xbf16>
    %131 = arith.truncf %129 : vector<8x128xf32> to vector<8x128xbf16>
    %cst_35 = arith.constant dense<0.000000e+00> : vector<8x128xf32>
    %132 = tpu.matmul %131, %130, %cst_35 {dimension_numbers = #tpu.dot_dimension_numbers<[1], [0], [0], [1], [0, 0, 1, 1], [], []>} : vector<8x128xbf16>, vector<128x128xbf16>, vector<8x128xf32> -> vector<8x128xf32>
    %133 = arith.addf %1, %132 : vector<8x128xf32>
    %c0_36 = arith.constant 0 : index
    %c0_37 = arith.constant 0 : index
    %134 = vector.load %arg8[%c0_36, %c0_37] : memref<1x128xf32, #tpu.memory_space<vmem>>, vector<1x128xf32>
    %135 = vector.broadcast %134 : vector<1x128xf32> to vector<8x128xf32>
    %136 = arith.addf %133, %135 : vector<8x128xf32>
    %c0_38 = arith.constant 0 : index
    %c0_39 = arith.constant 0 : index
    %137 = vector.load %arg9[%c0_38, %c0_39] : memref<1x128xf32, #tpu.memory_space<vmem>>, vector<1x128xf32>
    %c0_40 = arith.constant 0 : index
    %c0_41 = arith.constant 0 : index
    %138 = vector.load %arg10[%c0_40, %c0_41] : memref<1x128xf32, #tpu.memory_space<vmem>>, vector<1x128xf32>
    %cst_42 = arith.constant dense<0.000000e+00> : vector<8xf32>
    %139 = vector.multi_reduction <add>, %136, %cst_42 [1] : vector<8x128xf32> to vector<8xf32>
    %140 = vector.shape_cast %139 : vector<8xf32> to vector<8x1xf32>
    %cst_43 = arith.constant 1.280000e+02 : f32
    %141 = vector.broadcast %cst_43 : f32 to vector<8x1xf32>
    %142 = arith.divf %140, %141 : vector<8x1xf32>
    %143 = vector.broadcast %142 : vector<8x1xf32> to vector<8x128xf32>
    %144 = arith.subf %136, %143 : vector<8x128xf32>
    %145 = arith.mulf %144, %144 : vector<8x128xf32>
    %cst_44 = arith.constant dense<0.000000e+00> : vector<8xf32>
    %146 = vector.multi_reduction <add>, %145, %cst_44 [1] : vector<8x128xf32> to vector<8xf32>
    %147 = vector.shape_cast %146 : vector<8xf32> to vector<8x1xf32>
    %cst_45 = arith.constant 1.280000e+02 : f32
    %148 = vector.broadcast %cst_45 : f32 to vector<8x1xf32>
    %149 = arith.divf %147, %148 : vector<8x1xf32>
    %cst_46 = arith.constant 9.99999996E-13 : f32
    %150 = vector.broadcast %cst_46 : f32 to vector<8x1xf32>
    %151 = arith.addf %149, %150 : vector<8x1xf32>
    %152 = math.rsqrt %151 : vector<8x1xf32>
    %153 = vector.broadcast %152 : vector<8x1xf32> to vector<8x128xf32>
    %154 = arith.mulf %144, %153 : vector<8x128xf32>
    %155 = vector.broadcast %137 : vector<1x128xf32> to vector<8x128xf32>
    %156 = arith.mulf %154, %155 : vector<8x128xf32>
    %157 = vector.broadcast %138 : vector<1x128xf32> to vector<8x128xf32>
    %158 = arith.addf %156, %157 : vector<8x128xf32>
    %c0_47 = arith.constant 0 : index
    %c0_48 = arith.constant 0 : index
    %159 = vector.load %arg11[%c0_47, %c0_48] : memref<128x128xbf16, #tpu.memory_space<vmem>>, vector<128x128xbf16>
    %160 = arith.truncf %158 : vector<8x128xf32> to vector<8x128xbf16>
    %cst_49 = arith.constant dense<0.000000e+00> : vector<8x128xf32>
    %161 = tpu.matmul %160, %159, %cst_49 {dimension_numbers = #tpu.dot_dimension_numbers<[1], [0], [0], [1], [0, 0, 1, 1], [], []>} : vector<8x128xbf16>, vector<128x128xbf16>, vector<8x128xf32> -> vector<8x128xf32>
    %c0_50 = arith.constant 0 : index
    %c0_51 = arith.constant 0 : index
    %162 = vector.load %arg12[%c0_50, %c0_51] : memref<1x128xf32, #tpu.memory_space<vmem>>, vector<1x128xf32>
    %163 = vector.broadcast %162 : vector<1x128xf32> to vector<8x128xf32>
    %164 = arith.addf %161, %163 : vector<8x128xf32>
    %c0_52 = arith.constant 0 : index
    %c0_53 = arith.constant 0 : index
    %c0_54 = arith.constant 0 : index
    %165 = vector.load %arg3[%c0_52, %c0_53, %c0_54] : memref<1x5x128xf32, #tpu.memory_space<vmem>>, vector<1x5x128xf32>
    %166 = vector.shape_cast %165 : vector<1x5x128xf32> to vector<5x128xf32>
    %c0_55 = arith.constant 0 : index
    %c0_56 = arith.constant 0 : index
    %167 = vector.load %arg13[%c0_55, %c0_56] : memref<128x256xbf16, #tpu.memory_space<vmem>>, vector<128x256xbf16>
    %168 = arith.truncf %166 : vector<5x128xf32> to vector<5x128xbf16>
    %cst_57 = arith.constant dense<0.000000e+00> : vector<5x256xf32>
    %169 = tpu.matmul %168, %167, %cst_57 {dimension_numbers = #tpu.dot_dimension_numbers<[1], [0], [0], [1], [0, 0, 1, 1], [], []>} : vector<5x128xbf16>, vector<128x256xbf16>, vector<5x256xf32> -> vector<5x256xf32>
    %c0_58 = arith.constant 0 : index
    %c0_59 = arith.constant 0 : index
    %170 = vector.load %arg14[%c0_58, %c0_59] : memref<1x256xf32, #tpu.memory_space<vmem>>, vector<1x256xf32>
    %171 = vector.broadcast %170 : vector<1x256xf32> to vector<5x256xf32>
    %172 = arith.addf %169, %171 : vector<5x256xf32>
    %c0_60 = arith.constant 0 : index
    %c0_61 = arith.constant 0 : index
    %c0_62 = arith.constant 0 : index
    %173 = vector.load %arg4[%c0_60, %c0_61, %c0_62] : memref<1x5x128xf32, #tpu.memory_space<vmem>>, vector<1x5x128xf32>
    %174 = vector.shape_cast %173 : vector<1x5x128xf32> to vector<5x128xf32>
    %c0_63 = arith.constant 0 : index
    %c0_64 = arith.constant 0 : index
    %175 = vector.load %arg13[%c0_63, %c0_64] : memref<128x256xbf16, #tpu.memory_space<vmem>>, vector<128x256xbf16>
    %176 = arith.truncf %174 : vector<5x128xf32> to vector<5x128xbf16>
    %cst_65 = arith.constant dense<0.000000e+00> : vector<5x256xf32>
    %177 = tpu.matmul %176, %175, %cst_65 {dimension_numbers = #tpu.dot_dimension_numbers<[1], [0], [0], [1], [0, 0, 1, 1], [], []>} : vector<5x128xbf16>, vector<128x256xbf16>, vector<5x256xf32> -> vector<5x256xf32>
    %c0_66 = arith.constant 0 : index
    %c0_67 = arith.constant 0 : index
    %178 = vector.load %arg14[%c0_66, %c0_67] : memref<1x256xf32, #tpu.memory_space<vmem>>, vector<1x256xf32>
    %179 = vector.broadcast %178 : vector<1x256xf32> to vector<5x256xf32>
    %180 = arith.addf %177, %179 : vector<5x256xf32>
    %181 = vector.extract_strided_slice %172 {offsets = [0, 0], sizes = [5, 128], strides = [1, 1]} : vector<5x256xf32> to vector<5x128xf32>
    %182 = vector.extract_strided_slice %172 {offsets = [0, 128], sizes = [5, 128], strides = [1, 1]} : vector<5x256xf32> to vector<5x128xf32>
    %183 = tpu.iota {dimensions = array<i32: 1>} : vector<5x128xi32>
    %184 = arith.truncf %164 : vector<8x128xf32> to vector<8x128xbf16>
    %cst_68 = arith.constant 0.000000e+00 : f32
    %185 = vector.broadcast %cst_68 : f32 to vector<8x128xf32>
    %c0_i32_69 = arith.constant 0 : i32
    %186 = vector.broadcast %c0_i32_69 : i32 to vector<5x128xi32>
    %187 = arith.cmpi sge, %183, %186 : vector<5x128xi32>
    %c32_i32_70 = arith.constant 32 : i32
    %188 = vector.broadcast %c32_i32_70 : i32 to vector<5x128xi32>
    %189 = arith.cmpi slt, %183, %188 : vector<5x128xi32>
    %190 = arith.andi %187, %189 : vector<5x128xi1>
    %191 = arith.extui %190 : vector<5x128xi1> to vector<5x128xi32>
    %192 = arith.sitofp %191 : vector<5x128xi32> to vector<5x128xf32>
    %193 = arith.mulf %181, %192 : vector<5x128xf32>
    %194 = arith.truncf %193 : vector<5x128xf32> to vector<5x128xbf16>
    %195 = arith.mulf %182, %192 : vector<5x128xf32>
    %196 = arith.truncf %195 : vector<5x128xf32> to vector<5x128xbf16>
    %cst_71 = arith.constant dense<0.000000e+00> : vector<8x5xf32>
    %197 = tpu.matmul %184, %194, %cst_71 {dimension_numbers = #tpu.dot_dimension_numbers<[1], [1], [0], [0], [0, 0, 1, 0], [], []>} : vector<8x128xbf16>, vector<5x128xbf16>, vector<8x5xf32> -> vector<8x5xf32>
    %cst_72 = arith.constant 0.176776692 : f32
    %198 = vector.broadcast %cst_72 : f32 to vector<8x5xf32>
    %199 = arith.mulf %197, %198 : vector<8x5xf32>
    %cst_73 = arith.constant dense<0xFF800000> : vector<8xf32>
    %200 = vector.multi_reduction <maximumf>, %199, %cst_73 [1] : vector<8x5xf32> to vector<8xf32>
    %201 = vector.shape_cast %200 : vector<8xf32> to vector<8x1xf32>
    %202 = vector.broadcast %201 : vector<8x1xf32> to vector<8x5xf32>
    %203 = arith.subf %199, %202 : vector<8x5xf32>
    %204 = math.exp %203 : vector<8x5xf32>
    %cst_74 = arith.constant dense<0.000000e+00> : vector<8xf32>
    %205 = vector.multi_reduction <add>, %204, %cst_74 [1] : vector<8x5xf32> to vector<8xf32>
    %206 = vector.shape_cast %205 : vector<8xf32> to vector<8x1xf32>
    %207 = tpu.reciprocal %206 {approx = true} : vector<8x1xf32> -> vector<8x1xf32>
    %208 = vector.broadcast %207 : vector<8x1xf32> to vector<8x5xf32>
    %209 = arith.mulf %204, %208 : vector<8x5xf32>
    %210 = arith.truncf %209 : vector<8x5xf32> to vector<8x5xbf16>
    %cst_75 = arith.constant dense<0.000000e+00> : vector<8x128xf32>
    %211 = tpu.matmul %210, %196, %cst_75 {dimension_numbers = #tpu.dot_dimension_numbers<[1], [0], [0], [1], [0, 0, 1, 1], [], []>} : vector<8x5xbf16>, vector<5x128xbf16>, vector<8x128xf32> -> vector<8x128xf32>
    %212 = arith.addf %185, %211 : vector<8x128xf32>
    %c32_i32_76 = arith.constant 32 : i32
    %213 = vector.broadcast %c32_i32_76 : i32 to vector<5x128xi32>
    %214 = arith.cmpi sge, %183, %213 : vector<5x128xi32>
    %c64_i32_77 = arith.constant 64 : i32
    %215 = vector.broadcast %c64_i32_77 : i32 to vector<5x128xi32>
    %216 = arith.cmpi slt, %183, %215 : vector<5x128xi32>
    %217 = arith.andi %214, %216 : vector<5x128xi1>
    %218 = arith.extui %217 : vector<5x128xi1> to vector<5x128xi32>
    %219 = arith.sitofp %218 : vector<5x128xi32> to vector<5x128xf32>
    %220 = arith.mulf %181, %219 : vector<5x128xf32>
    %221 = arith.truncf %220 : vector<5x128xf32> to vector<5x128xbf16>
    %222 = arith.mulf %182, %219 : vector<5x128xf32>
    %223 = arith.truncf %222 : vector<5x128xf32> to vector<5x128xbf16>
    %cst_78 = arith.constant dense<0.000000e+00> : vector<8x5xf32>
    %224 = tpu.matmul %184, %221, %cst_78 {dimension_numbers = #tpu.dot_dimension_numbers<[1], [1], [0], [0], [0, 0, 1, 0], [], []>} : vector<8x128xbf16>, vector<5x128xbf16>, vector<8x5xf32> -> vector<8x5xf32>
    %cst_79 = arith.constant 0.176776692 : f32
    %225 = vector.broadcast %cst_79 : f32 to vector<8x5xf32>
    %226 = arith.mulf %224, %225 : vector<8x5xf32>
    %cst_80 = arith.constant dense<0xFF800000> : vector<8xf32>
    %227 = vector.multi_reduction <maximumf>, %226, %cst_80 [1] : vector<8x5xf32> to vector<8xf32>
    %228 = vector.shape_cast %227 : vector<8xf32> to vector<8x1xf32>
    %229 = vector.broadcast %228 : vector<8x1xf32> to vector<8x5xf32>
    %230 = arith.subf %226, %229 : vector<8x5xf32>
    %231 = math.exp %230 : vector<8x5xf32>
    %cst_81 = arith.constant dense<0.000000e+00> : vector<8xf32>
    %232 = vector.multi_reduction <add>, %231, %cst_81 [1] : vector<8x5xf32> to vector<8xf32>
    %233 = vector.shape_cast %232 : vector<8xf32> to vector<8x1xf32>
    %234 = tpu.reciprocal %233 {approx = true} : vector<8x1xf32> -> vector<8x1xf32>
    %235 = vector.broadcast %234 : vector<8x1xf32> to vector<8x5xf32>
    %236 = arith.mulf %231, %235 : vector<8x5xf32>
    %237 = arith.truncf %236 : vector<8x5xf32> to vector<8x5xbf16>
    %cst_82 = arith.constant dense<0.000000e+00> : vector<8x128xf32>
    %238 = tpu.matmul %237, %223, %cst_82 {dimension_numbers = #tpu.dot_dimension_numbers<[1], [0], [0], [1], [0, 0, 1, 1], [], []>} : vector<8x5xbf16>, vector<5x128xbf16>, vector<8x128xf32> -> vector<8x128xf32>
    %239 = arith.addf %212, %238 : vector<8x128xf32>
    %c64_i32_83 = arith.constant 64 : i32
    %240 = vector.broadcast %c64_i32_83 : i32 to vector<5x128xi32>
    %241 = arith.cmpi sge, %183, %240 : vector<5x128xi32>
    %c96_i32_84 = arith.constant 96 : i32
    %242 = vector.broadcast %c96_i32_84 : i32 to vector<5x128xi32>
    %243 = arith.cmpi slt, %183, %242 : vector<5x128xi32>
    %244 = arith.andi %241, %243 : vector<5x128xi1>
    %245 = arith.extui %244 : vector<5x128xi1> to vector<5x128xi32>
    %246 = arith.sitofp %245 : vector<5x128xi32> to vector<5x128xf32>
    %247 = arith.mulf %181, %246 : vector<5x128xf32>
    %248 = arith.truncf %247 : vector<5x128xf32> to vector<5x128xbf16>
    %249 = arith.mulf %182, %246 : vector<5x128xf32>
    %250 = arith.truncf %249 : vector<5x128xf32> to vector<5x128xbf16>
    %cst_85 = arith.constant dense<0.000000e+00> : vector<8x5xf32>
    %251 = tpu.matmul %184, %248, %cst_85 {dimension_numbers = #tpu.dot_dimension_numbers<[1], [1], [0], [0], [0, 0, 1, 0], [], []>} : vector<8x128xbf16>, vector<5x128xbf16>, vector<8x5xf32> -> vector<8x5xf32>
    %cst_86 = arith.constant 0.176776692 : f32
    %252 = vector.broadcast %cst_86 : f32 to vector<8x5xf32>
    %253 = arith.mulf %251, %252 : vector<8x5xf32>
    %cst_87 = arith.constant dense<0xFF800000> : vector<8xf32>
    %254 = vector.multi_reduction <maximumf>, %253, %cst_87 [1] : vector<8x5xf32> to vector<8xf32>
    %255 = vector.shape_cast %254 : vector<8xf32> to vector<8x1xf32>
    %256 = vector.broadcast %255 : vector<8x1xf32> to vector<8x5xf32>
    %257 = arith.subf %253, %256 : vector<8x5xf32>
    %258 = math.exp %257 : vector<8x5xf32>
    %cst_88 = arith.constant dense<0.000000e+00> : vector<8xf32>
    %259 = vector.multi_reduction <add>, %258, %cst_88 [1] : vector<8x5xf32> to vector<8xf32>
    %260 = vector.shape_cast %259 : vector<8xf32> to vector<8x1xf32>
    %261 = tpu.reciprocal %260 {approx = true} : vector<8x1xf32> -> vector<8x1xf32>
    %262 = vector.broadcast %261 : vector<8x1xf32> to vector<8x5xf32>
    %263 = arith.mulf %258, %262 : vector<8x5xf32>
    %264 = arith.truncf %263 : vector<8x5xf32> to vector<8x5xbf16>
    %cst_89 = arith.constant dense<0.000000e+00> : vector<8x128xf32>
    %265 = tpu.matmul %264, %250, %cst_89 {dimension_numbers = #tpu.dot_dimension_numbers<[1], [0], [0], [1], [0, 0, 1, 1], [], []>} : vector<8x5xbf16>, vector<5x128xbf16>, vector<8x128xf32> -> vector<8x128xf32>
    %266 = arith.addf %239, %265 : vector<8x128xf32>
    %c96_i32_90 = arith.constant 96 : i32
    %267 = vector.broadcast %c96_i32_90 : i32 to vector<5x128xi32>
    %268 = arith.cmpi sge, %183, %267 : vector<5x128xi32>
    %c128_i32_91 = arith.constant 128 : i32
    %269 = vector.broadcast %c128_i32_91 : i32 to vector<5x128xi32>
    %270 = arith.cmpi slt, %183, %269 : vector<5x128xi32>
    %271 = arith.andi %268, %270 : vector<5x128xi1>
    %272 = arith.extui %271 : vector<5x128xi1> to vector<5x128xi32>
    %273 = arith.sitofp %272 : vector<5x128xi32> to vector<5x128xf32>
    %274 = arith.mulf %181, %273 : vector<5x128xf32>
    %275 = arith.truncf %274 : vector<5x128xf32> to vector<5x128xbf16>
    %276 = arith.mulf %182, %273 : vector<5x128xf32>
    %277 = arith.truncf %276 : vector<5x128xf32> to vector<5x128xbf16>
    %cst_92 = arith.constant dense<0.000000e+00> : vector<8x5xf32>
    %278 = tpu.matmul %184, %275, %cst_92 {dimension_numbers = #tpu.dot_dimension_numbers<[1], [1], [0], [0], [0, 0, 1, 0], [], []>} : vector<8x128xbf16>, vector<5x128xbf16>, vector<8x5xf32> -> vector<8x5xf32>
    %cst_93 = arith.constant 0.176776692 : f32
    %279 = vector.broadcast %cst_93 : f32 to vector<8x5xf32>
    %280 = arith.mulf %278, %279 : vector<8x5xf32>
    %cst_94 = arith.constant dense<0xFF800000> : vector<8xf32>
    %281 = vector.multi_reduction <maximumf>, %280, %cst_94 [1] : vector<8x5xf32> to vector<8xf32>
    %282 = vector.shape_cast %281 : vector<8xf32> to vector<8x1xf32>
    %283 = vector.broadcast %282 : vector<8x1xf32> to vector<8x5xf32>
    %284 = arith.subf %280, %283 : vector<8x5xf32>
    %285 = math.exp %284 : vector<8x5xf32>
    %cst_95 = arith.constant dense<0.000000e+00> : vector<8xf32>
    %286 = vector.multi_reduction <add>, %285, %cst_95 [1] : vector<8x5xf32> to vector<8xf32>
    %287 = vector.shape_cast %286 : vector<8xf32> to vector<8x1xf32>
    %288 = tpu.reciprocal %287 {approx = true} : vector<8x1xf32> -> vector<8x1xf32>
    %289 = vector.broadcast %288 : vector<8x1xf32> to vector<8x5xf32>
    %290 = arith.mulf %285, %289 : vector<8x5xf32>
    %291 = arith.truncf %290 : vector<8x5xf32> to vector<8x5xbf16>
    %cst_96 = arith.constant dense<0.000000e+00> : vector<8x128xf32>
    %292 = tpu.matmul %291, %277, %cst_96 {dimension_numbers = #tpu.dot_dimension_numbers<[1], [0], [0], [1], [0, 0, 1, 1], [], []>} : vector<8x5xbf16>, vector<5x128xbf16>, vector<8x128xf32> -> vector<8x128xf32>
    %293 = arith.addf %266, %292 : vector<8x128xf32>
    %c0_97 = arith.constant 0 : index
    %c0_98 = arith.constant 0 : index
    %294 = vector.load %arg15[%c0_97, %c0_98] : memref<128x128xbf16, #tpu.memory_space<vmem>>, vector<128x128xbf16>
    %295 = arith.truncf %293 : vector<8x128xf32> to vector<8x128xbf16>
    %cst_99 = arith.constant dense<0.000000e+00> : vector<8x128xf32>
    %296 = tpu.matmul %295, %294, %cst_99 {dimension_numbers = #tpu.dot_dimension_numbers<[1], [0], [0], [1], [0, 0, 1, 1], [], []>} : vector<8x128xbf16>, vector<128x128xbf16>, vector<8x128xf32> -> vector<8x128xf32>
    %c0_100 = arith.constant 0 : index
    %c0_101 = arith.constant 0 : index
    %297 = vector.load %arg16[%c0_100, %c0_101] : memref<1x128xf32, #tpu.memory_space<vmem>>, vector<1x128xf32>
    %298 = vector.broadcast %297 : vector<1x128xf32> to vector<8x128xf32>
    %299 = arith.addf %296, %298 : vector<8x128xf32>
    %300 = vector.extract_strided_slice %180 {offsets = [0, 0], sizes = [5, 128], strides = [1, 1]} : vector<5x256xf32> to vector<5x128xf32>
    %301 = vector.extract_strided_slice %180 {offsets = [0, 128], sizes = [5, 128], strides = [1, 1]} : vector<5x256xf32> to vector<5x128xf32>
    %302 = tpu.iota {dimensions = array<i32: 1>} : vector<5x128xi32>
    %303 = arith.truncf %164 : vector<8x128xf32> to vector<8x128xbf16>
    %cst_102 = arith.constant 0.000000e+00 : f32
    %304 = vector.broadcast %cst_102 : f32 to vector<8x128xf32>
    %c0_i32_103 = arith.constant 0 : i32
    %305 = vector.broadcast %c0_i32_103 : i32 to vector<5x128xi32>
    %306 = arith.cmpi sge, %302, %305 : vector<5x128xi32>
    %c32_i32_104 = arith.constant 32 : i32
    %307 = vector.broadcast %c32_i32_104 : i32 to vector<5x128xi32>
    %308 = arith.cmpi slt, %302, %307 : vector<5x128xi32>
    %309 = arith.andi %306, %308 : vector<5x128xi1>
    %310 = arith.extui %309 : vector<5x128xi1> to vector<5x128xi32>
    %311 = arith.sitofp %310 : vector<5x128xi32> to vector<5x128xf32>
    %312 = arith.mulf %300, %311 : vector<5x128xf32>
    %313 = arith.truncf %312 : vector<5x128xf32> to vector<5x128xbf16>
    %314 = arith.mulf %301, %311 : vector<5x128xf32>
    %315 = arith.truncf %314 : vector<5x128xf32> to vector<5x128xbf16>
    %cst_105 = arith.constant dense<0.000000e+00> : vector<8x5xf32>
    %316 = tpu.matmul %303, %313, %cst_105 {dimension_numbers = #tpu.dot_dimension_numbers<[1], [1], [0], [0], [0, 0, 1, 0], [], []>} : vector<8x128xbf16>, vector<5x128xbf16>, vector<8x5xf32> -> vector<8x5xf32>
    %cst_106 = arith.constant 0.176776692 : f32
    %317 = vector.broadcast %cst_106 : f32 to vector<8x5xf32>
    %318 = arith.mulf %316, %317 : vector<8x5xf32>
    %cst_107 = arith.constant dense<0xFF800000> : vector<8xf32>
    %319 = vector.multi_reduction <maximumf>, %318, %cst_107 [1] : vector<8x5xf32> to vector<8xf32>
    %320 = vector.shape_cast %319 : vector<8xf32> to vector<8x1xf32>
    %321 = vector.broadcast %320 : vector<8x1xf32> to vector<8x5xf32>
    %322 = arith.subf %318, %321 : vector<8x5xf32>
    %323 = math.exp %322 : vector<8x5xf32>
    %cst_108 = arith.constant dense<0.000000e+00> : vector<8xf32>
    %324 = vector.multi_reduction <add>, %323, %cst_108 [1] : vector<8x5xf32> to vector<8xf32>
    %325 = vector.shape_cast %324 : vector<8xf32> to vector<8x1xf32>
    %326 = tpu.reciprocal %325 {approx = true} : vector<8x1xf32> -> vector<8x1xf32>
    %327 = vector.broadcast %326 : vector<8x1xf32> to vector<8x5xf32>
    %328 = arith.mulf %323, %327 : vector<8x5xf32>
    %329 = arith.truncf %328 : vector<8x5xf32> to vector<8x5xbf16>
    %cst_109 = arith.constant dense<0.000000e+00> : vector<8x128xf32>
    %330 = tpu.matmul %329, %315, %cst_109 {dimension_numbers = #tpu.dot_dimension_numbers<[1], [0], [0], [1], [0, 0, 1, 1], [], []>} : vector<8x5xbf16>, vector<5x128xbf16>, vector<8x128xf32> -> vector<8x128xf32>
    %331 = arith.addf %304, %330 : vector<8x128xf32>
    %c32_i32_110 = arith.constant 32 : i32
    %332 = vector.broadcast %c32_i32_110 : i32 to vector<5x128xi32>
    %333 = arith.cmpi sge, %302, %332 : vector<5x128xi32>
    %c64_i32_111 = arith.constant 64 : i32
    %334 = vector.broadcast %c64_i32_111 : i32 to vector<5x128xi32>
    %335 = arith.cmpi slt, %302, %334 : vector<5x128xi32>
    %336 = arith.andi %333, %335 : vector<5x128xi1>
    %337 = arith.extui %336 : vector<5x128xi1> to vector<5x128xi32>
    %338 = arith.sitofp %337 : vector<5x128xi32> to vector<5x128xf32>
    %339 = arith.mulf %300, %338 : vector<5x128xf32>
    %340 = arith.truncf %339 : vector<5x128xf32> to vector<5x128xbf16>
    %341 = arith.mulf %301, %338 : vector<5x128xf32>
    %342 = arith.truncf %341 : vector<5x128xf32> to vector<5x128xbf16>
    %cst_112 = arith.constant dense<0.000000e+00> : vector<8x5xf32>
    %343 = tpu.matmul %303, %340, %cst_112 {dimension_numbers = #tpu.dot_dimension_numbers<[1], [1], [0], [0], [0, 0, 1, 0], [], []>} : vector<8x128xbf16>, vector<5x128xbf16>, vector<8x5xf32> -> vector<8x5xf32>
    %cst_113 = arith.constant 0.176776692 : f32
    %344 = vector.broadcast %cst_113 : f32 to vector<8x5xf32>
    %345 = arith.mulf %343, %344 : vector<8x5xf32>
    %cst_114 = arith.constant dense<0xFF800000> : vector<8xf32>
    %346 = vector.multi_reduction <maximumf>, %345, %cst_114 [1] : vector<8x5xf32> to vector<8xf32>
    %347 = vector.shape_cast %346 : vector<8xf32> to vector<8x1xf32>
    %348 = vector.broadcast %347 : vector<8x1xf32> to vector<8x5xf32>
    %349 = arith.subf %345, %348 : vector<8x5xf32>
    %350 = math.exp %349 : vector<8x5xf32>
    %cst_115 = arith.constant dense<0.000000e+00> : vector<8xf32>
    %351 = vector.multi_reduction <add>, %350, %cst_115 [1] : vector<8x5xf32> to vector<8xf32>
    %352 = vector.shape_cast %351 : vector<8xf32> to vector<8x1xf32>
    %353 = tpu.reciprocal %352 {approx = true} : vector<8x1xf32> -> vector<8x1xf32>
    %354 = vector.broadcast %353 : vector<8x1xf32> to vector<8x5xf32>
    %355 = arith.mulf %350, %354 : vector<8x5xf32>
    %356 = arith.truncf %355 : vector<8x5xf32> to vector<8x5xbf16>
    %cst_116 = arith.constant dense<0.000000e+00> : vector<8x128xf32>
    %357 = tpu.matmul %356, %342, %cst_116 {dimension_numbers = #tpu.dot_dimension_numbers<[1], [0], [0], [1], [0, 0, 1, 1], [], []>} : vector<8x5xbf16>, vector<5x128xbf16>, vector<8x128xf32> -> vector<8x128xf32>
    %358 = arith.addf %331, %357 : vector<8x128xf32>
    %c64_i32_117 = arith.constant 64 : i32
    %359 = vector.broadcast %c64_i32_117 : i32 to vector<5x128xi32>
    %360 = arith.cmpi sge, %302, %359 : vector<5x128xi32>
    %c96_i32_118 = arith.constant 96 : i32
    %361 = vector.broadcast %c96_i32_118 : i32 to vector<5x128xi32>
    %362 = arith.cmpi slt, %302, %361 : vector<5x128xi32>
    %363 = arith.andi %360, %362 : vector<5x128xi1>
    %364 = arith.extui %363 : vector<5x128xi1> to vector<5x128xi32>
    %365 = arith.sitofp %364 : vector<5x128xi32> to vector<5x128xf32>
    %366 = arith.mulf %300, %365 : vector<5x128xf32>
    %367 = arith.truncf %366 : vector<5x128xf32> to vector<5x128xbf16>
    %368 = arith.mulf %301, %365 : vector<5x128xf32>
    %369 = arith.truncf %368 : vector<5x128xf32> to vector<5x128xbf16>
    %cst_119 = arith.constant dense<0.000000e+00> : vector<8x5xf32>
    %370 = tpu.matmul %303, %367, %cst_119 {dimension_numbers = #tpu.dot_dimension_numbers<[1], [1], [0], [0], [0, 0, 1, 0], [], []>} : vector<8x128xbf16>, vector<5x128xbf16>, vector<8x5xf32> -> vector<8x5xf32>
    %cst_120 = arith.constant 0.176776692 : f32
    %371 = vector.broadcast %cst_120 : f32 to vector<8x5xf32>
    %372 = arith.mulf %370, %371 : vector<8x5xf32>
    %cst_121 = arith.constant dense<0xFF800000> : vector<8xf32>
    %373 = vector.multi_reduction <maximumf>, %372, %cst_121 [1] : vector<8x5xf32> to vector<8xf32>
    %374 = vector.shape_cast %373 : vector<8xf32> to vector<8x1xf32>
    %375 = vector.broadcast %374 : vector<8x1xf32> to vector<8x5xf32>
    %376 = arith.subf %372, %375 : vector<8x5xf32>
    %377 = math.exp %376 : vector<8x5xf32>
    %cst_122 = arith.constant dense<0.000000e+00> : vector<8xf32>
    %378 = vector.multi_reduction <add>, %377, %cst_122 [1] : vector<8x5xf32> to vector<8xf32>
    %379 = vector.shape_cast %378 : vector<8xf32> to vector<8x1xf32>
    %380 = tpu.reciprocal %379 {approx = true} : vector<8x1xf32> -> vector<8x1xf32>
    %381 = vector.broadcast %380 : vector<8x1xf32> to vector<8x5xf32>
    %382 = arith.mulf %377, %381 : vector<8x5xf32>
    %383 = arith.truncf %382 : vector<8x5xf32> to vector<8x5xbf16>
    %cst_123 = arith.constant dense<0.000000e+00> : vector<8x128xf32>
    %384 = tpu.matmul %383, %369, %cst_123 {dimension_numbers = #tpu.dot_dimension_numbers<[1], [0], [0], [1], [0, 0, 1, 1], [], []>} : vector<8x5xbf16>, vector<5x128xbf16>, vector<8x128xf32> -> vector<8x128xf32>
    %385 = arith.addf %358, %384 : vector<8x128xf32>
    %c96_i32_124 = arith.constant 96 : i32
    %386 = vector.broadcast %c96_i32_124 : i32 to vector<5x128xi32>
    %387 = arith.cmpi sge, %302, %386 : vector<5x128xi32>
    %c128_i32_125 = arith.constant 128 : i32
    %388 = vector.broadcast %c128_i32_125 : i32 to vector<5x128xi32>
    %389 = arith.cmpi slt, %302, %388 : vector<5x128xi32>
    %390 = arith.andi %387, %389 : vector<5x128xi1>
    %391 = arith.extui %390 : vector<5x128xi1> to vector<5x128xi32>
    %392 = arith.sitofp %391 : vector<5x128xi32> to vector<5x128xf32>
    %393 = arith.mulf %300, %392 : vector<5x128xf32>
    %394 = arith.truncf %393 : vector<5x128xf32> to vector<5x128xbf16>
    %395 = arith.mulf %301, %392 : vector<5x128xf32>
    %396 = arith.truncf %395 : vector<5x128xf32> to vector<5x128xbf16>
    %cst_126 = arith.constant dense<0.000000e+00> : vector<8x5xf32>
    %397 = tpu.matmul %303, %394, %cst_126 {dimension_numbers = #tpu.dot_dimension_numbers<[1], [1], [0], [0], [0, 0, 1, 0], [], []>} : vector<8x128xbf16>, vector<5x128xbf16>, vector<8x5xf32> -> vector<8x5xf32>
    %cst_127 = arith.constant 0.176776692 : f32
    %398 = vector.broadcast %cst_127 : f32 to vector<8x5xf32>
    %399 = arith.mulf %397, %398 : vector<8x5xf32>
    %cst_128 = arith.constant dense<0xFF800000> : vector<8xf32>
    %400 = vector.multi_reduction <maximumf>, %399, %cst_128 [1] : vector<8x5xf32> to vector<8xf32>
    %401 = vector.shape_cast %400 : vector<8xf32> to vector<8x1xf32>
    %402 = vector.broadcast %401 : vector<8x1xf32> to vector<8x5xf32>
    %403 = arith.subf %399, %402 : vector<8x5xf32>
    %404 = math.exp %403 : vector<8x5xf32>
    %cst_129 = arith.constant dense<0.000000e+00> : vector<8xf32>
    %405 = vector.multi_reduction <add>, %404, %cst_129 [1] : vector<8x5xf32> to vector<8xf32>
    %406 = vector.shape_cast %405 : vector<8xf32> to vector<8x1xf32>
    %407 = tpu.reciprocal %406 {approx = true} : vector<8x1xf32> -> vector<8x1xf32>
    %408 = vector.broadcast %407 : vector<8x1xf32> to vector<8x5xf32>
    %409 = arith.mulf %404, %408 : vector<8x5xf32>
    %410 = arith.truncf %409 : vector<8x5xf32> to vector<8x5xbf16>
    %cst_130 = arith.constant dense<0.000000e+00> : vector<8x128xf32>
    %411 = tpu.matmul %410, %396, %cst_130 {dimension_numbers = #tpu.dot_dimension_numbers<[1], [0], [0], [1], [0, 0, 1, 1], [], []>} : vector<8x5xbf16>, vector<5x128xbf16>, vector<8x128xf32> -> vector<8x128xf32>
    %412 = arith.addf %385, %411 : vector<8x128xf32>
    %c0_131 = arith.constant 0 : index
    %c0_132 = arith.constant 0 : index
    %413 = vector.load %arg15[%c0_131, %c0_132] : memref<128x128xbf16, #tpu.memory_space<vmem>>, vector<128x128xbf16>
    %414 = arith.truncf %412 : vector<8x128xf32> to vector<8x128xbf16>
    %cst_133 = arith.constant dense<0.000000e+00> : vector<8x128xf32>
    %415 = tpu.matmul %414, %413, %cst_133 {dimension_numbers = #tpu.dot_dimension_numbers<[1], [0], [0], [1], [0, 0, 1, 1], [], []>} : vector<8x128xbf16>, vector<128x128xbf16>, vector<8x128xf32> -> vector<8x128xf32>
    %c0_134 = arith.constant 0 : index
    %c0_135 = arith.constant 0 : index
    %416 = vector.load %arg16[%c0_134, %c0_135] : memref<1x128xf32, #tpu.memory_space<vmem>>, vector<1x128xf32>
    %417 = vector.broadcast %416 : vector<1x128xf32> to vector<8x128xf32>
    %418 = arith.addf %415, %417 : vector<8x128xf32>
    %c0_136 = arith.constant 0 : index
    %c0_137 = arith.constant 0 : index
    %419 = vector.load %arg17[%c0_136, %c0_137] : memref<256x128xbf16, #tpu.memory_space<vmem>>, vector<256x128xbf16>
    %420 = vector.extract_strided_slice %419 {offsets = [0, 0], sizes = [128, 128], strides = [1, 1]} : vector<256x128xbf16> to vector<128x128xbf16>
    %421 = arith.truncf %299 : vector<8x128xf32> to vector<8x128xbf16>
    %cst_138 = arith.constant dense<0.000000e+00> : vector<8x128xf32>
    %422 = tpu.matmul %421, %420, %cst_138 {dimension_numbers = #tpu.dot_dimension_numbers<[1], [0], [0], [1], [0, 0, 1, 1], [], []>} : vector<8x128xbf16>, vector<128x128xbf16>, vector<8x128xf32> -> vector<8x128xf32>
    %423 = vector.extract_strided_slice %419 {offsets = [128, 0], sizes = [128, 128], strides = [1, 1]} : vector<256x128xbf16> to vector<128x128xbf16>
    %424 = arith.truncf %418 : vector<8x128xf32> to vector<8x128xbf16>
    %cst_139 = arith.constant dense<0.000000e+00> : vector<8x128xf32>
    %425 = tpu.matmul %424, %423, %cst_139 {dimension_numbers = #tpu.dot_dimension_numbers<[1], [0], [0], [1], [0, 0, 1, 1], [], []>} : vector<8x128xbf16>, vector<128x128xbf16>, vector<8x128xf32> -> vector<8x128xf32>
    %426 = arith.addf %422, %425 : vector<8x128xf32>
    %c0_140 = arith.constant 0 : index
    %c0_141 = arith.constant 0 : index
    %427 = vector.load %arg18[%c0_140, %c0_141] : memref<1x128xf32, #tpu.memory_space<vmem>>, vector<1x128xf32>
    %428 = vector.broadcast %427 : vector<1x128xf32> to vector<8x128xf32>
    %429 = arith.addf %426, %428 : vector<8x128xf32>
    %430 = arith.addf %429, %158 : vector<8x128xf32>
    %c0_142 = arith.constant 0 : index
    %c0_143 = arith.constant 0 : index
    %431 = vector.load %arg19[%c0_142, %c0_143] : memref<1x128xf32, #tpu.memory_space<vmem>>, vector<1x128xf32>
    %c0_144 = arith.constant 0 : index
    %c0_145 = arith.constant 0 : index
    %432 = vector.load %arg20[%c0_144, %c0_145] : memref<1x128xf32, #tpu.memory_space<vmem>>, vector<1x128xf32>
    %cst_146 = arith.constant dense<0.000000e+00> : vector<8xf32>
    %433 = vector.multi_reduction <add>, %430, %cst_146 [1] : vector<8x128xf32> to vector<8xf32>
    %434 = vector.shape_cast %433 : vector<8xf32> to vector<8x1xf32>
    %cst_147 = arith.constant 1.280000e+02 : f32
    %435 = vector.broadcast %cst_147 : f32 to vector<8x1xf32>
    %436 = arith.divf %434, %435 : vector<8x1xf32>
    %437 = vector.broadcast %436 : vector<8x1xf32> to vector<8x128xf32>
    %438 = arith.subf %430, %437 : vector<8x128xf32>
    %439 = arith.mulf %438, %438 : vector<8x128xf32>
    %cst_148 = arith.constant dense<0.000000e+00> : vector<8xf32>
    %440 = vector.multi_reduction <add>, %439, %cst_148 [1] : vector<8x128xf32> to vector<8xf32>
    %441 = vector.shape_cast %440 : vector<8xf32> to vector<8x1xf32>
    %cst_149 = arith.constant 1.280000e+02 : f32
    %442 = vector.broadcast %cst_149 : f32 to vector<8x1xf32>
    %443 = arith.divf %441, %442 : vector<8x1xf32>
    %cst_150 = arith.constant 9.99999996E-13 : f32
    %444 = vector.broadcast %cst_150 : f32 to vector<8x1xf32>
    %445 = arith.addf %443, %444 : vector<8x1xf32>
    %446 = math.rsqrt %445 : vector<8x1xf32>
    %447 = vector.broadcast %446 : vector<8x1xf32> to vector<8x128xf32>
    %448 = arith.mulf %438, %447 : vector<8x128xf32>
    %449 = vector.broadcast %431 : vector<1x128xf32> to vector<8x128xf32>
    %450 = arith.mulf %448, %449 : vector<8x128xf32>
    %451 = vector.broadcast %432 : vector<1x128xf32> to vector<8x128xf32>
    %452 = arith.addf %450, %451 : vector<8x128xf32>
    %c0_151 = arith.constant 0 : index
    %c0_152 = arith.constant 0 : index
    %453 = vector.load %arg21[%c0_151, %c0_152] : memref<128x512xbf16, #tpu.memory_space<vmem>>, vector<128x512xbf16>
    %454 = arith.truncf %452 : vector<8x128xf32> to vector<8x128xbf16>
    %cst_153 = arith.constant dense<0.000000e+00> : vector<8x512xf32>
    %455 = tpu.matmul %454, %453, %cst_153 {dimension_numbers = #tpu.dot_dimension_numbers<[1], [0], [0], [1], [0, 0, 1, 1], [], []>} : vector<8x128xbf16>, vector<128x512xbf16>, vector<8x512xf32> -> vector<8x512xf32>
    %c0_154 = arith.constant 0 : index
    %c0_155 = arith.constant 0 : index
    %456 = vector.load %arg22[%c0_154, %c0_155] : memref<1x512xf32, #tpu.memory_space<vmem>>, vector<1x512xf32>
    %457 = vector.broadcast %456 : vector<1x512xf32> to vector<8x512xf32>
    %458 = arith.addf %455, %457 : vector<8x512xf32>
    %459 = arith.mulf %458, %458 : vector<8x512xf32>
    %460 = arith.mulf %458, %459 : vector<8x512xf32>
    %cst_156 = arith.constant 4.471500e-02 : f32
    %461 = vector.broadcast %cst_156 : f32 to vector<8x512xf32>
    %462 = arith.mulf %461, %460 : vector<8x512xf32>
    %463 = arith.addf %458, %462 : vector<8x512xf32>
    %cst_157 = arith.constant 0.797884583 : f32
    %464 = vector.broadcast %cst_157 : f32 to vector<8x512xf32>
    %465 = arith.mulf %464, %463 : vector<8x512xf32>
    %466 = math.tanh %465 : vector<8x512xf32>
    %cst_158 = arith.constant 1.000000e+00 : f32
    %467 = vector.broadcast %cst_158 : f32 to vector<8x512xf32>
    %468 = arith.addf %467, %466 : vector<8x512xf32>
    %cst_159 = arith.constant 5.000000e-01 : f32
    %469 = vector.broadcast %cst_159 : f32 to vector<8x512xf32>
    %470 = arith.mulf %469, %468 : vector<8x512xf32>
    %471 = arith.mulf %458, %470 : vector<8x512xf32>
    %c0_160 = arith.constant 0 : index
    %c0_161 = arith.constant 0 : index
    %472 = vector.load %arg23[%c0_160, %c0_161] : memref<512x128xbf16, #tpu.memory_space<vmem>>, vector<512x128xbf16>
    %473 = arith.truncf %471 : vector<8x512xf32> to vector<8x512xbf16>
    %cst_162 = arith.constant dense<0.000000e+00> : vector<8x128xf32>
    %474 = tpu.matmul %473, %472, %cst_162 {dimension_numbers = #tpu.dot_dimension_numbers<[1], [0], [0], [1], [0, 0, 1, 1], [], []>} : vector<8x512xbf16>, vector<512x128xbf16>, vector<8x128xf32> -> vector<8x128xf32>
    %475 = arith.addf %452, %474 : vector<8x128xf32>
    %c0_163 = arith.constant 0 : index
    %c0_164 = arith.constant 0 : index
    %476 = vector.load %arg24[%c0_163, %c0_164] : memref<1x128xf32, #tpu.memory_space<vmem>>, vector<1x128xf32>
    %477 = vector.broadcast %476 : vector<1x128xf32> to vector<8x128xf32>
    %478 = arith.addf %475, %477 : vector<8x128xf32>
    %c0_165 = arith.constant 0 : index
    %c0_166 = arith.constant 0 : index
    %479 = vector.load %arg25[%c0_165, %c0_166] : memref<1x128xf32, #tpu.memory_space<vmem>>, vector<1x128xf32>
    %c0_167 = arith.constant 0 : index
    %c0_168 = arith.constant 0 : index
    %480 = vector.load %arg26[%c0_167, %c0_168] : memref<1x128xf32, #tpu.memory_space<vmem>>, vector<1x128xf32>
    %cst_169 = arith.constant dense<0.000000e+00> : vector<8xf32>
    %481 = vector.multi_reduction <add>, %478, %cst_169 [1] : vector<8x128xf32> to vector<8xf32>
    %482 = vector.shape_cast %481 : vector<8xf32> to vector<8x1xf32>
    %cst_170 = arith.constant 1.280000e+02 : f32
    %483 = vector.broadcast %cst_170 : f32 to vector<8x1xf32>
    %484 = arith.divf %482, %483 : vector<8x1xf32>
    %485 = vector.broadcast %484 : vector<8x1xf32> to vector<8x128xf32>
    %486 = arith.subf %478, %485 : vector<8x128xf32>
    %487 = arith.mulf %486, %486 : vector<8x128xf32>
    %cst_171 = arith.constant dense<0.000000e+00> : vector<8xf32>
    %488 = vector.multi_reduction <add>, %487, %cst_171 [1] : vector<8x128xf32> to vector<8xf32>
    %489 = vector.shape_cast %488 : vector<8xf32> to vector<8x1xf32>
    %cst_172 = arith.constant 1.280000e+02 : f32
    %490 = vector.broadcast %cst_172 : f32 to vector<8x1xf32>
    %491 = arith.divf %489, %490 : vector<8x1xf32>
    %cst_173 = arith.constant 9.99999996E-13 : f32
    %492 = vector.broadcast %cst_173 : f32 to vector<8x1xf32>
    %493 = arith.addf %491, %492 : vector<8x1xf32>
    %494 = math.rsqrt %493 : vector<8x1xf32>
    %495 = vector.broadcast %494 : vector<8x1xf32> to vector<8x128xf32>
    %496 = arith.mulf %486, %495 : vector<8x128xf32>
    %497 = vector.broadcast %479 : vector<1x128xf32> to vector<8x128xf32>
    %498 = arith.mulf %496, %497 : vector<8x128xf32>
    %499 = vector.broadcast %480 : vector<1x128xf32> to vector<8x128xf32>
    %500 = arith.addf %498, %499 : vector<8x128xf32>
    %c0_174 = arith.constant 0 : index
    %c0_175 = arith.constant 0 : index
    %c0_176 = arith.constant 0 : index
    %501 = vector.load %arg31[%c0_174, %c0_175, %c0_176] : memref<1x8x128xf32, #tpu.memory_space<vmem>>, vector<1x8x128xf32>
    %502 = vector.shape_cast %501 : vector<1x8x128xf32> to vector<8x128xf32>
    %503 = vector.shape_cast %500 : vector<8x128xf32> to vector<1x8x128xf32>
    tpu.vector_store %arg31[%c0_174, %c0_175, %c0_176], %503 {strides = array<i32>} : memref<1x8x128xf32, #tpu.memory_space<vmem>>, vector<1x8x128xf32>,
    %504 = vector.extract_strided_slice %500 {offsets = [0, 0], sizes = [1, 128], strides = [1, 1]} : vector<8x128xf32> to vector<1x128xf32>
    %c0_177 = arith.constant 0 : index
    %c0_178 = arith.constant 0 : index
    %505 = vector.load %arg27[%c0_177, %c0_178] : memref<128x128xbf16, #tpu.memory_space<vmem>>, vector<128x128xbf16>
    %506 = arith.truncf %504 : vector<1x128xf32> to vector<1x128xbf16>
    %cst_179 = arith.constant dense<0.000000e+00> : vector<1x128xf32>
    %507 = tpu.matmul %506, %505, %cst_179 {dimension_numbers = #tpu.dot_dimension_numbers<[1], [0], [0], [1], [0, 0, 1, 1], [], []>} : vector<1x128xbf16>, vector<128x128xbf16>, vector<1x128xf32> -> vector<1x128xf32>
    %c0_180 = arith.constant 0 : index
    %c0_181 = arith.constant 0 : index
    %508 = vector.load %arg28[%c0_180, %c0_181] : memref<1x128xf32, #tpu.memory_space<vmem>>, vector<1x128xf32>
    %509 = arith.addf %507, %508 : vector<1x128xf32>
    %cst_182 = arith.constant 0.000000e+00 : f32
    %510 = vector.broadcast %cst_182 : f32 to vector<1x128xf32>
    %511 = arith.maximumf %509, %510 : vector<1x128xf32>
    %c0_183 = arith.constant 0 : index
    %c0_184 = arith.constant 0 : index
    %512 = vector.load %arg29[%c0_183, %c0_184] : memref<128x128xbf16, #tpu.memory_space<vmem>>, vector<128x128xbf16>
    %513 = arith.truncf %511 : vector<1x128xf32> to vector<1x128xbf16>
    %cst_185 = arith.constant dense<0.000000e+00> : vector<1x128xf32>
    %514 = tpu.matmul %513, %512, %cst_185 {dimension_numbers = #tpu.dot_dimension_numbers<[1], [0], [0], [1], [0, 0, 1, 1], [], []>} : vector<1x128xbf16>, vector<128x128xbf16>, vector<1x128xf32> -> vector<1x128xf32>
    %c0_186 = arith.constant 0 : index
    %c0_187 = arith.constant 0 : index
    %515 = vector.load %arg30[%c0_186, %c0_187] : memref<1x128xf32, #tpu.memory_space<vmem>>, vector<1x128xf32>
    %516 = arith.addf %514, %515 : vector<1x128xf32>
    %c0_188 = arith.constant 0 : index
    %c0_189 = arith.constant 0 : index
    %c0_190 = arith.constant 0 : index
    %517 = vector.load %arg32[%c0_188, %c0_189, %c0_190] : memref<1x1x128xf32, #tpu.memory_space<vmem>>, vector<1x1x128xf32>
    %518 = vector.shape_cast %517 : vector<1x1x128xf32> to vector<1x128xf32>
    %519 = vector.shape_cast %516 : vector<1x128xf32> to vector<1x1x128xf32>
    tpu.vector_store %arg32[%c0_188, %c0_189, %c0_190], %519 {strides = array<i32>} : memref<1x1x128xf32, #tpu.memory_space<vmem>>, vector<1x1x128xf32>,
    return
  }
  func.func @transform_0(%arg0: i32) -> (i32, i32, i32) {
    %c0_i32 = arith.constant 0 : i32
    %c0_i32_0 = arith.constant 0 : i32
    %c0_i32_1 = arith.constant 0 : i32
    return %arg0, %c0_i32, %c0_i32_0 : i32, i32, i32
  }
  func.func @transform_1(%arg0: i32) -> (i32, i32, i32) {
    %c0_i32 = arith.constant 0 : i32
    %c0_i32_0 = arith.constant 0 : i32
    %c0_i32_1 = arith.constant 0 : i32
    return %arg0, %c0_i32, %c0_i32_0 : i32, i32, i32
  }
  func.func @transform_2(%arg0: i32) -> (i32, i32, i32) {
    %c0_i32 = arith.constant 0 : i32
    %c0_i32_0 = arith.constant 0 : i32
    %c0_i32_1 = arith.constant 0 : i32
    return %arg0, %c0_i32, %c0_i32_0 : i32, i32, i32
  }
  func.func @transform_3(%arg0: i32) -> (i32, i32, i32) {
    %c0_i32 = arith.constant 0 : i32
    %c0_i32_0 = arith.constant 0 : i32
    %c0_i32_1 = arith.constant 0 : i32
    return %arg0, %c0_i32, %c0_i32_0 : i32, i32, i32
  }
  func.func @transform_4(%arg0: i32) -> (i32, i32) {
    %c0_i32 = arith.constant 0 : i32
    %c0_i32_0 = arith.constant 0 : i32
    %c0_i32_1 = arith.constant 0 : i32
    return %c0_i32, %c0_i32_0 : i32, i32
  }
  func.func @transform_5(%arg0: i32) -> (i32, i32) {
    %c0_i32 = arith.constant 0 : i32
    %c0_i32_0 = arith.constant 0 : i32
    %c0_i32_1 = arith.constant 0 : i32
    return %c0_i32, %c0_i32_0 : i32, i32
  }
  func.func @transform_6(%arg0: i32) -> (i32, i32) {
    %c0_i32 = arith.constant 0 : i32
    %c0_i32_0 = arith.constant 0 : i32
    %c0_i32_1 = arith.constant 0 : i32
    return %c0_i32, %c0_i32_0 : i32, i32
  }
  func.func @transform_7(%arg0: i32) -> (i32, i32) {
    %c0_i32 = arith.constant 0 : i32
    %c0_i32_0 = arith.constant 0 : i32
    %c0_i32_1 = arith.constant 0 : i32
    return %c0_i32, %c0_i32_0 : i32, i32
  }
  func.func @transform_8(%arg0: i32) -> (i32, i32) {
    %c0_i32 = arith.constant 0 : i32
    %c0_i32_0 = arith.constant 0 : i32
    %c0_i32_1 = arith.constant 0 : i32
    return %c0_i32, %c0_i32_0 : i32, i32
  }
  func.func @transform_9(%arg0: i32) -> (i32, i32) {
    %c0_i32 = arith.constant 0 : i32
    %c0_i32_0 = arith.constant 0 : i32
    %c0_i32_1 = arith.constant 0 : i32
    return %c0_i32, %c0_i32_0 : i32, i32
  }
  func.func @transform_10(%arg0: i32) -> (i32, i32) {
    %c0_i32 = arith.constant 0 : i32
    %c0_i32_0 = arith.constant 0 : i32
    %c0_i32_1 = arith.constant 0 : i32
    return %c0_i32, %c0_i32_0 : i32, i32
  }
  func.func @transform_11(%arg0: i32) -> (i32, i32) {
    %c0_i32 = arith.constant 0 : i32
    %c0_i32_0 = arith.constant 0 : i32
    %c0_i32_1 = arith.constant 0 : i32
    return %c0_i32, %c0_i32_0 : i32, i32
  }
  func.func @transform_12(%arg0: i32) -> (i32, i32) {
    %c0_i32 = arith.constant 0 : i32
    %c0_i32_0 = arith.constant 0 : i32
    %c0_i32_1 = arith.constant 0 : i32
    return %c0_i32, %c0_i32_0 : i32, i32
  }
  func.func @transform_13(%arg0: i32) -> (i32, i32) {
    %c0_i32 = arith.constant 0 : i32
    %c0_i32_0 = arith.constant 0 : i32
    %c0_i32_1 = arith.constant 0 : i32
    return %c0_i32, %c0_i32_0 : i32, i32
  }
  func.func @transform_14(%arg0: i32) -> (i32, i32) {
    %c0_i32 = arith.constant 0 : i32
    %c0_i32_0 = arith.constant 0 : i32
    %c0_i32_1 = arith.constant 0 : i32
    return %c0_i32, %c0_i32_0 : i32, i32
  }
  func.func @transform_15(%arg0: i32) -> (i32, i32) {
    %c0_i32 = arith.constant 0 : i32
    %c0_i32_0 = arith.constant 0 : i32
    %c0_i32_1 = arith.constant 0 : i32
    return %c0_i32, %c0_i32_0 : i32, i32
  }
  func.func @transform_16(%arg0: i32) -> (i32, i32) {
    %c0_i32 = arith.constant 0 : i32
    %c0_i32_0 = arith.constant 0 : i32
    %c0_i32_1 = arith.constant 0 : i32
    return %c0_i32, %c0_i32_0 : i32, i32
  }
  func.func @transform_17(%arg0: i32) -> (i32, i32) {
    %c0_i32 = arith.constant 0 : i32
    %c0_i32_0 = arith.constant 0 : i32
    %c0_i32_1 = arith.constant 0 : i32
    return %c0_i32, %c0_i32_0 : i32, i32
  }
  func.func @transform_18(%arg0: i32) -> (i32, i32) {
    %c0_i32 = arith.constant 0 : i32
    %c0_i32_0 = arith.constant 0 : i32
    %c0_i32_1 = arith.constant 0 : i32
    return %c0_i32, %c0_i32_0 : i32, i32
  }
  func.func @transform_19(%arg0: i32) -> (i32, i32) {
    %c0_i32 = arith.constant 0 : i32
    %c0_i32_0 = arith.constant 0 : i32
    %c0_i32_1 = arith.constant 0 : i32
    return %c0_i32, %c0_i32_0 : i32, i32
  }
  func.func @transform_20(%arg0: i32) -> (i32, i32) {
    %c0_i32 = arith.constant 0 : i32
    %c0_i32_0 = arith.constant 0 : i32
    %c0_i32_1 = arith.constant 0 : i32
    return %c0_i32, %c0_i32_0 : i32, i32
  }
  func.func @transform_21(%arg0: i32) -> (i32, i32) {
    %c0_i32 = arith.constant 0 : i32
    %c0_i32_0 = arith.constant 0 : i32
    %c0_i32_1 = arith.constant 0 : i32
    return %c0_i32, %c0_i32_0 : i32, i32
  }
  func.func @transform_22(%arg0: i32) -> (i32, i32) {
    %c0_i32 = arith.constant 0 : i32
    %c0_i32_0 = arith.constant 0 : i32
    %c0_i32_1 = arith.constant 0 : i32
    return %c0_i32, %c0_i32_0 : i32, i32
  }
  func.func @transform_23(%arg0: i32) -> (i32, i32) {
    %c0_i32 = arith.constant 0 : i32
    %c0_i32_0 = arith.constant 0 : i32
    %c0_i32_1 = arith.constant 0 : i32
    return %c0_i32, %c0_i32_0 : i32, i32
  }
  func.func @transform_24(%arg0: i32) -> (i32, i32) {
    %c0_i32 = arith.constant 0 : i32
    %c0_i32_0 = arith.constant 0 : i32
    %c0_i32_1 = arith.constant 0 : i32
    return %c0_i32, %c0_i32_0 : i32, i32
  }
  func.func @transform_25(%arg0: i32) -> (i32, i32) {
    %c0_i32 = arith.constant 0 : i32
    %c0_i32_0 = arith.constant 0 : i32
    %c0_i32_1 = arith.constant 0 : i32
    return %c0_i32, %c0_i32_0 : i32, i32
  }
  func.func @transform_26(%arg0: i32) -> (i32, i32) {
    %c0_i32 = arith.constant 0 : i32
    %c0_i32_0 = arith.constant 0 : i32
    %c0_i32_1 = arith.constant 0 : i32
    return %c0_i32, %c0_i32_0 : i32, i32
  }
  func.func @transform_27(%arg0: i32) -> (i32, i32) {
    %c0_i32 = arith.constant 0 : i32
    %c0_i32_0 = arith.constant 0 : i32
    %c0_i32_1 = arith.constant 0 : i32
    return %c0_i32, %c0_i32_0 : i32, i32
  }
  func.func @transform_28(%arg0: i32) -> (i32, i32) {
    %c0_i32 = arith.constant 0 : i32
    %c0_i32_0 = arith.constant 0 : i32
    %c0_i32_1 = arith.constant 0 : i32
    return %c0_i32, %c0_i32_0 : i32, i32
  }
  func.func @transform_29(%arg0: i32) -> (i32, i32) {
    %c0_i32 = arith.constant 0 : i32
    %c0_i32_0 = arith.constant 0 : i32
    %c0_i32_1 = arith.constant 0 : i32
    return %c0_i32, %c0_i32_0 : i32, i32
  }
  func.func @transform_30(%arg0: i32) -> (i32, i32, i32) {
    %c0_i32 = arith.constant 0 : i32
    %c0_i32_0 = arith.constant 0 : i32
    %c0_i32_1 = arith.constant 0 : i32
    return %arg0, %c0_i32, %c0_i32_0 : i32, i32, i32
  }
  func.func @transform_31(%arg0: i32) -> (i32, i32, i32) {
    %c0_i32 = arith.constant 0 : i32
    %c0_i32_0 = arith.constant 0 : i32
    %c0_i32_1 = arith.constant 0 : i32
    return %arg0, %c0_i32, %c0_i32_0 : i32, i32, i32
  }
}

</mosaic_0001>

<bundles_post_ra>
// kernel: blip_nlvr_forward.5
= control target key start
LH: loop header
LB: loop body
LE: loop exit
PB: predicated region body
PF: predicated region fallthrough
CT: control target
= control target key end

     0   :  { %s450_s12 = smov 0   ;;  %s514_s0 = inlined_call_operand.vmem [shape: f32[16,192], index: 0, kind: input, shape index: {}]   ;;  %s515_s1 = inlined_call_operand.vmem [shape: bf16[192,128], index: 1, kind: input, shape index: {}]   ;;  %s516_s2 = inlined_call_operand.vmem [shape: f32[1,128], index: 2, kind: input, shape index: {}]   ;;  %s517_s3 = inlined_call_operand.vmem [shape: f32[16,128], index: 3, kind: output, shape index: {}]  }
   0x1 LB: > { %s375_s13 = sadd.s32 4294967295, %s427_s12   ;;  %p379_p0 = scmp.ge.s32.totalorder %s427_s12, 1  ;;  %s427_s12 = sphi %s450_s12, %s13_s12  }
   0x2   : > { %p137_p1 = scmp.lt.s32.totalorder %s427_s12, 3 }
   0x4   : > { %p138_p2 = pnand %p379_p0, %p137_p1 }
   0x5   : > { %v409_v0 = vld [vmem:[%s515_s1] sm:$0xff] (!%p138_p2)   ;;  %v429_v1 = vmov (!%p138_p2), 0   ;;  %p160_p3 = scmp.lt.s32.totalorder (!%p138_p2), %s375_s13, 1  ;;  %v410_v2 = vld [vmem:[%s515_s1 + $0x8] sm:$0xff] (!%p138_p2)   ;;  %v411_v3 = vld [vmem:[%s515_s1 + $0x10] sm:$0xff] (!%p138_p2)   ;;  %vm277_vm0 = vcmask (!%p138_p2), 523264  }
   0x6   : > { %141 = sbr.rel (%p138_p2) target bundleno = 269 (0x10d), region = 32  ;;  %281 = vmatprep.subr.bf16.mxu0 (!%p138_p2), %v429_v1  ;;  %v412_v4 = vld [vmem:[%s515_s1 + $0x18] sm:$0xff] (!%p138_p2)   ;;  %v413_v7 = vld [vmem:[%s515_s1 + $0x20] sm:$0xff] (!%p138_p2)   ;;  %v414_v8 = vld [vmem:[%s515_s1 + $0x28] sm:$0xff] (!%p138_p2)  }
   0x7   : > { %282 = vmatpush1.bf16.msra.mxu0 (!%p138_p2), %v409_v0  ;;  %v415_v9 = vld [vmem:[%s515_s1 + $0x30] sm:$0xff] (!%p138_p2)   ;;  %v416_v10 = vld [vmem:[%s515_s1 + $0x38] sm:$0xff] (!%p138_p2)   ;;  %v417_v11 = vld [vmem:[%s515_s1 + $0x40] sm:$0xff] (!%p138_p2)  }
   0x8   : > { %283 = vmatprep.subr.bf16.mxu0 (!%p138_p2), %v429_v1  ;;  %v418_v12 = vld [vmem:[%s515_s1 + $0x48] sm:$0xff] (!%p138_p2)   ;;  %v419_v13 = vld [vmem:[%s515_s1 + $0x50] sm:$0xff] (!%p138_p2)   ;;  %v420_v14 = vld [vmem:[%s515_s1 + $0x58] sm:$0xff] (!%p138_p2)  }
   0x9   : > { %v383_v17 = vld [vmem:[%s516_s2] ss:$0 sm:$0xff] (!%p138_p2) }
   0xb   : > { %284 = vmatpush1.bf16.msra.mxu0 (!%p138_p2), %v410_v2 }
   0xc   : > { %285 = vmatprep.subr.bf16.mxu0 (!%p138_p2), %v429_v1 }
   0xd   : > { %s519_s13 = smov (!%p160_p3, %s375_s13), 1 }
   0xe   : > { %s399_s20 = sshll.u32 %s519_s13, 4  ;;  %s382_s17 = sshll.u32 %s519_s13, 3 }
   0xf   : > { %s473_s23 = scalar_lea.vmem %s514_s0, %s399_s20  ;;  %286 = vmatpush1.bf16.msra.mxu0 %v411_v3  ;;  %s168_s22 = scalar_lea.vmem %s517_s3, %s382_s17 }
  0x10   : > { %287 = vmatprep.subr.bf16.mxu0 %v429_v1  ;;  %v171_v5 = vld [vmem:[%s473_s23 + $0x8] sm:$0xff]  ;;  %v170_v15 = vld [vmem:[%s473_s23] sm:$0xff] }
  0x11   : > { %v197_v6 = vpack.c.bf16 %v171_v5, %v171_v5  ;;  %v196_v16 = vpack.c.bf16 %v170_v15, %v170_v15 }
  0x13   : > { %288 = vmatpush1.bf16.msra.mxu0 %v412_v4  ;;  %396 = vmatprep.mubr.msk.bf16.mxu0 %vm277_vm0, %v197_v6 }
  0x14   : > { %289 = vmatprep.subr.bf16.mxu0 %v429_v1 }
  0x17   : > { %290 = vmatpush1.bf16.msra.mxu0 %v413_v7 }
  0x18   : > { %291 = vmatprep.subr.bf16.mxu0 %v429_v1 }
  0x1b   : > { %292 = vmatpush1.bf16.msra.mxu0 %v414_v8 }
  0x1c   : > { %293 = vmatprep.subr.bf16.mxu0 %v429_v1 }
  0x1f   : > { %294 = vmatpush1.bf16.msra.mxu0 %v415_v9 }
  0x20   : > { %295 = vmatprep.subr.bf16.mxu0 %v429_v1 }
  0x23   : > { %296 = vmatpush1.bf16.msra.mxu0 %v416_v10 }
  0x24   : > { %297 = vmatprep.subr.bf16.mxu0 %v429_v1 }
  0x27   : > { %298 = vmatpush1.bf16.msra.mxu0 %v417_v11 }
  0x28   : > { %299 = vmatprep.subr.bf16.mxu0 %v429_v1 }
  0x2b   : > { %300 = vmatpush1.bf16.msra.mxu0 %v418_v12 }
  0x2c   : > { %301 = vmatprep.subr.bf16.mxu0 %v429_v1 }
  0x2f   : > { %302 = vmatpush1.bf16.msra.mxu0 %v419_v13 }
  0x30   : > { %303 = vmatprep.subr.bf16.mxu0 %v429_v1 }
  0x33   : > { %304 = vmatpush1.bf16.msra.mxu0 %v420_v14 }
  0x36   : > { %314 = vmatmul.mubr.bf16.vlgmr.msra.gmra.mrb[0].mxu0 %v196_v16 }
 0x109   : > { %v315_v18 = vpop.f32.mrb[0].mxu0 }
 0x10a   : > { %v316_v19 = vadd.f32 %v383_v17, %v315_v18  ;;  %v317_v20 = vpop.f32.mrb[1].mxu0 }
 0x10b   : > { %v318_v21 = vpop.f32.mrb[2].mxu0 }
 0x10c   : > { %321 = vst [vmem:[%s168_s22] sm:$0xff] %v316_v19  ;;  %v319_v22 = vpop.f32.mrb[3].mxu0 }
 0x10d PF: > { %s13_s12 = sadd.s32 1, %s427_s12  }
 0x10e   : > { %p10_p4 = scmp.ge.s32.totalorder %s13_s12, 4  }
 0x110   :  { %12 = sbr.rel (!%p10_p4) target bundleno = 1 (0x1), region = 62 }

// kernel: blip_nlvr_forward.6
= control target key start
LH: loop header
LB: loop body
LE: loop exit
PB: predicated region body
PF: predicated region fallthrough
CT: control target
= control target key end

     0   :  { %s2589_s25 = smov 0   ;;  %s3031_s0 = inlined_call_operand.vmem [shape: f32[4,5,128], index: 0, kind: input, shape index: {}]   ;;  %s3032_s1 = inlined_call_operand.vmem [shape: f32[1,128], index: 1, kind: input, shape index: {}]   ;;  %s3033_s2 = inlined_call_operand.vmem [shape: f32[1,128], index: 2, kind: input, shape index: {}]   ;;  %s3034_s3 = inlined_call_operand.vmem [shape: bf16[128,384], index: 3, kind: input, shape index: {}]   ;;  %s3035_s4 = inlined_call_operand.vmem [shape: f32[1,384], index: 4, kind: input, shape index: {}]   ;;  %s3036_s5 = inlined_call_operand.vmem [shape: bf16[128,128], index: 5, kind: input, shape index: {}]   ;;  %s3037_s6 = inlined_call_operand.vmem [shape: f32[1,128], index: 6, kind: input, shape index: {}]   ;;  %s3038_s7 = inlined_call_operand.vmem [shape: f32[1,128], index: 7, kind: input, shape index: {}]   ;;  %s3039_s8 = inlined_call_operand.vmem [shape: f32[1,128], index: 8, kind: input, shape index: {}]   ;;  %s3040_s9 = inlined_call_operand.vmem [shape: bf16[128,512], index: 9, kind: input, shape index: {}]   ;;  %s3041_s10 = inlined_call_operand.vmem [shape: f32[1,512], index: 10, kind: input, shape index: {}]   ;;  %s3042_s11 = inlined_call_operand.vmem [shape: bf16[512,128], index: 11, kind: input, shape index: {}]   ;;  %s3043_s12 = inlined_call_operand.vmem [shape: f32[1,128], index: 12, kind: input, shape index: {}]   ;;  %s3044_s13 = inlined_call_operand.vmem [shape: f32[4,5,128], index: 13, kind: output, shape index: {}]  }
   0x1 LB: > { %s2050_s26 = sadd.s32 4294967295, %s2513_s25   ;;  %p2054_p0 = scmp.ge.s32.totalorder %s2513_s25, 1  ;;  %s2513_s25 = sphi %s2589_s25, %s23_s25  }
   0x2   : > { %p386_p1 = scmp.lt.s32.totalorder %s2513_s25, 5 }
   0x4   : > { %p387_p2 = pnand %p2054_p0, %p386_p1 }
   0x5   : > { %p428_p3 = scmp.lt.s32.totalorder (!%p387_p2), %s2050_s26, 3  ;;  %vm440_vm0 = vcmask (!%p387_p2), 1044480   ;;  %v2359_v2 = vld [vmem:[%s3034_s3 + $0x4] ss:$12 sps:$4 sm:$0xff] (!%p387_p2)   ;;  %v2361_v3 = vld [vmem:[%s3034_s3] ss:$12 sps:$4 sm:$0xff] (!%p387_p2)   ;;  %v504_v43 = vlaneseq (!%p387_p2) }
   0x6   : > { %390 = sbr.rel (%p387_p2) target bundleno = 2346 (0x92a), region = 72  ;;  %v2515_v4 = vmov (!%p387_p2), 0.0   ;;  %v2362_v5 = vld [vmem:[%s3034_s3 + $0x8] ss:$12 sps:$4 sm:$0xff] (!%p387_p2)   ;;  %v2365_v7 = vld [vmem:[%s3034_s3 + $0x18] ss:$12 sps:$4 sm:$0xff] (!%p387_p2)   ;;  %647 = vmatprep.subr.bf16.mxu0 (!%p387_p2), %v2359_v2 }
   0x7   : > { %2247 = vmatprep.subr.bf16.mxu1 (!%p387_p2), %v2515_v4  ;;  %v2363_v6 = vld [vmem:[%s3034_s3 + $0x1c] ss:$12 sps:$4 sm:$0xff] (!%p387_p2)   ;;  %v2366_v8 = vld [vmem:[%s3034_s3 + $0x20] ss:$12 sps:$4 sm:$0xff] (!%p387_p2)   ;;  %648 = vmatpush1.bf16.msra.mxu0 (!%p387_p2), %v2361_v3  ;;  %v2370_v16 = vld [vmem:[%s3034_s3 + $0x38] ss:$12 sps:$4 sm:$0xff] (!%p387_p2)  }
   0x8   : > { %v2367_v9 = vld [vmem:[%s3034_s3 + $0x34] ss:$12 sps:$4 sm:$0xff] (!%p387_p2)   ;;  %2248 = vmatpush3.bf16.msra.mxu1 (!%p387_p2), %v2362_v5  ;;  %649 = vmatprep.subr.bf16.mxu0 (!%p387_p2), %v2363_v6  ;;  %v2369_v15 = vld [vmem:[%s3034_s3 + $0x30] ss:$12 sps:$4 sm:$0xff] (!%p387_p2)   ;;  %v2371_v17 = vld [vmem:[%s3034_s3 + $0x4c] ss:$12 sps:$4 sm:$0xff] (!%p387_p2)  }
   0x9   : > { %2249 = vmatprep.subr.bf16.mxu1 (!%p387_p2), %v2515_v4  ;;  %v2373_v18 = vld [vmem:[%s3034_s3 + $0x48] ss:$12 sps:$4 sm:$0xff] (!%p387_p2)   ;;  %v2374_v19 = vld [vmem:[%s3034_s3 + $0x50] ss:$12 sps:$4 sm:$0xff] (!%p387_p2)   ;;  %v2377_v21 = vld [vmem:[%s3034_s3 + $0x60] ss:$12 sps:$4 sm:$0xff] (!%p387_p2)  }
   0xa   : > { %v2375_v20 = vld [vmem:[%s3034_s3 + $0x64] ss:$12 sps:$4 sm:$0xff] (!%p387_p2)   ;;  %v2378_v22 = vld [vmem:[%s3034_s3 + $0x68] ss:$12 sps:$4 sm:$0xff] (!%p387_p2)   ;;  %v2382_v25 = vld [vmem:[%s3034_s3 + $0x80] ss:$12 sps:$4 sm:$0xff] (!%p387_p2)  }
   0xb   : > { %650 = vmatpush1.bf16.msra.mxu0 (!%p387_p2), %v2365_v7  ;;  %v2379_v23 = vld [vmem:[%s3034_s3 + $0x7c] ss:$12 sps:$4 sm:$0xff] (!%p387_p2)   ;;  %v2381_v24 = vld [vmem:[%s3034_s3 + $0x78] ss:$12 sps:$4 sm:$0xff] (!%p387_p2)   ;;  %v2383_v26 = vld [vmem:[%s3034_s3 + $0x94] ss:$12 sps:$4 sm:$0xff] (!%p387_p2)  }
   0xc   : > { %2250 = vmatpush3.bf16.msra.mxu1 (!%p387_p2), %v2366_v8  ;;  %651 = vmatprep.subr.bf16.mxu0 (!%p387_p2), %v2367_v9  ;;  %v2516_v27 = vmov (!%p387_p2), 0   ;;  %vm2517_vm1 = vmmov (!%p387_p2), 0   ;;  %v2385_v28 = vld [vmem:[%s3034_s3 + $0x90] ss:$12 sps:$4 sm:$0xff] (!%p387_p2)   ;;  %v2386_v29 = vld [vmem:[%s3034_s3 + $0x98] ss:$12 sps:$4 sm:$0xff] (!%p387_p2)  }
   0xd   : > { %s3046_s26 = smov (!%p428_p3, %s2050_s26), 3  ;;  %2251 = vmatprep.subr.bf16.mxu1 %v2515_v4  ;;  %679 = vmatprep.mubr.bf16.mxu0 %v2516_v27  ;;  %v2387_v30 = vld [vmem:[%s3034_s3 + $0xac] ss:$12 sps:$4 sm:$0xff]   ;;  %v2389_v31 = vld [vmem:[%s3034_s3 + $0xa8] ss:$12 sps:$4 sm:$0xff]   ;;  %v2706_v44 = vshrl.u32 %v504_v43, 7 }
   0xe   : > { %s2055_s27 = sshll.u32 %s3046_s26, 3  ;;  %2263 = vmatprep.mubr.msk.bf16.mxu1 %vm2517_vm1, %v2515_v4  ;;  %v2390_v32 = vld [vmem:[%s3034_s3 + $0xb0] ss:$12 sps:$4 sm:$0xff]   ;;  %v2057_v37 = vld [vmem:[%s3032_s1] ss:$0 sm:$0xff]  ;;  %v729_v45 = vand.u32 127, %v504_v43 }
   0xf   : > { %s431_s30 = scalar_lea.vmem %s3031_s0, %s2055_s27  ;;  %652 = vmatpush1.bf16.msra.mxu0 %v2369_v15  ;;  %v2058_v39 = vld [vmem:[%s3033_s2] ss:$0 sm:$0xff]  ;;  %v514_v46 = vsub.s32 2, %v2706_v44  ;;  %v510_v48 = vsub.s32 1, %v2706_v44  ;;  %vm860_vm7 = vcmask 1041408   ;;  %v506_v51 = vsub.s32 0, %v2706_v44  ;;  %s435_s14 = scalar_lea.vmem %s3044_s13, %s2055_s27 }
  0x10   : > { %v2605_v0 = vld [vmem:[%s431_s30] sm:$0x1f]  ;;  %2252 = vmatpush3.bf16.msra.mxu1 %v2370_v16  ;;  %653 = vmatprep.subr.bf16.mxu0 %v2371_v17  ;;  %vm953_vm2 = vcmp.ge.s32.totalorder %v729_v45, 64  ;;  %vm954_vm3 = vcmp.lt.s32.totalorder %v729_v45, 96  ;;  %vm732_vm4 = vcmp.lt.s32.totalorder %v729_v45, 32  ;;  %vm1062_vm6 = vcmp.ge.s32.totalorder %v729_v45, 96 }
  0x11   : > { %v441_v1 = vsel %vm440_vm0, %v2605_v0, 0.0  ;;  %2253 = vmatprep.subr.bf16.mxu1 %v2515_v4  ;;  %v502_v47 = vld [vmem:[%s3035_s4] sm:$0x7]  ;;  %vm955_vm5 = vmand %vm953_vm2, %vm954_vm3  ;;  %v2083_v54 = vsel %vm732_vm4, 1.0, %v2515_v4  ;;  %vm794_vm8 = vcmp.ge.s32.totalorder %v729_v45, 32  ;;  %vm795_vm9 = vcmp.lt.s32.totalorder %v729_v45, 64 }
  0x12   : > { %442 = vadd.xlane.f32.xlu0 %v441_v1  ;;  %v515_v49 = vrot.slane %v502_v47, %v514_v46  ;;  %v511_v50 = vrot.slane %v502_v47, %v510_v48  ;;  %v2087_v55 = vsel %vm955_vm5, 1.0, %v2515_v4  ;;  %v2089_v57 = vsel %vm1062_vm6, 1.0, %v2515_v4  ;;  %vm796_vm11 = vmand %vm794_vm8, %vm795_vm9 }
  0x13   : > { %654 = vmatpush1.bf16.msra.mxu0 %v2373_v18  ;;  %vm861_vm10 = vcmask 1042432   ;;  %v2518_v60 = vmov 65535   ;;  %v2084_v17 = vsel %vm796_vm11, 1.0, %v2515_v4  ;;  %vm781_vm12 = vcmask 36864  }
  0x14   : > { %2254 = vmatpush3.bf16.msra.mxu1 %v2374_v19  ;;  %655 = vmatprep.subr.bf16.mxu0 %v2375_v20  ;;  %v862_v61 = vsel %vm860_vm7, 4294967295, %v2518_v60  ;;  %vm856_vm13 = vcmask 39936  }
  0x15   : > { %2255 = vmatprep.subr.bf16.mxu1 %v2515_v4 }
  0x17   : > { %656 = vmatpush1.bf16.msra.mxu0 %v2377_v21 }
  0x18   : > { %2256 = vmatpush3.bf16.msra.mxu1 %v2378_v22  ;;  %657 = vmatprep.subr.bf16.mxu0 %v2379_v23 }
  0x19   : > { %2257 = vmatprep.subr.bf16.mxu1 %v2515_v4 }
  0x1b   : > { %658 = vmatpush1.bf16.msra.mxu0 %v2381_v24 }
  0x1c   : > { %2258 = vmatpush3.bf16.msra.mxu1 %v2382_v25  ;;  %659 = vmatprep.subr.bf16.mxu0 %v2383_v26 }
  0x1d   : > { %2259 = vmatprep.subr.bf16.mxu1 %v2515_v4 }
  0x1f   : > { %660 = vmatpush1.bf16.msra.mxu0 %v2385_v28 }
  0x20   : > { %2260 = vmatpush3.bf16.msra.mxu1 %v2386_v29  ;;  %661 = vmatprep.subr.bf16.mxu0 %v2387_v30 }
  0x21   : > { %2261 = vmatprep.subr.bf16.mxu1 %v2515_v4 }
  0x23   : > { %662 = vmatpush1.bf16.msra.mxu0 %v2389_v31 }
  0x24   : > { %2262 = vmatpush3.bf16.msra.mxu1 %v2390_v32  ;;  %2267 = vmatprep.subr.bf16.mxu0 %v2515_v4 }
  0x25   : > { %2291 = vmatprep.subr.bf16.mxu1 %v2515_v4 }
  0x9f   : > { %v443_v10 = vpop.xlane.xlu0 %442 }
  0xa0   : > { %v445_v11 = vmul.f32 0.0078125, %v443_v10  ;;  %v863_v10 = vsel %vm861_vm10, %v862_v61, 0 }
  0xa2   : > { %v446_v12 = vsub.f32 %v2605_v0, %v445_v11  ;;  %v507_v11 = vrot.slane %v502_v47, %v506_v51 }
  0xa4   : > { %v447_v13 = vmul.f32 %v446_v12, %v446_v12 }
  0xa6   : > { %v448_v14 = vsel %vm440_vm0, %v447_v13, 0.0 }
  0xa7   : > { %449 = vadd.xlane.f32.xlu0 %v448_v14 }
 0x134   : > { %v450_v33 = vpop.xlane.xlu0 %449 }
 0x135   : > { %v451_v34 = vmul.f32 0.0078125, %v450_v33 }
 0x137   : > { %v452_v35 = vadd.f32 1e-06, %v451_v34 }
 0x139   : > { %2479 = vrsqrt.f32 %v452_v35 }
 0x143   : > { %v2480_v36 = vpop.eup %2479 }
 0x144   : > { %v454_v38 = vmul.f32 %v2480_v36, %v446_v12 }
 0x146   : > { %v461_v40 = vmul.f32 %v2057_v37, %v454_v38 }
 0x148   : > { %v468_v41 = vadd.f32 %v2058_v39, %v461_v40 }
 0x14a   : > { %v501_v42 = vpack.c.bf16 %v468_v41, %v468_v41 }
 0x14c   : > { %680 = vmatmul.mubr.bf16.vlgmr.msra.gmra.mrb[0].mxu0 %v501_v42  ;;  %2264 = vmatmul.mubr.bf16.vlgmr.msra.gmra.mrb[0].mxu1 %v501_v42 }
 0x14d   : > { %2269 = vmatprep.mubr.msk.bf16.mxu0 %vm2517_vm1, %v2515_v4  ;;  %2293 = vmatprep.mubr.msk.bf16.mxu1 %vm2517_vm1, %v2515_v4 }
 0x21f   : > { %v681_v52 = vpop.f32.mrb[0].mxu0  ;;  %v722_v53 = vpop.f32.mrb[0].mxu1 }
 0x220   : > { %v723_v56 = vadd.f32 %v722_v53, %v515_v49  ;;  %v683_v58 = vpop.f32.mrb[1].mxu0  ;;  %v2265_v59 = vpop.f32.mrb[1].mxu1  ;;  %v682_v21 = vadd.f32 %v681_v52, %v507_v11 }
 0x221   : > { %v684_v62 = vadd.f32 %v683_v58, %v511_v50  ;;  %v685_v63 = vpop.f32.mrb[2].mxu0  ;;  %v725_v1 = vpop.f32.mrb[2].mxu1 }
 0x222   : > { %v738_v2 = vmul.f32 %v2083_v54, %v723_v56  ;;  %v960_v3 = vmul.f32 %v2087_v55, %v723_v56  ;;  %v686_v5 = vpop.f32.mrb[3].mxu0  ;;  %v2266_v6 = vpop.f32.mrb[3].mxu1  ;;  %v1069_v7 = vmul.f32 %v2089_v57, %v723_v56  ;;  %v730_v24 = vpack.c.bf16 %v682_v21, %v682_v21  ;;  %v2392_v21 = vld [vmem:[%s3036_s5 + $0x8] sm:$0xff]  }
 0x223   : > { %v736_v8 = vmul.f32 %v2083_v54, %v684_v62  ;;  %v958_v9 = vmul.f32 %v2087_v55, %v684_v62  ;;  %v799_v22 = vmul.f32 %v2084_v17, %v684_v62  ;;  %v1067_v23 = vmul.f32 %v2089_v57, %v684_v62 }
 0x224   : > { %v739_v12 = vpack.c.bf16 %v738_v2, %v738_v2  ;;  %v961_v13 = vpack.c.bf16 %v960_v3, %v960_v3  ;;  %v1070_v14 = vpack.c.bf16 %v1069_v7, %v1069_v7  ;;  %v801_v25 = vmul.f32 %v2084_v17, %v723_v56  ;;  %v2391_v17 = vld [vmem:[%s3036_s5] sm:$0xff]  }
 0x225   : > { %v737_v15 = vpack.c.bf16 %v736_v8, %v736_v8  ;;  %v959_v16 = vpack.c.bf16 %v958_v9, %v958_v9  ;;  %v800_v26 = vpack.c.bf16 %v799_v22, %v799_v22  ;;  %v1068_v28 = vpack.c.bf16 %v1067_v23, %v1067_v23  ;;  %v2393_v22 = vld [vmem:[%s3036_s5 + $0x10] sm:$0xff]   ;;  %v2394_v23 = vld [vmem:[%s3036_s5 + $0x18] sm:$0xff]  }
 0x226   : > { %v2726_v18 = vand.u32 %v863_v10, %v739_v12  ;;  %v2728_v19 = vand.u32 %v961_v13, %v863_v10  ;;  %v2730_v20 = vand.u32 %v1070_v14, %v863_v10  ;;  %v802_v29 = vpack.c.bf16 %v801_v25, %v801_v25  ;;  %v2396_v25 = vld [vmem:[%s3036_s5 + $0x28] sm:$0xff]  }
 0x227   : > { %2268 = vmatpush3.bf16.xpose.msra.mxu0 %v737_v15  ;;  %2292 = vmatpush3.bf16.xpose.msra.mxu1 %v959_v16 }
 0x228   : > { %2273 = vmatprep.subr.bf16.mxu0 %v2515_v4  ;;  %2303 = vmatprep.subr.bf16.mxu1 %v2515_v4  ;;  %v865_v30 = vand.u32 %v863_v10, %v802_v29 }
 0x22e   : > { %2270 = vmatmul.mubr.bf16.vlgmr.msra.gmra.mrb[4].mxu0 %v730_v24  ;;  %2294 = vmatmul.mubr.bf16.vlgmr.msra.gmra.mrb[4].mxu1 %v730_v24 }
 0x22f   : > { %2274 = vmatpush3.bf16.xpose.msra.mxu0 %v800_v26  ;;  %2304 = vmatpush3.bf16.xpose.msra.mxu1 %v1068_v28  ;;  %v2397_v26 = vld [vmem:[%s3036_s5 + $0x30] sm:$0xff]  }
 0x230   : > { %2275 = vmatprep.mubr.msk.bf16.mxu0 %vm2517_vm1, %v2515_v4  ;;  %2305 = vmatprep.mubr.msk.bf16.mxu1 %vm2517_vm1, %v2515_v4 }
 0x231   : > { %2279 = vmatprep.subr.bf16.mxu0 %v2515_v4  ;;  %2315 = vmatprep.subr.bf16.mxu1 %v2515_v4 }
 0x236   : > { %2276 = vmatmul.mubr.bf16.vlgmr.msra.gmra.mrb[8].mxu0 %v730_v24  ;;  %2306 = vmatmul.mubr.bf16.vlgmr.msra.gmra.mrb[8].mxu1 %v730_v24  ;;  %v2395_v24 = vld [vmem:[%s3036_s5 + $0x20] sm:$0xff]  }
 0x237   : > { %2280 = vmatpush3.bf16.msra.mxu0 %v865_v30  ;;  %2281 = vmatprep.mubr.msk.bf16.mxu0 %vm2517_vm1, %v2515_v4 }
 0x238   : > { %2285 = vmatprep.subr.bf16.mxu0 %v2515_v4  ;;  %2331 = vmatprep.mubr.msk.bf16.mxu1 %vm2517_vm1, %v2515_v4 }
 0x239   : > { %2316 = vmatpush3.bf16.msra.mxu1 %v2391_v17  ;;  %v2423_v17 = vld [vmem:[%s3040_s9 + $0x80] ss:$16 sps:$4 sm:$0xff]  }
 0x23a   : > { %2317 = vmatprep.subr.bf16.mxu1 %v2515_v4 }
 0x23d   : > { %2318 = vmatpush3.bf16.msra.mxu1 %v2392_v21  ;;  %v2426_v21 = vld [vmem:[%s3040_s9 + $0x88] ss:$16 sps:$4 sm:$0xff]  }
 0x23e   : > { %2319 = vmatprep.subr.bf16.mxu1 %v2515_v4 }
 0x241   : > { %2320 = vmatpush3.bf16.msra.mxu1 %v2393_v22  ;;  %v2431_v22 = vld [vmem:[%s3040_s9 + $0xa4] ss:$16 sps:$4 sm:$0xff]  }
 0x242   : > { %2321 = vmatprep.subr.bf16.mxu1 %v2515_v4 }
 0x245   : > { %2322 = vmatpush3.bf16.msra.mxu1 %v2394_v23  ;;  %v2434_v23 = vld [vmem:[%s3040_s9 + $0xac] ss:$16 sps:$4 sm:$0xff]  }
 0x246   : > { %2323 = vmatprep.subr.bf16.mxu1 %v2515_v4 }
 0x249   : > { %2324 = vmatpush3.bf16.msra.mxu1 %v2395_v24  ;;  %v2429_v24 = vld [vmem:[%s3040_s9 + $0xa0] ss:$16 sps:$4 sm:$0xff]  }
 0x24a   : > { %2325 = vmatprep.subr.bf16.mxu1 %v2515_v4 }
 0x24d   : > { %2326 = vmatpush3.bf16.msra.mxu1 %v2396_v25  ;;  %v2432_v25 = vld [vmem:[%s3040_s9 + $0xa8] ss:$16 sps:$4 sm:$0xff]  }
 0x24e   : > { %2327 = vmatprep.subr.bf16.mxu1 %v2515_v4 }
 0x251   : > { %2328 = vmatpush3.bf16.msra.mxu1 %v2397_v26  ;;  %v2437_v26 = vld [vmem:[%s3040_s9 + $0xc4] ss:$16 sps:$4 sm:$0xff]  }
 0x252   : > { %2329 = vmatprep.subr.bf16.mxu1 %v2515_v4 }
 0x301   : > { %v774_v31 = vpop.f32.mrb[4].mxu0  ;;  %v996_v32 = vpop.f32.mrb[4].mxu1 }
 0x302   : > { %v1002_v33 = vmul.f32 0.17677669, %v996_v32  ;;  %v2271_v34 = vpop.f32.mrb[5].mxu0  ;;  %v2295_v35 = vpop.f32.mrb[5].mxu1  ;;  %v780_v52 = vmul.f32 0.17677669, %v774_v31 }
 0x303   : > { %v777_v36 = vpop.f32.mrb[6].mxu0  ;;  %v999_v37 = vpop.f32.mrb[6].mxu1 }
 0x304   : > { %v2272_v38 = vpop.f32.mrb[7].mxu0  ;;  %v2296_v39 = vpop.f32.mrb[7].mxu1  ;;  %v1003_v40 = vsel %vm781_vm12, %v1002_v33, -inf  ;;  %v782_v57 = vsel %vm781_vm12, %v780_v52, -inf }
 0x305   : > { %1004 = vmax.xlane.f32.xlu0 %v1003_v40 }
 0x309   : > { %v837_v41 = vpop.f32.mrb[8].mxu0  ;;  %v1105_v42 = vpop.f32.mrb[8].mxu1 }
 0x30a   : > { %v843_v43 = vmul.f32 0.17677669, %v837_v41  ;;  %v2277_v45 = vpop.f32.mrb[9].mxu0  ;;  %v2307_v47 = vpop.f32.mrb[9].mxu1  ;;  %v1111_v56 = vmul.f32 0.17677669, %v1105_v42 }
 0x30b   : > { %v840_v49 = vpop.f32.mrb[10].mxu0  ;;  %v1108_v50 = vpop.f32.mrb[10].mxu1  ;;  %v2398_v42 = vld [vmem:[%s3036_s5 + $0x38] sm:$0xff]  }
 0x30c   : > { %v2278_v53 = vpop.f32.mrb[11].mxu0  ;;  %v2308_v54 = vpop.f32.mrb[11].mxu1  ;;  %v844_v55 = vsel %vm781_vm12, %v843_v43, -inf  ;;  %v1112_v58 = vsel %vm781_vm12, %v1111_v56, -inf  ;;  %2330 = vmatpush3.bf16.msra.mxu1 %v2398_v42  ;;  %v2099_v50 = vld [vmem:[%s3037_s6] ss:$0 sm:$0xff] }
 0x30d   : > { %845 = vmax.xlane.f32.xlu1 %v844_v55 }
 0x311   : > { %783 = vmax.xlane.f32.xlu1 %v782_v57 }
 0x315   : > { %1113 = vmax.xlane.f32.xlu1 %v1112_v58  ;;  %v2401_v58 = vld [vmem:[%s3040_s9 + $0x4] ss:$16 sps:$4 sm:$0xff]  }
 0x392   : > { %v1005_v59 = vpop.xlane.xlu0 %1004 }
 0x393   : > { %v1006_v60 = vsub.f32 %v1002_v33, %v1005_v59  ;;  %v2404_v59 = vld [vmem:[%s3040_s9 + $0xc] ss:$16 sps:$4 sm:$0xff]  }
 0x394   : > { %1570 = vmatprep.subr.bf16.mxu1 %v2404_v59  ;;  %v2462_v59 = vld [vmem:[%s3042_s11 + $0x98] sm:$0xff]  }
 0x395   : > { %v1007_v63 = vmul.f32 1.442695, %v1006_v60  ;;  %v2407_v60 = vld [vmem:[%s3040_s9 + $0x24] ss:$16 sps:$4 sm:$0xff]  }
 0x39a   : > { %v846_v61 = vpop.xlane.xlu1 %845 }
 0x39b   : > { %v847_v62 = vsub.f32 %v843_v43, %v846_v61  ;;  %v2410_v61 = vld [vmem:[%s3040_s9 + $0x2c] ss:$16 sps:$4 sm:$0xff]  }
 0x39d   : > { %v848_v1 = vmul.f32 1.442695, %v847_v62  ;;  %v2405_v62 = vld [vmem:[%s3040_s9 + $0x20] ss:$16 sps:$4 sm:$0xff]  }
 0x39e   : > { %v784_v2 = vpop.xlane.xlu1 %783 }
 0x39f   : > { %2481 = vpow2.f32 %v848_v1  ;;  %v785_v3 = vsub.f32 %v780_v52, %v784_v2  ;;  %v2413_v1 = vld [vmem:[%s3040_s9 + $0x44] ss:$16 sps:$4 sm:$0xff]   ;;  %v2416_v2 = vld [vmem:[%s3040_s9 + $0x4c] ss:$16 sps:$4 sm:$0xff]  }
 0x3a0   : > { %2483 = vpow2.f32 %v1007_v63  ;;  %v2408_v63 = vld [vmem:[%s3040_s9 + $0x28] ss:$16 sps:$4 sm:$0xff]  }
 0x3a1   : > { %v786_v5 = vmul.f32 1.442695, %v785_v3  ;;  %v2411_v3 = vld [vmem:[%s3040_s9 + $0x40] ss:$16 sps:$4 sm:$0xff]  }
 0x3a2   : > { %v1114_v6 = vpop.xlane.xlu1 %1113 }
 0x3a3   : > { %2485 = vpow2.f32 %v786_v5  ;;  %v1115_v7 = vsub.f32 %v1111_v56, %v1114_v6  ;;  %v2414_v5 = vld [vmem:[%s3040_s9 + $0x48] ss:$16 sps:$4 sm:$0xff]  }
 0x3a5   : > { %v1116_v8 = vmul.f32 1.442695, %v1115_v7 }
 0x3a7   : > { %2487 = vpow2.f32 %v1116_v8 }
 0x3a9   : > { %v2482_v9 = vpop.eup %2481 }
 0x3aa   : > { %v850_v10 = vsel %vm781_vm12, %v2482_v9, 0.0  ;;  %v2484_v11 = vpop.eup %2483 }
 0x3ab   : > { %851 = vadd.xlane.f32.xlu0 %v850_v10  ;;  %v1009_v13 = vsel %vm781_vm12, %v2484_v11, 0.0 }
 0x3ad   : > { %v2486_v12 = vpop.eup %2485 }
 0x3ae   : > { %v788_v14 = vsel %vm781_vm12, %v2486_v12, 0.0 }
 0x3af   : > { %1010 = vadd.xlane.f32.xlu0 %v1009_v13  ;;  %789 = vadd.xlane.f32.xlu1 %v788_v14  ;;  %v2417_v13 = vld [vmem:[%s3040_s9 + $0x60] ss:$16 sps:$4 sm:$0xff]   ;;  %v2420_v14 = vld [vmem:[%s3040_s9 + $0x68] ss:$16 sps:$4 sm:$0xff]  }
 0x3b1   : > { %v2488_v15 = vpop.eup %2487 }
 0x3b2   : > { %v1118_v16 = vsel %vm781_vm12, %v2488_v15, 0.0 }
 0x3b3   : > { %1119 = vadd.xlane.f32.xlu1 %v1118_v16  ;;  %v2428_v16 = vld [vmem:[%s3040_s9 + $0x8c] ss:$16 sps:$4 sm:$0xff]  }
 0x438   : > { %v852_v28 = vpop.xlane.xlu0 %851 }
 0x439   : > { %2489 = vrcp.f32 %v852_v28  ;;  %v2440_v28 = vld [vmem:[%s3040_s9 + $0xcc] ss:$16 sps:$4 sm:$0xff]  }
 0x43c   : > { %v790_v29 = vpop.xlane.xlu1 %789  ;;  %v1011_v33 = vpop.xlane.xlu0 %1010 }
 0x43d   : > { %2491 = vrcp.f32 %v790_v29  ;;  %v2435_v29 = vld [vmem:[%s3040_s9 + $0xc0] ss:$16 sps:$4 sm:$0xff]  }
 0x43e   : > { %2493 = vrcp.f32 %v1011_v33  ;;  %v2441_v33 = vld [vmem:[%s3040_s9 + $0xe0] ss:$16 sps:$4 sm:$0xff]  }
 0x440   : > { %v1120_v37 = vpop.xlane.xlu1 %1119 }
 0x441   : > { %2495 = vrcp.f32 %v1120_v37 }
 0x443   : > { %v2490_v30 = vpop.eup %2489 }
 0x444   : > { %v854_v31 = vmul.f32 %v2490_v30, %v2482_v9  ;;  %v2438_v30 = vld [vmem:[%s3040_s9 + $0xc8] ss:$16 sps:$4 sm:$0xff]  }
 0x446   : > { %v855_v32 = vpack.c.bf16 %v854_v31, %v854_v31  ;;  %v2443_v31 = vld [vmem:[%s3040_s9 + $0xe4] ss:$16 sps:$4 sm:$0xff]  }
 0x447   : > { %v2492_v34 = vpop.eup %2491 }
 0x448   : > { %2282 = vmatmul.mubr.msk.bf16.vlgmr.msra.gmra.mrb[12].mxu0 %vm856_vm13, %v855_v32  ;;  %v792_v35 = vmul.f32 %v2492_v34, %v2486_v12  ;;  %v2422_v12 = vld [vmem:[%s3040_s9 + $0x6c] ss:$16 sps:$4 sm:$0xff]   ;;  %v2444_v34 = vld [vmem:[%s3040_s9 + $0xe8] ss:$16 sps:$4 sm:$0xff]  }
 0x449   : > { %2286 = vmatpush3.bf16.msra.mxu0 %v2726_v18  ;;  %2287 = vmatprep.mubr.msk.bf16.mxu0 %vm2517_vm1, %v2515_v4  ;;  %v2494_v18 = vpop.eup %2493  ;;  %v2446_v32 = vld [vmem:[%s3040_s9 + $0xec] ss:$16 sps:$4 sm:$0xff]  }
 0x44a   : > { %2297 = vmatprep.subr.bf16.mxu0 %v2515_v4  ;;  %v793_v36 = vpack.c.bf16 %v792_v35, %v792_v35  ;;  %v1013_v38 = vmul.f32 %v2494_v18, %v2484_v11  ;;  %v2419_v11 = vld [vmem:[%s3040_s9 + $0x64] ss:$16 sps:$4 sm:$0xff]  }
 0x44b   : > { %v2496_v40 = vpop.eup %2495 }
 0x44c   : > { %v1014_v39 = vpack.c.bf16 %v1013_v38, %v1013_v38  ;;  %v1122_v41 = vmul.f32 %v2496_v40, %v2488_v15  ;;  %v2425_v15 = vld [vmem:[%s3040_s9 + $0x84] ss:$16 sps:$4 sm:$0xff]   ;;  %v2100_v38 = vld [vmem:[%s3038_s7] ss:$0 sm:$0xff] }
 0x44d   : > { %v2101_v40 = vld [vmem:[%s3039_s8] ss:$0 sm:$0xff] }
 0x454   : > { %2288 = vmatmul.mubr.msk.bf16.vlgmr.msra.gmra.mrb[12].mxu0 %vm856_vm13, %v793_v36 }
 0x455   : > { %2298 = vmatpush3.bf16.msra.mxu0 %v2728_v19  ;;  %2299 = vmatprep.mubr.msk.bf16.mxu0 %vm2517_vm1, %v2515_v4  ;;  %v1123_v19 = vpack.c.bf16 %v1122_v41, %v1122_v41 }
 0x456   : > { %2309 = vmatprep.subr.bf16.mxu0 %v2515_v4 }
 0x460   : > { %2300 = vmatmul.mubr.msk.bf16.vlgmr.msra.gmra.mrb[12].mxu0 %vm856_vm13, %v1014_v39 }
 0x461   : > { %2310 = vmatpush3.bf16.msra.mxu0 %v2730_v20  ;;  %2311 = vmatprep.mubr.msk.bf16.mxu0 %vm2517_vm1, %v2515_v4 }
 0x462   : > { %1529 = vmatprep.subr.bf16.mxu0 %v2401_v58  ;;  %v2460_v58 = vld [vmem:[%s3042_s11 + $0xd8] sm:$0xff]  }
 0x46c   : > { %2312 = vmatmul.mubr.msk.bf16.vlgmr.msra.gmra.mrb[12].mxu0 %vm856_vm13, %v1123_v19 }
 0x46d   : > { %1561 = vmatprep.mubr.bf16.mxu0 %v2516_v27 }
 0x53f   : > { %v1164_v43 = vpop.f32.mrb[12].mxu0 }
 0x540   : > { %v1187_v45 = vpack.c.bf16 %v1164_v43, %v1164_v43  ;;  %v2313_v47 = vpop.f32.mrb[13].mxu0  ;;  %v2447_v43 = vld [vmem:[%s3042_s11 + $0x40] sm:$0xff]  }
 0x541   : > { %v1167_v49 = vpop.f32.mrb[14].mxu0  ;;  %v2449_v47 = vld [vmem:[%s3042_s11] sm:$0xff]  }
 0x542   : > { %v2314_v20 = vpop.f32.mrb[15].mxu0  ;;  %2332 = vmatmul.mubr.bf16.vlgmr.msra.gmra.mrb[12].mxu1 %v1187_v45  ;;  %v2448_v45 = vld [vmem:[%s3042_s11 + $0xc0] sm:$0xff]  }
 0x543   : > { %1602 = vmatprep.mubr.bf16.mxu1 %v2516_v27  ;;  %v2399_v27 = vld [vmem:[%s3040_s9] ss:$16 sps:$4 sm:$0xff]   ;;  %v2451_v20 = vld [vmem:[%s3042_s11 + $0x48] sm:$0xff]  }
 0x544   : > { %1530 = vmatpush1.bf16.msra.mxu0 %v2399_v27  ;;  %v2450_v49 = vld [vmem:[%s3042_s11 + $0x80] sm:$0xff]   ;;  %v2459_v27 = vld [vmem:[%s3042_s11 + $0x58] sm:$0xff]  }
 0x545   : > { %1531 = vmatprep.subr.bf16.mxu0 %v2407_v60  ;;  %v2463_v60 = vld [vmem:[%s3042_s11 + $0x60] sm:$0xff]  }
 0x548   : > { %1532 = vmatpush1.bf16.msra.mxu0 %v2405_v62  ;;  %v2465_v62 = vld [vmem:[%s3042_s11 + $0x20] sm:$0xff]  }
 0x549   : > { %1533 = vmatprep.subr.bf16.mxu0 %v2413_v1  ;;  %v2467_v1 = vld [vmem:[%s3042_s11 + $0x68] sm:$0xff]  }
 0x54c   : > { %1534 = vmatpush1.bf16.msra.mxu0 %v2411_v3  ;;  %v2469_v3 = vld [vmem:[%s3042_s11 + $0x28] sm:$0xff]  }
 0x54d   : > { %1535 = vmatprep.subr.bf16.mxu0 %v2419_v11  ;;  %v2476_v11 = vld [vmem:[%s3042_s11 + $0xf8] sm:$0xff]  }
 0x550   : > { %1536 = vmatpush1.bf16.msra.mxu0 %v2417_v13  ;;  %v2478_v13 = vld [vmem:[%s3042_s11 + $0xb8] sm:$0xff]  }
 0x551   : > { %1537 = vmatprep.subr.bf16.mxu0 %v2425_v15  ;;  %v1363_v15 = vsub.s32 3, %v2706_v44 }
 0x554   : > { %1538 = vmatpush1.bf16.msra.mxu0 %v2423_v17 }
 0x555   : > { %1539 = vmatprep.subr.bf16.mxu0 %v2431_v22 }
 0x558   : > { %1540 = vmatpush1.bf16.msra.mxu0 %v2429_v24 }
 0x559   : > { %1541 = vmatprep.subr.bf16.mxu0 %v2437_v26 }
 0x55c   : > { %1542 = vmatpush1.bf16.msra.mxu0 %v2435_v29 }
 0x55d   : > { %1543 = vmatprep.subr.bf16.mxu0 %v2443_v31 }
 0x560   : > { %1544 = vmatpush1.bf16.msra.mxu0 %v2441_v33 }
 0x561   : > { %2203 = vmatprep.subr.bf16.mxu0 %v2447_v43 }
 0x615   : > { %v1270_v4 = vpop.f32.mrb[12].mxu1 }
 0x616   : > { %v1276_v52 = vadd.f32 %v1270_v4, %v2605_v0  ;;  %v2333_v53 = vpop.f32.mrb[13].mxu1  ;;  %v2402_v0 = vld [vmem:[%s3040_s9 + $0x8] ss:$16 sps:$4 sm:$0xff]  }
 0x617   : > { %v1273_v54 = vpop.f32.mrb[14].mxu1  ;;  %1571 = vmatpush1.bf16.msra.mxu1 %v2402_v0  ;;  %v2452_v4 = vld [vmem:[%s3042_s11 + $0xc8] sm:$0xff]   ;;  %v2455_v53 = vld [vmem:[%s3042_s11 + $0x50] sm:$0xff]   ;;  %v2461_v0 = vld [vmem:[%s3042_s11 + $0x18] sm:$0xff]  }
 0x618   : > { %v2805_v55 = vadd.f32 %v2099_v50, %v1276_v52  ;;  %v2334_v56 = vpop.f32.mrb[15].mxu1  ;;  %1572 = vmatprep.subr.bf16.mxu1 %v2410_v61  ;;  %v2453_v50 = vld [vmem:[%s3042_s11 + $0x8] sm:$0xff]   ;;  %v2456_v54 = vld [vmem:[%s3042_s11 + $0xd0] sm:$0xff]   ;;  %v2464_v61 = vld [vmem:[%s3042_s11 + $0xe0] sm:$0xff]  }
 0x619   : > { %v2454_v52 = vld [vmem:[%s3042_s11 + $0x88] sm:$0xff]   ;;  %v2457_v56 = vld [vmem:[%s3042_s11 + $0x10] sm:$0xff]  }
 0x61a   : > { %v1287_v57 = vsel %vm440_vm0, %v2805_v55, 0.0 }
 0x61b   : > { %1288 = vadd.xlane.f32.xlu0 %v1287_v57  ;;  %1573 = vmatpush1.bf16.msra.mxu1 %v2408_v63  ;;  %v2458_v57 = vld [vmem:[%s3042_s11 + $0x90] sm:$0xff]   ;;  %v2466_v63 = vld [vmem:[%s3042_s11 + $0xa0] sm:$0xff]  }
 0x61c   : > { %1574 = vmatprep.subr.bf16.mxu1 %v2416_v2  ;;  %v2468_v2 = vld [vmem:[%s3042_s11 + $0xe8] sm:$0xff]  }
 0x61f   : > { %1575 = vmatpush1.bf16.msra.mxu1 %v2414_v5  ;;  %v2470_v5 = vld [vmem:[%s3042_s11 + $0xa8] sm:$0xff]  }
 0x620   : > { %1576 = vmatprep.subr.bf16.mxu1 %v2422_v12  ;;  %v2477_v12 = vld [vmem:[%s3042_s11 + $0x38] sm:$0xff]  }
 0x623   : > { %1577 = vmatpush1.bf16.msra.mxu1 %v2420_v14  ;;  %v1347_v14 = vld [vmem:[%s3041_s10] sm:$0xf] }
 0x624   : > { %1578 = vmatprep.subr.bf16.mxu1 %v2428_v16  ;;  %v1352_v16 = vrot.slane %v1347_v14, %v506_v51  ;;  %v1360_v17 = vrot.slane %v1347_v14, %v514_v46  ;;  %v1364_v22 = vrot.slane %v1347_v14, %v1363_v15 }
 0x627   : > { %1579 = vmatpush1.bf16.msra.mxu1 %v2426_v21  ;;  %v1356_v21 = vrot.slane %v1347_v14, %v510_v48 }
 0x628   : > { %1580 = vmatprep.subr.bf16.mxu1 %v2434_v23 }
 0x62b   : > { %1581 = vmatpush1.bf16.msra.mxu1 %v2432_v25 }
 0x62c   : > { %1582 = vmatprep.subr.bf16.mxu1 %v2440_v28 }
 0x62f   : > { %1583 = vmatpush1.bf16.msra.mxu1 %v2438_v30 }
 0x630   : > { %1584 = vmatprep.subr.bf16.mxu1 %v2446_v32 }
 0x633   : > { %1585 = vmatpush1.bf16.msra.mxu1 %v2444_v34 }
 0x634   : > { %2225 = vmatprep.subr.bf16.mxu1 %v2448_v45 }
 0x6a8   : > { %v1289_v6 = vpop.xlane.xlu0 %1288 }
 0x6a9   : > { %v1290_v7 = vmul.f32 0.0078125, %v1289_v6  ;;  %v2471_v6 = vld [vmem:[%s3042_s11 + $0x70] sm:$0xff]  }
 0x6ab   : > { %v1291_v8 = vsub.f32 %v2805_v55, %v1290_v7  ;;  %v2472_v7 = vld [vmem:[%s3042_s11 + $0xf0] sm:$0xff]  }
 0x6ad   : > { %v1292_v9 = vmul.f32 %v1291_v8, %v1291_v8 }
 0x6af   : > { %v1293_v10 = vsel %vm440_vm0, %v1292_v9, 0.0  ;;  %v2474_v9 = vld [vmem:[%s3042_s11 + $0xb0] sm:$0xff]  }
 0x6b0   : > { %1294 = vadd.xlane.f32.xlu1 %v1293_v10  ;;  %v2475_v10 = vld [vmem:[%s3042_s11 + $0x78] sm:$0xff]  }
 0x73d   : > { %v1295_v35 = vpop.xlane.xlu1 %1294 }
 0x73e   : > { %v1296_v36 = vmul.f32 0.0078125, %v1295_v35 }
 0x740   : > { %v1297_v37 = vadd.f32 1e-06, %v1296_v36 }
 0x742   : > { %2497 = vrsqrt.f32 %v1297_v37 }
 0x74c   : > { %v2498_v18 = vpop.eup %2497 }
 0x74d   : > { %v1299_v39 = vmul.f32 %v2498_v18, %v1291_v8  ;;  %v2473_v8 = vld [vmem:[%s3042_s11 + $0x30] sm:$0xff]  }
 0x74f   : > { %v1306_v41 = vmul.f32 %v2100_v38, %v1299_v39 }
 0x751   : > { %v1313_v19 = vadd.f32 %v2101_v40, %v1306_v41 }
 0x753   : > { %v1346_v42 = vpack.c.bf16 %v1313_v19, %v1313_v19 }
 0x755   : > { %1562 = vmatmul.mubr.bf16.vlgmr.msra.gmra.mrb[16].mxu0 %v1346_v42  ;;  %1603 = vmatmul.mubr.bf16.vlgmr.msra.gmra.mrb[16].mxu1 %v1346_v42 }
 0x756   : > { %2204 = vmatpush3.bf16.msra.mxu0 %v2449_v47  ;;  %2226 = vmatpush3.bf16.msra.mxu1 %v2450_v49 }
 0x757   : > { %2205 = vmatprep.subr.bf16.mxu0 %v2451_v20  ;;  %2227 = vmatprep.subr.bf16.mxu1 %v2452_v4 }
 0x75a   : > { %2206 = vmatpush3.bf16.msra.mxu0 %v2453_v50  ;;  %2228 = vmatpush3.bf16.msra.mxu1 %v2454_v52 }
 0x75b   : > { %2207 = vmatprep.subr.bf16.mxu0 %v2455_v53  ;;  %2229 = vmatprep.subr.bf16.mxu1 %v2456_v54 }
 0x75e   : > { %2208 = vmatpush3.bf16.msra.mxu0 %v2457_v56  ;;  %2230 = vmatpush3.bf16.msra.mxu1 %v2458_v57 }
 0x75f   : > { %2209 = vmatprep.subr.bf16.mxu0 %v2459_v27  ;;  %2231 = vmatprep.subr.bf16.mxu1 %v2460_v58 }
 0x762   : > { %2210 = vmatpush3.bf16.msra.mxu0 %v2461_v0  ;;  %2232 = vmatpush3.bf16.msra.mxu1 %v2462_v59 }
 0x763   : > { %2211 = vmatprep.subr.bf16.mxu0 %v2463_v60  ;;  %2233 = vmatprep.subr.bf16.mxu1 %v2464_v61 }
 0x766   : > { %2212 = vmatpush3.bf16.msra.mxu0 %v2465_v62  ;;  %2234 = vmatpush3.bf16.msra.mxu1 %v2466_v63 }
 0x767   : > { %2213 = vmatprep.subr.bf16.mxu0 %v2467_v1  ;;  %2235 = vmatprep.subr.bf16.mxu1 %v2468_v2 }
 0x76a   : > { %2214 = vmatpush3.bf16.msra.mxu0 %v2469_v3  ;;  %2236 = vmatpush3.bf16.msra.mxu1 %v2470_v5 }
 0x76b   : > { %2215 = vmatprep.subr.bf16.mxu0 %v2471_v6  ;;  %2237 = vmatprep.subr.bf16.mxu1 %v2472_v7 }
 0x76e   : > { %2216 = vmatpush3.bf16.msra.mxu0 %v2473_v8  ;;  %2238 = vmatpush3.bf16.msra.mxu1 %v2474_v9 }
 0x76f   : > { %2217 = vmatprep.subr.bf16.mxu0 %v2475_v10  ;;  %2239 = vmatprep.subr.bf16.mxu1 %v2476_v11 }
 0x772   : > { %2218 = vmatpush3.bf16.msra.mxu0 %v2477_v12  ;;  %2240 = vmatpush3.bf16.msra.mxu1 %v2478_v13 }
 0x828   : > { %v1563_v23 = vpop.f32.mrb[16].mxu0  ;;  %v1604_v24 = vpop.f32.mrb[16].mxu1 }
 0x829   : > { %v1564_v25 = vadd.f32 %v1563_v23, %v1352_v16  ;;  %v1605_v26 = vadd.f32 %v1604_v24, %v1360_v17  ;;  %v1565_v28 = vpop.f32.mrb[17].mxu0  ;;  %v1606_v29 = vpop.f32.mrb[17].mxu1  ;;  %v2166_v23 = vld [vmem:[%s3043_s12] ss:$0 sm:$0xff] }
 0x82a   : > { %v1566_v30 = vadd.f32 %v1565_v28, %v1356_v21  ;;  %v1607_v31 = vadd.f32 %v1606_v29, %v1364_v22  ;;  %v1567_v32 = vpop.f32.mrb[18].mxu0  ;;  %v1608_v33 = vpop.f32.mrb[18].mxu1 }
 0x82b   : > { %v1611_v34 = vmul.f32 %v1564_v25, %v1564_v25  ;;  %v1613_v35 = vmul.f32 %v1605_v26, %v1605_v26  ;;  %v1568_v51 = vpop.f32.mrb[19].mxu0  ;;  %v1609_v36 = vpop.f32.mrb[19].mxu1 }
 0x82c   : > { %v1612_v37 = vmul.f32 %v1566_v30, %v1566_v30  ;;  %v1614_v46 = vmul.f32 %v1607_v31, %v1607_v31 }
 0x82d   : > { %v1615_v18 = vmul.f32 %v1611_v34, %v1564_v25  ;;  %v1617_v44 = vmul.f32 %v1613_v35, %v1605_v26 }
 0x82e   : > { %v1616_v48 = vmul.f32 %v1612_v37, %v1566_v30  ;;  %v1618_v38 = vmul.f32 %v1614_v46, %v1607_v31 }
 0x82f   : > { %v1619_v39 = vmul.f32 0.044715, %v1615_v18  ;;  %v1621_v40 = vmul.f32 0.044715, %v1617_v44 }
 0x830   : > { %v1620_v41 = vmul.f32 0.044715, %v1616_v48  ;;  %v1622_v19 = vmul.f32 0.044715, %v1618_v38 }
 0x831   : > { %v1623_v42 = vadd.f32 %v1619_v39, %v1564_v25  ;;  %v1625_v43 = vadd.f32 %v1621_v40, %v1605_v26 }
 0x832   : > { %v1624_v45 = vadd.f32 %v1620_v41, %v1566_v30  ;;  %v1626_v47 = vadd.f32 %v1622_v19, %v1607_v31 }
 0x833   : > { %v1627_v49 = vmul.f32 0.7978846, %v1623_v42  ;;  %v1629_v20 = vmul.f32 0.7978846, %v1625_v43 }
 0x834   : > { %v1628_v4 = vmul.f32 0.7978846, %v1624_v45  ;;  %v1630_v50 = vmul.f32 0.7978846, %v1626_v47 }
 0x835   : > { %2499 = vtanh.f32 %v1627_v49 }
 0x836   : > { %2501 = vtanh.f32 %v1629_v20 }
 0x837   : > { %2503 = vtanh.f32 %v1628_v4 }
 0x838   : > { %2505 = vtanh.f32 %v1630_v50 }
 0x83f   : > { %v2500_v52 = vpop.eup %2499 }
 0x840   : > { %v2502_v53 = vpop.eup %2501  ;;  %v1635_v54 = vadd.f32 1.0, %v2500_v52 }
 0x841   : > { %v2504_v56 = vpop.eup %2503  ;;  %v1637_v57 = vadd.f32 1.0, %v2502_v53 }
 0x842   : > { %v2506_v27 = vpop.eup %2505  ;;  %v1636_v58 = vadd.f32 1.0, %v2504_v56  ;;  %v1639_v0 = vmul.f32 0.5, %v1635_v54 }
 0x843   : > { %v1638_v59 = vadd.f32 1.0, %v2506_v27  ;;  %v1641_v60 = vmul.f32 0.5, %v1637_v57 }
 0x844   : > { %v1640_v61 = vmul.f32 0.5, %v1636_v58  ;;  %v1643_v63 = vmul.f32 %v1639_v0, %v1564_v25 }
 0x845   : > { %v1642_v62 = vmul.f32 0.5, %v1638_v59  ;;  %v1645_v2 = vmul.f32 %v1641_v60, %v1605_v26 }
 0x846   : > { %v1644_v1 = vmul.f32 %v1640_v61, %v1566_v30  ;;  %v1711_v7 = vpack.c.bf16 %v1643_v63, %v1643_v63 }
 0x847   : > { %v1646_v3 = vmul.f32 %v1642_v62, %v1607_v31  ;;  %v1713_v8 = vpack.c.bf16 %v1645_v2, %v1645_v2 }
 0x848   : > { %v1712_v5 = vpack.c.bf16 %v1644_v1, %v1644_v1 }
 0x849   : > { %v1714_v6 = vpack.c.bf16 %v1646_v3, %v1646_v3 }
 0x84a   : > { %1939 = vmatprep.mubr.bf16.mxu0 %v1712_v5 }
 0x84b   : > { %1979 = vmatprep.mubr.bf16.mxu1 %v1714_v6  ;;  %1940 = vmatmul.mubr.bf16.vlgmr.msra.gmra.mrb[20].mxu0 %v1711_v7 }
 0x84c   : > { %1980 = vmatmul.mubr.bf16.vlgmr.msra.gmra.mrb[20].mxu1 %v1713_v8 }
 0x91e   : > { %v2219_v9 = vpop.f32.mrb[20].mxu0 }
 0x91f   : > { %v2241_v10 = vpop.f32.mrb[20].mxu1  ;;  %v2220_v11 = vpop.f32.mrb[21].mxu0 }
 0x920   : > { %v2221_v12 = vadd.f32 %v2220_v11, %v2219_v9  ;;  %v2242_v13 = vpop.f32.mrb[21].mxu1  ;;  %v2222_v14 = vpop.f32.mrb[22].mxu0 }
 0x921   : > { %v2243_v15 = vadd.f32 %v2242_v13, %v2241_v10  ;;  %v2244_v16 = vpop.f32.mrb[22].mxu1  ;;  %v2223_v17 = vpop.f32.mrb[23].mxu0 }
 0x922   : > { %v2245_v21 = vpop.f32.mrb[23].mxu1 }
 0x923   : > { %v1982_v22 = vadd.f32 %v2243_v15, %v2221_v12 }
 0x925   : > { %v1987_v24 = vadd.f32 %v1982_v22, %v2805_v55 }
 0x927   : > { %v1995_v25 = vadd.f32 %v2166_v23, %v1987_v24 }
 0x929   : > { %1996 = vst [vmem:[%s435_s14] sm:$0x1f] %v1995_v25 }
 0x92a PF: > { %s23_s25 = sadd.s32 1, %s2513_s25  }
 0x92b   : > { %p20_p4 = scmp.ge.s32.totalorder %s23_s25, 6  }
 0x92d   :  { %22 = sbr.rel (!%p20_p4) target bundleno = 1 (0x1), region = 102 }

// kernel: blip_nlvr_forward.7
= control target key start
LH: loop header
LB: loop body
LE: loop exit
PB: predicated region body
PF: predicated region fallthrough
CT: control target
= control target key end

     0   :  { %s2686_s18 = smov 0   ;;  %s3136_s0 = inlined_call_operand.vmem [shape: f32[4,5,128], index: 0, kind: input, shape index: {}]   ;;  %s3137_s1 = inlined_call_operand.vmem [shape: f32[1,128], index: 1, kind: input, shape index: {}]   ;;  %s3138_s2 = inlined_call_operand.vmem [shape: f32[1,128], index: 2, kind: input, shape index: {}]   ;;  %s3139_s3 = inlined_call_operand.vmem [shape: bf16[128,384], index: 3, kind: input, shape index: {}]   ;;  %s3140_s4 = inlined_call_operand.vmem [shape: f32[1,384], index: 4, kind: input, shape index: {}]   ;;  %s3141_s5 = inlined_call_operand.vmem [shape: bf16[128,128], index: 5, kind: input, shape index: {}]   ;;  %s3142_s6 = inlined_call_operand.vmem [shape: f32[1,128], index: 6, kind: input, shape index: {}]   ;;  %s3143_s7 = inlined_call_operand.vmem [shape: f32[1,128], index: 7, kind: input, shape index: {}]   ;;  %s3144_s8 = inlined_call_operand.vmem [shape: f32[1,128], index: 8, kind: input, shape index: {}]   ;;  %s3145_s9 = inlined_call_operand.vmem [shape: bf16[128,512], index: 9, kind: input, shape index: {}]   ;;  %s3146_s10 = inlined_call_operand.vmem [shape: f32[1,512], index: 10, kind: input, shape index: {}]   ;;  %s3147_s11 = inlined_call_operand.vmem [shape: bf16[512,128], index: 11, kind: input, shape index: {}]   ;;  %s3148_s12 = inlined_call_operand.vmem [shape: f32[1,128], index: 12, kind: input, shape index: {}]   ;;  %s3149_s13 = inlined_call_operand.vmem [shape: f32[1,128], index: 13, kind: input, shape index: {}]   ;;  %s3150_s14 = inlined_call_operand.vmem [shape: f32[1,128], index: 14, kind: input, shape index: {}]   ;;  %s3151_s15 = inlined_call_operand.vmem [shape: f32[4,5,128], index: 15, kind: output, shape index: {}]  }
   0x1 LB: > { %s2133_s19 = sadd.s32 4294967295, %s2600_s18   ;;  %p2137_p0 = scmp.ge.s32.totalorder %s2600_s18, 1  ;;  %s2600_s18 = sphi %s2686_s18, %s25_s18  }
   0x2   : > { %p436_p1 = scmp.lt.s32.totalorder %s2600_s18, 5 }
   0x4   : > { %p437_p2 = pnand %p2137_p0, %p436_p1 }
   0x5   : > { %p482_p3 = scmp.lt.s32.totalorder (!%p437_p2), %s2133_s19, 3  ;;  %vm494_vm0 = vcmask (!%p437_p2), 1044480   ;;  %v2444_v2 = vld [vmem:[%s3139_s3 + $0x4] ss:$12 sps:$4 sm:$0xff] (!%p437_p2)   ;;  %v2446_v3 = vld [vmem:[%s3139_s3] ss:$12 sps:$4 sm:$0xff] (!%p437_p2)   ;;  %v558_v43 = vlaneseq (!%p437_p2) }
   0x6   : > { %440 = sbr.rel (%p437_p2) target bundleno = 2659 (0xa63), region = 80  ;;  %v2602_v4 = vmov (!%p437_p2), 0.0   ;;  %v2447_v5 = vld [vmem:[%s3139_s3 + $0x8] ss:$12 sps:$4 sm:$0xff] (!%p437_p2)   ;;  %v2450_v7 = vld [vmem:[%s3139_s3 + $0x18] ss:$12 sps:$4 sm:$0xff] (!%p437_p2)   ;;  %701 = vmatprep.subr.bf16.mxu0 (!%p437_p2), %v2444_v2 }
   0x7   : > { %2332 = vmatprep.subr.bf16.mxu1 (!%p437_p2), %v2602_v4  ;;  %v2448_v6 = vld [vmem:[%s3139_s3 + $0x1c] ss:$12 sps:$4 sm:$0xff] (!%p437_p2)   ;;  %v2451_v8 = vld [vmem:[%s3139_s3 + $0x20] ss:$12 sps:$4 sm:$0xff] (!%p437_p2)   ;;  %702 = vmatpush1.bf16.msra.mxu0 (!%p437_p2), %v2446_v3  ;;  %v2455_v16 = vld [vmem:[%s3139_s3 + $0x38] ss:$12 sps:$4 sm:$0xff] (!%p437_p2)  }
   0x8   : > { %v2452_v9 = vld [vmem:[%s3139_s3 + $0x34] ss:$12 sps:$4 sm:$0xff] (!%p437_p2)   ;;  %2333 = vmatpush3.bf16.msra.mxu1 (!%p437_p2), %v2447_v5  ;;  %703 = vmatprep.subr.bf16.mxu0 (!%p437_p2), %v2448_v6  ;;  %v2454_v15 = vld [vmem:[%s3139_s3 + $0x30] ss:$12 sps:$4 sm:$0xff] (!%p437_p2)   ;;  %v2456_v17 = vld [vmem:[%s3139_s3 + $0x4c] ss:$12 sps:$4 sm:$0xff] (!%p437_p2)  }
   0x9   : > { %2334 = vmatprep.subr.bf16.mxu1 (!%p437_p2), %v2602_v4  ;;  %v2458_v18 = vld [vmem:[%s3139_s3 + $0x48] ss:$12 sps:$4 sm:$0xff] (!%p437_p2)   ;;  %v2459_v19 = vld [vmem:[%s3139_s3 + $0x50] ss:$12 sps:$4 sm:$0xff] (!%p437_p2)   ;;  %v2462_v21 = vld [vmem:[%s3139_s3 + $0x60] ss:$12 sps:$4 sm:$0xff] (!%p437_p2)  }
   0xa   : > { %v2460_v20 = vld [vmem:[%s3139_s3 + $0x64] ss:$12 sps:$4 sm:$0xff] (!%p437_p2)   ;;  %v2463_v22 = vld [vmem:[%s3139_s3 + $0x68] ss:$12 sps:$4 sm:$0xff] (!%p437_p2)   ;;  %v2467_v25 = vld [vmem:[%s3139_s3 + $0x80] ss:$12 sps:$4 sm:$0xff] (!%p437_p2)  }
   0xb   : > { %704 = vmatpush1.bf16.msra.mxu0 (!%p437_p2), %v2450_v7  ;;  %v2464_v23 = vld [vmem:[%s3139_s3 + $0x7c] ss:$12 sps:$4 sm:$0xff] (!%p437_p2)   ;;  %v2466_v24 = vld [vmem:[%s3139_s3 + $0x78] ss:$12 sps:$4 sm:$0xff] (!%p437_p2)   ;;  %v2468_v26 = vld [vmem:[%s3139_s3 + $0x94] ss:$12 sps:$4 sm:$0xff] (!%p437_p2)  }
   0xc   : > { %2335 = vmatpush3.bf16.msra.mxu1 (!%p437_p2), %v2451_v8  ;;  %705 = vmatprep.subr.bf16.mxu0 (!%p437_p2), %v2452_v9  ;;  %v2603_v27 = vmov (!%p437_p2), 0   ;;  %vm2604_vm1 = vmmov (!%p437_p2), 0   ;;  %v2470_v28 = vld [vmem:[%s3139_s3 + $0x90] ss:$12 sps:$4 sm:$0xff] (!%p437_p2)   ;;  %v2471_v29 = vld [vmem:[%s3139_s3 + $0x98] ss:$12 sps:$4 sm:$0xff] (!%p437_p2)  }
   0xd   : > { %s3153_s19 = smov (!%p482_p3, %s2133_s19), 3  ;;  %2336 = vmatprep.subr.bf16.mxu1 %v2602_v4  ;;  %733 = vmatprep.mubr.bf16.mxu0 %v2603_v27  ;;  %v2472_v30 = vld [vmem:[%s3139_s3 + $0xac] ss:$12 sps:$4 sm:$0xff]   ;;  %v2474_v31 = vld [vmem:[%s3139_s3 + $0xa8] ss:$12 sps:$4 sm:$0xff]   ;;  %v2803_v44 = vshrl.u32 %v558_v43, 7 }
   0xe   : > { %s2138_s20 = sshll.u32 %s3153_s19, 3  ;;  %2348 = vmatprep.mubr.msk.bf16.mxu1 %vm2604_vm1, %v2602_v4  ;;  %v2475_v32 = vld [vmem:[%s3139_s3 + $0xb0] ss:$12 sps:$4 sm:$0xff]   ;;  %v2140_v37 = vld [vmem:[%s3137_s1] ss:$0 sm:$0xff]  ;;  %v783_v45 = vand.u32 127, %v558_v43 }
   0xf   : > { %s485_s23 = scalar_lea.vmem %s3136_s0, %s2138_s20  ;;  %706 = vmatpush1.bf16.msra.mxu0 %v2454_v15  ;;  %v2141_v39 = vld [vmem:[%s3138_s2] ss:$0 sm:$0xff]  ;;  %v568_v46 = vsub.s32 2, %v2803_v44  ;;  %v564_v48 = vsub.s32 1, %v2803_v44  ;;  %vm914_vm7 = vcmask 1041408   ;;  %v560_v51 = vsub.s32 0, %v2803_v44  ;;  %s489_s22 = scalar_lea.vmem %s3151_s15, %s2138_s20 }
  0x10   : > { %v2702_v0 = vld [vmem:[%s485_s23] sm:$0x1f]  ;;  %2337 = vmatpush3.bf16.msra.mxu1 %v2455_v16  ;;  %707 = vmatprep.subr.bf16.mxu0 %v2456_v17  ;;  %vm1007_vm2 = vcmp.ge.s32.totalorder %v783_v45, 64  ;;  %vm1008_vm3 = vcmp.lt.s32.totalorder %v783_v45, 96  ;;  %vm786_vm4 = vcmp.lt.s32.totalorder %v783_v45, 32  ;;  %vm1116_vm6 = vcmp.ge.s32.totalorder %v783_v45, 96 }
  0x11   : > { %v495_v1 = vsel %vm494_vm0, %v2702_v0, 0.0  ;;  %2338 = vmatprep.subr.bf16.mxu1 %v2602_v4  ;;  %v556_v47 = vld [vmem:[%s3140_s4] sm:$0x7]  ;;  %vm1009_vm5 = vmand %vm1007_vm2, %vm1008_vm3  ;;  %v2166_v54 = vsel %vm786_vm4, 1.0, %v2602_v4  ;;  %vm848_vm8 = vcmp.ge.s32.totalorder %v783_v45, 32  ;;  %vm849_vm9 = vcmp.lt.s32.totalorder %v783_v45, 64 }
  0x12   : > { %496 = vadd.xlane.f32.xlu0 %v495_v1  ;;  %v569_v49 = vrot.slane %v556_v47, %v568_v46  ;;  %v565_v50 = vrot.slane %v556_v47, %v564_v48  ;;  %v2170_v55 = vsel %vm1009_vm5, 1.0, %v2602_v4  ;;  %v2172_v57 = vsel %vm1116_vm6, 1.0, %v2602_v4  ;;  %vm850_vm11 = vmand %vm848_vm8, %vm849_vm9 }
  0x13   : > { %708 = vmatpush1.bf16.msra.mxu0 %v2458_v18  ;;  %vm915_vm10 = vcmask 1042432   ;;  %v2605_v60 = vmov 65535   ;;  %v2167_v17 = vsel %vm850_vm11, 1.0, %v2602_v4  ;;  %vm835_vm12 = vcmask 36864  }
  0x14   : > { %2339 = vmatpush3.bf16.msra.mxu1 %v2459_v19  ;;  %709 = vmatprep.subr.bf16.mxu0 %v2460_v20  ;;  %v916_v61 = vsel %vm914_vm7, 4294967295, %v2605_v60  ;;  %vm910_vm13 = vcmask 39936  }
  0x15   : > { %2340 = vmatprep.subr.bf16.mxu1 %v2602_v4 }
  0x17   : > { %710 = vmatpush1.bf16.msra.mxu0 %v2462_v21 }
  0x18   : > { %2341 = vmatpush3.bf16.msra.mxu1 %v2463_v22  ;;  %711 = vmatprep.subr.bf16.mxu0 %v2464_v23 }
  0x19   : > { %2342 = vmatprep.subr.bf16.mxu1 %v2602_v4 }
  0x1b   : > { %712 = vmatpush1.bf16.msra.mxu0 %v2466_v24 }
  0x1c   : > { %2343 = vmatpush3.bf16.msra.mxu1 %v2467_v25  ;;  %713 = vmatprep.subr.bf16.mxu0 %v2468_v26 }
  0x1d   : > { %2344 = vmatprep.subr.bf16.mxu1 %v2602_v4 }
  0x1f   : > { %714 = vmatpush1.bf16.msra.mxu0 %v2470_v28 }
  0x20   : > { %2345 = vmatpush3.bf16.msra.mxu1 %v2471_v29  ;;  %715 = vmatprep.subr.bf16.mxu0 %v2472_v30 }
  0x21   : > { %2346 = vmatprep.subr.bf16.mxu1 %v2602_v4 }
  0x23   : > { %716 = vmatpush1.bf16.msra.mxu0 %v2474_v31 }
  0x24   : > { %2347 = vmatpush3.bf16.msra.mxu1 %v2475_v32  ;;  %2352 = vmatprep.subr.bf16.mxu0 %v2602_v4 }
  0x25   : > { %2376 = vmatprep.subr.bf16.mxu1 %v2602_v4 }
  0x9f   : > { %v497_v10 = vpop.xlane.xlu0 %496 }
  0xa0   : > { %v499_v11 = vmul.f32 0.0078125, %v497_v10  ;;  %v917_v10 = vsel %vm915_vm10, %v916_v61, 0 }
  0xa2   : > { %v500_v12 = vsub.f32 %v2702_v0, %v499_v11  ;;  %v561_v11 = vrot.slane %v556_v47, %v560_v51 }
  0xa4   : > { %v501_v13 = vmul.f32 %v500_v12, %v500_v12 }
  0xa6   : > { %v502_v14 = vsel %vm494_vm0, %v501_v13, 0.0 }
  0xa7   : > { %503 = vadd.xlane.f32.xlu0 %v502_v14 }
 0x134   : > { %v504_v33 = vpop.xlane.xlu0 %503 }
 0x135   : > { %v505_v34 = vmul.f32 0.0078125, %v504_v33 }
 0x137   : > { %v506_v35 = vadd.f32 1e-06, %v505_v34 }
 0x139   : > { %2564 = vrsqrt.f32 %v506_v35 }
 0x143   : > { %v2565_v36 = vpop.eup %2564 }
 0x144   : > { %v508_v38 = vmul.f32 %v2565_v36, %v500_v12 }
 0x146   : > { %v515_v40 = vmul.f32 %v2140_v37, %v508_v38 }
 0x148   : > { %v522_v41 = vadd.f32 %v2141_v39, %v515_v40 }
 0x14a   : > { %v555_v42 = vpack.c.bf16 %v522_v41, %v522_v41 }
 0x14c   : > { %734 = vmatmul.mubr.bf16.vlgmr.msra.gmra.mrb[0].mxu0 %v555_v42  ;;  %2349 = vmatmul.mubr.bf16.vlgmr.msra.gmra.mrb[0].mxu1 %v555_v42 }
 0x14d   : > { %2354 = vmatprep.mubr.msk.bf16.mxu0 %vm2604_vm1, %v2602_v4  ;;  %2378 = vmatprep.mubr.msk.bf16.mxu1 %vm2604_vm1, %v2602_v4 }
 0x21f   : > { %v735_v52 = vpop.f32.mrb[0].mxu0  ;;  %v776_v53 = vpop.f32.mrb[0].mxu1 }
 0x220   : > { %v777_v56 = vadd.f32 %v776_v53, %v569_v49  ;;  %v737_v58 = vpop.f32.mrb[1].mxu0  ;;  %v2350_v59 = vpop.f32.mrb[1].mxu1  ;;  %v736_v21 = vadd.f32 %v735_v52, %v561_v11 }
 0x221   : > { %v738_v62 = vadd.f32 %v737_v58, %v565_v50  ;;  %v739_v63 = vpop.f32.mrb[2].mxu0  ;;  %v779_v1 = vpop.f32.mrb[2].mxu1 }
 0x222   : > { %v792_v2 = vmul.f32 %v2166_v54, %v777_v56  ;;  %v1014_v3 = vmul.f32 %v2170_v55, %v777_v56  ;;  %v740_v5 = vpop.f32.mrb[3].mxu0  ;;  %v2351_v6 = vpop.f32.mrb[3].mxu1  ;;  %v1123_v7 = vmul.f32 %v2172_v57, %v777_v56  ;;  %v784_v24 = vpack.c.bf16 %v736_v21, %v736_v21  ;;  %v2477_v21 = vld [vmem:[%s3141_s5 + $0x8] sm:$0xff]  }
 0x223   : > { %v790_v8 = vmul.f32 %v2166_v54, %v738_v62  ;;  %v1012_v9 = vmul.f32 %v2170_v55, %v738_v62  ;;  %v853_v22 = vmul.f32 %v2167_v17, %v738_v62  ;;  %v1121_v23 = vmul.f32 %v2172_v57, %v738_v62 }
 0x224   : > { %v793_v12 = vpack.c.bf16 %v792_v2, %v792_v2  ;;  %v1015_v13 = vpack.c.bf16 %v1014_v3, %v1014_v3  ;;  %v1124_v14 = vpack.c.bf16 %v1123_v7, %v1123_v7  ;;  %v855_v25 = vmul.f32 %v2167_v17, %v777_v56  ;;  %v2476_v17 = vld [vmem:[%s3141_s5] sm:$0xff]  }
 0x225   : > { %v791_v15 = vpack.c.bf16 %v790_v8, %v790_v8  ;;  %v1013_v16 = vpack.c.bf16 %v1012_v9, %v1012_v9  ;;  %v854_v26 = vpack.c.bf16 %v853_v22, %v853_v22  ;;  %v1122_v28 = vpack.c.bf16 %v1121_v23, %v1121_v23  ;;  %v2478_v22 = vld [vmem:[%s3141_s5 + $0x10] sm:$0xff]   ;;  %v2479_v23 = vld [vmem:[%s3141_s5 + $0x18] sm:$0xff]  }
 0x226   : > { %v2823_v18 = vand.u32 %v917_v10, %v793_v12  ;;  %v2825_v19 = vand.u32 %v1015_v13, %v917_v10  ;;  %v2827_v20 = vand.u32 %v1124_v14, %v917_v10  ;;  %v856_v29 = vpack.c.bf16 %v855_v25, %v855_v25  ;;  %v2481_v25 = vld [vmem:[%s3141_s5 + $0x28] sm:$0xff]  }
 0x227   : > { %2353 = vmatpush3.bf16.xpose.msra.mxu0 %v791_v15  ;;  %2377 = vmatpush3.bf16.xpose.msra.mxu1 %v1013_v16 }
 0x228   : > { %2358 = vmatprep.subr.bf16.mxu0 %v2602_v4  ;;  %2388 = vmatprep.subr.bf16.mxu1 %v2602_v4  ;;  %v919_v30 = vand.u32 %v917_v10, %v856_v29 }
 0x22e   : > { %2355 = vmatmul.mubr.bf16.vlgmr.msra.gmra.mrb[4].mxu0 %v784_v24  ;;  %2379 = vmatmul.mubr.bf16.vlgmr.msra.gmra.mrb[4].mxu1 %v784_v24 }
 0x22f   : > { %2359 = vmatpush3.bf16.xpose.msra.mxu0 %v854_v26  ;;  %2389 = vmatpush3.bf16.xpose.msra.mxu1 %v1122_v28  ;;  %v2482_v26 = vld [vmem:[%s3141_s5 + $0x30] sm:$0xff]  }
 0x230   : > { %2360 = vmatprep.mubr.msk.bf16.mxu0 %vm2604_vm1, %v2602_v4  ;;  %2390 = vmatprep.mubr.msk.bf16.mxu1 %vm2604_vm1, %v2602_v4 }
 0x231   : > { %2364 = vmatprep.subr.bf16.mxu0 %v2602_v4  ;;  %2400 = vmatprep.subr.bf16.mxu1 %v2602_v4 }
 0x236   : > { %2361 = vmatmul.mubr.bf16.vlgmr.msra.gmra.mrb[8].mxu0 %v784_v24  ;;  %2391 = vmatmul.mubr.bf16.vlgmr.msra.gmra.mrb[8].mxu1 %v784_v24  ;;  %v2480_v24 = vld [vmem:[%s3141_s5 + $0x20] sm:$0xff]  }
 0x237   : > { %2365 = vmatpush3.bf16.msra.mxu0 %v919_v30  ;;  %2366 = vmatprep.mubr.msk.bf16.mxu0 %vm2604_vm1, %v2602_v4 }
 0x238   : > { %2370 = vmatprep.subr.bf16.mxu0 %v2602_v4  ;;  %2416 = vmatprep.mubr.msk.bf16.mxu1 %vm2604_vm1, %v2602_v4 }
 0x239   : > { %2401 = vmatpush3.bf16.msra.mxu1 %v2476_v17  ;;  %v2511_v17 = vld [vmem:[%s3145_s9 + $0x88] ss:$16 sps:$4 sm:$0xff]  }
 0x23a   : > { %2402 = vmatprep.subr.bf16.mxu1 %v2602_v4 }
 0x23d   : > { %2403 = vmatpush3.bf16.msra.mxu1 %v2477_v21  ;;  %v2513_v21 = vld [vmem:[%s3145_s9 + $0x8c] ss:$16 sps:$4 sm:$0xff]  }
 0x23e   : > { %2404 = vmatprep.subr.bf16.mxu1 %v2602_v4 }
 0x241   : > { %2405 = vmatpush3.bf16.msra.mxu1 %v2478_v22  ;;  %v2516_v22 = vld [vmem:[%s3145_s9 + $0xa4] ss:$16 sps:$4 sm:$0xff]  }
 0x242   : > { %2406 = vmatprep.subr.bf16.mxu1 %v2602_v4 }
 0x245   : > { %2407 = vmatpush3.bf16.msra.mxu1 %v2479_v23  ;;  %v2519_v23 = vld [vmem:[%s3145_s9 + $0xac] ss:$16 sps:$4 sm:$0xff]  }
 0x246   : > { %2408 = vmatprep.subr.bf16.mxu1 %v2602_v4 }
 0x249   : > { %2409 = vmatpush3.bf16.msra.mxu1 %v2480_v24  ;;  %v2514_v24 = vld [vmem:[%s3145_s9 + $0xa0] ss:$16 sps:$4 sm:$0xff]  }
 0x24a   : > { %2410 = vmatprep.subr.bf16.mxu1 %v2602_v4 }
 0x24d   : > { %2411 = vmatpush3.bf16.msra.mxu1 %v2481_v25  ;;  %v2517_v25 = vld [vmem:[%s3145_s9 + $0xa8] ss:$16 sps:$4 sm:$0xff]  }
 0x24e   : > { %2412 = vmatprep.subr.bf16.mxu1 %v2602_v4 }
 0x251   : > { %2413 = vmatpush3.bf16.msra.mxu1 %v2482_v26  ;;  %v2522_v26 = vld [vmem:[%s3145_s9 + $0xc4] ss:$16 sps:$4 sm:$0xff]  }
 0x252   : > { %2414 = vmatprep.subr.bf16.mxu1 %v2602_v4 }
 0x301   : > { %v828_v31 = vpop.f32.mrb[4].mxu0  ;;  %v1050_v32 = vpop.f32.mrb[4].mxu1 }
 0x302   : > { %v1056_v33 = vmul.f32 0.17677669, %v1050_v32  ;;  %v2356_v34 = vpop.f32.mrb[5].mxu0  ;;  %v2380_v35 = vpop.f32.mrb[5].mxu1  ;;  %v834_v52 = vmul.f32 0.17677669, %v828_v31 }
 0x303   : > { %v831_v36 = vpop.f32.mrb[6].mxu0  ;;  %v1053_v37 = vpop.f32.mrb[6].mxu1 }
 0x304   : > { %v2357_v38 = vpop.f32.mrb[7].mxu0  ;;  %v2381_v39 = vpop.f32.mrb[7].mxu1  ;;  %v1057_v40 = vsel %vm835_vm12, %v1056_v33, -inf  ;;  %v836_v57 = vsel %vm835_vm12, %v834_v52, -inf }
 0x305   : > { %1058 = vmax.xlane.f32.xlu0 %v1057_v40 }
 0x309   : > { %v891_v41 = vpop.f32.mrb[8].mxu0  ;;  %v1159_v42 = vpop.f32.mrb[8].mxu1 }
 0x30a   : > { %v897_v43 = vmul.f32 0.17677669, %v891_v41  ;;  %v2362_v45 = vpop.f32.mrb[9].mxu0  ;;  %v2392_v47 = vpop.f32.mrb[9].mxu1  ;;  %v1165_v56 = vmul.f32 0.17677669, %v1159_v42 }
 0x30b   : > { %v894_v49 = vpop.f32.mrb[10].mxu0  ;;  %v1162_v50 = vpop.f32.mrb[10].mxu1  ;;  %v2483_v42 = vld [vmem:[%s3141_s5 + $0x38] sm:$0xff]  }
 0x30c   : > { %v2363_v53 = vpop.f32.mrb[11].mxu0  ;;  %v2393_v54 = vpop.f32.mrb[11].mxu1  ;;  %v898_v55 = vsel %vm835_vm12, %v897_v43, -inf  ;;  %v1166_v58 = vsel %vm835_vm12, %v1165_v56, -inf  ;;  %2415 = vmatpush3.bf16.msra.mxu1 %v2483_v42  ;;  %v2182_v50 = vld [vmem:[%s3142_s6] ss:$0 sm:$0xff] }
 0x30d   : > { %899 = vmax.xlane.f32.xlu1 %v898_v55 }
 0x311   : > { %837 = vmax.xlane.f32.xlu1 %v836_v57 }
 0x315   : > { %1167 = vmax.xlane.f32.xlu1 %v1166_v58  ;;  %v2486_v58 = vld [vmem:[%s3145_s9 + $0x4] ss:$16 sps:$4 sm:$0xff]  }
 0x392   : > { %v1059_v59 = vpop.xlane.xlu0 %1058 }
 0x393   : > { %v1060_v60 = vsub.f32 %v1056_v33, %v1059_v59  ;;  %v2489_v59 = vld [vmem:[%s3145_s9 + $0xc] ss:$16 sps:$4 sm:$0xff]  }
 0x394   : > { %1624 = vmatprep.subr.bf16.mxu1 %v2489_v59  ;;  %v2547_v59 = vld [vmem:[%s3147_s11 + $0x98] sm:$0xff]  }
 0x395   : > { %v1061_v63 = vmul.f32 1.442695, %v1060_v60  ;;  %v2492_v60 = vld [vmem:[%s3145_s9 + $0x24] ss:$16 sps:$4 sm:$0xff]  }
 0x39a   : > { %v900_v61 = vpop.xlane.xlu1 %899 }
 0x39b   : > { %v901_v62 = vsub.f32 %v897_v43, %v900_v61  ;;  %v2495_v61 = vld [vmem:[%s3145_s9 + $0x2c] ss:$16 sps:$4 sm:$0xff]  }
 0x39d   : > { %v902_v1 = vmul.f32 1.442695, %v901_v62  ;;  %v2490_v62 = vld [vmem:[%s3145_s9 + $0x20] ss:$16 sps:$4 sm:$0xff]  }
 0x39e   : > { %v838_v2 = vpop.xlane.xlu1 %837 }
 0x39f   : > { %2566 = vpow2.f32 %v902_v1  ;;  %v839_v3 = vsub.f32 %v834_v52, %v838_v2  ;;  %v2498_v1 = vld [vmem:[%s3145_s9 + $0x44] ss:$16 sps:$4 sm:$0xff]   ;;  %v2501_v2 = vld [vmem:[%s3145_s9 + $0x4c] ss:$16 sps:$4 sm:$0xff]  }
 0x3a0   : > { %2568 = vpow2.f32 %v1061_v63  ;;  %v2493_v63 = vld [vmem:[%s3145_s9 + $0x28] ss:$16 sps:$4 sm:$0xff]  }
 0x3a1   : > { %v840_v5 = vmul.f32 1.442695, %v839_v3  ;;  %v2496_v3 = vld [vmem:[%s3145_s9 + $0x40] ss:$16 sps:$4 sm:$0xff]  }
 0x3a2   : > { %v1168_v6 = vpop.xlane.xlu1 %1167 }
 0x3a3   : > { %2570 = vpow2.f32 %v840_v5  ;;  %v1169_v7 = vsub.f32 %v1165_v56, %v1168_v6  ;;  %v2499_v5 = vld [vmem:[%s3145_s9 + $0x48] ss:$16 sps:$4 sm:$0xff]  }
 0x3a5   : > { %v1170_v8 = vmul.f32 1.442695, %v1169_v7 }
 0x3a7   : > { %2572 = vpow2.f32 %v1170_v8 }
 0x3a9   : > { %v2567_v9 = vpop.eup %2566 }
 0x3aa   : > { %v904_v10 = vsel %vm835_vm12, %v2567_v9, 0.0  ;;  %v2569_v11 = vpop.eup %2568 }
 0x3ab   : > { %905 = vadd.xlane.f32.xlu0 %v904_v10  ;;  %v1063_v13 = vsel %vm835_vm12, %v2569_v11, 0.0 }
 0x3ad   : > { %v2571_v12 = vpop.eup %2570 }
 0x3ae   : > { %v842_v14 = vsel %vm835_vm12, %v2571_v12, 0.0 }
 0x3af   : > { %1064 = vadd.xlane.f32.xlu0 %v1063_v13  ;;  %843 = vadd.xlane.f32.xlu1 %v842_v14  ;;  %v2502_v13 = vld [vmem:[%s3145_s9 + $0x60] ss:$16 sps:$4 sm:$0xff]   ;;  %v2505_v14 = vld [vmem:[%s3145_s9 + $0x68] ss:$16 sps:$4 sm:$0xff]  }
 0x3b1   : > { %v2573_v15 = vpop.eup %2572 }
 0x3b2   : > { %v1172_v16 = vsel %vm835_vm12, %v2573_v15, 0.0 }
 0x3b3   : > { %1173 = vadd.xlane.f32.xlu1 %v1172_v16  ;;  %v2508_v16 = vld [vmem:[%s3145_s9 + $0x80] ss:$16 sps:$4 sm:$0xff]  }
 0x438   : > { %v906_v28 = vpop.xlane.xlu0 %905 }
 0x439   : > { %2574 = vrcp.f32 %v906_v28  ;;  %v2525_v28 = vld [vmem:[%s3145_s9 + $0xcc] ss:$16 sps:$4 sm:$0xff]  }
 0x43c   : > { %v844_v29 = vpop.xlane.xlu1 %843  ;;  %v1065_v33 = vpop.xlane.xlu0 %1064 }
 0x43d   : > { %2576 = vrcp.f32 %v844_v29  ;;  %v2520_v29 = vld [vmem:[%s3145_s9 + $0xc0] ss:$16 sps:$4 sm:$0xff]  }
 0x43e   : > { %2578 = vrcp.f32 %v1065_v33  ;;  %v2526_v33 = vld [vmem:[%s3145_s9 + $0xe0] ss:$16 sps:$4 sm:$0xff]  }
 0x440   : > { %v1174_v37 = vpop.xlane.xlu1 %1173 }
 0x441   : > { %2580 = vrcp.f32 %v1174_v37 }
 0x443   : > { %v2575_v30 = vpop.eup %2574 }
 0x444   : > { %v908_v31 = vmul.f32 %v2575_v30, %v2567_v9  ;;  %v2523_v30 = vld [vmem:[%s3145_s9 + $0xc8] ss:$16 sps:$4 sm:$0xff]  }
 0x446   : > { %v909_v32 = vpack.c.bf16 %v908_v31, %v908_v31  ;;  %v2528_v31 = vld [vmem:[%s3145_s9 + $0xe4] ss:$16 sps:$4 sm:$0xff]  }
 0x447   : > { %v2577_v34 = vpop.eup %2576 }
 0x448   : > { %2367 = vmatmul.mubr.msk.bf16.vlgmr.msra.gmra.mrb[12].mxu0 %vm910_vm13, %v909_v32  ;;  %v846_v35 = vmul.f32 %v2577_v34, %v2571_v12  ;;  %v2507_v12 = vld [vmem:[%s3145_s9 + $0x6c] ss:$16 sps:$4 sm:$0xff]   ;;  %v2529_v34 = vld [vmem:[%s3145_s9 + $0xe8] ss:$16 sps:$4 sm:$0xff]  }
 0x449   : > { %2371 = vmatpush3.bf16.msra.mxu0 %v2823_v18  ;;  %2372 = vmatprep.mubr.msk.bf16.mxu0 %vm2604_vm1, %v2602_v4  ;;  %v2579_v18 = vpop.eup %2578  ;;  %v2531_v32 = vld [vmem:[%s3145_s9 + $0xec] ss:$16 sps:$4 sm:$0xff]  }
 0x44a   : > { %2382 = vmatprep.subr.bf16.mxu0 %v2602_v4  ;;  %v847_v36 = vpack.c.bf16 %v846_v35, %v846_v35  ;;  %v1067_v38 = vmul.f32 %v2579_v18, %v2569_v11  ;;  %v2504_v11 = vld [vmem:[%s3145_s9 + $0x64] ss:$16 sps:$4 sm:$0xff]  }
 0x44b   : > { %v2581_v40 = vpop.eup %2580 }
 0x44c   : > { %v1068_v39 = vpack.c.bf16 %v1067_v38, %v1067_v38  ;;  %v1176_v41 = vmul.f32 %v2581_v40, %v2573_v15  ;;  %v2510_v15 = vld [vmem:[%s3145_s9 + $0x84] ss:$16 sps:$4 sm:$0xff]   ;;  %v2183_v38 = vld [vmem:[%s3143_s7] ss:$0 sm:$0xff] }
 0x44d   : > { %v2184_v40 = vld [vmem:[%s3144_s8] ss:$0 sm:$0xff] }
 0x454   : > { %2373 = vmatmul.mubr.msk.bf16.vlgmr.msra.gmra.mrb[12].mxu0 %vm910_vm13, %v847_v36 }
 0x455   : > { %2383 = vmatpush3.bf16.msra.mxu0 %v2825_v19  ;;  %2384 = vmatprep.mubr.msk.bf16.mxu0 %vm2604_vm1, %v2602_v4  ;;  %v1177_v19 = vpack.c.bf16 %v1176_v41, %v1176_v41 }
 0x456   : > { %2394 = vmatprep.subr.bf16.mxu0 %v2602_v4 }
 0x460   : > { %2385 = vmatmul.mubr.msk.bf16.vlgmr.msra.gmra.mrb[12].mxu0 %vm910_vm13, %v1068_v39 }
 0x461   : > { %2395 = vmatpush3.bf16.msra.mxu0 %v2827_v20  ;;  %2396 = vmatprep.mubr.msk.bf16.mxu0 %vm2604_vm1, %v2602_v4 }
 0x462   : > { %1583 = vmatprep.subr.bf16.mxu0 %v2486_v58  ;;  %v2545_v58 = vld [vmem:[%s3147_s11 + $0xd8] sm:$0xff]  }
 0x46c   : > { %2397 = vmatmul.mubr.msk.bf16.vlgmr.msra.gmra.mrb[12].mxu0 %vm910_vm13, %v1177_v19 }
 0x46d   : > { %1615 = vmatprep.mubr.bf16.mxu0 %v2603_v27 }
 0x53f   : > { %v1218_v43 = vpop.f32.mrb[12].mxu0 }
 0x540   : > { %v1241_v45 = vpack.c.bf16 %v1218_v43, %v1218_v43  ;;  %v2398_v47 = vpop.f32.mrb[13].mxu0  ;;  %v2532_v43 = vld [vmem:[%s3147_s11 + $0x40] sm:$0xff]  }
 0x541   : > { %v1221_v49 = vpop.f32.mrb[14].mxu0  ;;  %v2534_v47 = vld [vmem:[%s3147_s11] sm:$0xff]  }
 0x542   : > { %v2399_v20 = vpop.f32.mrb[15].mxu0  ;;  %2417 = vmatmul.mubr.bf16.vlgmr.msra.gmra.mrb[12].mxu1 %v1241_v45  ;;  %v2533_v45 = vld [vmem:[%s3147_s11 + $0xc0] sm:$0xff]  }
 0x543   : > { %1656 = vmatprep.mubr.bf16.mxu1 %v2603_v27  ;;  %v2484_v27 = vld [vmem:[%s3145_s9] ss:$16 sps:$4 sm:$0xff]   ;;  %v2536_v20 = vld [vmem:[%s3147_s11 + $0x48] sm:$0xff]  }
 0x544   : > { %1584 = vmatpush1.bf16.msra.mxu0 %v2484_v27  ;;  %v2535_v49 = vld [vmem:[%s3147_s11 + $0x80] sm:$0xff]   ;;  %v2544_v27 = vld [vmem:[%s3147_s11 + $0x58] sm:$0xff]  }
 0x545   : > { %1585 = vmatprep.subr.bf16.mxu0 %v2492_v60  ;;  %v2548_v60 = vld [vmem:[%s3147_s11 + $0x60] sm:$0xff]  }
 0x548   : > { %1586 = vmatpush1.bf16.msra.mxu0 %v2490_v62  ;;  %v2550_v62 = vld [vmem:[%s3147_s11 + $0x20] sm:$0xff]  }
 0x549   : > { %1587 = vmatprep.subr.bf16.mxu0 %v2498_v1  ;;  %v2552_v1 = vld [vmem:[%s3147_s11 + $0x68] sm:$0xff]  }
 0x54c   : > { %1588 = vmatpush1.bf16.msra.mxu0 %v2496_v3  ;;  %v2554_v3 = vld [vmem:[%s3147_s11 + $0x28] sm:$0xff]  }
 0x54d   : > { %1589 = vmatprep.subr.bf16.mxu0 %v2504_v11  ;;  %v2561_v11 = vld [vmem:[%s3147_s11 + $0xf8] sm:$0xff]  }
 0x550   : > { %1590 = vmatpush1.bf16.msra.mxu0 %v2502_v13  ;;  %v2563_v13 = vld [vmem:[%s3147_s11 + $0xb8] sm:$0xff]  }
 0x551   : > { %1591 = vmatprep.subr.bf16.mxu0 %v2510_v15  ;;  %v1417_v15 = vsub.s32 3, %v2803_v44 }
 0x554   : > { %1592 = vmatpush1.bf16.msra.mxu0 %v2508_v16 }
 0x555   : > { %1593 = vmatprep.subr.bf16.mxu0 %v2516_v22 }
 0x558   : > { %1594 = vmatpush1.bf16.msra.mxu0 %v2514_v24 }
 0x559   : > { %1595 = vmatprep.subr.bf16.mxu0 %v2522_v26 }
 0x55c   : > { %1596 = vmatpush1.bf16.msra.mxu0 %v2520_v29 }
 0x55d   : > { %1597 = vmatprep.subr.bf16.mxu0 %v2528_v31 }
 0x560   : > { %1598 = vmatpush1.bf16.msra.mxu0 %v2526_v33 }
 0x561   : > { %2288 = vmatprep.subr.bf16.mxu0 %v2532_v43 }
 0x615   : > { %v1324_v4 = vpop.f32.mrb[12].mxu1 }
 0x616   : > { %v1330_v52 = vadd.f32 %v1324_v4, %v2702_v0  ;;  %v2418_v53 = vpop.f32.mrb[13].mxu1  ;;  %v2487_v0 = vld [vmem:[%s3145_s9 + $0x8] ss:$16 sps:$4 sm:$0xff]  }
 0x617   : > { %v1327_v54 = vpop.f32.mrb[14].mxu1  ;;  %1625 = vmatpush1.bf16.msra.mxu1 %v2487_v0  ;;  %v2537_v4 = vld [vmem:[%s3147_s11 + $0xc8] sm:$0xff]   ;;  %v2540_v53 = vld [vmem:[%s3147_s11 + $0x50] sm:$0xff]   ;;  %v2546_v0 = vld [vmem:[%s3147_s11 + $0x18] sm:$0xff]  }
 0x618   : > { %v2902_v55 = vadd.f32 %v2182_v50, %v1330_v52  ;;  %v2419_v56 = vpop.f32.mrb[15].mxu1  ;;  %1626 = vmatprep.subr.bf16.mxu1 %v2495_v61  ;;  %v2538_v50 = vld [vmem:[%s3147_s11 + $0x8] sm:$0xff]   ;;  %v2541_v54 = vld [vmem:[%s3147_s11 + $0xd0] sm:$0xff]   ;;  %v2549_v61 = vld [vmem:[%s3147_s11 + $0xe0] sm:$0xff]  }
 0x619   : > { %v2539_v52 = vld [vmem:[%s3147_s11 + $0x88] sm:$0xff]   ;;  %v2542_v56 = vld [vmem:[%s3147_s11 + $0x10] sm:$0xff]  }
 0x61a   : > { %v1341_v57 = vsel %vm494_vm0, %v2902_v55, 0.0 }
 0x61b   : > { %1342 = vadd.xlane.f32.xlu0 %v1341_v57  ;;  %1627 = vmatpush1.bf16.msra.mxu1 %v2493_v63  ;;  %v2543_v57 = vld [vmem:[%s3147_s11 + $0x90] sm:$0xff]   ;;  %v2551_v63 = vld [vmem:[%s3147_s11 + $0xa0] sm:$0xff]  }
 0x61c   : > { %1628 = vmatprep.subr.bf16.mxu1 %v2501_v2  ;;  %v2553_v2 = vld [vmem:[%s3147_s11 + $0xe8] sm:$0xff]  }
 0x61f   : > { %1629 = vmatpush1.bf16.msra.mxu1 %v2499_v5  ;;  %v2555_v5 = vld [vmem:[%s3147_s11 + $0xa8] sm:$0xff]  }
 0x620   : > { %1630 = vmatprep.subr.bf16.mxu1 %v2507_v12  ;;  %v2562_v12 = vld [vmem:[%s3147_s11 + $0x38] sm:$0xff]  }
 0x623   : > { %1631 = vmatpush1.bf16.msra.mxu1 %v2505_v14  ;;  %v1401_v14 = vld [vmem:[%s3146_s10] sm:$0xf] }
 0x624   : > { %1632 = vmatprep.subr.bf16.mxu1 %v2513_v21  ;;  %v1406_v16 = vrot.slane %v1401_v14, %v560_v51  ;;  %v1410_v21 = vrot.slane %v1401_v14, %v564_v48  ;;  %v1418_v22 = vrot.slane %v1401_v14, %v1417_v15 }
 0x627   : > { %1633 = vmatpush1.bf16.msra.mxu1 %v2511_v17  ;;  %v1414_v17 = vrot.slane %v1401_v14, %v568_v46 }
 0x628   : > { %1634 = vmatprep.subr.bf16.mxu1 %v2519_v23 }
 0x62b   : > { %1635 = vmatpush1.bf16.msra.mxu1 %v2517_v25 }
 0x62c   : > { %1636 = vmatprep.subr.bf16.mxu1 %v2525_v28 }
 0x62f   : > { %1637 = vmatpush1.bf16.msra.mxu1 %v2523_v30 }
 0x630   : > { %1638 = vmatprep.subr.bf16.mxu1 %v2531_v32 }
 0x633   : > { %1639 = vmatpush1.bf16.msra.mxu1 %v2529_v34 }
 0x634   : > { %2310 = vmatprep.subr.bf16.mxu1 %v2533_v45 }
 0x6a8   : > { %v1343_v6 = vpop.xlane.xlu0 %1342 }
 0x6a9   : > { %v1344_v7 = vmul.f32 0.0078125, %v1343_v6  ;;  %v2556_v6 = vld [vmem:[%s3147_s11 + $0x70] sm:$0xff]  }
 0x6ab   : > { %v1345_v8 = vsub.f32 %v2902_v55, %v1344_v7  ;;  %v2557_v7 = vld [vmem:[%s3147_s11 + $0xf0] sm:$0xff]  }
 0x6ad   : > { %v1346_v9 = vmul.f32 %v1345_v8, %v1345_v8 }
 0x6af   : > { %v1347_v10 = vsel %vm494_vm0, %v1346_v9, 0.0  ;;  %v2559_v9 = vld [vmem:[%s3147_s11 + $0xb0] sm:$0xff]  }
 0x6b0   : > { %1348 = vadd.xlane.f32.xlu1 %v1347_v10  ;;  %v2560_v10 = vld [vmem:[%s3147_s11 + $0x78] sm:$0xff]  }
 0x73d   : > { %v1349_v35 = vpop.xlane.xlu1 %1348 }
 0x73e   : > { %v1350_v36 = vmul.f32 0.0078125, %v1349_v35 }
 0x740   : > { %v1351_v37 = vadd.f32 1e-06, %v1350_v36 }
 0x742   : > { %2582 = vrsqrt.f32 %v1351_v37 }
 0x74c   : > { %v2583_v18 = vpop.eup %2582 }
 0x74d   : > { %v1353_v39 = vmul.f32 %v2583_v18, %v1345_v8  ;;  %v2558_v8 = vld [vmem:[%s3147_s11 + $0x30] sm:$0xff]  }
 0x74f   : > { %v1360_v41 = vmul.f32 %v2183_v38, %v1353_v39 }
 0x751   : > { %v1367_v19 = vadd.f32 %v2184_v40, %v1360_v41 }
 0x753   : > { %v1400_v42 = vpack.c.bf16 %v1367_v19, %v1367_v19 }
 0x755   : > { %1616 = vmatmul.mubr.bf16.vlgmr.msra.gmra.mrb[16].mxu0 %v1400_v42  ;;  %1657 = vmatmul.mubr.bf16.vlgmr.msra.gmra.mrb[16].mxu1 %v1400_v42 }
 0x756   : > { %2289 = vmatpush3.bf16.msra.mxu0 %v2534_v47  ;;  %2311 = vmatpush3.bf16.msra.mxu1 %v2535_v49 }
 0x757   : > { %2290 = vmatprep.subr.bf16.mxu0 %v2536_v20  ;;  %2312 = vmatprep.subr.bf16.mxu1 %v2537_v4 }
 0x75a   : > { %2291 = vmatpush3.bf16.msra.mxu0 %v2538_v50  ;;  %2313 = vmatpush3.bf16.msra.mxu1 %v2539_v52 }
 0x75b   : > { %2292 = vmatprep.subr.bf16.mxu0 %v2540_v53  ;;  %2314 = vmatprep.subr.bf16.mxu1 %v2541_v54 }
 0x75e   : > { %2293 = vmatpush3.bf16.msra.mxu0 %v2542_v56  ;;  %2315 = vmatpush3.bf16.msra.mxu1 %v2543_v57 }
 0x75f   : > { %2294 = vmatprep.subr.bf16.mxu0 %v2544_v27  ;;  %2316 = vmatprep.subr.bf16.mxu1 %v2545_v58 }
 0x762   : > { %2295 = vmatpush3.bf16.msra.mxu0 %v2546_v0  ;;  %2317 = vmatpush3.bf16.msra.mxu1 %v2547_v59 }
 0x763   : > { %2296 = vmatprep.subr.bf16.mxu0 %v2548_v60  ;;  %2318 = vmatprep.subr.bf16.mxu1 %v2549_v61 }
 0x766   : > { %2297 = vmatpush3.bf16.msra.mxu0 %v2550_v62  ;;  %2319 = vmatpush3.bf16.msra.mxu1 %v2551_v63 }
 0x767   : > { %2298 = vmatprep.subr.bf16.mxu0 %v2552_v1  ;;  %2320 = vmatprep.subr.bf16.mxu1 %v2553_v2 }
 0x76a   : > { %2299 = vmatpush3.bf16.msra.mxu0 %v2554_v3  ;;  %2321 = vmatpush3.bf16.msra.mxu1 %v2555_v5 }
 0x76b   : > { %2300 = vmatprep.subr.bf16.mxu0 %v2556_v6  ;;  %2322 = vmatprep.subr.bf16.mxu1 %v2557_v7 }
 0x76e   : > { %2301 = vmatpush3.bf16.msra.mxu0 %v2558_v8  ;;  %2323 = vmatpush3.bf16.msra.mxu1 %v2559_v9 }
 0x76f   : > { %2302 = vmatprep.subr.bf16.mxu0 %v2560_v10  ;;  %2324 = vmatprep.subr.bf16.mxu1 %v2561_v11 }
 0x772   : > { %2303 = vmatpush3.bf16.msra.mxu0 %v2562_v12  ;;  %2325 = vmatpush3.bf16.msra.mxu1 %v2563_v13 }
 0x828   : > { %v1617_v23 = vpop.f32.mrb[16].mxu0  ;;  %v1658_v24 = vpop.f32.mrb[16].mxu1 }
 0x829   : > { %v1618_v25 = vadd.f32 %v1617_v23, %v1406_v16  ;;  %v1659_v26 = vadd.f32 %v1658_v24, %v1414_v17  ;;  %v1619_v28 = vpop.f32.mrb[17].mxu0  ;;  %v1660_v29 = vpop.f32.mrb[17].mxu1  ;;  %v2249_v23 = vld [vmem:[%s3148_s12] ss:$0 sm:$0xff] }
 0x82a   : > { %v1620_v30 = vadd.f32 %v1619_v28, %v1410_v21  ;;  %v1661_v31 = vadd.f32 %v1660_v29, %v1418_v22  ;;  %v1621_v32 = vpop.f32.mrb[18].mxu0  ;;  %v1662_v33 = vpop.f32.mrb[18].mxu1 }
 0x82b   : > { %v1665_v34 = vmul.f32 %v1618_v25, %v1618_v25  ;;  %v1667_v35 = vmul.f32 %v1659_v26, %v1659_v26  ;;  %v1622_v51 = vpop.f32.mrb[19].mxu0  ;;  %v1663_v36 = vpop.f32.mrb[19].mxu1 }
 0x82c   : > { %v1666_v37 = vmul.f32 %v1620_v30, %v1620_v30  ;;  %v1668_v46 = vmul.f32 %v1661_v31, %v1661_v31 }
 0x82d   : > { %v1669_v18 = vmul.f32 %v1665_v34, %v1618_v25  ;;  %v1671_v44 = vmul.f32 %v1667_v35, %v1659_v26 }
 0x82e   : > { %v1670_v48 = vmul.f32 %v1666_v37, %v1620_v30  ;;  %v1672_v38 = vmul.f32 %v1668_v46, %v1661_v31  ;;  %v2251_v37 = vld [vmem:[%s3150_s14] ss:$0 sm:$0xff] }
 0x82f   : > { %v1673_v39 = vmul.f32 0.044715, %v1669_v18  ;;  %v1675_v40 = vmul.f32 0.044715, %v1671_v44 }
 0x830   : > { %v1674_v41 = vmul.f32 0.044715, %v1670_v48  ;;  %v1676_v19 = vmul.f32 0.044715, %v1672_v38 }
 0x831   : > { %v1677_v42 = vadd.f32 %v1673_v39, %v1618_v25  ;;  %v1679_v43 = vadd.f32 %v1675_v40, %v1659_v26 }
 0x832   : > { %v1678_v45 = vadd.f32 %v1674_v41, %v1620_v30  ;;  %v1680_v47 = vadd.f32 %v1676_v19, %v1661_v31 }
 0x833   : > { %v1681_v49 = vmul.f32 0.7978846, %v1677_v42  ;;  %v1683_v20 = vmul.f32 0.7978846, %v1679_v43 }
 0x834   : > { %v1682_v4 = vmul.f32 0.7978846, %v1678_v45  ;;  %v1684_v50 = vmul.f32 0.7978846, %v1680_v47 }
 0x835   : > { %2584 = vtanh.f32 %v1681_v49 }
 0x836   : > { %2586 = vtanh.f32 %v1683_v20 }
 0x837   : > { %2588 = vtanh.f32 %v1682_v4 }
 0x838   : > { %2590 = vtanh.f32 %v1684_v50 }
 0x83f   : > { %v2585_v52 = vpop.eup %2584 }
 0x840   : > { %v2587_v53 = vpop.eup %2586  ;;  %v1689_v54 = vadd.f32 1.0, %v2585_v52 }
 0x841   : > { %v2589_v56 = vpop.eup %2588  ;;  %v1691_v57 = vadd.f32 1.0, %v2587_v53 }
 0x842   : > { %v2591_v27 = vpop.eup %2590  ;;  %v1690_v58 = vadd.f32 1.0, %v2589_v56  ;;  %v1693_v0 = vmul.f32 0.5, %v1689_v54 }
 0x843   : > { %v1692_v59 = vadd.f32 1.0, %v2591_v27  ;;  %v1695_v60 = vmul.f32 0.5, %v1691_v57 }
 0x844   : > { %v1694_v61 = vmul.f32 0.5, %v1690_v58  ;;  %v1697_v63 = vmul.f32 %v1693_v0, %v1618_v25 }
 0x845   : > { %v1696_v62 = vmul.f32 0.5, %v1692_v59  ;;  %v1699_v2 = vmul.f32 %v1695_v60, %v1659_v26 }
 0x846   : > { %v1698_v1 = vmul.f32 %v1694_v61, %v1620_v30  ;;  %v1765_v7 = vpack.c.bf16 %v1697_v63, %v1697_v63 }
 0x847   : > { %v1700_v3 = vmul.f32 %v1696_v62, %v1661_v31  ;;  %v1767_v8 = vpack.c.bf16 %v1699_v2, %v1699_v2 }
 0x848   : > { %v1766_v5 = vpack.c.bf16 %v1698_v1, %v1698_v1 }
 0x849   : > { %v1768_v6 = vpack.c.bf16 %v1700_v3, %v1700_v3 }
 0x84a   : > { %1993 = vmatprep.mubr.bf16.mxu0 %v1766_v5 }
 0x84b   : > { %2033 = vmatprep.mubr.bf16.mxu1 %v1768_v6  ;;  %1994 = vmatmul.mubr.bf16.vlgmr.msra.gmra.mrb[20].mxu0 %v1765_v7 }
 0x84c   : > { %2034 = vmatmul.mubr.bf16.vlgmr.msra.gmra.mrb[20].mxu1 %v1767_v8 }
 0x91e   : > { %v2304_v9 = vpop.f32.mrb[20].mxu0 }
 0x91f   : > { %v2326_v10 = vpop.f32.mrb[20].mxu1  ;;  %v2305_v11 = vpop.f32.mrb[21].mxu0 }
 0x920   : > { %v2306_v12 = vadd.f32 %v2305_v11, %v2304_v9  ;;  %v2327_v13 = vpop.f32.mrb[21].mxu1  ;;  %v2307_v14 = vpop.f32.mrb[22].mxu0 }
 0x921   : > { %v2328_v15 = vadd.f32 %v2327_v13, %v2326_v10  ;;  %v2329_v16 = vpop.f32.mrb[22].mxu1  ;;  %v2308_v17 = vpop.f32.mrb[23].mxu0 }
 0x922   : > { %v2330_v21 = vpop.f32.mrb[23].mxu1 }
 0x923   : > { %v2036_v22 = vadd.f32 %v2328_v15, %v2306_v12 }
 0x925   : > { %v2041_v24 = vadd.f32 %v2036_v22, %v2902_v55  ;;  %v2250_v55 = vld [vmem:[%s3149_s13] ss:$0 sm:$0xff] }
 0x927   : > { %v2049_v25 = vadd.f32 %v2249_v23, %v2041_v24 }
 0x929   : > { %v2052_v26 = vsel %vm494_vm0, %v2049_v25, 0.0 }
 0x92a   : > { %2053 = vadd.xlane.f32.xlu0 %v2052_v26 }
 0x9b7   : > { %v2054_v28 = vpop.xlane.xlu0 %2053 }
 0x9b8   : > { %v2055_v29 = vmul.f32 0.0078125, %v2054_v28 }
 0x9ba   : > { %v2056_v30 = vsub.f32 %v2049_v25, %v2055_v29 }
 0x9bc   : > { %v2057_v31 = vmul.f32 %v2056_v30, %v2056_v30 }
 0x9be   : > { %v2058_v32 = vsel %vm494_vm0, %v2057_v31, 0.0 }
 0x9bf   : > { %2059 = vadd.xlane.f32.xlu1 %v2058_v32 }
 0xa4c   : > { %v2060_v33 = vpop.xlane.xlu1 %2059 }
 0xa4d   : > { %v2061_v34 = vmul.f32 0.0078125, %v2060_v33 }
 0xa4f   : > { %v2062_v35 = vadd.f32 1e-06, %v2061_v34 }
 0xa51   : > { %2592 = vrsqrt.f32 %v2062_v35 }
 0xa5b   : > { %v2593_v51 = vpop.eup %2592 }
 0xa5c   : > { %v2064_v36 = vmul.f32 %v2593_v51, %v2056_v30 }
 0xa5e   : > { %v2071_v46 = vmul.f32 %v2250_v55, %v2064_v36 }
 0xa60   : > { %v2078_v18 = vadd.f32 %v2251_v37, %v2071_v46 }
 0xa62   : > { %2079 = vst [vmem:[%s489_s22] sm:$0x1f] %v2078_v18 }
 0xa63 PF: > { %s25_s18 = sadd.s32 1, %s2600_s18  }
 0xa64   : > { %p22_p4 = scmp.ge.s32.totalorder %s25_s18, 6  }
 0xa66   :  { %24 = sbr.rel (!%p22_p4) target bundleno = 1 (0x1), region = 110 }

// kernel: blip_nlvr_forward.8
= control target key start
LH: loop header
LB: loop body
LE: loop exit
PB: predicated region body
PF: predicated region fallthrough
CT: control target
= control target key end

     0   :  { %s6708_s0 = inlined_call_operand.vmem [shape: f32[2,8,128], index: 0, kind: input, shape index: {}]   ;;  %s6709_s1 = inlined_call_operand.vmem [shape: f32[2,1,8], index: 1, kind: input, shape index: {}]   ;;  %s6710_s2 = inlined_call_operand.vmem [shape: f32[2,5,128], index: 2, kind: input, shape index: {}]   ;;  %s6711_s3 = inlined_call_operand.vmem [shape: f32[2,5,128], index: 3, kind: input, shape index: {}]   ;;  %s6712_s4 = inlined_call_operand.hbm [shape: f32[1,128], index: 4, kind: input, shape index: {}]   ;;  %s6713_s5 = inlined_call_operand.hbm [shape: f32[1,128], index: 5, kind: input, shape index: {}]   ;;  %s6714_s6 = inlined_call_operand.vmem [shape: bf16[128,384], index: 6, kind: input, shape index: {}]   ;;  %s6715_s7 = inlined_call_operand.vmem [shape: f32[1,384], index: 7, kind: input, shape index: {}]   ;;  %s6716_s8 = inlined_call_operand.vmem [shape: bf16[128,128], index: 8, kind: input, shape index: {}]   ;;  %s6717_s9 = inlined_call_operand.hbm [shape: f32[1,128], index: 9, kind: input, shape index: {}]   ;;  %s6718_s10 = inlined_call_operand.hbm [shape: f32[1,128], index: 10, kind: input, shape index: {}]   ;;  %s6719_s11 = inlined_call_operand.hbm [shape: f32[1,128], index: 11, kind: input, shape index: {}]   ;;  %s6720_s12 = inlined_call_operand.vmem [shape: bf16[128,128], index: 12, kind: input, shape index: {}]   ;;  %s6721_s13 = inlined_call_operand.hbm [shape: f32[1,128], index: 13, kind: input, shape index: {}]   ;;  %s6722_s14 = inlined_call_operand.vmem [shape: bf16[128,256], index: 14, kind: input, shape index: {}]   ;;  %s6723_s15 = inlined_call_operand.vmem [shape: f32[1,256], index: 15, kind: input, shape index: {}]   ;;  %s6724_s16 = inlined_call_operand.vmem [shape: bf16[128,128], index: 16, kind: input, shape index: {}]   ;;  %s6725_s17 = inlined_call_operand.hbm [shape: f32[1,128], index: 17, kind: input, shape index: {}]   ;;  %s6726_s18 = inlined_call_operand.hbm [shape: f32[1,128], index: 18, kind: input, shape index: {}]   ;;  %s6727_s19 = inlined_call_operand.hbm [shape: f32[1,128], index: 19, kind: input, shape index: {}]   ;;  %s6728_s20 = inlined_call_operand.vmem [shape: bf16[128,512], index: 20, kind: input, shape index: {}]   ;;  %s6729_s21 = inlined_call_operand.vmem [shape: f32[1,512], index: 21, kind: input, shape index: {}]   ;;  %s6730_s22 = inlined_call_operand.vmem [shape: bf16[512,128], index: 22, kind: input, shape index: {}]   ;;  %s6731_s23 = inlined_call_operand.hbm [shape: f32[1,128], index: 23, kind: input, shape index: {}]   ;;  %s6732_s24 = inlined_call_operand.hbm [shape: f32[1,128], index: 24, kind: input, shape index: {}]   ;;  %s6733_s25 = inlined_call_operand.hbm [shape: f32[1,128], index: 25, kind: input, shape index: {}]   ;;  %s6734_s26 = inlined_call_operand.vmem [shape: f32[2,8,128], index: 26, kind: output, shape index: {}]  }
   0x1   :  { %6748 = sst [smem:[#allocation29_spill]] %s6708_s0 }
   0x2   :  { %6749 = sst [smem:[#allocation30_spill]] %s6709_s1 }
   0x3   :  { %6750 = sst [smem:[#allocation31_spill]] %s6710_s2 }
   0x4   :  { %6751 = sst [smem:[#allocation32_spill]] %s6711_s3 }
   0x5   :  { %6752 = sst [smem:[#allocation33_spill]] %s6712_s4 }
   0x6   :  { %6753 = sst [smem:[#allocation34_spill]] %s6713_s5 }
   0x7   :  { %6754 = sst [smem:[#allocation35_spill]] %s6714_s6 }
   0x8   :  { %6755 = sst [smem:[#allocation36_spill]] %s6715_s7 }
   0x9   :  { %6756 = sst [smem:[#allocation37_spill]] %s6716_s8 }
   0xa   :  { %6757 = sst [smem:[#allocation38_spill]] %s6717_s9 }
   0xb   :  { %6758 = sst [smem:[#allocation39_spill]] %s6718_s10 }
   0xc   :  { %6759 = sst [smem:[#allocation40_spill]] %s6728_s20 }
   0xd   :  { %6760 = sst [smem:[#allocation41_spill]] %s6729_s21 }
   0xe   :  { %6761 = sst [smem:[#allocation42_spill]] %s6730_s22 }
   0xf   :  { %6762 = sst [smem:[#allocation43_spill]] %s6734_s26 }
  0x10   :  { %31 = vsyncpa [#allocation3], 0 }
  0x11   :  { %32 = vsyncpa [#allocation5], 0 }
  0x12   :  { %33 = vsyncpa [#allocation8], 0 }
  0x13   :  { %34 = vsyncpa [#allocation11], 0 }
  0x14   :  { %35 = vsyncpa [#allocation14], 0 }
  0x15   :  { %36 = vsyncpa [#allocation17], 0 }
  0x16   :  { %37 = vsyncpa [#allocation20], 0  ;;  %s5597_s27 = smov 0  }
  0x17 LB: > { %6763 = sst [smem:[#allocation28_spill]] %s5444_s27  ;;  %s5446_s3 = smov [#allocation4]   ;;  %s5444_s27 = sphi %s5597_s27, %s43_s27  }
  0x18   : > { %s664_s7 = sshll.u32 %s5446_s3, 4  ;;  %s5603_s28 = sadd.s32 4294967295, %s5444_s27   ;;  %s5608_s7 = int_to_ptr.vmem [resolvable:$true] %s664_s7 }
  0x19   : > { %p4104_p0 = scmp.ge.s32.totalorder %s5444_s27, 1  ;;  %p640_p1 = scmp.lt.s32.totalorder %s5444_s27, 3 }
  0x1a   : > { %p6744_p2 = scmp.eq.s32.totalorder %s5603_s28, 0  ;;  %s5447_s4 = smov [#allocation7]  }
  0x1b   : > { %p5610_p3 = pnand %p4104_p0, %p640_p1  ;;  %s695_s29 = sshll.u32 %s5447_s4, 4  ;;  %s5616_s29 = int_to_ptr.vmem [resolvable:$true] %s695_s29 }
  0x1c   : > { %s5448_s0 = smov [#allocation10]   ;;  %s5449_s2 = smov [#allocation13]  }
  0x1d   : > { %s6764_s8 = scalar_select %p5610_p3, 1, 0 }
  0x1e   : > { %p4765_p4 = pneg %p5610_p3  ;;  %s720_s9 = sshll.u32 %s5448_s0, 4  ;;  %s5624_s9 = int_to_ptr.vmem [resolvable:$true] %s720_s9 }
  0x1f   : > { %s751_s5 = sshll.u32 %s5449_s2, 4  ;;  %s6766_s1 = sld [smem:[#allocation34_spill]]  ;;  %s5626_s5 = int_to_ptr.vmem [resolvable:$true] %s751_s5 }
  0x20   : > { %p5620_p5 = pnand %p6744_p2, %p4765_p4 }
  0x22   : > { %p5636_p7 = pneg %p5620_p5 }
  0x25   : > { %s5074_s3 = scalar_lea.hbm %s6766_s1, 16 }
  0x26   : > { %p5075_p6 = scmp.ne.s32.totalorder %s6766_s1, %s5074_s3  ;;  %p5081_p10 = scmp.lt.u32.totalorder %s5074_s3, %s6766_s1 }
  0x28   : > { %p5077_p8 = pnand %p5636_p7, %p5075_p6 }
  0x2a   : > { %p5078_p9 = pneg %p5077_p8 }
  0x2c   : > { %p5083_p11 = pnand %p5081_p10, %p5078_p9 }
  0x2e   : > { %5086 = shalt.err (!%p5083_p11)
}
  0x2f   : > { %s5087_s27 = scalar_lea.vmem %s5608_s7, 16  ;;  %s5094_s10 = scalar_lea.vmem %s5608_s7, 32 }
  0x30   : > { %p5088_p12 = scmp.ne.s32.totalorder %s5608_s7, %s5087_s27  ;;  %p5095_p1 = scmp.lt.s32.totalorder %s5608_s7, %s5608_s7 }
  0x31   : > { %p5096_p4 = scmp.lt.s32.totalorder %s5094_s10, %s5087_s27 }
  0x32   : > { %p5090_p13 = pnand %p5088_p12, %p5636_p7 }
  0x33   : > { %p5097_p6 = por %p5096_p4, %p5095_p1 }
  0x34   : > { %p5091_p0 = pneg %p5090_p13 }
  0x36   : > { %p5098_p8 = pnand %p5097_p6, %p5091_p0 }
  0x38   : > { %5101 = shalt.err (!%p5098_p8)
}
  0x39   : > { %4771 = dma.hbm_to_vmem [thread:$0]  (!%p5620_p5), %s6766_s1, 16, %s5608_s7, [#allocation5]  }
  0x3a   : > { %s6768_s2 = sld [smem:[#allocation39_spill]] }
  0x40   : > { %s5102_s21 = scalar_lea.hbm %s6768_s2, 16 }
  0x41   : > { %p5103_p9 = scmp.ne.s32.totalorder %s6768_s2, %s5102_s21  ;;  %p5109_p12 = scmp.lt.u32.totalorder %s5102_s21, %s6768_s2 }
  0x43   : > { %p5105_p10 = pnand %p5103_p9, %p5636_p7 }
  0x45   : > { %p5106_p11 = pneg %p5105_p10 }
  0x47   : > { %p5111_p13 = pnand %p5109_p12, %p5106_p11 }
  0x49   : > { %5114 = shalt.err (!%p5111_p13)
}
  0x4a   : > { %s5115_s7 = scalar_lea.vmem %s5616_s29, 16  ;;  %s5122_s20 = scalar_lea.vmem %s5616_s29, 32 }
  0x4b   : > { %p5116_p0 = scmp.ne.s32.totalorder %s5616_s29, %s5115_s7  ;;  %p5123_p6 = scmp.lt.s32.totalorder %s5616_s29, %s5616_s29 }
  0x4c   : > { %p5124_p8 = scmp.lt.s32.totalorder %s5122_s20, %s5115_s7 }
  0x4d   : > { %p5118_p1 = pnand %p5116_p0, %p5636_p7 }
  0x4e   : > { %p5125_p9 = por %p5124_p8, %p5123_p6 }
  0x4f   : > { %p5119_p4 = pneg %p5118_p1 }
  0x51   : > { %p5126_p10 = pnand %p5125_p9, %p5119_p4 }
  0x53   : > { %5129 = shalt.err (!%p5126_p10)
}
  0x54   : > { %4777 = dma.hbm_to_vmem [thread:$0]  (!%p5620_p5), %s6768_s2, 16, %s5616_s29, [#allocation8]  }
  0x55   : > { %s5130_s3 = scalar_lea.hbm %s6721_s13, 16 }
  0x56   : > { %p5131_p11 = scmp.ne.s32.totalorder %s6721_s13, %s5130_s3  ;;  %p5137_p0 = scmp.lt.u32.totalorder %s5130_s3, %s6721_s13 }
  0x58   : > { %p5133_p12 = pnand %p5131_p11, %p5636_p7 }
  0x5a   : > { %p5134_p13 = pneg %p5133_p12 }
  0x5c   : > { %p5139_p1 = pnand %p5137_p0, %p5134_p13 }
  0x5e   : > { %5142 = shalt.err (!%p5139_p1)
}
  0x5f   : > { %s5143_s29 = scalar_lea.vmem %s5624_s9, 16  ;;  %s5150_s20 = scalar_lea.vmem %s5624_s9, 32 }
  0x60   : > { %p5144_p4 = scmp.ne.s32.totalorder %s5624_s9, %s5143_s29  ;;  %p5151_p9 = scmp.lt.s32.totalorder %s5624_s9, %s5624_s9 }
  0x61   : > { %p5152_p10 = scmp.lt.s32.totalorder %s5150_s20, %s5143_s29 }
  0x62   : > { %p5146_p6 = pnand %p5144_p4, %p5636_p7 }
  0x63   : > { %p5153_p11 = por %p5152_p10, %p5151_p9 }
  0x64   : > { %p5147_p8 = pneg %p5146_p6 }
  0x66   : > { %p5154_p12 = pnand %p5153_p11, %p5147_p8 }
  0x68   : > { %5157 = shalt.err (!%p5154_p12)
}
  0x69   : > { %4783 = dma.hbm_to_vmem [thread:$0]  (!%p5620_p5), %s6721_s13, 16, %s5624_s9, [#allocation11]  }
  0x6a   : > { %s5158_s3 = scalar_lea.hbm %s6726_s18, 16 }
  0x6b   : > { %p5159_p13 = scmp.ne.s32.totalorder %s6726_s18, %s5158_s3  ;;  %p5165_p4 = scmp.lt.u32.totalorder %s5158_s3, %s6726_s18 }
  0x6d   : > { %p5161_p0 = pnand %p5159_p13, %p5636_p7 }
  0x6f   : > { %p5162_p1 = pneg %p5161_p0 }
  0x71   : > { %p5167_p6 = pnand %p5165_p4, %p5162_p1 }
  0x73   : > { %5170 = shalt.err (!%p5167_p6)
}
  0x74   : > { %s5171_s9 = scalar_lea.vmem %s5626_s5, 16  ;;  %s5178_s29 = scalar_lea.vmem %s5626_s5, 32 }
  0x75   : > { %p5172_p8 = scmp.ne.s32.totalorder %s5626_s5, %s5171_s9  ;;  %p5179_p11 = scmp.lt.s32.totalorder %s5626_s5, %s5626_s5 }
  0x76   : > { %p5180_p12 = scmp.lt.s32.totalorder %s5178_s29, %s5171_s9 }
  0x77   : > { %p5174_p9 = pnand %p5172_p8, %p5636_p7 }
  0x78   : > { %p5181_p13 = por %p5180_p12, %p5179_p11 }
  0x79   : > { %p5175_p10 = pneg %p5174_p9 }
  0x7b   : > { %p5182_p0 = pnand %p5181_p13, %p5175_p10 }
  0x7d   : > { %5185 = shalt.err (!%p5182_p0)
}
  0x7e   : > { %4789 = dma.hbm_to_vmem [thread:$0]  (!%p5620_p5), %s6726_s18, 16, %s5626_s5, [#allocation14]  }
  0x7f   : > { %s5450_s22 = smov [#allocation16]   ;;  %s5451_s6 = smov [#allocation2]  }
  0x80   : > { %s782_s26 = sshll.u32 %s5450_s22, 4  ;;  %s653_s3 = sshll.u32 %s5451_s6, 4  ;;  %s783_s26 = int_to_ptr.vmem [resolvable:$true] %s782_s26  ;;  %s654_s3 = int_to_ptr.vmem [resolvable:$true] %s653_s3 }
  0x81   : > { %s5186_s10 = scalar_lea.hbm %s6731_s23, 16 }
  0x82   : > { %p5187_p1 = scmp.ne.s32.totalorder %s6731_s23, %s5186_s10  ;;  %p5193_p8 = scmp.lt.u32.totalorder %s5186_s10, %s6731_s23 }
  0x84   : > { %p5189_p4 = pnand %p5187_p1, %p5636_p7 }
  0x86   : > { %p5190_p6 = pneg %p5189_p4 }
  0x88   : > { %p5195_p9 = pnand %p5193_p8, %p5190_p6 }
  0x8a   : > { %5198 = shalt.err (!%p5195_p9)
}
  0x8b   : > { %s5199_s5 = scalar_lea.vmem %s783_s26, 16  ;;  %s5206_s21 = scalar_lea.vmem %s783_s26, 32 }
  0x8c   : > { %p5200_p10 = scmp.ne.s32.totalorder %s783_s26, %s5199_s5  ;;  %p5207_p13 = scmp.lt.s32.totalorder %s783_s26, %s783_s26 }
  0x8d   : > { %p5208_p0 = scmp.lt.s32.totalorder %s5206_s21, %s5199_s5 }
  0x8e   : > { %p5202_p11 = pnand %p5200_p10, %p5636_p7 }
  0x8f   : > { %p5209_p2 = por %p5208_p0, %p5207_p13 }
  0x90   : > { %p5203_p12 = pneg %p5202_p11 }
  0x92   : > { %p5210_p3 = pnand %p5209_p2, %p5203_p12 }
  0x94   : > { %5213 = shalt.err (!%p5210_p3)
}
  0x95   : > { %4795 = dma.hbm_to_vmem [thread:$0]  (!%p5620_p5), %s6731_s23, 16, %s783_s26, [#allocation17]  }
  0x96   : > { %s6769_s10 = sld [smem:[#allocation33_spill]] }
  0x9c   : > { %s5214_s7 = scalar_lea.hbm %s6769_s10, 16 }
  0x9d   : > { %p5215_p1 = scmp.ne.s32.totalorder %s6769_s10, %s5214_s7  ;;  %p5221_p3 = scmp.lt.u32.totalorder %s5214_s7, %s6769_s10 }
  0x9f   : > { %p5217_p4 = pnand %p5215_p1, %p5636_p7 }
  0xa1   : > { %p5218_p2 = pneg %p5217_p4 }
  0xa3   : > { %p5223_p6 = pnand %p5221_p3, %p5218_p2 }
  0xa5   : > { %5226 = shalt.err (!%p5223_p6)
}
  0xa6   : > { %s5227_s21 = scalar_lea.vmem %s654_s3, 16  ;;  %s5234_s26 = scalar_lea.vmem %s654_s3, 32 }
  0xa7   : > { %p5228_p8 = scmp.ne.s32.totalorder %s654_s3, %s5227_s21  ;;  %p5235_p11 = scmp.lt.s32.totalorder %s654_s3, %s654_s3 }
  0xa8   : > { %p5236_p12 = scmp.lt.s32.totalorder %s5234_s26, %s5227_s21 }
  0xa9   : > { %p5230_p9 = pnand %p5228_p8, %p5636_p7 }
  0xaa   : > { %p5237_p13 = por %p5236_p12, %p5235_p11 }
  0xab   : > { %p5231_p10 = pneg %p5230_p9 }
  0xad   : > { %p5238_p0 = pnand %p5237_p13, %p5231_p10 }
  0xaf   : > { %5241 = shalt.err (!%p5238_p0)
}
  0xb0   : > { %4768 = dma.hbm_to_vmem [thread:$0]  (!%p5620_p5), %s6769_s10, 16, %s654_s3, [#allocation3]  }
  0xb1   : > { %s5452_s4 = smov [#allocation6]   ;;  %s5453_s7 = smov [#allocation9]  }
  0xb2   : > { %s684_s27 = sshll.u32 %s5452_s4, 4  ;;  %s706_s9 = sshll.u32 %s5453_s7, 4  ;;  %s685_s27 = int_to_ptr.vmem [resolvable:$true] %s684_s27  ;;  %s707_s9 = int_to_ptr.vmem [resolvable:$true] %s706_s9 }
  0xb3   : > { %s6770_s5 = sld [smem:[#allocation38_spill]] }
  0xb9   : > { %s5242_s1 = scalar_lea.hbm %s6770_s5, 16 }
  0xba   : > { %p5243_p1 = scmp.ne.s32.totalorder %s6770_s5, %s5242_s1  ;;  %p5249_p3 = scmp.lt.u32.totalorder %s5242_s1, %s6770_s5 }
  0xbc   : > { %p5245_p4 = pnand %p5243_p1, %p5636_p7 }
  0xbe   : > { %p5246_p2 = pneg %p5245_p4 }
  0xc0   : > { %p5251_p6 = pnand %p5249_p3, %p5246_p2 }
  0xc2   : > { %5254 = shalt.err (!%p5251_p6)
}
  0xc3   : > { %s5255_s3 = scalar_lea.vmem %s685_s27, 16  ;;  %s5262_s6 = scalar_lea.vmem %s685_s27, 32 }
  0xc4   : > { %p5256_p8 = scmp.ne.s32.totalorder %s685_s27, %s5255_s3  ;;  %p5263_p11 = scmp.lt.s32.totalorder %s685_s27, %s685_s27 }
  0xc5   : > { %p5264_p12 = scmp.lt.s32.totalorder %s5262_s6, %s5255_s3 }
  0xc6   : > { %p5258_p9 = pnand %p5256_p8, %p5636_p7 }
  0xc7   : > { %p5265_p13 = por %p5264_p12, %p5263_p11 }
  0xc8   : > { %p5259_p10 = pneg %p5258_p9 }
  0xca   : > { %p5266_p0 = pnand %p5265_p13, %p5259_p10 }
  0xcc   : > { %5269 = shalt.err (!%p5266_p0)
}
  0xcd   : > { %4774 = dma.hbm_to_vmem [thread:$0]  (!%p5620_p5), %s6770_s5, 16, %s685_s27, [#allocation5]  }
  0xce   : > { %s5270_s29 = scalar_lea.hbm %s6719_s11, 16 }
  0xcf   : > { %p5271_p1 = scmp.ne.s32.totalorder %s6719_s11, %s5270_s29  ;;  %p5277_p3 = scmp.lt.u32.totalorder %s5270_s29, %s6719_s11 }
  0xd1   : > { %p5273_p4 = pnand %p5271_p1, %p5636_p7 }
  0xd3   : > { %p5274_p2 = pneg %p5273_p4 }
  0xd5   : > { %p5279_p6 = pnand %p5277_p3, %p5274_p2 }
  0xd7   : > { %5282 = shalt.err (!%p5279_p6)
}
  0xd8   : > { %s5283_s3 = scalar_lea.vmem %s707_s9, 16  ;;  %s5290_s27 = scalar_lea.vmem %s707_s9, 32 }
  0xd9   : > { %p5284_p8 = scmp.ne.s32.totalorder %s707_s9, %s5283_s3  ;;  %p5291_p11 = scmp.lt.s32.totalorder %s707_s9, %s707_s9 }
  0xda   : > { %p5292_p12 = scmp.lt.s32.totalorder %s5290_s27, %s5283_s3 }
  0xdb   : > { %p5286_p9 = pnand %p5284_p8, %p5636_p7 }
  0xdc   : > { %p5293_p13 = por %p5292_p12, %p5291_p11 }
  0xdd   : > { %p5287_p10 = pneg %p5286_p9 }
  0xdf   : > { %p5294_p0 = pnand %p5293_p13, %p5287_p10 }
  0xe1   : > { %5297 = shalt.err (!%p5294_p0)
}
  0xe2   : > { %4780 = dma.hbm_to_vmem [thread:$0]  (!%p5620_p5), %s6719_s11, 16, %s707_s9, [#allocation8]  }
  0xe3   : > { %s5454_s7 = smov [#allocation12]   ;;  %s5455_s2 = smov [#allocation15]  }
  0xe4   : > { %s740_s1 = sshll.u32 %s5454_s7, 4  ;;  %s762_s29 = sshll.u32 %s5455_s2, 4  ;;  %s741_s1 = int_to_ptr.vmem [resolvable:$true] %s740_s1  ;;  %s763_s29 = int_to_ptr.vmem [resolvable:$true] %s762_s29 }
  0xe5   : > { %s5298_s26 = scalar_lea.hbm %s6725_s17, 16 }
  0xe6   : > { %p5299_p1 = scmp.ne.s32.totalorder %s6725_s17, %s5298_s26  ;;  %p5305_p3 = scmp.lt.u32.totalorder %s5298_s26, %s6725_s17 }
  0xe8   : > { %p5301_p4 = pnand %p5299_p1, %p5636_p7 }
  0xea   : > { %p5302_p2 = pneg %p5301_p4 }
  0xec   : > { %p5307_p6 = pnand %p5305_p3, %p5302_p2 }
  0xee   : > { %5310 = shalt.err (!%p5307_p6)
}
  0xef   : > { %s5311_s9 = scalar_lea.vmem %s741_s1, 16  ;;  %s5318_s4 = scalar_lea.vmem %s741_s1, 32 }
  0xf0   : > { %p5312_p8 = scmp.ne.s32.totalorder %s741_s1, %s5311_s9  ;;  %p5319_p11 = scmp.lt.s32.totalorder %s741_s1, %s741_s1 }
  0xf1   : > { %p5320_p12 = scmp.lt.s32.totalorder %s5318_s4, %s5311_s9 }
  0xf2   : > { %p5314_p9 = pnand %p5312_p8, %p5636_p7 }
  0xf3   : > { %p5321_p13 = por %p5320_p12, %p5319_p11 }
  0xf4   : > { %p5315_p10 = pneg %p5314_p9 }
  0xf6   : > { %p5322_p0 = pnand %p5321_p13, %p5315_p10 }
  0xf8   : > { %5325 = shalt.err (!%p5322_p0)
}
  0xf9   : > { %4786 = dma.hbm_to_vmem [thread:$0]  (!%p5620_p5), %s6725_s17, 16, %s741_s1, [#allocation11]  }
  0xfa   : > { %s5326_s26 = scalar_lea.hbm %s6727_s19, 16 }
  0xfb   : > { %p5327_p1 = scmp.ne.s32.totalorder %s6727_s19, %s5326_s26  ;;  %p5333_p3 = scmp.lt.u32.totalorder %s5326_s26, %s6727_s19 }
  0xfd   : > { %p5329_p4 = pnand %p5327_p1, %p5636_p7 }
  0xff   : > { %p5330_p2 = pneg %p5329_p4 }
 0x101   : > { %p5335_p6 = pnand %p5333_p3, %p5330_p2 }
 0x103   : > { %5338 = shalt.err (!%p5335_p6)
}
 0x104   : > { %s5339_s9 = scalar_lea.vmem %s763_s29, 16  ;;  %s5346_s1 = scalar_lea.vmem %s763_s29, 32 }
 0x105   : > { %p5340_p8 = scmp.ne.s32.totalorder %s763_s29, %s5339_s9  ;;  %p5347_p11 = scmp.lt.s32.totalorder %s763_s29, %s763_s29 }
 0x106   : > { %p5348_p12 = scmp.lt.s32.totalorder %s5346_s1, %s5339_s9 }
 0x107   : > { %p5342_p9 = pnand %p5340_p8, %p5636_p7 }
 0x108   : > { %p5349_p13 = por %p5348_p12, %p5347_p11 }
 0x109   : > { %p5343_p10 = pneg %p5342_p9 }
 0x10b   : > { %p5350_p0 = pnand %p5349_p13, %p5343_p10 }
 0x10d   : > { %5353 = shalt.err (!%p5350_p0)
}
 0x10e   : > { %4792 = dma.hbm_to_vmem [thread:$0]  (!%p5620_p5), %s6727_s19, 16, %s763_s29, [#allocation14]  }
 0x10f   : > { %s5456_s2 = smov [#allocation18]   ;;  %s5457_s21 = smov [#allocation19]  }
 0x110   : > { %s793_s20 = sshll.u32 %s5456_s2, 4  ;;  %s804_s26 = sshll.u32 %s5457_s21, 4  ;;  %s794_s20 = int_to_ptr.vmem [resolvable:$true] %s793_s20  ;;  %s805_s26 = int_to_ptr.vmem [resolvable:$true] %s804_s26 }
 0x111   : > { %s5354_s27 = scalar_lea.hbm %s6732_s24, 16 }
 0x112   : > { %p5355_p1 = scmp.ne.s32.totalorder %s6732_s24, %s5354_s27  ;;  %p5361_p3 = scmp.lt.u32.totalorder %s5354_s27, %s6732_s24 }
 0x114   : > { %p5357_p4 = pnand %p5355_p1, %p5636_p7 }
 0x116   : > { %p5358_p2 = pneg %p5357_p4 }
 0x118   : > { %p5363_p6 = pnand %p5361_p3, %p5358_p2 }
 0x11a   : > { %5366 = shalt.err (!%p5363_p6)
}
 0x11b   : > { %s5367_s29 = scalar_lea.vmem %s794_s20, 16  ;;  %s5374_s7 = scalar_lea.vmem %s794_s20, 32 }
 0x11c   : > { %p5368_p8 = scmp.ne.s32.totalorder %s794_s20, %s5367_s29  ;;  %p5375_p11 = scmp.lt.s32.totalorder %s794_s20, %s794_s20 }
 0x11d   : > { %p5376_p12 = scmp.lt.s32.totalorder %s5374_s7, %s5367_s29 }
 0x11e   : > { %p5370_p9 = pnand %p5368_p8, %p5636_p7 }
 0x11f   : > { %p5377_p13 = por %p5376_p12, %p5375_p11 }
 0x120   : > { %p5371_p10 = pneg %p5370_p9 }
 0x122   : > { %p5378_p0 = pnand %p5377_p13, %p5371_p10 }
 0x124   : > { %5381 = shalt.err (!%p5378_p0)
}
 0x125   : > { %4798 = dma.hbm_to_vmem [thread:$0]  (!%p5620_p5), %s6732_s24, 16, %s794_s20, [#allocation17]  }
 0x126   : > { %s5382_s27 = scalar_lea.hbm %s6733_s25, 16 }
 0x127   : > { %p5383_p1 = scmp.ne.s32.totalorder %s6733_s25, %s5382_s27  ;;  %p5389_p3 = scmp.lt.u32.totalorder %s5382_s27, %s6733_s25 }
 0x129   : > { %p5385_p4 = pnand %p5383_p1, %p5636_p7 }
 0x12b   : > { %p5386_p2 = pneg %p5385_p4 }
 0x12d   : > { %p5391_p6 = pnand %p5389_p3, %p5386_p2 }
 0x12f   : > { %5394 = shalt.err (!%p5391_p6)
}
 0x130   : > { %s5395_s29 = scalar_lea.vmem %s805_s26, 16  ;;  %s5402_s20 = scalar_lea.vmem %s805_s26, 32 }
 0x131   : > { %p5396_p8 = scmp.ne.s32.totalorder %s805_s26, %s5395_s29  ;;  %p5403_p11 = scmp.lt.s32.totalorder %s805_s26, %s805_s26 }
 0x132   : > { %p5404_p12 = scmp.lt.s32.totalorder %s5402_s20, %s5395_s29 }
 0x133   : > { %p5398_p9 = pnand %p5396_p8, %p5636_p7 }
 0x134   : > { %p5405_p13 = por %p5404_p12, %p5403_p11 }
 0x135   : > { %p5399_p10 = pneg %p5398_p9 }
 0x137   : > { %p5406_p0 = pnand %p5405_p13, %p5399_p10 }
 0x139   : > { %5409 = shalt.err (!%p5406_p0)
}
 0x13a   : > { %4801 = dma.hbm_to_vmem [thread:$0]  (!%p5620_p5), %s6733_s25, 16, %s805_s26, [#allocation20]  }
 0x13b   : > { %p6771_p1 = scmp.ne.s32.totalorder %s6764_s8, 0 }
 0x13c   : > { %p6772_p4 = scmp.eq.s32.totalorder (!%p6771_p1), %s5603_s28, 0 }
 0x13d   : > { %844 = sbr.rel (%p6771_p1) target bundleno = 5288 (0x14a8), region = 124 }
 0x144   : > { %5415 = dma.done.wait (%p6772_p4), [#allocation3], 16   ;;  %p6773_p7 = pmov %p6772_p4 }
 0x145   : > { %p6774_p2 = pmov %p6772_p4 }
 0x146   : > { %5417 = vsyncadd (%p6773_p7), [#allocation3], 4294967280 }
 0x147   : > { %5419 = dma.done.wait (%p6774_p2), [#allocation5], 32   ;;  %p6775_p3 = pmov %p6774_p2 }
 0x148   : > { %p6776_p6 = pmov %p6774_p2 }
 0x149   : > { %5421 = vsyncadd (%p6775_p3), [#allocation5], 4294967264 }
 0x14a   : > { %5423 = dma.done.wait (%p6776_p6), [#allocation8], 32   ;;  %p6777_p5 = pmov %p6774_p2 }
 0x14b   : > { %p6778_p8 = pmov %p6774_p2 }
 0x14c   : > { %5425 = vsyncadd (%p6777_p5), [#allocation8], 4294967264 }
 0x14d   : > { %5427 = dma.done.wait (%p6778_p8), [#allocation11], 32   ;;  %p6779_p9 = pmov %p6774_p2 }
 0x14e   : > { %p6780_p10 = pmov %p6774_p2 }
 0x14f   : > { %5429 = vsyncadd (%p6779_p9), [#allocation11], 4294967264 }
 0x150   : > { %5431 = dma.done.wait (%p6780_p10), [#allocation14], 32   ;;  %p6781_p11 = pmov %p6774_p2 }
 0x151   : > { %p6782_p12 = pmov %p6774_p2 }
 0x152   : > { %5433 = vsyncadd (%p6781_p11), [#allocation14], 4294967264 }
 0x153   : > { %5435 = dma.done.wait (%p6782_p12), [#allocation17], 32   ;;  %p6783_p13 = pmov %p6774_p2 }
 0x154   : > { %p6784_p0 = pmov %p6774_p2 }
 0x155   : > { %5437 = vsyncadd (%p6783_p13), [#allocation17], 4294967264 }
 0x156   : > { %5439 = dma.done.wait (%p6784_p0), [#allocation20], 16   ;;  %p6785_p1 = pmov %p6784_p0 }
 0x157   : > { %p967_p4 = scmp.lt.s32.totalorder %s5603_s28, 1  ;;  %s6786_s26 = sld [smem:[#allocation29_spill]]  ;;  %v5458_v3 = vmov 0.0   ;;  %v5459_v25 = vmov 0   ;;  %vm5460_vm0 = vmmov 0   ;;  %v1051_v41 = vlaneseq }
 0x158   : > { %5441 = vsyncadd (%p6785_p1), [#allocation20], 4294967280  ;;  %s6787_s27 = sld [smem:[#allocation35_spill]]  ;;  %4431 = vmatprep.subr.bf16.mxu1 %v5458_v3  ;;  %1226 = vmatprep.mubr.bf16.mxu0 %v5459_v25  ;;  %v4135_v35 = vld [vmem:[#allocation2] ss:$0 sm:$0xff]  ;;  %s6789_s2 = sld [smem:[#allocation36_spill]] }
 0x159   : > { %s6800_s28 = smov (!%p967_p4, %s5603_s28), 1  ;;  %4447 = vmatprep.mubr.msk.bf16.mxu1 %vm5460_vm0, %v5458_v3  ;;  %v4136_v37 = vld [vmem:[#allocation4] ss:$0 sm:$0xff]  ;;  %v6008_v42 = vshrl.u32 %v1051_v41, 7  ;;  %v1283_v43 = vand.u32 127, %v1051_v41  ;;  %vm1415_vm9 = vcmask 1043456  }
 0x15a   : > { %s5909_s8 = sshll.u32 %s6800_s28, 3  ;;  %vm1336_vm10 = vcmask 64512   ;;  %s6791_s3 = sld [smem:[#allocation37_spill]]  ;;  %vm2291_vm11 = vcmask 1041408   ;;  %vm2292_vm12 = vcmask 1042432   ;;  %vm2218_vm13 = vcmask 39936  }
 0x15b   : > { %v1061_v44 = vsub.s32 2, %v6008_v42  ;;  %v6015_v46 = vsub.s32 1, %v6008_v42  ;;  %vm1505_vm1 = vcmp.ge.s32.totalorder %v1283_v43, 64  ;;  %vm1506_vm2 = vcmp.lt.s32.totalorder %v1283_v43, 96  ;;  %s6792_s1 = sld [smem:[#allocation31_spill]]  ;;  %s6794_s7 = sld [smem:[#allocation40_spill]] }
 0x15c   : > { %vm1286_vm3 = vcmp.lt.s32.totalorder %v1283_v43, 32  ;;  %vm1507_vm4 = vmand %vm1505_vm1, %vm1506_vm2  ;;  %vm1615_vm5 = vcmp.ge.s32.totalorder %v1283_v43, 96  ;;  %v6027_v53 = vsub.s32 0, %v6008_v42  ;;  %vm1349_vm6 = vcmp.ge.s32.totalorder %v1283_v43, 32  ;;  %s6795_s20 = sld [smem:[#allocation42_spill]] }
 0x15d   : > { %s970_s21 = scalar_lea.vmem %s6786_s26, %s5909_s8  ;;  %v6021_v51 = vsel %vm1286_vm3, 1.0, %v5458_v3  ;;  %v6024_v52 = vsel %vm1507_vm4, 1.0, %v5458_v3  ;;  %vm1350_vm7 = vcmp.lt.s32.totalorder %v1283_v43, 64  ;;  %v6030_v60 = vsel %vm1615_vm5, 1.0, %v5458_v3  ;;  %s6790_s26 = sld [smem:[#allocation30_spill]] }
 0x15e   : > { %v987_v0 = vld [vmem:[%s970_s21] sm:$0xff]  ;;  %s6788_s6 = smov %s6787_s27  ;;  %vm1351_vm8 = vmand %vm1349_vm6, %vm1350_vm7 }
 0x15f   : > { %990 = vadd.xlane.f32.xlu0 %v987_v0  ;;  %v4850_v1 = vld [vmem:[%s6787_s27 + $0x4] ss:$12 sps:$4 sm:$0xff]   ;;  %v4852_v2 = vld [vmem:[%s6788_s6] ss:$12 sps:$4 sm:$0xff]   ;;  %v4853_v4 = vld [vmem:[%s6788_s6 + $0x8] ss:$12 sps:$4 sm:$0xff]  }
 0x160   : > { %v4854_v5 = vld [vmem:[%s6788_s6 + $0x1c] ss:$12 sps:$4 sm:$0xff]   ;;  %v4856_v6 = vld [vmem:[%s6788_s6 + $0x18] ss:$12 sps:$4 sm:$0xff]   ;;  %1194 = vmatprep.subr.bf16.mxu0 %v4850_v1  ;;  %v4857_v7 = vld [vmem:[%s6788_s6 + $0x20] ss:$12 sps:$4 sm:$0xff]   ;;  %4432 = vmatpush3.bf16.msra.mxu1 %v4853_v4 }
 0x161   : > { %v4858_v8 = vld [vmem:[%s6788_s6 + $0x34] ss:$12 sps:$4 sm:$0xff]   ;;  %1195 = vmatpush1.bf16.msra.mxu0 %v4852_v2  ;;  %4433 = vmatprep.subr.bf16.mxu1 %v5458_v3  ;;  %v4860_v13 = vld [vmem:[%s6788_s6 + $0x30] ss:$12 sps:$4 sm:$0xff]   ;;  %v4861_v14 = vld [vmem:[%s6788_s6 + $0x38] ss:$12 sps:$4 sm:$0xff]   ;;  %s977_s4 = scalar_lea.vmem %s6792_s1, %s5909_s8 }
 0x162   : > { %1196 = vmatprep.subr.bf16.mxu0 %v4854_v5  ;;  %v4862_v15 = vld [vmem:[%s6788_s6 + $0x4c] ss:$12 sps:$4 sm:$0xff]   ;;  %v4864_v16 = vld [vmem:[%s6788_s6 + $0x48] ss:$12 sps:$4 sm:$0xff]   ;;  %v4865_v17 = vld [vmem:[%s6788_s6 + $0x50] ss:$12 sps:$4 sm:$0xff]  }
 0x163   : > { %v4866_v18 = vld [vmem:[%s6788_s6 + $0x64] ss:$12 sps:$4 sm:$0xff]   ;;  %v4868_v19 = vld [vmem:[%s6788_s6 + $0x60] ss:$12 sps:$4 sm:$0xff]   ;;  %v4869_v20 = vld [vmem:[%s6788_s6 + $0x68] ss:$12 sps:$4 sm:$0xff]   ;;  %s973_s21 = scalar_lea.vmem %s6790_s26, %s6800_s28 }
 0x164   : > { %4434 = vmatpush3.bf16.msra.mxu1 %v4857_v7  ;;  %v4870_v21 = vld [vmem:[%s6788_s6 + $0x7c] ss:$12 sps:$4 sm:$0xff]   ;;  %v4872_v22 = vld [vmem:[%s6788_s6 + $0x78] ss:$12 sps:$4 sm:$0xff]   ;;  %v4873_v23 = vld [vmem:[%s6788_s6 + $0x80] ss:$12 sps:$4 sm:$0xff]  }
 0x165   : > { %1197 = vmatpush1.bf16.msra.mxu0 %v4856_v6  ;;  %4435 = vmatprep.subr.bf16.mxu1 %v5458_v3  ;;  %v4874_v24 = vld [vmem:[%s6788_s6 + $0x94] ss:$12 sps:$4 sm:$0xff]   ;;  %v4876_v26 = vld [vmem:[%s6788_s6 + $0x90] ss:$12 sps:$4 sm:$0xff]   ;;  %v4877_v27 = vld [vmem:[%s6788_s6 + $0x98] ss:$12 sps:$4 sm:$0xff]  }
 0x166   : > { %1198 = vmatprep.subr.bf16.mxu0 %v4858_v8  ;;  %v4878_v28 = vld [vmem:[%s6788_s6 + $0xac] ss:$12 sps:$4 sm:$0xff]   ;;  %v4880_v29 = vld [vmem:[%s6788_s6 + $0xa8] ss:$12 sps:$4 sm:$0xff]   ;;  %v4881_v30 = vld [vmem:[%s6788_s6 + $0xb0] ss:$12 sps:$4 sm:$0xff]  }
 0x167   : > { %v1049_v45 = vld [vmem:[%s6789_s2] sm:$0x7]  ;;  %s6793_s27 = sld [smem:[#allocation32_spill]] }
 0x168   : > { %4436 = vmatpush3.bf16.msra.mxu1 %v4861_v14  ;;  %v1062_v47 = vrot.slane %v1049_v45, %v1061_v44  ;;  %v1058_v48 = vrot.slane %v1049_v45, %v6015_v46  ;;  %v1054_v4 = vrot.slane %v1049_v45, %v6027_v53 }
 0x169   : > { %1199 = vmatpush1.bf16.msra.mxu0 %v4860_v13  ;;  %4437 = vmatprep.subr.bf16.mxu1 %v5458_v3 }
 0x16a   : > { %1200 = vmatprep.subr.bf16.mxu0 %v4862_v15 }
 0x16c   : > { %4438 = vmatpush3.bf16.msra.mxu1 %v4865_v17 }
 0x16d   : > { %1201 = vmatpush1.bf16.msra.mxu0 %v4864_v16  ;;  %4439 = vmatprep.subr.bf16.mxu1 %v5458_v3  ;;  %s981_s9 = scalar_lea.vmem %s6793_s27, %s5909_s8  ;;  %s6797_s27 = sld [smem:[#allocation43_spill]] }
 0x16e   : > { %1202 = vmatprep.subr.bf16.mxu0 %v4866_v18 }
 0x170   : > { %4440 = vmatpush3.bf16.msra.mxu1 %v4869_v20 }
 0x171   : > { %1203 = vmatpush1.bf16.msra.mxu0 %v4868_v19  ;;  %4441 = vmatprep.subr.bf16.mxu1 %v5458_v3 }
 0x172   : > { %1204 = vmatprep.subr.bf16.mxu0 %v4870_v21 }
 0x174   : > { %4442 = vmatpush3.bf16.msra.mxu1 %v4873_v23 }
 0x175   : > { %1205 = vmatpush1.bf16.msra.mxu0 %v4872_v22  ;;  %4443 = vmatprep.subr.bf16.mxu1 %v5458_v3 }
 0x176   : > { %1206 = vmatprep.subr.bf16.mxu0 %v4874_v24 }
 0x178   : > { %4444 = vmatpush3.bf16.msra.mxu1 %v4877_v27  ;;  %v4161_v27 = vld [vmem:[%s973_s21] ss:$0 sm:$0xff]  ;;  %s6796_s21 = sld [smem:[#allocation41_spill]] }
 0x179   : > { %1207 = vmatpush1.bf16.msra.mxu0 %v4876_v26  ;;  %4445 = vmatprep.subr.bf16.mxu1 %v5458_v3 }
 0x17a   : > { %1208 = vmatprep.subr.bf16.mxu0 %v4878_v28 }
 0x17c   : > { %4446 = vmatpush3.bf16.msra.mxu1 %v4881_v30 }
 0x17d   : > { %1209 = vmatpush1.bf16.msra.mxu0 %v4880_v29  ;;  %4475 = vmatprep.subr.bf16.mxu1 %v5458_v3 }
 0x17e   : > { %4451 = vmatprep.subr.bf16.mxu0 %v5458_v3 }
 0x1ec   : > { %v991_v9 = vpop.xlane.xlu0 %990 }
 0x1ed   : > { %v993_v10 = vmul.f32 0.0078125, %v991_v9 }
 0x1ef   : > { %v994_v11 = vsub.f32 %v987_v0, %v993_v10  ;;  %v6039_v10 = vsel %vm1351_vm8, 1.0, %v5458_v3 }
 0x1f1   : > { %v995_v12 = vmul.f32 %v994_v11, %v994_v11 }
 0x1f3   : > { %996 = vadd.xlane.f32.xlu0 %v995_v12 }
 0x280   : > { %v997_v31 = vpop.xlane.xlu0 %996 }
 0x281   : > { %v998_v32 = vmul.f32 0.0078125, %v997_v31 }
 0x283   : > { %v999_v33 = vadd.f32 1e-12, %v998_v32 }
 0x285   : > { %5010 = vrsqrt.f32 %v999_v33 }
 0x28f   : > { %v5011_v34 = vpop.eup %5010 }
 0x290   : > { %v1001_v36 = vmul.f32 %v5011_v34, %v994_v11 }
 0x292   : > { %v1008_v38 = vmul.f32 %v4135_v35, %v1001_v36 }
 0x294   : > { %v6000_v39 = vadd.f32 %v4136_v37, %v1008_v38 }
 0x296   : > { %v1048_v40 = vpack.c.bf16 %v6000_v39, %v6000_v39 }
 0x298   : > { %1227 = vmatmul.mubr.bf16.vlgmr.msra.gmra.mrb[0].mxu0 %v1048_v40  ;;  %4448 = vmatmul.mubr.bf16.vlgmr.msra.gmra.mrb[0].mxu1 %v1048_v40 }
 0x299   : > { %4453 = vmatprep.mubr.msk.bf16.mxu0 %vm5460_vm0, %v5458_v3  ;;  %4477 = vmatprep.mubr.msk.bf16.mxu1 %vm5460_vm0, %v5458_v3 }
 0x36b   : > { %v1228_v49 = vpop.f32.mrb[0].mxu0  ;;  %v1269_v50 = vpop.f32.mrb[0].mxu1 }
 0x36c   : > { %v1270_v54 = vadd.f32 %v1269_v50, %v1062_v47  ;;  %v1230_v55 = vpop.f32.mrb[1].mxu0  ;;  %v4449_v56 = vpop.f32.mrb[1].mxu1  ;;  %v1229_v14 = vadd.f32 %v1228_v49, %v1054_v4 }
 0x36d   : > { %v1231_v57 = vadd.f32 %v1230_v55, %v1058_v48  ;;  %v1232_v58 = vpop.f32.mrb[2].mxu0  ;;  %v1272_v59 = vpop.f32.mrb[2].mxu1 }
 0x36e   : > { %v1233_v61 = vpop.f32.mrb[3].mxu0  ;;  %v4450_v62 = vpop.f32.mrb[3].mxu1  ;;  %v1292_v63 = vmul.f32 %v6021_v51, %v1270_v54  ;;  %v1512_v0 = vmul.f32 %v6024_v52, %v1270_v54  ;;  %v1622_v7 = vmul.f32 %v6030_v60, %v1270_v54  ;;  %v1284_v18 = vpack.c.bf16 %v1229_v14, %v1229_v14 }
 0x36f   : > { %v1290_v1 = vmul.f32 %v6021_v51, %v1231_v57  ;;  %v1510_v2 = vmul.f32 %v6024_v52, %v1231_v57  ;;  %v1354_v16 = vmul.f32 %v6039_v10, %v1231_v57  ;;  %v1620_v17 = vmul.f32 %v6030_v60, %v1231_v57 }
 0x370   : > { %v1293_v5 = vpack.c.bf16 %v1292_v63, %v1292_v63  ;;  %v1513_v6 = vpack.c.bf16 %v1512_v0, %v1512_v0  ;;  %v1623_v13 = vpack.c.bf16 %v1622_v7, %v1622_v7  ;;  %v1356_v21 = vmul.f32 %v6039_v10, %v1270_v54 }
 0x371   : > { %v1291_v8 = vpack.c.bf16 %v1290_v1, %v1290_v1  ;;  %v1511_v9 = vpack.c.bf16 %v1510_v2, %v1510_v2  ;;  %v1355_v19 = vpack.c.bf16 %v1354_v16, %v1354_v16  ;;  %v1621_v20 = vpack.c.bf16 %v1620_v17, %v1620_v17 }
 0x372   : > { %v6042_v11 = vsel %vm1415_vm9, %v1293_v5, 0  ;;  %v6045_v12 = vsel %vm1415_vm9, %v1513_v6, 0  ;;  %v6050_v15 = vsel %vm1415_vm9, %v1623_v13, 0  ;;  %v1357_v22 = vpack.c.bf16 %v1356_v21, %v1356_v21 }
 0x373   : > { %4452 = vmatpush3.bf16.xpose.msra.mxu0 %v1291_v8  ;;  %4476 = vmatpush3.bf16.xpose.msra.mxu1 %v1511_v9 }
 0x374   : > { %4457 = vmatprep.subr.bf16.mxu0 %v5458_v3  ;;  %4487 = vmatprep.subr.bf16.mxu1 %v5458_v3  ;;  %v1417_v23 = vsel %vm1415_vm9, %v1357_v22, 0 }
 0x37a   : > { %4454 = vmatmul.mubr.bf16.vlgmr.msra.gmra.mrb[4].mxu0 %v1284_v18  ;;  %4478 = vmatmul.mubr.bf16.vlgmr.msra.gmra.mrb[4].mxu1 %v1284_v18 }
 0x37b   : > { %4458 = vmatpush3.bf16.xpose.msra.mxu0 %v1355_v19  ;;  %4488 = vmatpush3.bf16.xpose.msra.mxu1 %v1621_v20 }
 0x37c   : > { %4459 = vmatprep.mubr.msk.bf16.mxu0 %vm5460_vm0, %v5458_v3  ;;  %4489 = vmatprep.mubr.msk.bf16.mxu1 %vm5460_vm0, %v5458_v3 }
 0x37d   : > { %4463 = vmatprep.subr.bf16.mxu0 %v5458_v3  ;;  %4499 = vmatprep.subr.bf16.mxu1 %v5458_v3 }
 0x382   : > { %4460 = vmatmul.mubr.bf16.vlgmr.msra.gmra.mrb[8].mxu0 %v1284_v18  ;;  %4490 = vmatmul.mubr.bf16.vlgmr.msra.gmra.mrb[8].mxu1 %v1284_v18 }
 0x383   : > { %4464 = vmatpush3.bf16.msra.mxu0 %v1417_v23  ;;  %4465 = vmatprep.mubr.msk.bf16.mxu0 %vm5460_vm0, %v5458_v3  ;;  %v4882_v23 = vld [vmem:[%s6791_s3] sm:$0xff]  }
 0x384   : > { %4469 = vmatprep.subr.bf16.mxu0 %v5458_v3  ;;  %4515 = vmatprep.mubr.msk.bf16.mxu1 %vm5460_vm0, %v5458_v3 }
 0x385   : > { %4500 = vmatpush3.bf16.msra.mxu1 %v4882_v23  ;;  %v4910_v23 = vld [vmem:[%s6720_s12 + $0x10] sm:$0xff]  }
 0x386   : > { %4501 = vmatprep.subr.bf16.mxu1 %v5458_v3 }
 0x44d   : > { %v1328_v24 = vpop.f32.mrb[4].mxu0  ;;  %v1548_v26 = vpop.f32.mrb[4].mxu1 }
 0x44e   : > { %v1554_v28 = vmul.f32 0.17677669, %v1548_v26  ;;  %v4455_v29 = vpop.f32.mrb[5].mxu0  ;;  %v4479_v30 = vpop.f32.mrb[5].mxu1  ;;  %v1334_v40 = vmul.f32 0.17677669, %v1328_v24 }
 0x44f   : > { %v1331_v31 = vpop.f32.mrb[6].mxu0  ;;  %v1551_v32 = vpop.f32.mrb[6].mxu1  ;;  %v4883_v24 = vld [vmem:[%s6791_s3 + $0x8] sm:$0xff]   ;;  %v4884_v26 = vld [vmem:[%s6791_s3 + $0x10] sm:$0xff]  }
 0x450   : > { %v4456_v33 = vpop.f32.mrb[7].mxu0  ;;  %v4480_v34 = vpop.f32.mrb[7].mxu1  ;;  %v1555_v35 = vadd.f32 %v4161_v27, %v1554_v28  ;;  %v1335_v57 = vadd.f32 %v4161_v27, %v1334_v40  ;;  %4502 = vmatpush3.bf16.msra.mxu1 %v4883_v24  ;;  %v4886_v28 = vld [vmem:[%s6791_s3 + $0x20] sm:$0xff]   ;;  %v4887_v29 = vld [vmem:[%s6791_s3 + $0x28] sm:$0xff]   ;;  %v4888_v30 = vld [vmem:[%s6791_s3 + $0x30] sm:$0xff]  }
 0x451   : > { %4503 = vmatprep.subr.bf16.mxu1 %v5458_v3  ;;  %v4913_v24 = vld [vmem:[%s6722_s14 + $0x64] ss:$8 sps:$4 sm:$0xff]  }
 0x452   : > { %v1556_v36 = vsel %vm1336_vm10, %v1555_v35, -inf  ;;  %v1337_v58 = vsel %vm1336_vm10, %v1335_v57, -inf }
 0x453   : > { %1557 = vmax.xlane.f32.xlu0 %v1556_v36 }
 0x454   : > { %4504 = vmatpush3.bf16.msra.mxu1 %v4884_v26  ;;  %v4911_v26 = vld [vmem:[%s6722_s14 + $0x60] ss:$8 sps:$4 sm:$0xff]  }
 0x455   : > { %v1392_v37 = vpop.f32.mrb[8].mxu0  ;;  %v1658_v38 = vpop.f32.mrb[8].mxu1  ;;  %4505 = vmatprep.subr.bf16.mxu1 %v5458_v3 }
 0x456   : > { %v1398_v41 = vmul.f32 0.17677669, %v1392_v37  ;;  %v4461_v43 = vpop.f32.mrb[9].mxu0  ;;  %v4491_v45 = vpop.f32.mrb[9].mxu1  ;;  %v1664_v55 = vmul.f32 0.17677669, %v1658_v38 }
 0x457   : > { %v1395_v47 = vpop.f32.mrb[10].mxu0  ;;  %v1661_v48 = vpop.f32.mrb[10].mxu1 }
 0x458   : > { %v4462_v49 = vpop.f32.mrb[11].mxu0  ;;  %v4492_v50 = vpop.f32.mrb[11].mxu1  ;;  %v1399_v54 = vadd.f32 %v4161_v27, %v1398_v41  ;;  %v1665_v59 = vadd.f32 %v4161_v27, %v1664_v55  ;;  %v4885_v27 = vld [vmem:[%s6791_s3 + $0x18] sm:$0xff]  }
 0x459   : > { %4506 = vmatpush3.bf16.msra.mxu1 %v4885_v27  ;;  %v4889_v49 = vld [vmem:[%s6791_s3 + $0x38] sm:$0xff]  }
 0x45a   : > { %v1400_v56 = vsel %vm1336_vm10, %v1399_v54, -inf  ;;  %v1666_v61 = vsel %vm1336_vm10, %v1665_v59, -inf  ;;  %4507 = vmatprep.subr.bf16.mxu1 %v5458_v3  ;;  %v4914_v27 = vld [vmem:[%s6720_s12 + $0x18] sm:$0xff]  }
 0x45b   : > { %1401 = vmax.xlane.f32.xlu1 %v1400_v56 }
 0x45d   : > { %4508 = vmatpush3.bf16.msra.mxu1 %v4886_v28  ;;  %v4917_v28 = vld [vmem:[%s6722_s14 + $0x74] ss:$8 sps:$4 sm:$0xff]  }
 0x45e   : > { %4509 = vmatprep.subr.bf16.mxu1 %v5458_v3 }
 0x45f   : > { %1338 = vmax.xlane.f32.xlu1 %v1337_v58  ;;  %v4178_v58 = vld [vmem:[#allocation6] ss:$0 sm:$0xff] }
 0x461   : > { %4510 = vmatpush3.bf16.msra.mxu1 %v4887_v29  ;;  %v4915_v29 = vld [vmem:[%s6722_s14 + $0x70] ss:$8 sps:$4 sm:$0xff]  }
 0x462   : > { %4511 = vmatprep.subr.bf16.mxu1 %v5458_v3 }
 0x463   : > { %1667 = vmax.xlane.f32.xlu1 %v1666_v61 }
 0x465   : > { %4512 = vmatpush3.bf16.msra.mxu1 %v4888_v30  ;;  %v4918_v30 = vld [vmem:[%s6720_s12 + $0x20] sm:$0xff]  }
 0x466   : > { %4513 = vmatprep.subr.bf16.mxu1 %v5458_v3 }
 0x469   : > { %4514 = vmatpush3.bf16.msra.mxu1 %v4889_v49 }
 0x4e0   : > { %v1558_v62 = vpop.xlane.xlu0 %1557 }
 0x4e1   : > { %v1559_v63 = vsub.f32 %v1555_v35, %v1558_v62 }
 0x4e3   : > { %v1560_v2 = vmul.f32 1.442695, %v1559_v63 }
 0x4e8   : > { %v1402_v0 = vpop.xlane.xlu1 %1401 }
 0x4e9   : > { %v1403_v1 = vsub.f32 %v1399_v54, %v1402_v0 }
 0x4eb   : > { %v1404_v4 = vmul.f32 1.442695, %v1403_v1  ;;  %v6133_v1 = vld [vmem:[%s6722_s14] ss:$8 sps:$4 sm:$0xff]  }
 0x4ec   : > { %v1339_v5 = vpop.xlane.xlu1 %1338 }
 0x4ed   : > { %5012 = vpow2.f32 %v1404_v4  ;;  %v1340_v6 = vsub.f32 %v1335_v57, %v1339_v5  ;;  %v6143_v4 = vld [vmem:[%s6722_s14 + $0x14] ss:$8 sps:$4 sm:$0xff]   ;;  %v6153_v5 = vld [vmem:[%s6722_s14 + $0x10] ss:$8 sps:$4 sm:$0xff]  }
 0x4ee   : > { %5014 = vpow2.f32 %v1560_v2  ;;  %v6138_v2 = vld [vmem:[%s6722_s14 + $0x4] ss:$8 sps:$4 sm:$0xff]  }
 0x4ef   : > { %v1341_v7 = vmul.f32 1.442695, %v1340_v6  ;;  %2088 = vmatprep.subr.bf16.mxu1 %v6138_v2  ;;  %v6159_v6 = vld [vmem:[%s6722_s14 + $0x24] ss:$8 sps:$4 sm:$0xff]  }
 0x4f0   : > { %v1668_v8 = vpop.xlane.xlu1 %1667 }
 0x4f1   : > { %5016 = vpow2.f32 %v1341_v7  ;;  %v1669_v9 = vsub.f32 %v1665_v59, %v1668_v8  ;;  %v4906_v7 = vld [vmem:[%s6720_s12 + $0x8] sm:$0xff]  }
 0x4f2   : > { %v6169_v8 = vld [vmem:[%s6722_s14 + $0x20] ss:$8 sps:$4 sm:$0xff]  }
 0x4f3   : > { %v1670_v13 = vmul.f32 1.442695, %v1669_v9  ;;  %v6175_v9 = vld [vmem:[%s6722_s14 + $0x34] ss:$8 sps:$4 sm:$0xff]  }
 0x4f5   : > { %5018 = vpow2.f32 %v1670_v13  ;;  %v6182_v13 = vld [vmem:[%s6722_s14 + $0x30] ss:$8 sps:$4 sm:$0xff]  }
 0x4f7   : > { %v5013_v14 = vpop.eup %5012 }
 0x4f8   : > { %v1406_v16 = vsel %vm1336_vm10, %v5013_v14, 0.0  ;;  %v5015_v17 = vpop.eup %5014 }
 0x4f9   : > { %1407 = vadd.xlane.f32.xlu0 %v1406_v16  ;;  %v1562_v19 = vsel %vm1336_vm10, %v5015_v17, 0.0  ;;  %v6194_v16 = vld [vmem:[%s6722_s14 + $0x40] ss:$8 sps:$4 sm:$0xff]  }
 0x4fb   : > { %v5017_v18 = vpop.eup %5016 }
 0x4fc   : > { %v1343_v20 = vsel %vm1336_vm10, %v5017_v18, 0.0 }
 0x4fd   : > { %1563 = vadd.xlane.f32.xlu0 %v1562_v19  ;;  %1344 = vadd.xlane.f32.xlu1 %v1343_v20 }
 0x4ff   : > { %v5019_v21 = vpop.eup %5018 }
 0x500   : > { %v1672_v22 = vsel %vm1336_vm10, %v5019_v21, 0.0 }
 0x501   : > { %1673 = vadd.xlane.f32.xlu1 %v1672_v22 }
 0x586   : > { %v1408_v31 = vpop.xlane.xlu0 %1407 }
 0x587   : > { %5020 = vrcp.f32 %v1408_v31  ;;  %v1978_v31 = vld [vmem:[%s977_s4] sm:$0x1f] }
 0x58a   : > { %v1345_v32 = vpop.xlane.xlu1 %1344  ;;  %v1564_v36 = vpop.xlane.xlu0 %1563 }
 0x58b   : > { %5022 = vrcp.f32 %v1345_v32  ;;  %v1995_v32 = vpack.c.bf16 %v1978_v31, %v1978_v31 }
 0x58c   : > { %5024 = vrcp.f32 %v1564_v36 }
 0x58e   : > { %v1674_v41 = vpop.xlane.xlu1 %1673 }
 0x58f   : > { %5026 = vrcp.f32 %v1674_v41  ;;  %v4179_v41 = vld [vmem:[#allocation7] ss:$0 sm:$0xff] }
 0x591   : > { %v5021_v33 = vpop.eup %5020 }
 0x592   : > { %v1410_v34 = vmul.f32 %v5021_v33, %v5013_v14  ;;  %v6188_v14 = vld [vmem:[%s6722_s14 + $0x44] ss:$8 sps:$4 sm:$0xff]  }
 0x593   : > { %v4919_v33 = vld [vmem:[%s6720_s12 + $0x28] sm:$0xff]  }
 0x594   : > { %v1411_v35 = vpack.c.bf16 %v1410_v34, %v1410_v34  ;;  %v4920_v34 = vld [vmem:[%s6720_s12 + $0x30] sm:$0xff]  }
 0x595   : > { %v5023_v37 = vpop.eup %5022 }
 0x596   : > { %4466 = vmatmul.mubr.msk.bf16.vlgmr.msra.gmra.mrb[12].mxu0 %vm1336_vm10, %v1411_v35  ;;  %v1347_v38 = vmul.f32 %v5023_v37, %v5017_v18  ;;  %v4907_v18 = vld [vmem:[%s6722_s14 + $0x50] ss:$8 sps:$4 sm:$0xff]  }
 0x597   : > { %4470 = vmatpush3.bf16.msra.mxu0 %v6042_v11  ;;  %4471 = vmatprep.mubr.msk.bf16.mxu0 %vm5460_vm0, %v5458_v3  ;;  %v5025_v11 = vpop.eup %5024  ;;  %v4921_v35 = vld [vmem:[%s6720_s12 + $0x38] sm:$0xff]  }
 0x598   : > { %4481 = vmatprep.subr.bf16.mxu0 %v5458_v3  ;;  %v1348_v40 = vpack.c.bf16 %v1347_v38, %v1347_v38  ;;  %v1566_v43 = vmul.f32 %v5025_v11, %v5015_v17  ;;  %v6200_v17 = vld [vmem:[%s6722_s14 + $0x54] ss:$8 sps:$4 sm:$0xff]  }
 0x59a   : > { %v1567_v45 = vpack.c.bf16 %v1566_v43, %v1566_v43  ;;  %v4180_v43 = vld [vmem:[#allocation9] ss:$0 sm:$0xff] }
 0x5a2   : > { %4472 = vmatmul.mubr.msk.bf16.vlgmr.msra.gmra.mrb[12].mxu0 %vm1336_vm10, %v1348_v40 }
 0x5a3   : > { %4482 = vmatpush3.bf16.msra.mxu0 %v6045_v12  ;;  %4483 = vmatprep.mubr.msk.bf16.mxu0 %vm5460_vm0, %v5458_v3  ;;  %v5027_v12 = vpop.eup %5026 }
 0x5a4   : > { %4493 = vmatprep.subr.bf16.mxu0 %v5458_v3  ;;  %v1676_v47 = vmul.f32 %v5027_v12, %v5019_v21 }
 0x5a6   : > { %v1677_v48 = vpack.c.bf16 %v1676_v47, %v1676_v47 }
 0x5ae   : > { %4484 = vmatmul.mubr.msk.bf16.vlgmr.msra.gmra.mrb[12].mxu0 %vm1336_vm10, %v1567_v45 }
 0x5af   : > { %4494 = vmatpush3.bf16.msra.mxu0 %v6050_v15  ;;  %4495 = vmatprep.mubr.msk.bf16.mxu0 %vm5460_vm0, %v5458_v3 }
 0x5b0   : > { %4519 = vmatprep.subr.bf16.mxu0 %v5458_v3 }
 0x5ba   : > { %4496 = vmatmul.mubr.msk.bf16.vlgmr.msra.gmra.mrb[12].mxu0 %vm1336_vm10, %v1677_v48  ;;  %v1996_v48 = vld [vmem:[%s6723_s15] sm:$0x3] }
 0x5bb   : > { %4535 = vmatprep.mubr.msk.bf16.mxu0 %vm5460_vm0, %v5458_v3  ;;  %v6270_v49 = vrot.slane %v1996_v48, %v6027_v53 }
 0x68d   : > { %v1718_v50 = vpop.f32.mrb[12].mxu0 }
 0x68e   : > { %v1741_v15 = vpack.c.bf16 %v1718_v50, %v1718_v50  ;;  %v4497_v54 = vpop.f32.mrb[13].mxu0  ;;  %v6273_v50 = vrot.slane %v1996_v48, %v6015_v46 }
 0x68f   : > { %v1721_v55 = vpop.f32.mrb[14].mxu0 }
 0x690   : > { %v4498_v56 = vpop.f32.mrb[15].mxu0  ;;  %4516 = vmatmul.mubr.bf16.vlgmr.msra.gmra.mrb[12].mxu1 %v1741_v15 }
 0x691   : > { %2120 = vmatprep.mubr.bf16.mxu1 %v5459_v25  ;;  %2089 = vmatpush1.bf16.msra.mxu1 %v6133_v1 }
 0x692   : > { %2090 = vmatprep.subr.bf16.mxu1 %v6143_v4 }
 0x695   : > { %2091 = vmatpush1.bf16.msra.mxu1 %v6153_v5 }
 0x696   : > { %2092 = vmatprep.subr.bf16.mxu1 %v6159_v6 }
 0x699   : > { %2093 = vmatpush1.bf16.msra.mxu1 %v6169_v8 }
 0x69a   : > { %2094 = vmatprep.subr.bf16.mxu1 %v6175_v9 }
 0x69d   : > { %2095 = vmatpush1.bf16.msra.mxu1 %v6182_v13 }
 0x69e   : > { %2096 = vmatprep.subr.bf16.mxu1 %v6188_v14 }
 0x6a1   : > { %2097 = vmatpush1.bf16.msra.mxu1 %v6194_v16 }
 0x6a2   : > { %2098 = vmatprep.subr.bf16.mxu1 %v6200_v17 }
 0x6a5   : > { %2099 = vmatpush1.bf16.msra.mxu1 %v4907_v18 }
 0x6a6   : > { %2100 = vmatprep.subr.bf16.mxu1 %v4913_v24 }
 0x6a9   : > { %2101 = vmatpush1.bf16.msra.mxu1 %v4911_v26 }
 0x6aa   : > { %2102 = vmatprep.subr.bf16.mxu1 %v4917_v28 }
 0x6ad   : > { %2103 = vmatpush1.bf16.msra.mxu1 %v4915_v29 }
 0x6ae   : > { %4539 = vmatprep.subr.bf16.mxu1 %v5458_v3 }
 0x6b0   : > { %2121 = vmatmul.mubr.bf16.vlgmr.msra.gmra.mrb[16].mxu1 %v1995_v32 }
 0x6b1   : > { %4541 = vmatprep.mubr.msk.bf16.mxu1 %vm5460_vm0, %v5458_v3 }
 0x763   : > { %v1824_v57 = vpop.f32.mrb[12].mxu1 }
 0x764   : > { %v1830_v59 = vadd.f32 %v1824_v57, %v6000_v39  ;;  %v4517_v61 = vpop.f32.mrb[13].mxu1  ;;  %v4902_v39 = vld [vmem:[%s6720_s12] sm:$0xff]  }
 0x765   : > { %v1827_v62 = vpop.f32.mrb[14].mxu1  ;;  %4520 = vmatpush3.bf16.msra.mxu0 %v4902_v39 }
 0x766   : > { %v4518_v63 = vpop.f32.mrb[15].mxu1  ;;  %v1838_v0 = vadd.f32 %v4178_v58, %v1830_v59  ;;  %4521 = vmatprep.subr.bf16.mxu0 %v5458_v3 }
 0x768   : > { %1841 = vadd.xlane.f32.xlu0 %v1838_v0 }
 0x769   : > { %4522 = vmatpush3.bf16.msra.mxu0 %v4906_v7 }
 0x76a   : > { %4523 = vmatprep.subr.bf16.mxu0 %v5458_v3 }
 0x76d   : > { %4524 = vmatpush3.bf16.msra.mxu0 %v4910_v23 }
 0x76e   : > { %4525 = vmatprep.subr.bf16.mxu0 %v5458_v3 }
 0x771   : > { %4526 = vmatpush3.bf16.msra.mxu0 %v4914_v27 }
 0x772   : > { %4527 = vmatprep.subr.bf16.mxu0 %v5458_v3 }
 0x775   : > { %4528 = vmatpush3.bf16.msra.mxu0 %v4918_v30 }
 0x776   : > { %4529 = vmatprep.subr.bf16.mxu0 %v5458_v3 }
 0x779   : > { %4530 = vmatpush3.bf16.msra.mxu0 %v4919_v33 }
 0x77a   : > { %4531 = vmatprep.subr.bf16.mxu0 %v5458_v3 }
 0x77d   : > { %4532 = vmatpush3.bf16.msra.mxu0 %v4920_v34 }
 0x77e   : > { %4533 = vmatprep.subr.bf16.mxu0 %v5458_v3 }
 0x781   : > { %4534 = vmatpush3.bf16.msra.mxu0 %v4921_v35 }
 0x782   : > { %2131 = vmatprep.subr.bf16.mxu0 %v6138_v2  ;;  %v2129_v2 = vld [vmem:[%s981_s9] sm:$0x1f]  ;;  %s985_s9 = scalar_lea.vmem %s6797_s27, %s5909_s8 }
 0x783   : > { %v2122_v15 = vpop.f32.mrb[16].mxu1  ;;  %v2130_v39 = vpack.c.bf16 %v2129_v2, %v2129_v2 }
 0x784   : > { %v2123_v54 = vadd.f32 %v2122_v15, %v6270_v49  ;;  %v2124_v55 = vpop.f32.mrb[17].mxu1 }
 0x785   : > { %v6277_v56 = vadd.f32 %v2124_v55, %v6273_v50  ;;  %v2126_v57 = vpop.f32.mrb[18].mxu1 }
 0x786   : > { %v2127_v58 = vpop.f32.mrb[19].mxu1  ;;  %v2173_v59 = vmul.f32 %v6021_v51, %v2123_v54 }
 0x787   : > { %v2233_v61 = vmul.f32 %v6039_v10, %v6277_v56 }
 0x788   : > { %v2174_v62 = vpack.c.bf16 %v2173_v59, %v2173_v59 }
 0x789   : > { %v2234_v63 = vpack.c.bf16 %v2233_v61, %v2233_v61 }
 0x78a   : > { %4540 = vmatpush3.bf16.xpose.msra.mxu1 %v2174_v62 }
 0x78b   : > { %4545 = vmatprep.subr.bf16.mxu1 %v5458_v3 }
 0x7f5   : > { %v1842_v19 = vpop.xlane.xlu0 %1841 }
 0x7f6   : > { %v1843_v20 = vmul.f32 0.0078125, %v1842_v19  ;;  %v2384_v19 = vmul.f32 %v6024_v52, %v2123_v54 }
 0x7f8   : > { %v1844_v21 = vsub.f32 %v1838_v0, %v1843_v20  ;;  %v5461_v0 = vmov 65535   ;;  %v2385_v20 = vpack.c.bf16 %v2384_v19, %v2384_v19 }
 0x7fa   : > { %v1845_v22 = vmul.f32 %v1844_v21, %v1844_v21 }
 0x7fc   : > { %1846 = vadd.xlane.f32.xlu1 %v1845_v22 }
 0x889   : > { %v1847_v36 = vpop.xlane.xlu1 %1846 }
 0x88a   : > { %v1848_v37 = vmul.f32 0.0078125, %v1847_v36 }
 0x88c   : > { %v1849_v38 = vadd.f32 1e-12, %v1848_v37 }
 0x88e   : > { %5028 = vrsqrt.f32 %v1849_v38 }
 0x898   : > { %v5029_v40 = vpop.eup %5028 }
 0x899   : > { %v1851_v11 = vmul.f32 %v5029_v40, %v1844_v21  ;;  %v2488_v21 = vmul.f32 %v6030_v60, %v2123_v54 }
 0x89b   : > { %v1858_v45 = vmul.f32 %v4179_v41, %v1851_v11  ;;  %v2489_v22 = vpack.c.bf16 %v2488_v21, %v2488_v21  ;;  %v6337_v21 = vld [vmem:[%s6724_s16] sm:$0xff]  }
 0x89d   : > { %v6250_v12 = vadd.f32 %v4180_v43, %v1858_v45 }
 0x89f   : > { %v1882_v47 = vpack.c.bf16 %v6250_v12, %v6250_v12 }
 0x8a1   : > { %4536 = vmatmul.mubr.bf16.vlgmr.msra.gmra.mrb[16].mxu0 %v1882_v47 }
 0x8a2   : > { %2132 = vmatpush1.bf16.msra.mxu0 %v6133_v1  ;;  %2163 = vmatprep.mubr.bf16.mxu0 %v5459_v25  ;;  %v2293_v1 = vsel %vm2291_vm11, 4294967295, %v5461_v0 }
 0x8a3   : > { %2133 = vmatprep.subr.bf16.mxu0 %v6143_v4  ;;  %v6287_v4 = vsel %vm2292_vm12, %v2293_v1, 0 }
 0x8a6   : > { %2134 = vmatpush1.bf16.msra.mxu0 %v6153_v5  ;;  %v2296_v5 = vand.u32 %v6287_v4, %v2234_v63 }
 0x8a7   : > { %2135 = vmatprep.subr.bf16.mxu0 %v6159_v6  ;;  %v4181_v6 = vld [vmem:[#allocation10] ss:$0 sm:$0xff] }
 0x8aa   : > { %2136 = vmatpush1.bf16.msra.mxu0 %v6169_v8  ;;  %v2231_v8 = vmul.f32 %v6039_v10, %v2123_v54 }
 0x8ab   : > { %2137 = vmatprep.subr.bf16.mxu0 %v6175_v9 }
 0x8ae   : > { %2138 = vmatpush1.bf16.msra.mxu0 %v6182_v13 }
 0x8af   : > { %2139 = vmatprep.subr.bf16.mxu0 %v6188_v14 }
 0x8b2   : > { %2140 = vmatpush1.bf16.msra.mxu0 %v6194_v16 }
 0x8b3   : > { %2141 = vmatprep.subr.bf16.mxu0 %v6200_v17 }
 0x8b6   : > { %2142 = vmatpush1.bf16.msra.mxu0 %v4907_v18  ;;  %v2232_v18 = vpack.c.bf16 %v2231_v8, %v2231_v8 }
 0x8b7   : > { %2143 = vmatprep.subr.bf16.mxu0 %v4913_v24 }
 0x8ba   : > { %2144 = vmatpush1.bf16.msra.mxu0 %v4911_v26 }
 0x8bb   : > { %2145 = vmatprep.subr.bf16.mxu0 %v4917_v28 }
 0x8be   : > { %2146 = vmatpush1.bf16.msra.mxu0 %v4915_v29 }
 0x8bf   : > { %4551 = vmatprep.subr.bf16.mxu0 %v5458_v3 }
 0x8c1   : > { %2164 = vmatmul.mubr.bf16.vlgmr.msra.gmra.mrb[20].mxu0 %v2130_v39 }
 0x8c2   : > { %4552 = vmatpush3.bf16.msra.mxu0 %v2296_v5  ;;  %4553 = vmatprep.mubr.msk.bf16.mxu0 %vm5460_vm0, %v5458_v3 }
 0x8c3   : > { %4557 = vmatprep.subr.bf16.mxu0 %v5458_v3 }
 0x974   : > { %v1972_v7 = vpop.f32.mrb[16].mxu0 }
 0x975   : > { %v1973_v9 = vadd.f32 %v4181_v6, %v1972_v7  ;;  %v4537_v13 = vpop.f32.mrb[17].mxu0 }
 0x976   : > { %v1975_v14 = vpop.f32.mrb[18].mxu0 }
 0x977   : > { %v6294_v16 = vpack.c.bf16 %v1973_v9, %v1973_v9  ;;  %v4538_v17 = vpop.f32.mrb[19].mxu0 }
 0x979   : > { %4542 = vmatmul.mubr.bf16.vlgmr.msra.gmra.mrb[20].mxu1 %v6294_v16 }
 0x97a   : > { %4546 = vmatpush3.bf16.xpose.msra.mxu1 %v2232_v18  ;;  %4547 = vmatprep.mubr.msk.bf16.mxu1 %vm5460_vm0, %v5458_v3 }
 0x97b   : > { %4563 = vmatprep.subr.bf16.mxu1 %v5458_v3 }
 0x981   : > { %4548 = vmatmul.mubr.bf16.vlgmr.msra.gmra.mrb[24].mxu1 %v6294_v16 }
 0x982   : > { %4564 = vmatpush3.bf16.xpose.msra.mxu1 %v2385_v20  ;;  %4565 = vmatprep.mubr.msk.bf16.mxu1 %vm5460_vm0, %v5458_v3 }
 0x983   : > { %4575 = vmatprep.subr.bf16.mxu1 %v5458_v3 }
 0x989   : > { %4566 = vmatmul.mubr.bf16.vlgmr.msra.gmra.mrb[28].mxu1 %v6294_v16 }
 0x98a   : > { %4576 = vmatpush3.bf16.xpose.msra.mxu1 %v2489_v22  ;;  %4577 = vmatprep.mubr.msk.bf16.mxu1 %vm5460_vm0, %v5458_v3 }
 0x98b   : > { %4587 = vmatprep.subr.bf16.mxu1 %v5458_v3 }
 0x991   : > { %4578 = vmatmul.mubr.bf16.vlgmr.msra.gmra.mrb[32].mxu1 %v6294_v16 }
 0x992   : > { %4603 = vmatprep.mubr.msk.bf16.mxu1 %vm5460_vm0, %v5458_v3  ;;  %4588 = vmatpush3.bf16.msra.mxu1 %v6337_v21 }
 0x993   : > { %4589 = vmatprep.subr.bf16.mxu1 %v5458_v3 }
 0x994   : > { %v6330_v19 = vpop.f32.mrb[20].mxu0 }
 0x995   : > { %v6332_v20 = vpop.f32.mrb[21].mxu0 }
 0x996   : > { %v2169_v22 = vpop.f32.mrb[22].mxu0 }
 0xa4c   : > { %v2211_v23 = vpop.f32.mrb[20].mxu1 }
 0xa4d   : > { %v2217_v24 = vmul.f32 0.17677669, %v2211_v23  ;;  %v4543_v26 = vpop.f32.mrb[21].mxu1  ;;  %v2170_v23 = vpop.f32.mrb[23].mxu0 }
 0xa4e   : > { %v2214_v27 = vpop.f32.mrb[22].mxu1  ;;  %v6350_v26 = vld [vmem:[%s6724_s16 + $0x10] sm:$0xff]  }
 0xa4f   : > { %v4544_v28 = vpop.f32.mrb[23].mxu1  ;;  %v2219_v29 = vsel %vm2218_vm13, %v2217_v24, -inf  ;;  %v6357_v27 = vld [vmem:[%s6724_s16 + $0x18] sm:$0xff]  }
 0xa50   : > { %2220 = vmax.xlane.f32.xlu1 %v2219_v29  ;;  %v6364_v28 = vld [vmem:[%s6724_s16 + $0x20] sm:$0xff]   ;;  %v6371_v29 = vld [vmem:[%s6724_s16 + $0x28] sm:$0xff]  }
 0xa54   : > { %v2269_v30 = vpop.f32.mrb[24].mxu1 }
 0xa55   : > { %v2275_v31 = vmul.f32 0.17677669, %v2269_v30  ;;  %v4549_v32 = vpop.f32.mrb[25].mxu1  ;;  %v6378_v30 = vld [vmem:[%s6724_s16 + $0x30] sm:$0xff]  }
 0xa56   : > { %v2272_v33 = vpop.f32.mrb[26].mxu1 }
 0xa57   : > { %v4550_v34 = vpop.f32.mrb[27].mxu1  ;;  %v2276_v35 = vsel %vm2218_vm13, %v2275_v31, -inf }
 0xa58   : > { %2277 = vmax.xlane.f32.xlu0 %v2276_v35  ;;  %v2175_v34 = vmul.f32 %v6021_v51, %v6277_v56 }
 0xa5c   : > { %v2422_v36 = vpop.f32.mrb[28].mxu1 }
 0xa5d   : > { %v2428_v37 = vmul.f32 0.17677669, %v2422_v36  ;;  %v4567_v38 = vpop.f32.mrb[29].mxu1  ;;  %v2176_v36 = vpack.c.bf16 %v2175_v34, %v2175_v34 }
 0xa5e   : > { %v2425_v40 = vpop.f32.mrb[30].mxu1 }
 0xa5f   : > { %v4568_v41 = vpop.f32.mrb[31].mxu1  ;;  %v2429_v11 = vsel %vm2218_vm13, %v2428_v37, -inf  ;;  %v2342_v40 = vand.u32 %v6287_v4, %v2176_v36 }
 0xa60   : > { %2430 = vmax.xlane.f32.xlu0 %v2429_v11 }
 0xa64   : > { %v2526_v43 = vpop.f32.mrb[32].mxu1 }
 0xa65   : > { %v2532_v45 = vmul.f32 0.17677669, %v2526_v43  ;;  %v4579_v47 = vpop.f32.mrb[33].mxu1  ;;  %v2386_v43 = vmul.f32 %v6024_v52, %v6277_v56 }
 0xa66   : > { %v2529_v48 = vpop.f32.mrb[34].mxu1 }
 0xa67   : > { %v4580_v15 = vpop.f32.mrb[35].mxu1  ;;  %v2533_v54 = vsel %vm2218_vm13, %v2532_v45, -inf  ;;  %v2387_v47 = vpack.c.bf16 %v2386_v43, %v2386_v43 }
 0xa68   : > { %2534 = vmax.xlane.f32.xlu1 %v2533_v54 }
 0xa69   : > { %v2445_v15 = vand.u32 %v2387_v47, %v6287_v4 }
 0xadd   : > { %v2221_v55 = vpop.xlane.xlu1 %2220 }
 0xade   : > { %v2222_v57 = vsub.f32 %v2217_v24, %v2221_v55  ;;  %v6343_v24 = vld [vmem:[%s6724_s16 + $0x8] sm:$0xff]  }
 0xadf   : > { %4590 = vmatpush3.bf16.msra.mxu1 %v6343_v24 }
 0xae0   : > { %v2223_v58 = vmul.f32 1.442695, %v2222_v57  ;;  %4591 = vmatprep.subr.bf16.mxu1 %v5458_v3  ;;  %v2490_v57 = vmul.f32 %v6030_v60, %v6277_v56 }
 0xae2   : > { %5030 = vpow2.f32 %v2223_v58 }
 0xae3   : > { %4592 = vmatpush3.bf16.msra.mxu1 %v6350_v26 }
 0xae4   : > { %4593 = vmatprep.subr.bf16.mxu1 %v5458_v3 }
 0xae5   : > { %v2278_v59 = vpop.xlane.xlu0 %2277 }
 0xae6   : > { %v2279_v61 = vsub.f32 %v2275_v31, %v2278_v59  ;;  %v6385_v31 = vld [vmem:[%s6724_s16 + $0x38] sm:$0xff]   ;;  %v2491_v59 = vpack.c.bf16 %v2490_v57, %v2490_v57 }
 0xae7   : > { %4594 = vmatpush3.bf16.msra.mxu1 %v6357_v27 }
 0xae8   : > { %v2280_v62 = vmul.f32 1.442695, %v2279_v61  ;;  %4595 = vmatprep.subr.bf16.mxu1 %v5458_v3 }
 0xaea   : > { %5032 = vpow2.f32 %v2280_v62  ;;  %v2549_v62 = vand.u32 %v2491_v59, %v6287_v4 }
 0xaeb   : > { %4596 = vmatpush3.bf16.msra.mxu1 %v6364_v28 }
 0xaec   : > { %v6317_v63 = vpop.eup %5030  ;;  %4597 = vmatprep.subr.bf16.mxu1 %v5458_v3 }
 0xaed   : > { %v2431_v0 = vpop.xlane.xlu0 %2430  ;;  %v2225_v1 = vsel %vm2218_vm13, %v6317_v63, 0.0 }
 0xaee   : > { %v2432_v2 = vsub.f32 %v2428_v37, %v2431_v0  ;;  %2226 = vadd.xlane.f32.xlu1 %v2225_v1 }
 0xaef   : > { %4598 = vmatpush3.bf16.msra.mxu1 %v6371_v29 }
 0xaf0   : > { %v2433_v39 = vmul.f32 1.442695, %v2432_v2  ;;  %4599 = vmatprep.subr.bf16.mxu1 %v5458_v3 }
 0xaf2   : > { %5034 = vpow2.f32 %v2433_v39 }
 0xaf3   : > { %4600 = vmatpush3.bf16.msra.mxu1 %v6378_v30 }
 0xaf4   : > { %v5033_v5 = vpop.eup %5032  ;;  %4601 = vmatprep.subr.bf16.mxu1 %v5458_v3 }
 0xaf5   : > { %v2535_v6 = vpop.xlane.xlu1 %2534  ;;  %v2282_v7 = vsel %vm2218_vm13, %v5033_v5, 0.0 }
 0xaf6   : > { %v2536_v8 = vsub.f32 %v2532_v45, %v2535_v6  ;;  %2283 = vadd.xlane.f32.xlu0 %v2282_v7 }
 0xaf7   : > { %4602 = vmatpush3.bf16.msra.mxu1 %v6385_v31 }
 0xaf8   : > { %v2537_v9 = vmul.f32 1.442695, %v2536_v8  ;;  %4631 = vmatprep.subr.bf16.mxu1 %v5458_v3 }
 0xafa   : > { %5036 = vpow2.f32 %v2537_v9 }
 0xafc   : > { %v6322_v13 = vpop.eup %5034 }
 0xafd   : > { %v2435_v14 = vsel %vm2218_vm13, %v6322_v13, 0.0 }
 0xafe   : > { %2436 = vadd.xlane.f32.xlu0 %v2435_v14 }
 0xb04   : > { %v6326_v17 = vpop.eup %5036 }
 0xb05   : > { %v2539_v18 = vsel %vm2218_vm13, %v6326_v17, 0.0 }
 0xb06   : > { %2540 = vadd.xlane.f32.xlu1 %v2539_v18 }
 0xb7b   : > { %v2227_v33 = vpop.xlane.xlu1 %2226 }
 0xb83   : > { %v2284_v32 = vpop.xlane.xlu0 %2283 }
 0xb84   : > { %5038 = vrcp.f32 %v2284_v32 }
 0xb85   : > { %5040 = vrcp.f32 %v2227_v33 }
 0xb8b   : > { %v2437_v41 = vpop.xlane.xlu0 %2436 }
 0xb8c   : > { %5042 = vrcp.f32 %v2437_v41 }
 0xb8e   : > { %v5039_v35 = vpop.eup %5038 }
 0xb8f   : > { %v2286_v37 = vmul.f32 %v5039_v35, %v5033_v5  ;;  %v5041_v11 = vpop.eup %5040  ;;  %v6423_v5 = vadd.f32 %v6332_v20, %v6273_v50 }
 0xb90   : > { %v2229_v45 = vmul.f32 %v5041_v11, %v6317_v63  ;;  %v2166_v63 = vadd.f32 %v6330_v19, %v6270_v49 }
 0xb91   : > { %v2287_v38 = vpack.c.bf16 %v2286_v37, %v2286_v37  ;;  %v2763_v7 = vmul.f32 %v6039_v10, %v6423_v5 }
 0xb92   : > { %v2230_v48 = vpack.c.bf16 %v2229_v45, %v2229_v45  ;;  %v2704_v56 = vmul.f32 %v6021_v51, %v2166_v63  ;;  %v2761_v49 = vmul.f32 %v6039_v10, %v2166_v63  ;;  %v2910_v10 = vmul.f32 %v6024_v52, %v2166_v63 }
 0xb93   : > { %4554 = vmatmul.mubr.msk.bf16.vlgmr.msra.gmra.mrb[24].mxu0 %vm2218_vm13, %v2287_v38  ;;  %v2541_v54 = vpop.xlane.xlu1 %2540  ;;  %v2764_v8 = vpack.c.bf16 %v2763_v7, %v2763_v7  ;;  %v3014_v20 = vmul.f32 %v6030_v60, %v2166_v63 }
 0xb94   : > { %4558 = vmatpush3.bf16.msra.mxu0 %v2342_v40  ;;  %4559 = vmatprep.mubr.msk.bf16.mxu0 %vm5460_vm0, %v5458_v3  ;;  %5044 = vrcp.f32 %v2541_v54  ;;  %v2705_v2 = vpack.c.bf16 %v2704_v56, %v2704_v56  ;;  %v2762_v6 = vpack.c.bf16 %v2761_v49, %v2761_v49  ;;  %v2911_v18 = vpack.c.bf16 %v2910_v10, %v2910_v10 }
 0xb95   : > { %4569 = vmatprep.subr.bf16.mxu0 %v5458_v3  ;;  %v2822_v9 = vand.u32 %v2764_v8, %v6287_v4  ;;  %v3015_v34 = vpack.c.bf16 %v3014_v20, %v3014_v20  ;;  %v2706_v8 = vmul.f32 %v6021_v51, %v6423_v5 }
 0xb96   : > { %v5043_v55 = vpop.eup %5042 }
 0xb97   : > { %v2439_v58 = vmul.f32 %v5043_v55, %v6322_v13 }
 0xb99   : > { %v2440_v61 = vpack.c.bf16 %v2439_v58, %v2439_v58 }
 0xb9e   : > { %v5045_v0 = vpop.eup %5044 }
 0xb9f   : > { %4560 = vmatmul.mubr.msk.bf16.vlgmr.msra.gmra.mrb[24].mxu0 %vm2218_vm13, %v2230_v48  ;;  %v2543_v1 = vmul.f32 %v5045_v0, %v6326_v17 }
 0xba0   : > { %4570 = vmatpush3.bf16.msra.mxu0 %v2445_v15  ;;  %4571 = vmatprep.mubr.msk.bf16.mxu0 %vm5460_vm0, %v5458_v3 }
 0xba1   : > { %4581 = vmatprep.subr.bf16.mxu0 %v5458_v3  ;;  %v2544_v39 = vpack.c.bf16 %v2543_v1, %v2543_v1 }
 0xbab   : > { %4572 = vmatmul.mubr.msk.bf16.vlgmr.msra.gmra.mrb[24].mxu0 %vm2218_vm13, %v2440_v61 }
 0xbac   : > { %4582 = vmatpush3.bf16.msra.mxu0 %v2549_v62  ;;  %4583 = vmatprep.mubr.msk.bf16.mxu0 %vm5460_vm0, %v5458_v3 }
 0xbad   : > { %4607 = vmatprep.subr.bf16.mxu0 %v5458_v3 }
 0xbb7   : > { %4584 = vmatmul.mubr.msk.bf16.vlgmr.msra.gmra.mrb[24].mxu0 %vm2218_vm13, %v2544_v39 }
 0xbb8   : > { %4608 = vmatpush3.bf16.xpose.msra.mxu0 %v2705_v2  ;;  %4609 = vmatprep.mubr.msk.bf16.mxu0 %vm5460_vm0, %v5458_v3 }
 0xbb9   : > { %4613 = vmatprep.subr.bf16.mxu0 %v5458_v3 }
 0xbbf   : > { %4610 = vmatmul.mubr.bf16.vlgmr.msra.gmra.mrb[28].mxu0 %v6294_v16 }
 0xbc0   : > { %4614 = vmatpush3.bf16.xpose.msra.mxu0 %v2762_v6  ;;  %4615 = vmatprep.mubr.msk.bf16.mxu0 %vm5460_vm0, %v5458_v3 }
 0xbc1   : > { %4619 = vmatprep.subr.bf16.mxu0 %v5458_v3 }
 0xbc7   : > { %4616 = vmatmul.mubr.bf16.vlgmr.msra.gmra.mrb[32].mxu0 %v6294_v16 }
 0xbc8   : > { %4620 = vmatpush3.bf16.msra.mxu0 %v2822_v9  ;;  %4621 = vmatprep.mubr.msk.bf16.mxu0 %vm5460_vm0, %v5458_v3 }
 0xbc9   : > { %4625 = vmatprep.subr.bf16.mxu0 %v5458_v3 }
 0xc8a   : > { %v2585_v50 = vpop.f32.mrb[24].mxu0 }
 0xc8b   : > { %v2608_v13 = vpack.c.bf16 %v2585_v50, %v2585_v50  ;;  %v4585_v14 = vpop.f32.mrb[25].mxu0 }
 0xc8c   : > { %v2588_v17 = vpop.f32.mrb[26].mxu0 }
 0xc8d   : > { %v4586_v19 = vpop.f32.mrb[27].mxu0  ;;  %4604 = vmatmul.mubr.bf16.vlgmr.msra.gmra.mrb[36].mxu1 %v2608_v13  ;;  %v2707_v13 = vpack.c.bf16 %v2706_v8, %v2706_v8  ;;  %v4948_v8 = vld [vmem:[%s6794_s7 + $0x60] ss:$16 sps:$4 sm:$0xff]  }
 0xc8e   : > { %4632 = vmatpush3.bf16.xpose.msra.mxu1 %v2911_v18  ;;  %4633 = vmatprep.mubr.msk.bf16.mxu1 %vm5460_vm0, %v5458_v3 }
 0xc8f   : > { %4643 = vmatprep.subr.bf16.mxu1 %v5458_v3  ;;  %v2868_v19 = vand.u32 %v2707_v13, %v6287_v4  ;;  %v4954_v13 = vld [vmem:[%s6794_s7 + $0x80] ss:$16 sps:$4 sm:$0xff]  }
 0xc92   : > { %v2742_v22 = vpop.f32.mrb[28].mxu0 }
 0xc93   : > { %v2748_v23 = vmul.f32 0.17677669, %v2742_v22  ;;  %v4611_v32 = vpop.f32.mrb[29].mxu0  ;;  %v2912_v22 = vmul.f32 %v6024_v52, %v6423_v5  ;;  %v3016_v52 = vmul.f32 %v6030_v60, %v6423_v5 }
 0xc94   : > { %v2745_v33 = vpop.f32.mrb[30].mxu0 }
 0xc95   : > { %v4612_v35 = vpop.f32.mrb[31].mxu0  ;;  %4634 = vmatmul.mubr.bf16.vlgmr.msra.gmra.mrb[40].mxu1 %v6294_v16  ;;  %v2749_v36 = vsel %vm2218_vm13, %v2748_v23, -inf  ;;  %v2913_v33 = vpack.c.bf16 %v2912_v22, %v2912_v22  ;;  %v4968_v22 = vld [vmem:[%s6794_s7 + $0xc4] ss:$16 sps:$4 sm:$0xff]  }
 0xc96   : > { %4644 = vmatpush3.bf16.xpose.msra.mxu1 %v3015_v34  ;;  %2750 = vmax.xlane.f32.xlu1 %v2749_v36 }
 0xc97   : > { %4645 = vmatprep.mubr.msk.bf16.mxu1 %vm5460_vm0, %v5458_v3  ;;  %4655 = vmatprep.subr.bf16.mxu1 %v5458_v3  ;;  %v2971_v35 = vand.u32 %v2913_v33, %v6287_v4  ;;  %v4974_v33 = vld [vmem:[%s6794_s7 + $0xe4] ss:$16 sps:$4 sm:$0xff]  }
 0xc9a   : > { %v2799_v37 = vpop.f32.mrb[32].mxu0 }
 0xc9b   : > { %v2805_v38 = vmul.f32 0.17677669, %v2799_v37  ;;  %v4617_v40 = vpop.f32.mrb[33].mxu0 }
 0xc9c   : > { %v2802_v41 = vpop.f32.mrb[34].mxu0  ;;  %v3017_v40 = vpack.c.bf16 %v3016_v52, %v3016_v52 }
 0xc9d   : > { %v4618_v11 = vpop.f32.mrb[35].mxu0  ;;  %4646 = vmatmul.mubr.bf16.vlgmr.msra.gmra.mrb[44].mxu1 %v6294_v16  ;;  %v2806_v43 = vsel %vm2218_vm13, %v2805_v38, -inf }
 0xc9e   : > { %2807 = vmax.xlane.f32.xlu0 %v2806_v43  ;;  %4656 = vmatpush3.bf16.msra.mxu1 %v6337_v21  ;;  %v3075_v43 = vand.u32 %v3017_v40, %v6287_v4  ;;  %v4210_v4 = vld [vmem:[#allocation12] ss:$0 sm:$0xff] }
 0xc9f   : > { %4657 = vmatprep.subr.bf16.mxu1 %v5458_v3  ;;  %4671 = vmatprep.mubr.msk.bf16.mxu1 %vm5460_vm0, %v5458_v3 }
 0xca2   : > { %4658 = vmatpush3.bf16.msra.mxu1 %v6343_v24 }
 0xca3   : > { %4659 = vmatprep.subr.bf16.mxu1 %v5458_v3 }
 0xca6   : > { %4660 = vmatpush3.bf16.msra.mxu1 %v6350_v26 }
 0xca7   : > { %4661 = vmatprep.subr.bf16.mxu1 %v5458_v3 }
 0xcaa   : > { %4662 = vmatpush3.bf16.msra.mxu1 %v6357_v27 }
 0xcab   : > { %4663 = vmatprep.subr.bf16.mxu1 %v5458_v3 }
 0xcae   : > { %4664 = vmatpush3.bf16.msra.mxu1 %v6364_v28 }
 0xcaf   : > { %4665 = vmatprep.subr.bf16.mxu1 %v5458_v3 }
 0xcb2   : > { %4666 = vmatpush3.bf16.msra.mxu1 %v6371_v29 }
 0xcb3   : > { %4667 = vmatprep.subr.bf16.mxu1 %v5458_v3 }
 0xcb6   : > { %4668 = vmatpush3.bf16.msra.mxu1 %v6378_v30 }
 0xcb7   : > { %4669 = vmatprep.subr.bf16.mxu1 %v5458_v3 }
 0xcba   : > { %4670 = vmatpush3.bf16.msra.mxu1 %v6385_v31 }
 0xd23   : > { %v2751_v26 = vpop.xlane.xlu1 %2750 }
 0xd24   : > { %v2752_v27 = vsub.f32 %v2748_v23, %v2751_v26 }
 0xd26   : > { %v2753_v45 = vmul.f32 1.442695, %v2752_v27 }
 0xd2b   : > { %v2808_v16 = vpop.xlane.xlu0 %2807 }
 0xd2c   : > { %v2809_v21 = vsub.f32 %v2805_v38, %v2808_v16 }
 0xd2e   : > { %v2810_v24 = vmul.f32 1.442695, %v2809_v21 }
 0xd30   : > { %5046 = vpow2.f32 %v2810_v24 }
 0xd31   : > { %5048 = vpow2.f32 %v2753_v45 }
 0xd3a   : > { %v5047_v30 = vpop.eup %5046 }
 0xd3b   : > { %v2812_v55 = vsel %vm2218_vm13, %v5047_v30, 0.0  ;;  %v5049_v63 = vpop.eup %5048 }
 0xd3c   : > { %v2755_v0 = vsel %vm2218_vm13, %v5049_v63, 0.0 }
 0xd68   : > { %v2948_v28 = vpop.f32.mrb[40].mxu1 }
 0xd69   : > { %v2954_v47 = vmul.f32 0.17677669, %v2948_v28  ;;  %v4635_v48 = vpop.f32.mrb[41].mxu1  ;;  %v4675_v28 = vadd.f32 %v4210_v4, %v4210_v4  ;;  %v4983_v4 = vld [vmem:[%s6795_s20 + $0xc8] sm:$0xff]  }
 0xd6a   : > { %v2951_v29 = vpop.f32.mrb[42].mxu1 }
 0xd6b   : > { %v4636_v15 = vpop.f32.mrb[43].mxu1  ;;  %v2955_v54 = vsel %vm2218_vm13, %v2954_v47, -inf }
 0xd6c   : > { %2956 = vmax.xlane.f32.xlu0 %v2955_v54 }
 0xd70   : > { %v3052_v31 = vpop.f32.mrb[44].mxu1  ;;  %2813 = vadd.xlane.f32.xlu0 %v2812_v55  ;;  %v4930_v55 = vld [vmem:[%s6794_s7] ss:$16 sps:$4 sm:$0xff]  }
 0xd71   : > { %v3058_v57 = vmul.f32 0.17677669, %v3052_v31  ;;  %v4647_v58 = vpop.f32.mrb[45].mxu1  ;;  %v4932_v31 = vld [vmem:[%s6794_s7 + $0x4] ss:$16 sps:$4 sm:$0xff]  }
 0xd72   : > { %v3055_v59 = vpop.f32.mrb[46].mxu1  ;;  %v4941_v58 = vld [vmem:[%s6794_s7 + $0x2c] ss:$16 sps:$4 sm:$0xff]  }
 0xd73   : > { %v4648_v61 = vpop.f32.mrb[47].mxu1  ;;  %v3059_v62 = vsel %vm2218_vm13, %v3058_v57, -inf  ;;  %v4936_v59 = vld [vmem:[%s6794_s7 + $0x20] ss:$16 sps:$4 sm:$0xff]  }
 0xd74   : > { %3060 = vmax.xlane.f32.xlu1 %v3059_v62  ;;  %v4939_v61 = vld [vmem:[%s6794_s7 + $0x28] ss:$16 sps:$4 sm:$0xff]   ;;  %v4944_v62 = vld [vmem:[%s6794_s7 + $0x44] ss:$16 sps:$4 sm:$0xff]  }
 0xd78   : > { %2756 = vadd.xlane.f32.xlu1 %v2755_v0  ;;  %v4942_v0 = vld [vmem:[%s6794_s7 + $0x40] ss:$16 sps:$4 sm:$0xff]  }
 0xdf9   : > { %v2957_v56 = vpop.xlane.xlu0 %2956 }
 0xdfa   : > { %v2958_v1 = vsub.f32 %v2954_v47, %v2957_v56  ;;  %v4945_v56 = vld [vmem:[%s6794_s7 + $0x48] ss:$16 sps:$4 sm:$0xff]  }
 0xdfc   : > { %v2959_v2 = vmul.f32 1.442695, %v2958_v1 }
 0xdfd   : > { %v2814_v39 = vpop.xlane.xlu0 %2813 }
 0xdfe   : > { %5050 = vpow2.f32 %v2959_v2 }
 0xdff   : > { %5052 = vrcp.f32 %v2814_v39 }
 0xe01   : > { %v3061_v49 = vpop.xlane.xlu1 %3060 }
 0xe02   : > { %v3062_v6 = vsub.f32 %v3058_v57, %v3061_v49  ;;  %v4935_v57 = vld [vmem:[%s6794_s7 + $0xc] ss:$16 sps:$4 sm:$0xff]  }
 0xe03   : > { %3445 = vmatprep.subr.bf16.mxu1 %v4935_v57  ;;  %v4995_v57 = vld [vmem:[%s6795_s20 + $0xe0] sm:$0xff]  }
 0xe04   : > { %v3063_v7 = vmul.f32 1.442695, %v3062_v6  ;;  %v4950_v6 = vld [vmem:[%s6794_s7 + $0x64] ss:$16 sps:$4 sm:$0xff]  }
 0xe05   : > { %v2757_v9 = vpop.xlane.xlu1 %2756 }
 0xe06   : > { %5054 = vpow2.f32 %v3063_v7  ;;  %v4953_v7 = vld [vmem:[%s6794_s7 + $0x6c] ss:$16 sps:$4 sm:$0xff]  }
 0xe07   : > { %5056 = vrcp.f32 %v2757_v9  ;;  %v4951_v9 = vld [vmem:[%s6794_s7 + $0x68] ss:$16 sps:$4 sm:$0xff]  }
 0xe08   : > { %v5051_v10 = vpop.eup %5050 }
 0xe09   : > { %v5053_v50 = vpop.eup %5052  ;;  %v2961_v14 = vsel %vm2218_vm13, %v5051_v10, 0.0 }
 0xe0a   : > { %v2816_v17 = vmul.f32 %v5053_v50, %v5047_v30  ;;  %2962 = vadd.xlane.f32.xlu0 %v2961_v14  ;;  %v4959_v50 = vld [vmem:[%s6794_s7 + $0x8c] ss:$16 sps:$4 sm:$0xff]   ;;  %v4957_v14 = vld [vmem:[%s6794_s7 + $0x88] ss:$16 sps:$4 sm:$0xff]  }
 0xe0c   : > { %v2817_v18 = vpack.c.bf16 %v2816_v17, %v2816_v17  ;;  %v4962_v17 = vld [vmem:[%s6794_s7 + $0xa4] ss:$16 sps:$4 sm:$0xff]  }
 0xe0e   : > { %4622 = vmatmul.mubr.msk.bf16.vlgmr.msra.gmra.mrb[36].mxu0 %vm2218_vm13, %v2817_v18  ;;  %v4965_v18 = vld [vmem:[%s6794_s7 + $0xac] ss:$16 sps:$4 sm:$0xff]  }
 0xe0f   : > { %4626 = vmatpush3.bf16.msra.mxu0 %v2868_v19  ;;  %4627 = vmatprep.mubr.msk.bf16.mxu0 %vm5460_vm0, %v5458_v3  ;;  %v4960_v19 = vld [vmem:[%s6794_s7 + $0xa0] ss:$16 sps:$4 sm:$0xff]  }
 0xe10   : > { %v5055_v51 = vpop.eup %5054  ;;  %4637 = vmatprep.subr.bf16.mxu0 %v5458_v3 }
 0xe11   : > { %v5057_v20 = vpop.eup %5056  ;;  %v3065_v23 = vsel %vm2218_vm13, %v5055_v51, 0.0 }
 0xe12   : > { %3066 = vadd.xlane.f32.xlu1 %v3065_v23  ;;  %v2759_v32 = vmul.f32 %v5057_v20, %v5049_v63  ;;  %v4947_v63 = vld [vmem:[%s6794_s7 + $0x4c] ss:$16 sps:$4 sm:$0xff]   ;;  %v4966_v20 = vld [vmem:[%s6794_s7 + $0xc0] ss:$16 sps:$4 sm:$0xff]   ;;  %v4969_v23 = vld [vmem:[%s6794_s7 + $0xc8] ss:$16 sps:$4 sm:$0xff]  }
 0xe14   : > { %v2760_v34 = vpack.c.bf16 %v2759_v32, %v2759_v32  ;;  %v4971_v32 = vld [vmem:[%s6794_s7 + $0xcc] ss:$16 sps:$4 sm:$0xff]  }
 0xe1a   : > { %4628 = vmatmul.mubr.msk.bf16.vlgmr.msra.gmra.mrb[36].mxu0 %vm2218_vm13, %v2760_v34  ;;  %v4977_v34 = vld [vmem:[%s6794_s7 + $0xec] ss:$16 sps:$4 sm:$0xff]  }
 0xe1b   : > { %4638 = vmatpush3.bf16.msra.mxu0 %v2971_v35  ;;  %4639 = vmatprep.mubr.msk.bf16.mxu0 %vm5460_vm0, %v5458_v3  ;;  %v4972_v35 = vld [vmem:[%s6794_s7 + $0xe0] ss:$16 sps:$4 sm:$0xff]  }
 0xe1c   : > { %4649 = vmatprep.subr.bf16.mxu0 %v5458_v3 }
 0xe97   : > { %v2963_v36 = vpop.xlane.xlu0 %2962 }
 0xe98   : > { %5058 = vrcp.f32 %v2963_v36  ;;  %v4975_v36 = vld [vmem:[%s6794_s7 + $0xe8] ss:$16 sps:$4 sm:$0xff]  }
 0xe9f   : > { %v3067_v37 = vpop.xlane.xlu1 %3066 }
 0xea0   : > { %5060 = vrcp.f32 %v3067_v37 }
 0xea2   : > { %v5059_v38 = vpop.eup %5058 }
 0xea3   : > { %v2965_v41 = vmul.f32 %v5059_v38, %v5051_v10  ;;  %v4956_v10 = vld [vmem:[%s6794_s7 + $0x84] ss:$16 sps:$4 sm:$0xff]  }
 0xea5   : > { %v2966_v11 = vpack.c.bf16 %v2965_v41, %v2965_v41  ;;  %v4223_v41 = vld [vmem:[#allocation13] ss:$0 sm:$0xff] }
 0xea7   : > { %4640 = vmatmul.mubr.msk.bf16.vlgmr.msra.gmra.mrb[36].mxu0 %vm2218_vm13, %v2966_v11 }
 0xea8   : > { %4650 = vmatpush3.bf16.msra.mxu0 %v3075_v43  ;;  %4651 = vmatprep.mubr.msk.bf16.mxu0 %vm5460_vm0, %v5458_v3  ;;  %v4224_v43 = vld [vmem:[#allocation15] ss:$0 sm:$0xff] }
 0xea9   : > { %3404 = vmatprep.subr.bf16.mxu0 %v4932_v31  ;;  %v4993_v31 = vld [vmem:[%s6795_s20 + $0x98] sm:$0xff]  }
 0xeaa   : > { %v5061_v16 = vpop.eup %5060 }
 0xeab   : > { %v3069_v21 = vmul.f32 %v5061_v16, %v5055_v51  ;;  %v4963_v51 = vld [vmem:[%s6794_s7 + $0xa8] ss:$16 sps:$4 sm:$0xff]  }
 0xead   : > { %v3070_v24 = vpack.c.bf16 %v3069_v21, %v3069_v21 }
 0xeb3   : > { %4652 = vmatmul.mubr.msk.bf16.vlgmr.msra.gmra.mrb[36].mxu0 %vm2218_vm13, %v3070_v24 }
 0xeb4   : > { %3436 = vmatprep.mubr.bf16.mxu0 %v5459_v25  ;;  %3405 = vmatpush1.bf16.msra.mxu0 %v4930_v55  ;;  %v4992_v55 = vld [vmem:[%s6795_s20 + $0x18] sm:$0xff]  }
 0xf86   : > { %v3111_v60 = vpop.f32.mrb[36].mxu0 }
 0xf87   : > { %v3118_v5 = vpack.c.bf16 %v3111_v60, %v3111_v60  ;;  %v4653_v26 = vpop.f32.mrb[37].mxu0  ;;  %v4978_v60 = vld [vmem:[%s6795_s20 + $0x40] sm:$0xff]  }
 0xf88   : > { %v3114_v27 = vpop.f32.mrb[38].mxu0  ;;  %v4980_v26 = vld [vmem:[%s6795_s20] sm:$0xff]  }
 0xf89   : > { %v4654_v45 = vpop.f32.mrb[39].mxu0  ;;  %4672 = vmatmul.mubr.bf16.vlgmr.msra.gmra.mrb[36].mxu1 %v3118_v5  ;;  %v4979_v5 = vld [vmem:[%s6795_s20 + $0xc0] sm:$0xff]  }
 0xf8a   : > { %3477 = vmatprep.mubr.bf16.mxu1 %v5459_v25  ;;  %v4933_v25 = vld [vmem:[%s6794_s7 + $0x8] ss:$16 sps:$4 sm:$0xff]   ;;  %v4981_v27 = vld [vmem:[%s6795_s20 + $0x80] sm:$0xff]  }
 0xf8b   : > { %3446 = vmatpush1.bf16.msra.mxu1 %v4933_v25  ;;  %v4982_v45 = vld [vmem:[%s6795_s20 + $0x48] sm:$0xff]   ;;  %v4994_v25 = vld [vmem:[%s6795_s20 + $0x60] sm:$0xff]  }
 0xf8c   : > { %3447 = vmatprep.subr.bf16.mxu1 %v4941_v58  ;;  %v4997_v58 = vld [vmem:[%s6795_s20 + $0xa0] sm:$0xff]  }
 0xf8f   : > { %3448 = vmatpush1.bf16.msra.mxu1 %v4939_v61  ;;  %v4999_v61 = vld [vmem:[%s6795_s20 + $0xe8] sm:$0xff]  }
 0xf90   : > { %3449 = vmatprep.subr.bf16.mxu1 %v4947_v63  ;;  %v5001_v63 = vld [vmem:[%s6795_s20 + $0xa8] sm:$0xff]  }
 0xf93   : > { %3450 = vmatpush1.bf16.msra.mxu1 %v4945_v56  ;;  %v5003_v56 = vld [vmem:[%s6795_s20 + $0xf0] sm:$0xff]  }
 0xf94   : > { %3451 = vmatprep.subr.bf16.mxu1 %v4953_v7  ;;  %v5009_v7 = vld [vmem:[%s6795_s20 + $0xb8] sm:$0xff]  }
 0xf97   : > { %3452 = vmatpush1.bf16.msra.mxu1 %v4951_v9  ;;  %v3238_v9 = vsub.s32 3, %v6008_v42 }
 0xf98   : > { %3453 = vmatprep.subr.bf16.mxu1 %v4959_v50 }
 0xf9b   : > { %3454 = vmatpush1.bf16.msra.mxu1 %v4957_v14 }
 0xf9c   : > { %3455 = vmatprep.subr.bf16.mxu1 %v4965_v18 }
 0xf9f   : > { %3456 = vmatpush1.bf16.msra.mxu1 %v4963_v51 }
 0xfa0   : > { %3457 = vmatprep.subr.bf16.mxu1 %v4971_v32 }
 0xfa3   : > { %3458 = vmatpush1.bf16.msra.mxu1 %v4969_v23 }
 0xfa4   : > { %3459 = vmatprep.subr.bf16.mxu1 %v4977_v34 }
 0xfa7   : > { %3460 = vmatpush1.bf16.msra.mxu1 %v4975_v36 }
 0xfa8   : > { %4409 = vmatprep.subr.bf16.mxu1 %v4979_v5 }
0x105c   : > { %v3153_v47 = vpop.f32.mrb[36].mxu1 }
0x105d   : > { %v4676_v48 = vadd.f32 %v4675_v28, %v3153_v47  ;;  %v4673_v3 = vpop.f32.mrb[37].mxu1  ;;  %v4984_v28 = vld [vmem:[%s6795_s20 + $0x8] sm:$0xff]  }
0x105e   : > { %v3156_v29 = vpop.f32.mrb[38].mxu1  ;;  %v4985_v47 = vld [vmem:[%s6795_s20 + $0x88] sm:$0xff]   ;;  %v4987_v3 = vld [vmem:[%s6795_s20 + $0xd0] sm:$0xff]  }
0x105f   : > { %v3160_v15 = vmul.f32 0.5, %v4676_v48  ;;  %v4674_v54 = vpop.f32.mrb[39].mxu1  ;;  %v4986_v48 = vld [vmem:[%s6795_s20 + $0x50] sm:$0xff]  }
0x1060   : > { %v4988_v29 = vld [vmem:[%s6795_s20 + $0x10] sm:$0xff]   ;;  %v4990_v54 = vld [vmem:[%s6795_s20 + $0x58] sm:$0xff]  }
0x1061   : > { %v3161_v30 = vadd.f32 %v3160_v15, %v6250_v12  ;;  %v4938_v12 = vld [vmem:[%s6794_s7 + $0x24] ss:$16 sps:$4 sm:$0xff]  }
0x1062   : > { %3406 = vmatprep.subr.bf16.mxu0 %v4938_v12  ;;  %v4989_v15 = vld [vmem:[%s6795_s20 + $0x90] sm:$0xff]   ;;  %v4996_v12 = vld [vmem:[%s6795_s20 + $0x20] sm:$0xff]  }
0x1063   : > { %3164 = vadd.xlane.f32.xlu0 %v3161_v30  ;;  %3407 = vmatpush1.bf16.msra.mxu0 %v4936_v59  ;;  %v4998_v59 = vld [vmem:[%s6795_s20 + $0x68] sm:$0xff]  }
0x1064   : > { %3408 = vmatprep.subr.bf16.mxu0 %v4944_v62  ;;  %v5000_v62 = vld [vmem:[%s6795_s20 + $0x28] sm:$0xff]  }
0x1067   : > { %3409 = vmatpush1.bf16.msra.mxu0 %v4942_v0  ;;  %v5002_v0 = vld [vmem:[%s6795_s20 + $0x70] sm:$0xff]  }
0x1068   : > { %3410 = vmatprep.subr.bf16.mxu0 %v4950_v6  ;;  %v5008_v6 = vld [vmem:[%s6795_s20 + $0x38] sm:$0xff]  }
0x106b   : > { %3411 = vmatpush1.bf16.msra.mxu0 %v4948_v8  ;;  %v3222_v8 = vld [vmem:[%s6796_s21] sm:$0xf] }
0x106c   : > { %3412 = vmatprep.subr.bf16.mxu0 %v4956_v10  ;;  %v3227_v10 = vrot.slane %v3222_v8, %v6027_v53  ;;  %v3235_v50 = vrot.slane %v3222_v8, %v1061_v44  ;;  %v3239_v14 = vrot.slane %v3222_v8, %v3238_v9 }
0x106f   : > { %3413 = vmatpush1.bf16.msra.mxu0 %v4954_v13  ;;  %v3231_v13 = vrot.slane %v3222_v8, %v6015_v46 }
0x1070   : > { %3414 = vmatprep.subr.bf16.mxu0 %v4962_v17 }
0x1073   : > { %3415 = vmatpush1.bf16.msra.mxu0 %v4960_v19 }
0x1074   : > { %3416 = vmatprep.subr.bf16.mxu0 %v4968_v22 }
0x1077   : > { %3417 = vmatpush1.bf16.msra.mxu0 %v4966_v20 }
0x1078   : > { %3418 = vmatprep.subr.bf16.mxu0 %v4974_v33 }
0x107b   : > { %3419 = vmatpush1.bf16.msra.mxu0 %v4972_v35 }
0x107c   : > { %4387 = vmatprep.subr.bf16.mxu0 %v4978_v60 }
0x10f0   : > { %v3165_v1 = vpop.xlane.xlu0 %3164 }
0x10f1   : > { %v3166_v2 = vmul.f32 0.0078125, %v3165_v1  ;;  %v5004_v1 = vld [vmem:[%s6795_s20 + $0x30] sm:$0xff]  }
0x10f3   : > { %v3167_v39 = vsub.f32 %v3161_v30, %v3166_v2  ;;  %v4991_v30 = vld [vmem:[%s6795_s20 + $0xd8] sm:$0xff]   ;;  %v5005_v2 = vld [vmem:[%s6795_s20 + $0xb0] sm:$0xff]  }
0x10f5   : > { %v3168_v49 = vmul.f32 %v3167_v39, %v3167_v39 }
0x10f7   : > { %3169 = vadd.xlane.f32.xlu1 %v3168_v49  ;;  %v5007_v49 = vld [vmem:[%s6795_s20 + $0xf8] sm:$0xff]  }
0x1184   : > { %v3170_v52 = vpop.xlane.xlu1 %3169 }
0x1185   : > { %v3171_v37 = vmul.f32 0.0078125, %v3170_v52 }
0x1187   : > { %v3172_v38 = vadd.f32 1e-12, %v3171_v37 }
0x1189   : > { %5062 = vrsqrt.f32 %v3172_v38 }
0x1193   : > { %v5063_v40 = vpop.eup %5062 }
0x1194   : > { %v3174_v11 = vmul.f32 %v5063_v40, %v3167_v39  ;;  %v5006_v39 = vld [vmem:[%s6795_s20 + $0x78] sm:$0xff]  }
0x1196   : > { %v3181_v16 = vmul.f32 %v4223_v41, %v3174_v11 }
0x1198   : > { %v6592_v21 = vadd.f32 %v4224_v43, %v3181_v16 }
0x119a   : > { %v3221_v24 = vpack.c.bf16 %v6592_v21, %v6592_v21 }
0x119c   : > { %3437 = vmatmul.mubr.bf16.vlgmr.msra.gmra.mrb[40].mxu0 %v3221_v24  ;;  %3478 = vmatmul.mubr.bf16.vlgmr.msra.gmra.mrb[48].mxu1 %v3221_v24 }
0x119d   : > { %4388 = vmatpush3.bf16.msra.mxu0 %v4980_v26  ;;  %4410 = vmatpush3.bf16.msra.mxu1 %v4981_v27 }
0x119e   : > { %4389 = vmatprep.subr.bf16.mxu0 %v4982_v45  ;;  %4411 = vmatprep.subr.bf16.mxu1 %v4983_v4 }
0x11a1   : > { %4390 = vmatpush3.bf16.msra.mxu0 %v4984_v28  ;;  %4412 = vmatpush3.bf16.msra.mxu1 %v4985_v47 }
0x11a2   : > { %4391 = vmatprep.subr.bf16.mxu0 %v4986_v48  ;;  %4413 = vmatprep.subr.bf16.mxu1 %v4987_v3 }
0x11a5   : > { %4392 = vmatpush3.bf16.msra.mxu0 %v4988_v29  ;;  %4414 = vmatpush3.bf16.msra.mxu1 %v4989_v15 }
0x11a6   : > { %4393 = vmatprep.subr.bf16.mxu0 %v4990_v54  ;;  %4415 = vmatprep.subr.bf16.mxu1 %v4991_v30 }
0x11a9   : > { %4394 = vmatpush3.bf16.msra.mxu0 %v4992_v55  ;;  %4416 = vmatpush3.bf16.msra.mxu1 %v4993_v31 }
0x11aa   : > { %4395 = vmatprep.subr.bf16.mxu0 %v4994_v25  ;;  %4417 = vmatprep.subr.bf16.mxu1 %v4995_v57 }
0x11ad   : > { %4396 = vmatpush3.bf16.msra.mxu0 %v4996_v12  ;;  %4418 = vmatpush3.bf16.msra.mxu1 %v4997_v58 }
0x11ae   : > { %4397 = vmatprep.subr.bf16.mxu0 %v4998_v59  ;;  %4419 = vmatprep.subr.bf16.mxu1 %v4999_v61 }
0x11b1   : > { %4398 = vmatpush3.bf16.msra.mxu0 %v5000_v62  ;;  %4420 = vmatpush3.bf16.msra.mxu1 %v5001_v63 }
0x11b2   : > { %4399 = vmatprep.subr.bf16.mxu0 %v5002_v0  ;;  %4421 = vmatprep.subr.bf16.mxu1 %v5003_v56 }
0x11b5   : > { %4400 = vmatpush3.bf16.msra.mxu0 %v5004_v1  ;;  %4422 = vmatpush3.bf16.msra.mxu1 %v5005_v2 }
0x11b6   : > { %4401 = vmatprep.subr.bf16.mxu0 %v5006_v39  ;;  %4423 = vmatprep.subr.bf16.mxu1 %v5007_v49 }
0x11b9   : > { %4402 = vmatpush3.bf16.msra.mxu0 %v5008_v6  ;;  %4424 = vmatpush3.bf16.msra.mxu1 %v5009_v7 }
0x126f   : > { %v3438_v17 = vpop.f32.mrb[40].mxu0  ;;  %v3479_v18 = vpop.f32.mrb[48].mxu1 }
0x1270   : > { %v3439_v19 = vadd.f32 %v3438_v17, %v3227_v10  ;;  %v3480_v51 = vadd.f32 %v3479_v18, %v3235_v50  ;;  %v3440_v20 = vpop.f32.mrb[41].mxu0  ;;  %v3481_v22 = vpop.f32.mrb[49].mxu1  ;;  %v4289_v17 = vld [vmem:[#allocation16] ss:$0 sm:$0xff] }
0x1271   : > { %v3441_v23 = vadd.f32 %v3440_v20, %v3231_v13  ;;  %v3482_v32 = vadd.f32 %v3481_v22, %v3239_v14  ;;  %v3442_v33 = vpop.f32.mrb[42].mxu0  ;;  %v3483_v34 = vpop.f32.mrb[50].mxu1 }
0x1272   : > { %v3486_v35 = vmul.f32 %v3439_v19, %v3439_v19  ;;  %v3488_v36 = vmul.f32 %v3480_v51, %v3480_v51  ;;  %v3443_v52 = vpop.f32.mrb[43].mxu0  ;;  %v3484_v53 = vpop.f32.mrb[51].mxu1 }
0x1273   : > { %v3487_v37 = vmul.f32 %v3441_v23, %v3441_v23  ;;  %v3489_v42 = vmul.f32 %v3482_v32, %v3482_v32  ;;  %v4291_v53 = vld [vmem:[#allocation19] ss:$0 sm:$0xff] }
0x1274   : > { %v3490_v44 = vmul.f32 %v3486_v35, %v3439_v19  ;;  %v3492_v38 = vmul.f32 %v3488_v36, %v3480_v51  ;;  %v4290_v36 = vld [vmem:[#allocation18] ss:$0 sm:$0xff] }
0x1275   : > { %v3491_v46 = vmul.f32 %v3487_v37, %v3441_v23  ;;  %v3493_v40 = vmul.f32 %v3489_v42, %v3482_v32 }
0x1276   : > { %v3494_v41 = vmul.f32 0.044715, %v3490_v44  ;;  %v3496_v11 = vmul.f32 0.044715, %v3492_v38 }
0x1277   : > { %v3495_v43 = vmul.f32 0.044715, %v3491_v46  ;;  %v3497_v16 = vmul.f32 0.044715, %v3493_v40 }
0x1278   : > { %v3498_v24 = vadd.f32 %v3494_v41, %v3439_v19  ;;  %v3500_v60 = vadd.f32 %v3496_v11, %v3480_v51 }
0x1279   : > { %v3499_v5 = vadd.f32 %v3495_v43, %v3441_v23  ;;  %v3501_v26 = vadd.f32 %v3497_v16, %v3482_v32 }
0x127a   : > { %v3502_v27 = vmul.f32 0.7978846, %v3498_v24  ;;  %v3504_v45 = vmul.f32 0.7978846, %v3500_v60 }
0x127b   : > { %v3503_v4 = vmul.f32 0.7978846, %v3499_v5  ;;  %v3505_v28 = vmul.f32 0.7978846, %v3501_v26 }
0x127c   : > { %5064 = vtanh.f32 %v3502_v27 }
0x127d   : > { %5066 = vtanh.f32 %v3504_v45 }
0x127e   : > { %5068 = vtanh.f32 %v3503_v4 }
0x127f   : > { %5070 = vtanh.f32 %v3505_v28 }
0x1286   : > { %v5065_v47 = vpop.eup %5064 }
0x1287   : > { %v5067_v48 = vpop.eup %5066  ;;  %v3510_v3 = vadd.f32 1.0, %v5065_v47 }
0x1288   : > { %v5069_v29 = vpop.eup %5068  ;;  %v3512_v15 = vadd.f32 1.0, %v5067_v48 }
0x1289   : > { %v5071_v54 = vpop.eup %5070  ;;  %v3511_v30 = vadd.f32 1.0, %v5069_v29  ;;  %v3514_v55 = vmul.f32 0.5, %v3510_v3 }
0x128a   : > { %v3513_v31 = vadd.f32 1.0, %v5071_v54  ;;  %v3516_v25 = vmul.f32 0.5, %v3512_v15 }
0x128b   : > { %v3515_v57 = vmul.f32 0.5, %v3511_v30  ;;  %v3518_v58 = vmul.f32 %v3514_v55, %v3439_v19 }
0x128c   : > { %v3517_v12 = vmul.f32 0.5, %v3513_v31  ;;  %v3520_v61 = vmul.f32 %v3516_v25, %v3480_v51 }
0x128d   : > { %v3519_v59 = vmul.f32 %v3515_v57, %v3441_v23  ;;  %v3586_v56 = vpack.c.bf16 %v3518_v58, %v3518_v58 }
0x128e   : > { %v3521_v62 = vmul.f32 %v3517_v12, %v3482_v32  ;;  %v3588_v1 = vpack.c.bf16 %v3520_v61, %v3520_v61 }
0x128f   : > { %v3587_v63 = vpack.c.bf16 %v3519_v59, %v3519_v59 }
0x1290   : > { %v3589_v0 = vpack.c.bf16 %v3521_v62, %v3521_v62 }
0x1291   : > { %3814 = vmatprep.mubr.bf16.mxu0 %v3587_v63 }
0x1292   : > { %3854 = vmatprep.mubr.bf16.mxu1 %v3589_v0  ;;  %3815 = vmatmul.mubr.bf16.vlgmr.msra.gmra.mrb[44].mxu0 %v3586_v56 }
0x1293   : > { %3855 = vmatmul.mubr.bf16.vlgmr.msra.gmra.mrb[52].mxu1 %v3588_v1 }
0x1365   : > { %v4403_v2 = vpop.f32.mrb[44].mxu0 }
0x1366   : > { %v4425_v39 = vpop.f32.mrb[52].mxu1  ;;  %v4404_v49 = vpop.f32.mrb[45].mxu0 }
0x1367   : > { %v4405_v6 = vadd.f32 %v4404_v49, %v4403_v2  ;;  %v4426_v7 = vpop.f32.mrb[53].mxu1  ;;  %v4406_v8 = vpop.f32.mrb[46].mxu0 }
0x1368   : > { %v4427_v9 = vadd.f32 %v4426_v7, %v4425_v39  ;;  %v4428_v10 = vpop.f32.mrb[54].mxu1  ;;  %v4407_v50 = vpop.f32.mrb[47].mxu0 }
0x1369   : > { %v4429_v13 = vpop.f32.mrb[55].mxu1 }
0x136a   : > { %v3857_v14 = vadd.f32 %v4427_v9, %v4405_v6 }
0x136c   : > { %v3862_v18 = vadd.f32 %v3857_v14, %v6592_v21 }
0x136e   : > { %v3870_v19 = vadd.f32 %v4289_v17, %v3862_v18 }
0x1370   : > { %3873 = vadd.xlane.f32.xlu0 %v3870_v19 }
0x13fd   : > { %v3874_v51 = vpop.xlane.xlu0 %3873 }
0x13fe   : > { %v3875_v20 = vmul.f32 0.0078125, %v3874_v51 }
0x1400   : > { %v3876_v22 = vsub.f32 %v3870_v19, %v3875_v20 }
0x1402   : > { %v3877_v23 = vmul.f32 %v3876_v22, %v3876_v22 }
0x1404   : > { %3878 = vadd.xlane.f32.xlu1 %v3877_v23 }
0x1491   : > { %v3879_v32 = vpop.xlane.xlu1 %3878 }
0x1492   : > { %v3880_v33 = vmul.f32 0.0078125, %v3879_v32 }
0x1494   : > { %v3881_v34 = vadd.f32 1e-12, %v3880_v33 }
0x1496   : > { %5072 = vrsqrt.f32 %v3881_v34 }
0x14a0   : > { %v5073_v35 = vpop.eup %5072 }
0x14a1   : > { %v3883_v52 = vmul.f32 %v5073_v35, %v3876_v22 }
0x14a3   : > { %v3890_v37 = vmul.f32 %v4290_v36, %v3883_v52 }
0x14a5   : > { %v3897_v21 = vadd.f32 %v4291_v53, %v3890_v37 }
0x14a7   : > { %3898 = vst [vmem:[%s985_s9] sm:$0xff] %v3897_v21 }
0x14a8 PF: > { %s6798_s1 = sld [smem:[#allocation28_spill]] }
0x14ae   : > { %s43_s27 = sadd.s32 1, %s6798_s1  }
0x14af   : > { %p40_p7 = scmp.ge.s32.totalorder %s43_s27, 4  }
0x14b1   :  { %42 = sbr.rel (!%p40_p7) target bundleno = 23 (0x17), region = 212 }
0x14b8   :  { %3918 = vsyncpa [#allocation3], 1 }
0x14b9   :  { %3920 = vsyncpa [#allocation3 + $0x1], 1 }
0x14ba   :  { %3921 = vsyncpa [#allocation5], 1 }
0x14bb   :  { %3922 = vsyncpa [#allocation8], 1 }
0x14bc   :  { %3923 = vsyncpa [#allocation11], 1 }
0x14bd   :  { %3924 = vsyncpa [#allocation14], 1 }
0x14be   :  { %3925 = vsyncpa [#allocation17], 1 }
0x14bf   :  { %3926 = vsyncpa [#allocation20], 1 }

// kernel: blip_nlvr_forward.9
= control target key start
LH: loop header
LB: loop body
LE: loop exit
PB: predicated region body
PF: predicated region fallthrough
CT: control target
= control target key end

     0   :  { %s5673_s6 = smov 1   ;;  %s5674_s10 = smov 2   ;;  %s6598_s0 = inlined_call_operand.smem [shape: u32[32], index: -1, kind: input, shape index: {}] }
   0x1   :  { %s5718_s5 = sld [smem:[%s6598_s0]]   ;;  %s5675_s14 = smov 3  }
   0x2   :  { %s5723_s9 = sld [smem:[%s6598_s0 + %s5673_s6]]   ;;  %s5676_s18 = smov 4  }
   0x3   :  { %s5728_s13 = sld [smem:[%s6598_s0 + %s5674_s10]]   ;;  %s5677_s22 = smov 5  }
   0x4   :  { %s5733_s17 = sld [smem:[%s6598_s0 + %s5675_s14]]   ;;  %s5678_s26 = smov 6  }
   0x5   :  { %s5738_s21 = sld [smem:[%s6598_s0 + %s5676_s18]]   ;;  %s5679_s30 = smov 7  }
   0x6   :  { %s5743_s25 = sld [smem:[%s6598_s0 + %s5677_s22]]   ;;  %s5680_s4 = smov 8  }
   0x7   :  { %6608 = sst [smem:[#allocation8_spill]] %s5718_s5  ;;  %s5681_s10 = smov 9  }
   0x8   :  { %6609 = sst [smem:[#allocation9_spill]] %s5723_s9  ;;  %s5682_s15 = smov 10  }
   0x9   :  { %6610 = sst [smem:[#allocation10_spill]] %s5728_s13  ;;  %s5683_s20 = smov 11  }
   0xa   :  { %s5748_s29 = sld [smem:[%s6598_s0 + %s5678_s26]]   ;;  %s5684_s26 = smov 12  }
   0xb   :  { %s5753_s3 = sld [smem:[%s6598_s0 + %s5679_s30]]   ;;  %s5685_s1 = smov 13  }
   0xc   :  { %s5758_s8 = sld [smem:[%s6598_s0 + %s5680_s4]]   ;;  %s5686_s7 = smov 14  }
   0xd   :  { %s5763_s14 = sld [smem:[%s6598_s0 + %s5681_s10]]   ;;  %s5688_s22 = smov 16  }
   0xe   :  { %s5768_s19 = sld [smem:[%s6598_s0 + %s5682_s15]]   ;;  %s5687_s15 = smov 15  }
   0xf   :  { %s5773_s24 = sld [smem:[%s6598_s0 + %s5683_s20]]   ;;  %s5689_s28 = smov 17  }
  0x10   :  { %s5778_s30 = sld [smem:[%s6598_s0 + %s5684_s26]]  }
  0x11   :  { %6611 = sst [smem:[#allocation11_spill]] %s5753_s3 }
  0x12   :  { %6612 = sst [smem:[#allocation12_spill]] %s5758_s8 }
  0x13   :  { %6613 = sst [smem:[#allocation13_spill]] %s5763_s14 }
  0x14   :  { %s5783_s6 = sld [smem:[%s6598_s0 + %s5685_s1]]  }
  0x15   :  { %s5788_s12 = sld [smem:[%s6598_s0 + %s5686_s7]]   ;;  %s5690_s7 = smov 18  }
  0x16   :  { %s5793_s20 = sld [smem:[%s6598_s0 + %s5687_s15]]   ;;  %s5691_s15 = smov 19  }
  0x17   :  { %s5798_s27 = sld [smem:[%s6598_s0 + %s5688_s22]]   ;;  %s5692_s22 = smov 20  }
  0x18   :  { %s5803_s4 = sld [smem:[%s6598_s0 + %s5689_s28]]   ;;  %s5693_s28 = smov 21  }
  0x1a   :  { %6614 = sst [smem:[#allocation14_spill]] %s5783_s6 }
  0x1b   :  { %6615 = sst [smem:[#allocation15_spill]] %s5788_s12 }
  0x1c   :  { %6616 = sst [smem:[#allocation16_spill]] %s5793_s20 }
  0x1d   :  { %6617 = sst [smem:[#allocation17_spill]] %s5798_s27 }
  0x1e   :  { %6618 = sst [smem:[#allocation18_spill]] %s5803_s4 }
  0x1f   :  { %s5808_s12 = sld [smem:[%s6598_s0 + %s5690_s7]]   ;;  %s5694_s7 = smov 22  }
  0x20   :  { %s5813_s20 = sld [smem:[%s6598_s0 + %s5691_s15]]   ;;  %s5695_s15 = smov 23  }
  0x21   :  { %s5818_s27 = sld [smem:[%s6598_s0 + %s5692_s22]]   ;;  %s5696_s22 = smov 24  }
  0x22   :  { %s5823_s4 = sld [smem:[%s6598_s0 + %s5693_s28]]   ;;  %s5697_s28 = smov 25  }
  0x25   :  { %6619 = sst [smem:[#allocation19_spill]] %s5808_s12 }
  0x26   :  { %6620 = sst [smem:[#allocation20_spill]] %s5813_s20 }
  0x27   :  { %6621 = sst [smem:[#allocation21_spill]] %s5818_s27 }
  0x28   :  { %6622 = sst [smem:[#allocation22_spill]] %s5823_s4 }
  0x29   :  { %s5828_s12 = sld [smem:[%s6598_s0 + %s5694_s7]]   ;;  %s5698_s7 = smov 26  }
  0x2a   :  { %s5833_s20 = sld [smem:[%s6598_s0 + %s5695_s15]]   ;;  %s5699_s15 = smov 27  }
  0x2b   :  { %s5838_s27 = sld [smem:[%s6598_s0 + %s5696_s22]]   ;;  %s5700_s22 = smov 28  }
  0x2c   :  { %s5843_s4 = sld [smem:[%s6598_s0 + %s5697_s28]]   ;;  %s5701_s28 = smov 29  }
  0x2f   :  { %6623 = sst [smem:[#allocation23_spill]] %s5828_s12 }
  0x30   :  { %6624 = sst [smem:[#allocation24_spill]] %s5833_s20 }
  0x31   :  { %6625 = sst [smem:[#allocation25_spill]] %s5838_s27 }
  0x32   :  { %6626 = sst [smem:[#allocation26_spill]] %s5843_s4 }
  0x33   :  { %s5848_s12 = sld [smem:[%s6598_s0 + %s5698_s7]]   ;;  %s5702_s7 = smov 30  }
  0x34   :  { %s5853_s20 = sld [smem:[%s6598_s0 + %s5699_s15]]   ;;  %s5703_s15 = smov 31  }
  0x35   :  { %s5858_s27 = sld [smem:[%s6598_s0 + %s5700_s22]]  }
  0x36   :  { %s5863_s4 = sld [smem:[%s6598_s0 + %s5701_s28]]  }
  0x39   :  { %6627 = sst [smem:[#allocation27_spill]] %s5848_s12 }
  0x3a   :  { %6628 = sst [smem:[#allocation28_spill]] %s5853_s20 }
  0x3b   :  { %s5868_s12 = sld [smem:[%s6598_s0 + %s5702_s7]]  }
  0x3c   :  { %s5873_s20 = sld [smem:[%s6598_s0 + %s5703_s15]]  }
  0x3d   :  { %69 = vsyncpa [#allocation3], 0 }
  0x3e   :  { %71 = vsyncpa [#allocation3 + $0x1], 0 }
  0x3f   :  { %72 = vsyncpa [#allocation5], 0 }
  0x40   :  { %74 = vsyncpa [#allocation5 + $0x1], 0  ;;  %s5875_s22 = smov 0   ;;  %s5877_s23 = smov 0  }
  0x41   :  { %s5879_s26 = smov 0   ;;  %s5881_s28 = smov 0  }
  0x42 LB: > { %s5896_s0 = sadd.s32 4294967295, %s5671_s28   ;;  %s4510_s1 = sadd.s32 4294967294, %s5671_s28   ;;  %s5671_s28 = sphi %s5881_s28, %s6655_s28   ;;  %s5667_s26 = sphi %s5879_s26, %s6654_s26   ;;  %s5663_s23 = sphi %s5877_s23, %s6653_s23   ;;  %s5659_s22 = sphi %s5875_s22, %s6652_s22  }
  0x43   : > { %s5900_s2 = sadd.s32 1, %s5671_s28   ;;  %s737_s7 = sadd.s32 1, %s5667_s26 }
  0x44   : > { %s734_s10 = ssub.s32 %s5671_s28, %s5900_s2  ;;  %p747_p0 = scmp.ne.s32.totalorder %s5667_s26, %s5663_s23 }
  0x45   : > { %p735_p1 = scmp.eq.s32.totalorder %s734_s10, 0  ;;  %p748_p2 = scmp.eq.s32.totalorder %s5896_s0, 1 }
  0x46   : > { %p753_p3 = scmp.ne.s32.totalorder %s5663_s23, %s5659_s22  ;;  %p754_p4 = scmp.eq.s32.totalorder %s4510_s1, 1 }
  0x47   : > { %s5911_s11 = scalar_select %p735_p1, %s5667_s26, %s737_s7  }
  0x48   : > { %p5913_p5 = por %p748_p2, %p747_p0  ;;  %p5917_p6 = por %p754_p4, %p753_p3 }
  0x49   : > { %p4513_p7 = scmp.ge.s32.totalorder %s5671_s28, 1  ;;  %p903_p8 = scmp.lt.s32.totalorder %s5671_s28, 3 }
  0x4b   : > { %p904_p9 = pnand %p4513_p7, %p903_p8 }
  0x4c   : > { %v5323_v0 = vld [vmem:[%s5738_s21 + $0x4] ss:$12 sps:$4 sm:$0xff] (!%p904_p9)   ;;  %v5325_v1 = vld [vmem:[%s5738_s21] ss:$12 sps:$4 sm:$0xff] (!%p904_p9)   ;;  %v5704_v2 = vmov (!%p904_p9), 0   ;;  %v5705_v4 = vmov (!%p904_p9), 0.0   ;;  %v1049_v28 = vlaneseq (!%p904_p9) }
  0x4d   : > { %907 = sbr.rel (%p904_p9) target bundleno = 5396 (0x1514), region = 140  ;;  %1224 = vmatprep.mubr.bf16.mxu0 (!%p904_p9), %v5704_v2  ;;  %1192 = vmatprep.subr.bf16.mxu0 (!%p904_p9), %v5323_v0  ;;  %v5326_v3 = vld [vmem:[%s5738_s21 + $0x1c] ss:$12 sps:$4 sm:$0xff] (!%p904_p9)   ;;  %v5328_v5 = vld [vmem:[%s5738_s21 + $0x18] ss:$12 sps:$4 sm:$0xff] (!%p904_p9)   ;;  %p997_p10 = scmp.lt.s32.totalorder (!%p904_p9), %s5896_s0, 1 }
  0x4e   : > { %4884 = vmatprep.subr.bf16.mxu1 (!%p904_p9), %v5705_v4  ;;  %1193 = vmatpush1.bf16.msra.mxu0 (!%p904_p9), %v5325_v1  ;;  %v5329_v6 = vld [vmem:[%s5738_s21 + $0x34] ss:$12 sps:$4 sm:$0xff] (!%p904_p9)   ;;  %v5331_v7 = vld [vmem:[%s5738_s21 + $0x30] ss:$12 sps:$4 sm:$0xff] (!%p904_p9)   ;;  %v5332_v8 = vld [vmem:[%s5738_s21 + $0x4c] ss:$12 sps:$4 sm:$0xff] (!%p904_p9)  }
  0x4f   : > { %1194 = vmatprep.subr.bf16.mxu0 (!%p904_p9), %v5326_v3  ;;  %v5334_v9 = vld [vmem:[%s5738_s21 + $0x48] ss:$12 sps:$4 sm:$0xff] (!%p904_p9)   ;;  %v5335_v11 = vld [vmem:[%s5738_s21 + $0x64] ss:$12 sps:$4 sm:$0xff] (!%p904_p9)   ;;  %v5348_v12 = vld [vmem:[%s5738_s21 + $0x20] ss:$12 sps:$4 sm:$0xff] (!%p904_p9)  }
  0x50   : > { %v5347_v10 = vld [vmem:[%s5738_s21 + $0x8] ss:$12 sps:$4 sm:$0xff] (!%p904_p9)   ;;  %s6631_s5 = sld [smem:[#allocation8_spill]] (!%p904_p9)  ;;  %v5337_v13 = vld [vmem:[%s5738_s21 + $0x60] ss:$12 sps:$4 sm:$0xff] (!%p904_p9)   ;;  %vm5706_vm0 = vmmov (!%p904_p9), 0  }
  0x51   : > { %4885 = vmatpush3.bf16.msra.mxu1 (!%p904_p9), %v5347_v10  ;;  %v5338_v14 = vld [vmem:[%s5738_s21 + $0x7c] ss:$12 sps:$4 sm:$0xff] (!%p904_p9)   ;;  %v5340_v15 = vld [vmem:[%s5738_s21 + $0x78] ss:$12 sps:$4 sm:$0xff] (!%p904_p9)   ;;  %v5341_v17 = vld [vmem:[%s5738_s21 + $0x94] ss:$12 sps:$4 sm:$0xff] (!%p904_p9)   ;;  %4900 = vmatprep.mubr.msk.bf16.mxu1 (!%p904_p9), %vm5706_vm0, %v5705_v4 }
  0x52   : > { %1195 = vmatpush1.bf16.msra.mxu0 (!%p904_p9), %v5328_v5  ;;  %4886 = vmatprep.subr.bf16.mxu1 (!%p904_p9), %v5705_v4  ;;  %v5349_v16 = vld [vmem:[%s5738_s21 + $0x38] ss:$12 sps:$4 sm:$0xff] (!%p904_p9)   ;;  %v5350_v18 = vld [vmem:[%s5738_s21 + $0x50] ss:$12 sps:$4 sm:$0xff] (!%p904_p9)   ;;  %v5351_v21 = vld [vmem:[%s5738_s21 + $0x68] ss:$12 sps:$4 sm:$0xff] (!%p904_p9)  }
  0x53   : > { %1196 = vmatprep.subr.bf16.mxu0 (!%p904_p9), %v5329_v6  ;;  %v5343_v19 = vld [vmem:[%s5738_s21 + $0x90] ss:$12 sps:$4 sm:$0xff] (!%p904_p9)   ;;  %v5344_v20 = vld [vmem:[%s5738_s21 + $0xac] ss:$12 sps:$4 sm:$0xff] (!%p904_p9)   ;;  %v5346_v22 = vld [vmem:[%s5738_s21 + $0xa8] ss:$12 sps:$4 sm:$0xff] (!%p904_p9)  }
  0x54   : > { %s5935_s18 = scalar_select %p997_p10, %s5896_s0, 1  ;;  %v5352_v24 = vld [vmem:[%s5738_s21 + $0x80] ss:$12 sps:$4 sm:$0xff]   ;;  %v5353_v26 = vld [vmem:[%s5738_s21 + $0x98] ss:$12 sps:$4 sm:$0xff]   ;;  %v5977_v29 = vshrl.u32 %v1049_v28, 7 }
  0x55   : > { %4887 = vmatpush3.bf16.msra.mxu1 %v5348_v12  ;;  %v5354_v27 = vld [vmem:[%s5738_s21 + $0xb0] ss:$12 sps:$4 sm:$0xff]   ;;  %v1281_v30 = vand.u32 127, %v1049_v28  ;;  %v1047_v32 = vld [vmem:[%s5743_s25] sm:$0x7]  ;;  %s6632_s9 = sld [smem:[#allocation9_spill]] }
  0x56   : > { %1197 = vmatpush1.bf16.msra.mxu0 %v5331_v7  ;;  %s5941_s1 = sshll.u32 %s5935_s18, 3  ;;  %4888 = vmatprep.subr.bf16.mxu1 %v5705_v4  ;;  %v5980_v31 = vsub.s32 1, %v5977_v29  ;;  %v5985_v34 = vsub.s32 0, %v5977_v29  ;;  %v1059_v59 = vsub.s32 2, %v5977_v29  ;;  %vm1413_vm9 = vcmask 1043456   ;;  %s6633_s3 = sld [smem:[#allocation11_spill]] }
  0x57   : > { %1198 = vmatprep.subr.bf16.mxu0 %v5332_v8  ;;  %s1000_s7 = scalar_lea.vmem %s6631_s5, %s5941_s1  ;;  %vm1503_vm1 = vcmp.ge.s32.totalorder %v1281_v30, 64  ;;  %vm1504_vm2 = vcmp.lt.s32.totalorder %v1281_v30, 96  ;;  %vm1284_vm3 = vcmp.lt.s32.totalorder %v1281_v30, 32  ;;  %vm1347_vm5 = vcmp.ge.s32.totalorder %v1281_v30, 32  ;;  %s6634_s13 = sld [smem:[#allocation10_spill]] }
  0x58   : > { %v5958_v23 = vld [vmem:[%s1000_s7] sm:$0xff]  ;;  %v1056_v33 = vrot.slane %v1047_v32, %v5980_v31  ;;  %vm1505_vm4 = vmand %vm1503_vm1, %vm1504_vm2  ;;  %v5988_v37 = vsel %vm1284_vm3, 1.0, %v5705_v4  ;;  %vm1348_vm6 = vcmp.lt.s32.totalorder %v1281_v30, 64  ;;  %vm1613_vm8 = vcmp.ge.s32.totalorder %v1281_v30, 96  ;;  %s6635_s8 = sld [smem:[#allocation12_spill]]  ;;  %s6636_s14 = sld [smem:[#allocation13_spill]] }
  0x59   : > { %4889 = vmatpush3.bf16.msra.mxu1 %v5349_v16  ;;  %v1046_v25 = vpack.c.bf16 %v5958_v23, %v5958_v23  ;;  %v5991_v38 = vsel %vm1505_vm4, 1.0, %v5705_v4  ;;  %vm1349_vm7 = vmand %vm1347_vm5, %vm1348_vm6  ;;  %v1052_v44 = vrot.slane %v1047_v32, %v5985_v34  ;;  %v6000_v48 = vsel %vm1613_vm8, 1.0, %v5705_v4  ;;  %s6637_s6 = sld [smem:[#allocation14_spill]]  ;;  %s1011_s7 = scalar_lea.vmem %s5733_s17, %s5941_s1 }
  0x5a   : > { %1199 = vmatpush1.bf16.msra.mxu0 %v5334_v9  ;;  %4890 = vmatprep.subr.bf16.mxu1 %v5705_v4  ;;  %v5997_v47 = vsel %vm1349_vm7, 1.0, %v5705_v4  ;;  %v1060_v60 = vrot.slane %v1047_v32, %v1059_v59  ;;  %vm1334_vm10 = vcmask 64512   ;;  %vm2290_vm11 = vcmask 1041408   ;;  %s6651_s5 = sld [smem:[#allocation28_spill]] }
  0x5b   : > { %1200 = vmatprep.subr.bf16.mxu0 %v5335_v11  ;;  %s1003_s10 = scalar_lea.vmem %s6632_s9, %s5935_s18  ;;  %vm2291_vm12 = vcmask 1042432   ;;  %vm2217_vm13 = vcmask 39936  }
  0x5d   : > { %4891 = vmatpush3.bf16.msra.mxu1 %v5350_v18  ;;  %s1007_s18 = scalar_lea.vmem %s6634_s13, %s5941_s1  ;;  %s6638_s1 = sld [smem:[#allocation15_spill]] }
  0x5e   : > { %1201 = vmatpush1.bf16.msra.mxu0 %v5337_v13  ;;  %4892 = vmatprep.subr.bf16.mxu1 %v5705_v4 }
  0x5f   : > { %1202 = vmatprep.subr.bf16.mxu0 %v5338_v14  ;;  %v4542_v14 = vld [vmem:[%s1003_s10] ss:$0 sm:$0xff]  ;;  %s6639_s10 = sld [smem:[#allocation17_spill]] }
  0x61   : > { %4893 = vmatpush3.bf16.msra.mxu1 %v5351_v21 }
  0x62   : > { %1203 = vmatpush1.bf16.msra.mxu0 %v5340_v15  ;;  %4894 = vmatprep.subr.bf16.mxu1 %v5705_v4 }
  0x63   : > { %1204 = vmatprep.subr.bf16.mxu0 %v5341_v17 }
  0x65   : > { %4895 = vmatpush3.bf16.msra.mxu1 %v5352_v24 }
  0x66   : > { %1205 = vmatpush1.bf16.msra.mxu0 %v5343_v19  ;;  %4896 = vmatprep.subr.bf16.mxu1 %v5705_v4 }
  0x67   : > { %1206 = vmatprep.subr.bf16.mxu0 %v5344_v20 }
  0x69   : > { %4897 = vmatpush3.bf16.msra.mxu1 %v5353_v26 }
  0x6a   : > { %1207 = vmatpush1.bf16.msra.mxu0 %v5346_v22  ;;  %4898 = vmatprep.subr.bf16.mxu1 %v5705_v4 }
  0x6b   : > { %4904 = vmatprep.subr.bf16.mxu0 %v5705_v4 }
  0x6d   : > { %1225 = vmatmul.mubr.bf16.vlgmr.msra.gmra.mrb[0].mxu0 %v1046_v25  ;;  %4899 = vmatpush3.bf16.msra.mxu1 %v5354_v27 }
  0x6e   : > { %4928 = vmatprep.subr.bf16.mxu1 %v5705_v4  ;;  %4906 = vmatprep.mubr.msk.bf16.mxu0 %vm5706_vm0, %v5705_v4 }
  0x70   : > { %4901 = vmatmul.mubr.bf16.vlgmr.msra.gmra.mrb[0].mxu1 %v1046_v25 }
  0x71   : > { %4930 = vmatprep.mubr.msk.bf16.mxu1 %vm5706_vm0, %v5705_v4 }
 0x140   : > { %v1226_v35 = vpop.f32.mrb[0].mxu0 }
 0x141   : > { %v1228_v36 = vpop.f32.mrb[1].mxu0  ;;  %v1227_v49 = vadd.f32 %v1226_v35, %v1052_v44 }
 0x142   : > { %v1229_v39 = vadd.f32 %v1228_v36, %v1056_v33  ;;  %v1230_v40 = vpop.f32.mrb[2].mxu0 }
 0x143   : > { %v1231_v41 = vpop.f32.mrb[3].mxu0  ;;  %v1282_v52 = vpack.c.bf16 %v1227_v49, %v1227_v49  ;;  %v1267_v55 = vpop.f32.mrb[0].mxu1 }
 0x144   : > { %v1288_v42 = vmul.f32 %v5988_v37, %v1229_v39  ;;  %v1508_v43 = vmul.f32 %v5991_v38, %v1229_v39  ;;  %v1352_v50 = vmul.f32 %v5997_v47, %v1229_v39  ;;  %v1618_v51 = vmul.f32 %v6000_v48, %v1229_v39  ;;  %v4902_v56 = vpop.f32.mrb[1].mxu1 }
 0x145   : > { %v1270_v57 = vpop.f32.mrb[2].mxu1  ;;  %v1268_v61 = vadd.f32 %v1267_v55, %v1060_v60 }
 0x146   : > { %v1289_v45 = vpack.c.bf16 %v1288_v42, %v1288_v42  ;;  %v1509_v46 = vpack.c.bf16 %v1508_v43, %v1508_v43  ;;  %v1353_v53 = vpack.c.bf16 %v1352_v50, %v1352_v50  ;;  %v1619_v54 = vpack.c.bf16 %v1618_v51, %v1618_v51  ;;  %v4903_v58 = vpop.f32.mrb[3].mxu1 }
 0x147   : > { %v1354_v62 = vmul.f32 %v5997_v47, %v1268_v61  ;;  %v1290_v1 = vmul.f32 %v5988_v37, %v1268_v61  ;;  %v1510_v3 = vmul.f32 %v5991_v38, %v1268_v61  ;;  %v1620_v5 = vmul.f32 %v6000_v48, %v1268_v61 }
 0x148   : > { %4905 = vmatpush3.bf16.xpose.msra.mxu0 %v1289_v45  ;;  %4929 = vmatpush3.bf16.xpose.msra.mxu1 %v1509_v46 }
 0x149   : > { %4910 = vmatprep.subr.bf16.mxu0 %v5705_v4  ;;  %4940 = vmatprep.subr.bf16.mxu1 %v5705_v4  ;;  %v1355_v63 = vpack.c.bf16 %v1354_v62, %v1354_v62  ;;  %v1291_v6 = vpack.c.bf16 %v1290_v1, %v1290_v1  ;;  %v1511_v7 = vpack.c.bf16 %v1510_v3, %v1510_v3 }
 0x14a   : > { %v1621_v8 = vpack.c.bf16 %v1620_v5, %v1620_v5 }
 0x14b   : > { %v1415_v0 = vsel %vm1413_vm9, %v1355_v63, 0  ;;  %v6024_v9 = vsel %vm1413_vm9, %v1291_v6, 0  ;;  %v6026_v10 = vsel %vm1413_vm9, %v1511_v7, 0 }
 0x14c   : > { %v6028_v11 = vsel %vm1413_vm9, %v1621_v8, 0  ;;  %v5355_v8 = vld [vmem:[%s5748_s29] sm:$0xff]  }
 0x14f   : > { %4907 = vmatmul.mubr.bf16.vlgmr.msra.gmra.mrb[4].mxu0 %v1282_v52  ;;  %4931 = vmatmul.mubr.bf16.vlgmr.msra.gmra.mrb[4].mxu1 %v1282_v52 }
 0x150   : > { %4911 = vmatpush3.bf16.xpose.msra.mxu0 %v1353_v53  ;;  %4941 = vmatpush3.bf16.xpose.msra.mxu1 %v1619_v54 }
 0x151   : > { %4912 = vmatprep.mubr.msk.bf16.mxu0 %vm5706_vm0, %v5705_v4  ;;  %4942 = vmatprep.mubr.msk.bf16.mxu1 %vm5706_vm0, %v5705_v4 }
 0x152   : > { %4916 = vmatprep.subr.bf16.mxu0 %v5705_v4  ;;  %4952 = vmatprep.subr.bf16.mxu1 %v5705_v4 }
 0x157   : > { %4913 = vmatmul.mubr.bf16.vlgmr.msra.gmra.mrb[8].mxu0 %v1282_v52  ;;  %4943 = vmatmul.mubr.bf16.vlgmr.msra.gmra.mrb[8].mxu1 %v1282_v52 }
 0x158   : > { %4918 = vmatprep.mubr.msk.bf16.mxu0 %vm5706_vm0, %v5705_v4  ;;  %4968 = vmatprep.mubr.msk.bf16.mxu1 %vm5706_vm0, %v5705_v4 }
 0x159   : > { %4917 = vmatpush3.bf16.msra.mxu0 %v1415_v0  ;;  %4953 = vmatpush3.bf16.msra.mxu1 %v5355_v8  ;;  %v5383_v8 = vld [vmem:[%s5768_s19 + $0x10] sm:$0xff]  }
 0x15a   : > { %4922 = vmatprep.subr.bf16.mxu0 %v5705_v4  ;;  %4954 = vmatprep.subr.bf16.mxu1 %v5705_v4 }
 0x222   : > { %v1326_v12 = vpop.f32.mrb[4].mxu0  ;;  %v1546_v13 = vpop.f32.mrb[4].mxu1 }
 0x223   : > { %v1552_v15 = vmul.f32 0.17677669, %v1546_v13  ;;  %v4908_v16 = vpop.f32.mrb[5].mxu0  ;;  %v4932_v17 = vpop.f32.mrb[5].mxu1  ;;  %v1332_v25 = vmul.f32 0.17677669, %v1326_v12 }
 0x224   : > { %v1329_v18 = vpop.f32.mrb[6].mxu0  ;;  %v1549_v19 = vpop.f32.mrb[6].mxu1  ;;  %v5356_v12 = vld [vmem:[%s5748_s29 + $0x8] sm:$0xff]   ;;  %v5357_v13 = vld [vmem:[%s5748_s29 + $0x10] sm:$0xff]  }
 0x225   : > { %v4909_v20 = vpop.f32.mrb[7].mxu0  ;;  %v4933_v21 = vpop.f32.mrb[7].mxu1  ;;  %v1553_v22 = vadd.f32 %v4542_v14, %v1552_v15  ;;  %v1333_v45 = vadd.f32 %v4542_v14, %v1332_v25  ;;  %4955 = vmatpush3.bf16.msra.mxu1 %v5356_v12  ;;  %v5359_v15 = vld [vmem:[%s5748_s29 + $0x20] sm:$0xff]   ;;  %v5360_v16 = vld [vmem:[%s5748_s29 + $0x28] sm:$0xff]   ;;  %v5361_v17 = vld [vmem:[%s5748_s29 + $0x30] sm:$0xff]  }
 0x226   : > { %4956 = vmatprep.subr.bf16.mxu1 %v5705_v4  ;;  %v5386_v12 = vld [vmem:[%s5778_s30 + $0x64] ss:$8 sps:$4 sm:$0xff]  }
 0x227   : > { %v1554_v24 = vsel %vm1334_vm10, %v1553_v22, -inf  ;;  %v1335_v46 = vsel %vm1334_vm10, %v1333_v45, -inf }
 0x228   : > { %1555 = vmax.xlane.f32.xlu1 %v1554_v24 }
 0x229   : > { %4957 = vmatpush3.bf16.msra.mxu1 %v5357_v13  ;;  %v5384_v13 = vld [vmem:[%s5778_s30 + $0x60] ss:$8 sps:$4 sm:$0xff]  }
 0x22a   : > { %v1390_v26 = vpop.f32.mrb[8].mxu0  ;;  %v1656_v27 = vpop.f32.mrb[8].mxu1  ;;  %4958 = vmatprep.subr.bf16.mxu1 %v5705_v4 }
 0x22b   : > { %v1396_v28 = vmul.f32 0.17677669, %v1390_v26  ;;  %v1662_v30 = vmul.f32 0.17677669, %v1656_v27  ;;  %v4914_v32 = vpop.f32.mrb[9].mxu0  ;;  %v4944_v33 = vpop.f32.mrb[9].mxu1 }
 0x22c   : > { %v1393_v35 = vpop.f32.mrb[10].mxu0  ;;  %v1659_v36 = vpop.f32.mrb[10].mxu1 }
 0x22d   : > { %v4915_v39 = vpop.f32.mrb[11].mxu0  ;;  %v4945_v40 = vpop.f32.mrb[11].mxu1  ;;  %v1663_v41 = vadd.f32 %v4542_v14, %v1662_v30  ;;  %v1397_v42 = vadd.f32 %v4542_v14, %v1396_v28  ;;  %v5358_v14 = vld [vmem:[%s5748_s29 + $0x18] sm:$0xff]  }
 0x22e   : > { %4959 = vmatpush3.bf16.msra.mxu1 %v5358_v14  ;;  %v5362_v36 = vld [vmem:[%s5748_s29 + $0x38] sm:$0xff]  }
 0x22f   : > { %v1664_v43 = vsel %vm1334_vm10, %v1663_v41, -inf  ;;  %v1398_v44 = vsel %vm1334_vm10, %v1397_v42, -inf  ;;  %4960 = vmatprep.subr.bf16.mxu1 %v5705_v4  ;;  %v5387_v14 = vld [vmem:[%s5768_s19 + $0x18] sm:$0xff]  }
 0x230   : > { %1665 = vmax.xlane.f32.xlu1 %v1664_v43  ;;  %1399 = vmax.xlane.f32.xlu0 %v1398_v44  ;;  %v4559_v44 = vld [vmem:[%s6633_s3] ss:$0 sm:$0xff]  ;;  %s6645_s3 = sld [smem:[#allocation23_spill]] }
 0x232   : > { %4961 = vmatpush3.bf16.msra.mxu1 %v5359_v15  ;;  %v5390_v15 = vld [vmem:[%s5778_s30 + $0x74] ss:$8 sps:$4 sm:$0xff]  }
 0x233   : > { %4962 = vmatprep.subr.bf16.mxu1 %v5705_v4 }
 0x234   : > { %1336 = vmax.xlane.f32.xlu0 %v1335_v46 }
 0x236   : > { %4963 = vmatpush3.bf16.msra.mxu1 %v5360_v16  ;;  %v5388_v16 = vld [vmem:[%s5778_s30 + $0x70] ss:$8 sps:$4 sm:$0xff]  }
 0x237   : > { %4964 = vmatprep.subr.bf16.mxu1 %v5705_v4 }
 0x23a   : > { %4965 = vmatpush3.bf16.msra.mxu1 %v5361_v17  ;;  %v5391_v17 = vld [vmem:[%s5768_s19 + $0x20] sm:$0xff]  }
 0x23b   : > { %4966 = vmatprep.subr.bf16.mxu1 %v5705_v4 }
 0x23e   : > { %4967 = vmatpush3.bf16.msra.mxu1 %v5362_v36 }
 0x2b5   : > { %v1556_v49 = vpop.xlane.xlu1 %1555 }
 0x2b6   : > { %v1557_v50 = vsub.f32 %v1553_v22, %v1556_v49 }
 0x2b8   : > { %v1558_v56 = vmul.f32 1.442695, %v1557_v50 }
 0x2bd   : > { %v1666_v51 = vpop.xlane.xlu1 %1665  ;;  %v1400_v52 = vpop.xlane.xlu0 %1399 }
 0x2be   : > { %v1401_v53 = vsub.f32 %v1397_v42, %v1400_v52  ;;  %v1667_v54 = vsub.f32 %v1663_v41, %v1666_v51  ;;  %v6077_v52 = vld [vmem:[%s5778_s30] ss:$8 sps:$4 sm:$0xff]  }
 0x2c0   : > { %v1402_v55 = vmul.f32 1.442695, %v1401_v53  ;;  %v1668_v60 = vmul.f32 1.442695, %v1667_v54  ;;  %v6080_v53 = vld [vmem:[%s5778_s30 + $0x4] ss:$8 sps:$4 sm:$0xff]  }
 0x2c1   : > { %v1337_v57 = vpop.xlane.xlu0 %1336  ;;  %v6083_v54 = vld [vmem:[%s5778_s30 + $0x14] ss:$8 sps:$4 sm:$0xff]   ;;  %2087 = vmatprep.subr.bf16.mxu1 %v6080_v53 }
 0x2c2   : > { %v1338_v58 = vsub.f32 %v1333_v45, %v1337_v57  ;;  %5515 = vpow2.f32 %v1402_v55  ;;  %v5375_v55 = vld [vmem:[%s5768_s19] sm:$0xff]   ;;  %v5379_v57 = vld [vmem:[%s5768_s19 + $0x8] sm:$0xff]  }
 0x2c3   : > { %5517 = vpow2.f32 %v1558_v56  ;;  %v6093_v56 = vld [vmem:[%s5778_s30 + $0x24] ss:$8 sps:$4 sm:$0xff]  }
 0x2c4   : > { %v1339_v61 = vmul.f32 1.442695, %v1338_v58  ;;  %v6099_v58 = vld [vmem:[%s5778_s30 + $0x20] ss:$8 sps:$4 sm:$0xff]  }
 0x2c6   : > { %5519 = vpow2.f32 %v1339_v61  ;;  %v6108_v61 = vld [vmem:[%s5778_s30 + $0x30] ss:$8 sps:$4 sm:$0xff]  }
 0x2c7   : > { %5521 = vpow2.f32 %v1668_v60  ;;  %v6103_v60 = vld [vmem:[%s5778_s30 + $0x34] ss:$8 sps:$4 sm:$0xff]  }
 0x2cc   : > { %v5516_v62 = vpop.eup %5515 }
 0x2cd   : > { %v1404_v63 = vsel %vm1334_vm10, %v5516_v62, 0.0  ;;  %v5518_v0 = vpop.eup %5517 }
 0x2ce   : > { %1405 = vadd.xlane.f32.xlu0 %v1404_v63  ;;  %v1560_v6 = vsel %vm1334_vm10, %v5518_v0, 0.0  ;;  %v6116_v63 = vld [vmem:[%s5778_s30 + $0x40] ss:$8 sps:$4 sm:$0xff]  }
 0x2d0   : > { %v5520_v1 = vpop.eup %5519 }
 0x2d1   : > { %v1341_v3 = vsel %vm1334_vm10, %v5520_v1, 0.0  ;;  %v5522_v5 = vpop.eup %5521 }
 0x2d2   : > { %1342 = vadd.xlane.f32.xlu1 %v1341_v3  ;;  %1561 = vadd.xlane.f32.xlu0 %v1560_v6  ;;  %v1670_v7 = vsel %vm1334_vm10, %v5522_v5, 0.0 }
 0x2d6   : > { %1671 = vadd.xlane.f32.xlu1 %v1670_v7 }
 0x35b   : > { %v1406_v18 = vpop.xlane.xlu0 %1405 }
 0x35c   : > { %5523 = vrcp.f32 %v1406_v18  ;;  %v1977_v18 = vld [vmem:[%s1007_s18] sm:$0x1f]  ;;  %s6640_s18 = sld [smem:[#allocation16_spill]] }
 0x35f   : > { %v1343_v19 = vpop.xlane.xlu1 %1342  ;;  %v1562_v24 = vpop.xlane.xlu0 %1561 }
 0x360   : > { %5525 = vrcp.f32 %v1343_v19  ;;  %v1994_v19 = vpack.c.bf16 %v1977_v18, %v1977_v18 }
 0x361   : > { %5527 = vrcp.f32 %v1562_v24 }
 0x363   : > { %v1672_v28 = vpop.xlane.xlu1 %1671 }
 0x364   : > { %5529 = vrcp.f32 %v1672_v28  ;;  %v4560_v28 = vld [vmem:[%s6635_s8] ss:$0 sm:$0xff] }
 0x366   : > { %v5524_v20 = vpop.eup %5523 }
 0x367   : > { %v1408_v21 = vmul.f32 %v5524_v20, %v5516_v62  ;;  %v6112_v62 = vld [vmem:[%s5778_s30 + $0x44] ss:$8 sps:$4 sm:$0xff]  }
 0x368   : > { %v5392_v20 = vld [vmem:[%s5768_s19 + $0x28] sm:$0xff]  }
 0x369   : > { %v1409_v22 = vpack.c.bf16 %v1408_v21, %v1408_v21  ;;  %v5393_v21 = vld [vmem:[%s5768_s19 + $0x30] sm:$0xff]  }
 0x36a   : > { %v5526_v25 = vpop.eup %5525 }
 0x36b   : > { %4919 = vmatmul.mubr.msk.bf16.vlgmr.msra.gmra.mrb[12].mxu0 %vm1334_vm10, %v1409_v22  ;;  %v1345_v26 = vmul.f32 %v5526_v25, %v5520_v1  ;;  %v5380_v1 = vld [vmem:[%s5778_s30 + $0x50] ss:$8 sps:$4 sm:$0xff]  }
 0x36c   : > { %4923 = vmatpush3.bf16.msra.mxu0 %v6024_v9  ;;  %4924 = vmatprep.mubr.msk.bf16.mxu0 %vm5706_vm0, %v5705_v4  ;;  %v5528_v9 = vpop.eup %5527  ;;  %v5394_v22 = vld [vmem:[%s5768_s19 + $0x38] sm:$0xff]  }
 0x36d   : > { %4934 = vmatprep.subr.bf16.mxu0 %v5705_v4  ;;  %v1346_v27 = vpack.c.bf16 %v1345_v26, %v1345_v26  ;;  %v1564_v30 = vmul.f32 %v5528_v9, %v5518_v0  ;;  %v6120_v0 = vld [vmem:[%s5778_s30 + $0x54] ss:$8 sps:$4 sm:$0xff]  }
 0x36f   : > { %v1565_v32 = vpack.c.bf16 %v1564_v30, %v1564_v30  ;;  %v4561_v30 = vld [vmem:[%s6636_s14] ss:$0 sm:$0xff] }
 0x377   : > { %4925 = vmatmul.mubr.msk.bf16.vlgmr.msra.gmra.mrb[12].mxu0 %vm1334_vm10, %v1346_v27 }
 0x378   : > { %4935 = vmatpush3.bf16.msra.mxu0 %v6026_v10  ;;  %4936 = vmatprep.mubr.msk.bf16.mxu0 %vm5706_vm0, %v5705_v4  ;;  %v5530_v10 = vpop.eup %5529 }
 0x379   : > { %4946 = vmatprep.subr.bf16.mxu0 %v5705_v4  ;;  %v1674_v33 = vmul.f32 %v5530_v10, %v5522_v5 }
 0x37b   : > { %v1675_v35 = vpack.c.bf16 %v1674_v33, %v1674_v33 }
 0x383   : > { %4937 = vmatmul.mubr.msk.bf16.vlgmr.msra.gmra.mrb[12].mxu0 %vm1334_vm10, %v1565_v32 }
 0x384   : > { %4947 = vmatpush3.bf16.msra.mxu0 %v6028_v11  ;;  %4948 = vmatprep.mubr.msk.bf16.mxu0 %vm5706_vm0, %v5705_v4 }
 0x385   : > { %4972 = vmatprep.subr.bf16.mxu0 %v5705_v4 }
 0x38f   : > { %4949 = vmatmul.mubr.msk.bf16.vlgmr.msra.gmra.mrb[12].mxu0 %vm1334_vm10, %v1675_v35  ;;  %v1995_v35 = vld [vmem:[%s6637_s6] sm:$0x3] }
 0x390   : > { %4988 = vmatprep.mubr.msk.bf16.mxu0 %vm5706_vm0, %v5705_v4  ;;  %4973 = vmatpush3.bf16.msra.mxu0 %v5375_v55  ;;  %v6166_v36 = vrot.slane %v1995_v35, %v5985_v34 }
 0x391   : > { %4974 = vmatprep.subr.bf16.mxu0 %v5705_v4 }
 0x394   : > { %4975 = vmatpush3.bf16.msra.mxu0 %v5379_v57 }
 0x395   : > { %4976 = vmatprep.subr.bf16.mxu0 %v5705_v4 }
 0x398   : > { %4977 = vmatpush3.bf16.msra.mxu0 %v5383_v8 }
 0x399   : > { %4978 = vmatprep.subr.bf16.mxu0 %v5705_v4 }
 0x39c   : > { %4979 = vmatpush3.bf16.msra.mxu0 %v5387_v14 }
 0x39d   : > { %4980 = vmatprep.subr.bf16.mxu0 %v5705_v4 }
 0x3a0   : > { %4981 = vmatpush3.bf16.msra.mxu0 %v5391_v17 }
 0x3a1   : > { %4982 = vmatprep.subr.bf16.mxu0 %v5705_v4 }
 0x3a4   : > { %4983 = vmatpush3.bf16.msra.mxu0 %v5392_v20 }
 0x3a5   : > { %4984 = vmatprep.subr.bf16.mxu0 %v5705_v4 }
 0x3a8   : > { %4985 = vmatpush3.bf16.msra.mxu0 %v5393_v21 }
 0x3a9   : > { %4986 = vmatprep.subr.bf16.mxu0 %v5705_v4 }
 0x3ac   : > { %4987 = vmatpush3.bf16.msra.mxu0 %v5394_v22 }
 0x3ad   : > { %2130 = vmatprep.subr.bf16.mxu0 %v6080_v53  ;;  %v2128_v53 = vld [vmem:[%s1011_s7] sm:$0x1f]  ;;  %s6641_s7 = sld [smem:[#allocation18_spill]] }
 0x3ae   : > { %v2129_v55 = vpack.c.bf16 %v2128_v53, %v2128_v53 }
 0x462   : > { %v1716_v39 = vpop.f32.mrb[12].mxu0 }
 0x463   : > { %v1739_v11 = vpack.c.bf16 %v1716_v39, %v1716_v39  ;;  %v4950_v40 = vpop.f32.mrb[13].mxu0  ;;  %v6169_v39 = vrot.slane %v1995_v35, %v5980_v31 }
 0x464   : > { %v1719_v41 = vpop.f32.mrb[14].mxu0 }
 0x465   : > { %v4951_v42 = vpop.f32.mrb[15].mxu0  ;;  %4969 = vmatmul.mubr.bf16.vlgmr.msra.gmra.mrb[12].mxu1 %v1739_v11 }
 0x466   : > { %2119 = vmatprep.mubr.bf16.mxu1 %v5704_v2  ;;  %2088 = vmatpush1.bf16.msra.mxu1 %v6077_v52 }
 0x467   : > { %2089 = vmatprep.subr.bf16.mxu1 %v6083_v54 }
 0x538   : > { %v1822_v43 = vpop.f32.mrb[12].mxu1 }
 0x539   : > { %v1828_v45 = vadd.f32 %v1822_v43, %v5958_v23  ;;  %v4970_v46 = vpop.f32.mrb[13].mxu1  ;;  %v6089_v23 = vld [vmem:[%s5778_s30 + $0x10] ss:$8 sps:$4 sm:$0xff]  }
 0x53a   : > { %v1825_v49 = vpop.f32.mrb[14].mxu1  ;;  %2090 = vmatpush1.bf16.msra.mxu1 %v6089_v23 }
 0x53b   : > { %v4971_v50 = vpop.f32.mrb[15].mxu1  ;;  %v1836_v51 = vadd.f32 %v4559_v44, %v1828_v45  ;;  %2091 = vmatprep.subr.bf16.mxu1 %v6093_v56 }
 0x53d   : > { %1839 = vadd.xlane.f32.xlu0 %v1836_v51 }
 0x53e   : > { %2092 = vmatpush1.bf16.msra.mxu1 %v6099_v58 }
 0x53f   : > { %2093 = vmatprep.subr.bf16.mxu1 %v6103_v60 }
 0x542   : > { %2094 = vmatpush1.bf16.msra.mxu1 %v6108_v61 }
 0x543   : > { %2095 = vmatprep.subr.bf16.mxu1 %v6112_v62 }
 0x546   : > { %2096 = vmatpush1.bf16.msra.mxu1 %v6116_v63 }
 0x547   : > { %2097 = vmatprep.subr.bf16.mxu1 %v6120_v0 }
 0x54a   : > { %2098 = vmatpush1.bf16.msra.mxu1 %v5380_v1 }
 0x54b   : > { %2099 = vmatprep.subr.bf16.mxu1 %v5386_v12 }
 0x54e   : > { %2100 = vmatpush1.bf16.msra.mxu1 %v5384_v13 }
 0x54f   : > { %2101 = vmatprep.subr.bf16.mxu1 %v5390_v15 }
 0x552   : > { %2102 = vmatpush1.bf16.msra.mxu1 %v5388_v16 }
 0x553   : > { %4992 = vmatprep.subr.bf16.mxu1 %v5705_v4 }
 0x555   : > { %2120 = vmatmul.mubr.bf16.vlgmr.msra.gmra.mrb[16].mxu1 %v1994_v19 }
 0x556   : > { %4994 = vmatprep.mubr.msk.bf16.mxu1 %vm5706_vm0, %v5705_v4 }
 0x5ca   : > { %v1840_v3 = vpop.xlane.xlu0 %1839 }
 0x5cb   : > { %v1842_v5 = vmul.f32 0.0078125, %v1840_v3 }
 0x5cd   : > { %v1843_v6 = vsub.f32 %v1836_v51, %v1842_v5  ;;  %v5707_v51 = vmov 65535  }
 0x5cf   : > { %v1844_v7 = vmul.f32 %v1843_v6, %v1843_v6 }
 0x5d1   : > { %1845 = vadd.xlane.f32.xlu1 %v1844_v7 }
 0x628   : > { %v2121_v11 = vpop.f32.mrb[16].mxu1 }
 0x629   : > { %v2122_v40 = vadd.f32 %v2121_v11, %v6166_v36  ;;  %v2123_v41 = vpop.f32.mrb[17].mxu1 }
 0x62a   : > { %v6173_v42 = vadd.f32 %v2123_v41, %v6169_v39  ;;  %v2125_v43 = vpop.f32.mrb[18].mxu1 }
 0x62b   : > { %v2126_v44 = vpop.f32.mrb[19].mxu1  ;;  %v2172_v45 = vmul.f32 %v5988_v37, %v2122_v40  ;;  %v2383_v3 = vmul.f32 %v5991_v38, %v2122_v40 }
 0x62c   : > { %v2232_v46 = vmul.f32 %v5997_v47, %v6173_v42 }
 0x62d   : > { %v2173_v49 = vpack.c.bf16 %v2172_v45, %v2172_v45  ;;  %v2384_v5 = vpack.c.bf16 %v2383_v3, %v2383_v3 }
 0x62e   : > { %v2233_v50 = vpack.c.bf16 %v2232_v46, %v2232_v46 }
 0x62f   : > { %4993 = vmatpush3.bf16.xpose.msra.mxu1 %v2173_v49 }
 0x630   : > { %4998 = vmatprep.subr.bf16.mxu1 %v5705_v4 }
 0x65e   : > { %v1846_v24 = vpop.xlane.xlu1 %1845 }
 0x65f   : > { %v1847_v25 = vmul.f32 0.0078125, %v1846_v24 }
 0x661   : > { %v1848_v26 = vadd.f32 1e-12, %v1847_v25 }
 0x663   : > { %5531 = vrsqrt.f32 %v1848_v26 }
 0x66d   : > { %v5532_v27 = vpop.eup %5531 }
 0x66e   : > { %v1850_v9 = vmul.f32 %v5532_v27, %v1843_v6  ;;  %v2487_v6 = vmul.f32 %v6000_v48, %v2122_v40 }
 0x670   : > { %v1857_v32 = vmul.f32 %v4560_v28, %v1850_v9  ;;  %v2488_v7 = vpack.c.bf16 %v2487_v6, %v2487_v6  ;;  %v6230_v6 = vld [vmem:[%s6638_s1] sm:$0xff]  }
 0x672   : > { %v6148_v10 = vadd.f32 %v4561_v30, %v1857_v32 }
 0x674   : > { %v1881_v33 = vpack.c.bf16 %v6148_v10, %v6148_v10 }
 0x676   : > { %4989 = vmatmul.mubr.bf16.vlgmr.msra.gmra.mrb[16].mxu0 %v1881_v33 }
 0x677   : > { %2131 = vmatpush1.bf16.msra.mxu0 %v6077_v52  ;;  %2162 = vmatprep.mubr.bf16.mxu0 %v5704_v2  ;;  %v2292_v52 = vsel %vm2290_vm11, 4294967295, %v5707_v51 }
 0x678   : > { %2132 = vmatprep.subr.bf16.mxu0 %v6083_v54  ;;  %v6181_v54 = vsel %vm2291_vm12, %v2292_v52, 0 }
 0x67b   : > { %2133 = vmatpush1.bf16.msra.mxu0 %v6089_v23  ;;  %v2295_v23 = vand.u32 %v6181_v54, %v2233_v50 }
 0x67c   : > { %2134 = vmatprep.subr.bf16.mxu0 %v6093_v56  ;;  %v4562_v56 = vld [vmem:[%s5773_s24] ss:$0 sm:$0xff] }
 0x67f   : > { %2135 = vmatpush1.bf16.msra.mxu0 %v6099_v58  ;;  %v2230_v58 = vmul.f32 %v5997_v47, %v2122_v40 }
 0x680   : > { %2136 = vmatprep.subr.bf16.mxu0 %v6103_v60 }
 0x683   : > { %2137 = vmatpush1.bf16.msra.mxu0 %v6108_v61 }
 0x684   : > { %2138 = vmatprep.subr.bf16.mxu0 %v6112_v62 }
 0x687   : > { %2139 = vmatpush1.bf16.msra.mxu0 %v6116_v63 }
 0x688   : > { %2140 = vmatprep.subr.bf16.mxu0 %v6120_v0 }
 0x68b   : > { %2141 = vmatpush1.bf16.msra.mxu0 %v5380_v1  ;;  %v2231_v1 = vpack.c.bf16 %v2230_v58, %v2230_v58 }
 0x68c   : > { %2142 = vmatprep.subr.bf16.mxu0 %v5386_v12 }
 0x68f   : > { %2143 = vmatpush1.bf16.msra.mxu0 %v5384_v13 }
 0x690   : > { %2144 = vmatprep.subr.bf16.mxu0 %v5390_v15 }
 0x693   : > { %2145 = vmatpush1.bf16.msra.mxu0 %v5388_v16 }
 0x694   : > { %5004 = vmatprep.subr.bf16.mxu0 %v5705_v4 }
 0x696   : > { %2163 = vmatmul.mubr.bf16.vlgmr.msra.gmra.mrb[20].mxu0 %v2129_v55 }
 0x697   : > { %5005 = vmatpush3.bf16.msra.mxu0 %v2295_v23  ;;  %5006 = vmatprep.mubr.msk.bf16.mxu0 %vm5706_vm0, %v5705_v4 }
 0x698   : > { %5010 = vmatprep.subr.bf16.mxu0 %v5705_v4 }
 0x749   : > { %v1971_v57 = vpop.f32.mrb[16].mxu0 }
 0x74a   : > { %v1972_v60 = vadd.f32 %v4562_v56, %v1971_v57  ;;  %v4990_v61 = vpop.f32.mrb[17].mxu0 }
 0x74b   : > { %v1974_v62 = vpop.f32.mrb[18].mxu0 }
 0x74c   : > { %v6189_v63 = vpack.c.bf16 %v1972_v60, %v1972_v60  ;;  %v4991_v0 = vpop.f32.mrb[19].mxu0 }
 0x74e   : > { %4995 = vmatmul.mubr.bf16.vlgmr.msra.gmra.mrb[20].mxu1 %v6189_v63 }
 0x74f   : > { %4999 = vmatpush3.bf16.xpose.msra.mxu1 %v2231_v1  ;;  %5000 = vmatprep.mubr.msk.bf16.mxu1 %vm5706_vm0, %v5705_v4 }
 0x750   : > { %5016 = vmatprep.subr.bf16.mxu1 %v5705_v4 }
 0x756   : > { %5001 = vmatmul.mubr.bf16.vlgmr.msra.gmra.mrb[24].mxu1 %v6189_v63 }
 0x757   : > { %5017 = vmatpush3.bf16.xpose.msra.mxu1 %v2384_v5  ;;  %5018 = vmatprep.mubr.msk.bf16.mxu1 %vm5706_vm0, %v5705_v4 }
 0x758   : > { %5028 = vmatprep.subr.bf16.mxu1 %v5705_v4 }
 0x75e   : > { %5019 = vmatmul.mubr.bf16.vlgmr.msra.gmra.mrb[28].mxu1 %v6189_v63 }
 0x75f   : > { %5029 = vmatpush3.bf16.xpose.msra.mxu1 %v2488_v7  ;;  %5030 = vmatprep.mubr.msk.bf16.mxu1 %vm5706_vm0, %v5705_v4 }
 0x760   : > { %5040 = vmatprep.subr.bf16.mxu1 %v5705_v4 }
 0x766   : > { %5031 = vmatmul.mubr.bf16.vlgmr.msra.gmra.mrb[32].mxu1 %v6189_v63 }
 0x767   : > { %5056 = vmatprep.mubr.msk.bf16.mxu1 %vm5706_vm0, %v5705_v4  ;;  %5041 = vmatpush3.bf16.msra.mxu1 %v6230_v6 }
 0x768   : > { %5042 = vmatprep.subr.bf16.mxu1 %v5705_v4 }
 0x769   : > { %v6225_v3 = vpop.f32.mrb[20].mxu0 }
 0x76a   : > { %v6227_v5 = vpop.f32.mrb[21].mxu0 }
 0x76b   : > { %v2168_v7 = vpop.f32.mrb[22].mxu0 }
 0x821   : > { %v2210_v8 = vpop.f32.mrb[20].mxu1 }
 0x822   : > { %v2216_v12 = vmul.f32 0.17677669, %v2210_v8  ;;  %v4996_v13 = vpop.f32.mrb[21].mxu1  ;;  %v2169_v8 = vpop.f32.mrb[23].mxu0 }
 0x823   : > { %v2213_v14 = vpop.f32.mrb[22].mxu1  ;;  %v6239_v13 = vld [vmem:[%s6638_s1 + $0x10] sm:$0xff]  }
 0x824   : > { %v4997_v15 = vpop.f32.mrb[23].mxu1  ;;  %v2218_v16 = vsel %vm2217_vm13, %v2216_v12, -inf  ;;  %v6244_v14 = vld [vmem:[%s6638_s1 + $0x18] sm:$0xff]  }
 0x825   : > { %2219 = vmax.xlane.f32.xlu1 %v2218_v16  ;;  %v6249_v15 = vld [vmem:[%s6638_s1 + $0x20] sm:$0xff]   ;;  %v6254_v16 = vld [vmem:[%s6638_s1 + $0x28] sm:$0xff]  }
 0x829   : > { %v2268_v17 = vpop.f32.mrb[24].mxu1 }
 0x82a   : > { %v2274_v18 = vmul.f32 0.17677669, %v2268_v17  ;;  %v5002_v19 = vpop.f32.mrb[25].mxu1  ;;  %v6259_v17 = vld [vmem:[%s6638_s1 + $0x30] sm:$0xff]  }
 0x82b   : > { %v2271_v20 = vpop.f32.mrb[26].mxu1 }
 0x82c   : > { %v5003_v21 = vpop.f32.mrb[27].mxu1  ;;  %v2275_v22 = vsel %vm2217_vm13, %v2274_v18, -inf }
 0x82d   : > { %2276 = vmax.xlane.f32.xlu0 %v2275_v22  ;;  %v2174_v21 = vmul.f32 %v5988_v37, %v6173_v42 }
 0x831   : > { %v2421_v24 = vpop.f32.mrb[28].mxu1 }
 0x832   : > { %v2427_v25 = vmul.f32 0.17677669, %v2421_v24  ;;  %v5020_v26 = vpop.f32.mrb[29].mxu1  ;;  %v2175_v24 = vpack.c.bf16 %v2174_v21, %v2174_v21 }
 0x833   : > { %v2424_v27 = vpop.f32.mrb[30].mxu1 }
 0x834   : > { %v5021_v28 = vpop.f32.mrb[31].mxu1  ;;  %v2428_v9 = vsel %vm2217_vm13, %v2427_v25, -inf  ;;  %v2341_v27 = vand.u32 %v6181_v54, %v2175_v24 }
 0x835   : > { %2429 = vmax.xlane.f32.xlu0 %v2428_v9 }
 0x839   : > { %v2525_v30 = vpop.f32.mrb[32].mxu1 }
 0x83a   : > { %v2531_v32 = vmul.f32 0.17677669, %v2525_v30  ;;  %v5032_v33 = vpop.f32.mrb[33].mxu1  ;;  %v2385_v30 = vmul.f32 %v5991_v38, %v6173_v42 }
 0x83b   : > { %v2528_v35 = vpop.f32.mrb[34].mxu1 }
 0x83c   : > { %v5033_v11 = vpop.f32.mrb[35].mxu1  ;;  %v2532_v40 = vsel %vm2217_vm13, %v2531_v32, -inf  ;;  %v2386_v33 = vpack.c.bf16 %v2385_v30, %v2385_v30 }
 0x83d   : > { %2533 = vmax.xlane.f32.xlu1 %v2532_v40 }
 0x83e   : > { %v2444_v11 = vand.u32 %v2386_v33, %v6181_v54 }
 0x8b2   : > { %v2220_v41 = vpop.xlane.xlu1 %2219 }
 0x8b3   : > { %v2221_v43 = vsub.f32 %v2216_v12, %v2220_v41  ;;  %v6234_v12 = vld [vmem:[%s6638_s1 + $0x8] sm:$0xff]  }
 0x8b4   : > { %5043 = vmatpush3.bf16.msra.mxu1 %v6234_v12 }
 0x8b5   : > { %v2222_v44 = vmul.f32 1.442695, %v2221_v43  ;;  %5044 = vmatprep.subr.bf16.mxu1 %v5705_v4  ;;  %v2489_v43 = vmul.f32 %v6000_v48, %v6173_v42 }
 0x8b7   : > { %5533 = vpow2.f32 %v2222_v44 }
 0x8b8   : > { %5045 = vmatpush3.bf16.msra.mxu1 %v6239_v13 }
 0x8b9   : > { %5046 = vmatprep.subr.bf16.mxu1 %v5705_v4 }
 0x8ba   : > { %v2277_v45 = vpop.xlane.xlu0 %2276 }
 0x8bb   : > { %v2278_v46 = vsub.f32 %v2274_v18, %v2277_v45  ;;  %v6264_v18 = vld [vmem:[%s6638_s1 + $0x38] sm:$0xff]   ;;  %v2490_v45 = vpack.c.bf16 %v2489_v43, %v2489_v43  ;;  %s6644_s1 = sld [smem:[#allocation20_spill]] }
 0x8bc   : > { %5047 = vmatpush3.bf16.msra.mxu1 %v6244_v14 }
 0x8bd   : > { %v2279_v49 = vmul.f32 1.442695, %v2278_v46  ;;  %5048 = vmatprep.subr.bf16.mxu1 %v5705_v4 }
 0x8bf   : > { %5535 = vpow2.f32 %v2279_v49  ;;  %v2548_v49 = vand.u32 %v2490_v45, %v6181_v54 }
 0x8c0   : > { %5049 = vmatpush3.bf16.msra.mxu1 %v6249_v15 }
 0x8c1   : > { %v6212_v50 = vpop.eup %5533  ;;  %5050 = vmatprep.subr.bf16.mxu1 %v5705_v4 }
 0x8c2   : > { %v2430_v51 = vpop.xlane.xlu0 %2429  ;;  %v2224_v52 = vsel %vm2217_vm13, %v6212_v50, 0.0 }
 0x8c3   : > { %v2431_v53 = vsub.f32 %v2427_v25, %v2430_v51  ;;  %2225 = vadd.xlane.f32.xlu1 %v2224_v52 }
 0x8c4   : > { %5051 = vmatpush3.bf16.msra.mxu1 %v6254_v16 }
 0x8c5   : > { %v2432_v55 = vmul.f32 1.442695, %v2431_v53  ;;  %5052 = vmatprep.subr.bf16.mxu1 %v5705_v4 }
 0x8c7   : > { %5537 = vpow2.f32 %v2432_v55 }
 0x8c8   : > { %5053 = vmatpush3.bf16.msra.mxu1 %v6259_v17 }
 0x8c9   : > { %v5536_v23 = vpop.eup %5535  ;;  %5054 = vmatprep.subr.bf16.mxu1 %v5705_v4 }
 0x8ca   : > { %v2534_v56 = vpop.xlane.xlu1 %2533  ;;  %v2281_v57 = vsel %vm2217_vm13, %v5536_v23, 0.0 }
 0x8cb   : > { %v2535_v58 = vsub.f32 %v2531_v32, %v2534_v56  ;;  %2282 = vadd.xlane.f32.xlu0 %v2281_v57 }
 0x8cc   : > { %5055 = vmatpush3.bf16.msra.mxu1 %v6264_v18 }
 0x8cd   : > { %v2536_v60 = vmul.f32 1.442695, %v2535_v58  ;;  %5084 = vmatprep.subr.bf16.mxu1 %v5705_v4 }
 0x8cf   : > { %5539 = vpow2.f32 %v2536_v60 }
 0x8d1   : > { %v6217_v61 = vpop.eup %5537 }
 0x8d2   : > { %v2434_v62 = vsel %vm2217_vm13, %v6217_v61, 0.0 }
 0x8d3   : > { %2435 = vadd.xlane.f32.xlu0 %v2434_v62 }
 0x8d9   : > { %v6221_v0 = vpop.eup %5539 }
 0x8da   : > { %v2538_v1 = vsel %vm2217_vm13, %v6221_v0, 0.0 }
 0x8db   : > { %2539 = vadd.xlane.f32.xlu1 %v2538_v1 }
 0x950   : > { %v2226_v20 = vpop.xlane.xlu1 %2225 }
 0x958   : > { %v2283_v19 = vpop.xlane.xlu0 %2282 }
 0x959   : > { %5541 = vrcp.f32 %v2283_v19 }
 0x95a   : > { %5543 = vrcp.f32 %v2226_v20 }
 0x960   : > { %v2436_v28 = vpop.xlane.xlu0 %2435 }
 0x961   : > { %5545 = vrcp.f32 %v2436_v28 }
 0x963   : > { %v5542_v22 = vpop.eup %5541 }
 0x964   : > { %v2285_v25 = vmul.f32 %v5542_v22, %v5536_v23  ;;  %v5544_v9 = vpop.eup %5543  ;;  %v6302_v23 = vadd.f32 %v6227_v5, %v6169_v39 }
 0x965   : > { %v2228_v32 = vmul.f32 %v5544_v9, %v6212_v50  ;;  %v2165_v50 = vadd.f32 %v6225_v3, %v6166_v36 }
 0x966   : > { %v2286_v26 = vpack.c.bf16 %v2285_v25, %v2285_v25  ;;  %v2762_v57 = vmul.f32 %v5997_v47, %v6302_v23 }
 0x967   : > { %v2229_v35 = vpack.c.bf16 %v2228_v32, %v2228_v32  ;;  %v2703_v42 = vmul.f32 %v5988_v37, %v2165_v50  ;;  %v2760_v36 = vmul.f32 %v5997_v47, %v2165_v50  ;;  %v2909_v47 = vmul.f32 %v5991_v38, %v2165_v50 }
 0x968   : > { %5007 = vmatmul.mubr.msk.bf16.vlgmr.msra.gmra.mrb[24].mxu0 %vm2217_vm13, %v2286_v26  ;;  %v2540_v40 = vpop.xlane.xlu1 %2539  ;;  %v2763_v58 = vpack.c.bf16 %v2762_v57, %v2762_v57  ;;  %v3013_v5 = vmul.f32 %v6000_v48, %v2165_v50 }
 0x969   : > { %5011 = vmatpush3.bf16.msra.mxu0 %v2341_v27  ;;  %5012 = vmatprep.mubr.msk.bf16.mxu0 %vm5706_vm0, %v5705_v4  ;;  %5547 = vrcp.f32 %v2540_v40  ;;  %v2704_v53 = vpack.c.bf16 %v2703_v42, %v2703_v42  ;;  %v2761_v56 = vpack.c.bf16 %v2760_v36, %v2760_v36  ;;  %v2910_v1 = vpack.c.bf16 %v2909_v47, %v2909_v47 }
 0x96a   : > { %5022 = vmatprep.subr.bf16.mxu0 %v5705_v4  ;;  %v2821_v60 = vand.u32 %v2763_v58, %v6181_v54  ;;  %v3014_v21 = vpack.c.bf16 %v3013_v5, %v3013_v5 }
 0x96b   : > { %v5546_v41 = vpop.eup %5545 }
 0x96c   : > { %v2438_v44 = vmul.f32 %v5546_v41, %v6217_v61 }
 0x96e   : > { %v2439_v46 = vpack.c.bf16 %v2438_v44, %v2438_v44 }
 0x973   : > { %v5548_v51 = vpop.eup %5547 }
 0x974   : > { %5013 = vmatmul.mubr.msk.bf16.vlgmr.msra.gmra.mrb[24].mxu0 %vm2217_vm13, %v2229_v35  ;;  %v2542_v52 = vmul.f32 %v5548_v51, %v6221_v0 }
 0x975   : > { %5023 = vmatpush3.bf16.msra.mxu0 %v2444_v11  ;;  %5024 = vmatprep.mubr.msk.bf16.mxu0 %vm5706_vm0, %v5705_v4 }
 0x976   : > { %5034 = vmatprep.subr.bf16.mxu0 %v5705_v4  ;;  %v2543_v55 = vpack.c.bf16 %v2542_v52, %v2542_v52 }
 0x980   : > { %5025 = vmatmul.mubr.msk.bf16.vlgmr.msra.gmra.mrb[24].mxu0 %vm2217_vm13, %v2439_v46 }
 0x981   : > { %5035 = vmatpush3.bf16.msra.mxu0 %v2548_v49  ;;  %5036 = vmatprep.mubr.msk.bf16.mxu0 %vm5706_vm0, %v5705_v4 }
 0x982   : > { %5060 = vmatprep.subr.bf16.mxu0 %v5705_v4 }
 0x98c   : > { %5037 = vmatmul.mubr.msk.bf16.vlgmr.msra.gmra.mrb[24].mxu0 %vm2217_vm13, %v2543_v55 }
 0x98d   : > { %5061 = vmatpush3.bf16.xpose.msra.mxu0 %v2704_v53  ;;  %5062 = vmatprep.mubr.msk.bf16.mxu0 %vm5706_vm0, %v5705_v4 }
 0x98e   : > { %5066 = vmatprep.subr.bf16.mxu0 %v5705_v4 }
 0x994   : > { %5063 = vmatmul.mubr.bf16.vlgmr.msra.gmra.mrb[28].mxu0 %v6189_v63 }
 0x995   : > { %5067 = vmatpush3.bf16.xpose.msra.mxu0 %v2761_v56  ;;  %5068 = vmatprep.mubr.msk.bf16.mxu0 %vm5706_vm0, %v5705_v4 }
 0x996   : > { %5072 = vmatprep.subr.bf16.mxu0 %v5705_v4 }
 0x99c   : > { %5069 = vmatmul.mubr.bf16.vlgmr.msra.gmra.mrb[32].mxu0 %v6189_v63 }
 0x99d   : > { %5073 = vmatpush3.bf16.msra.mxu0 %v2821_v60  ;;  %5074 = vmatprep.mubr.msk.bf16.mxu0 %vm5706_vm0, %v5705_v4 }
 0x99e   : > { %5078 = vmatprep.subr.bf16.mxu0 %v5705_v4 }
 0xa5f   : > { %v2584_v39 = vpop.f32.mrb[24].mxu0 }
 0xa60   : > { %v2607_v61 = vpack.c.bf16 %v2584_v39, %v2584_v39  ;;  %v5038_v62 = vpop.f32.mrb[25].mxu0 }
 0xa61   : > { %v2587_v0 = vpop.f32.mrb[26].mxu0 }
 0xa62   : > { %v5039_v3 = vpop.f32.mrb[27].mxu0  ;;  %5057 = vmatmul.mubr.bf16.vlgmr.msra.gmra.mrb[36].mxu1 %v2607_v61  ;;  %v2705_v61 = vmul.f32 %v5988_v37, %v6302_v23 }
 0xa63   : > { %5085 = vmatpush3.bf16.xpose.msra.mxu1 %v2910_v1  ;;  %5086 = vmatprep.mubr.msk.bf16.mxu1 %vm5706_vm0, %v5705_v4 }
 0xa64   : > { %5096 = vmatprep.subr.bf16.mxu1 %v5705_v4  ;;  %v2706_v3 = vpack.c.bf16 %v2705_v61, %v2705_v61 }
 0xa67   : > { %v2741_v7 = vpop.f32.mrb[28].mxu0 }
 0xa68   : > { %v2747_v8 = vmul.f32 0.17677669, %v2741_v7  ;;  %v5064_v19 = vpop.f32.mrb[29].mxu0 }
 0xa69   : > { %v2744_v20 = vpop.f32.mrb[30].mxu0  ;;  %v2867_v19 = vand.u32 %v2706_v3, %v6181_v54 }
 0xa6a   : > { %v5065_v22 = vpop.f32.mrb[31].mxu0  ;;  %5087 = vmatmul.mubr.bf16.vlgmr.msra.gmra.mrb[40].mxu1 %v6189_v63  ;;  %v2748_v24 = vsel %vm2217_vm13, %v2747_v8, -inf }
 0xa6b   : > { %5097 = vmatpush3.bf16.xpose.msra.mxu1 %v3014_v21  ;;  %2749 = vmax.xlane.f32.xlu1 %v2748_v24  ;;  %v2911_v21 = vmul.f32 %v5991_v38, %v6302_v23  ;;  %v3015_v38 = vmul.f32 %v6000_v48, %v6302_v23 }
 0xa6c   : > { %5098 = vmatprep.mubr.msk.bf16.mxu1 %vm5706_vm0, %v5705_v4  ;;  %5108 = vmatprep.subr.bf16.mxu1 %v5705_v4 }
 0xa6f   : > { %v2798_v25 = vpop.f32.mrb[32].mxu0 }
 0xa70   : > { %v2804_v26 = vmul.f32 0.17677669, %v2798_v25  ;;  %v5070_v27 = vpop.f32.mrb[33].mxu0  ;;  %v2912_v25 = vpack.c.bf16 %v2911_v21, %v2911_v21 }
 0xa71   : > { %v2801_v28 = vpop.f32.mrb[34].mxu0 }
 0xa72   : > { %v5071_v9 = vpop.f32.mrb[35].mxu0  ;;  %5099 = vmatmul.mubr.bf16.vlgmr.msra.gmra.mrb[44].mxu1 %v6189_v63  ;;  %v2805_v30 = vsel %vm2217_vm13, %v2804_v26, -inf  ;;  %v2970_v27 = vand.u32 %v2912_v25, %v6181_v54 }
 0xa73   : > { %2806 = vmax.xlane.f32.xlu0 %v2805_v30  ;;  %5109 = vmatpush3.bf16.msra.mxu1 %v6230_v6 }
 0xa74   : > { %5110 = vmatprep.subr.bf16.mxu1 %v5705_v4  ;;  %5124 = vmatprep.mubr.msk.bf16.mxu1 %vm5706_vm0, %v5705_v4 }
 0xa77   : > { %5111 = vmatpush3.bf16.msra.mxu1 %v6234_v12 }
 0xa78   : > { %5112 = vmatprep.subr.bf16.mxu1 %v5705_v4 }
 0xa7b   : > { %5113 = vmatpush3.bf16.msra.mxu1 %v6239_v13 }
 0xa7c   : > { %5114 = vmatprep.subr.bf16.mxu1 %v5705_v4 }
 0xa7f   : > { %5115 = vmatpush3.bf16.msra.mxu1 %v6244_v14 }
 0xa80   : > { %5116 = vmatprep.subr.bf16.mxu1 %v5705_v4 }
 0xa83   : > { %5117 = vmatpush3.bf16.msra.mxu1 %v6249_v15 }
 0xa84   : > { %5118 = vmatprep.subr.bf16.mxu1 %v5705_v4 }
 0xa87   : > { %5119 = vmatpush3.bf16.msra.mxu1 %v6254_v16 }
 0xa88   : > { %5120 = vmatprep.subr.bf16.mxu1 %v5705_v4 }
 0xa8b   : > { %5121 = vmatpush3.bf16.msra.mxu1 %v6259_v17 }
 0xa8c   : > { %5122 = vmatprep.subr.bf16.mxu1 %v5705_v4 }
 0xa8f   : > { %5123 = vmatpush3.bf16.msra.mxu1 %v6264_v18 }
 0xa90   : > { %5148 = vmatprep.subr.bf16.mxu1 %v5705_v4 }
 0xaf8   : > { %v2750_v13 = vpop.xlane.xlu1 %2749 }
 0xaf9   : > { %v2751_v32 = vsub.f32 %v2747_v8, %v2750_v13 }
 0xafb   : > { %v2752_v35 = vmul.f32 1.442695, %v2751_v32  ;;  %v5412_v32 = vld [vmem:[%s6639_s10 + $0x48] sm:$0xff]  }
 0xb00   : > { %v2807_v63 = vpop.xlane.xlu0 %2806 }
 0xb01   : > { %v2808_v6 = vsub.f32 %v2804_v26, %v2807_v63  ;;  %v3016_v63 = vpack.c.bf16 %v3015_v38, %v3015_v38 }
 0xb03   : > { %v2809_v12 = vmul.f32 1.442695, %v2808_v6  ;;  %v3074_v13 = vand.u32 %v3016_v63, %v6181_v54  ;;  %v5411_v54 = vld [vmem:[%s6639_s10 + $0x40] sm:$0xff]  }
 0xb05   : > { %5549 = vpow2.f32 %v2809_v12 }
 0xb06   : > { %5551 = vpow2.f32 %v2752_v35  ;;  %v5415_v35 = vld [vmem:[%s6639_s10 + $0x60] sm:$0xff]  }
 0xb0f   : > { %v5550_v44 = vpop.eup %5549 }
 0xb10   : > { %v2811_v45 = vsel %vm2217_vm13, %v5550_v44, 0.0  ;;  %v5552_v53 = vpop.eup %5551 }
 0xb11   : > { %v2754_v55 = vsel %vm2217_vm13, %v5552_v53, 0.0 }
 0xb35   : > { %v6346_v14 = vpop.f32.mrb[36].mxu1 }
 0xb36   : > { %v5058_v15 = vpop.f32.mrb[37].mxu1 }
 0xb37   : > { %v2700_v16 = vpop.f32.mrb[38].mxu1 }
 0xb38   : > { %v5059_v33 = vpop.f32.mrb[39].mxu1  ;;  %v5413_v16 = vld [vmem:[%s6639_s10 + $0x50] sm:$0xff]  }
 0xb39   : > { %v5414_v33 = vld [vmem:[%s6639_s10 + $0x58] sm:$0xff]  }
 0xb3d   : > { %v2947_v11 = vpop.f32.mrb[40].mxu1 }
 0xb3e   : > { %v2953_v17 = vmul.f32 0.17677669, %v2947_v11  ;;  %v5088_v40 = vpop.f32.mrb[41].mxu1  ;;  %v5416_v11 = vld [vmem:[%s6639_s10 + $0x68] sm:$0xff]  }
 0xb3f   : > { %v2950_v41 = vpop.f32.mrb[42].mxu1 }
 0xb40   : > { %v5089_v18 = vpop.f32.mrb[43].mxu1  ;;  %v2954_v43 = vsel %vm2217_vm13, %v2953_v17, -inf  ;;  %v5403_v41 = vld [vmem:[%s6639_s10] sm:$0xff]  }
 0xb41   : > { %2955 = vmax.xlane.f32.xlu0 %v2954_v43 }
 0xb45   : > { %v3051_v46 = vpop.f32.mrb[44].mxu1  ;;  %2812 = vadd.xlane.f32.xlu0 %v2811_v45 }
 0xb46   : > { %v3057_v49 = vmul.f32 0.17677669, %v3051_v46  ;;  %v5100_v50 = vpop.f32.mrb[45].mxu1  ;;  %v5404_v46 = vld [vmem:[%s6639_s10 + $0x8] sm:$0xff]  }
 0xb47   : > { %v3054_v51 = vpop.f32.mrb[46].mxu1  ;;  %v5406_v50 = vld [vmem:[%s6639_s10 + $0x18] sm:$0xff]  }
 0xb48   : > { %v5101_v42 = vpop.f32.mrb[47].mxu1  ;;  %v3058_v52 = vsel %vm2217_vm13, %v3057_v49, -inf  ;;  %v5407_v51 = vld [vmem:[%s6639_s10 + $0x20] sm:$0xff]  }
 0xb49   : > { %3059 = vmax.xlane.f32.xlu1 %v3058_v52  ;;  %v5408_v42 = vld [vmem:[%s6639_s10 + $0x28] sm:$0xff]   ;;  %v5409_v52 = vld [vmem:[%s6639_s10 + $0x30] sm:$0xff]  }
 0xb4d   : > { %2755 = vadd.xlane.f32.xlu1 %v2754_v55  ;;  %v5410_v55 = vld [vmem:[%s6639_s10 + $0x38] sm:$0xff]  }
 0xbce   : > { %v2956_v36 = vpop.xlane.xlu0 %2955 }
 0xbcf   : > { %v2957_v56 = vsub.f32 %v2953_v17, %v2956_v36  ;;  %v5417_v17 = vld [vmem:[%s6639_s10 + $0x70] sm:$0xff]  }
 0xbd1   : > { %v2958_v57 = vmul.f32 1.442695, %v2957_v56 }
 0xbd2   : > { %v2813_v58 = vpop.xlane.xlu0 %2812 }
 0xbd3   : > { %5553 = vpow2.f32 %v2958_v57  ;;  %v5418_v57 = vld [vmem:[%s6639_s10 + $0x78] sm:$0xff]  }
 0xbd4   : > { %5555 = vrcp.f32 %v2813_v58 }
 0xbd6   : > { %v3060_v60 = vpop.xlane.xlu1 %3059 }
 0xbd7   : > { %v3061_v47 = vsub.f32 %v3057_v49, %v3060_v60  ;;  %v5405_v49 = vld [vmem:[%s6639_s10 + $0x10] sm:$0xff]  }
 0xbd9   : > { %v3062_v39 = vmul.f32 1.442695, %v3061_v47 }
 0xbda   : > { %v2756_v62 = vpop.xlane.xlu1 %2755 }
 0xbdb   : > { %5557 = vpow2.f32 %v3062_v39 }
 0xbdc   : > { %5559 = vrcp.f32 %v2756_v62 }
 0xbdd   : > { %v5554_v0 = vpop.eup %5553 }
 0xbde   : > { %v5556_v1 = vpop.eup %5555  ;;  %v2960_v5 = vsel %vm2217_vm13, %v5554_v0, 0.0 }
 0xbdf   : > { %v2815_v7 = vmul.f32 %v5556_v1, %v5550_v44  ;;  %2961 = vadd.xlane.f32.xlu0 %v2960_v5 }
 0xbe1   : > { %v2816_v8 = vpack.c.bf16 %v2815_v7, %v2815_v7  ;;  %v4620_v7 = vld [vmem:[%s6641_s7] ss:$0 sm:$0xff]  ;;  %s6643_s7 = sld [smem:[#allocation19_spill]] }
 0xbe3   : > { %5075 = vmatmul.mubr.msk.bf16.vlgmr.msra.gmra.mrb[36].mxu0 %vm2217_vm13, %v2816_v8 }
 0xbe4   : > { %5079 = vmatpush3.bf16.msra.mxu0 %v2867_v19  ;;  %5080 = vmatprep.mubr.msk.bf16.mxu0 %vm5706_vm0, %v5705_v4 }
 0xbe5   : > { %v5558_v37 = vpop.eup %5557  ;;  %5090 = vmatprep.subr.bf16.mxu0 %v5705_v4 }
 0xbe6   : > { %v5560_v20 = vpop.eup %5559  ;;  %v3064_v22 = vsel %vm2217_vm13, %v5558_v37, 0.0 }
 0xbe7   : > { %3065 = vadd.xlane.f32.xlu1 %v3064_v22  ;;  %v2758_v24 = vmul.f32 %v5560_v20, %v5552_v53  ;;  %v4591_v53 = vld [vmem:[%s6640_s18] ss:$0 sm:$0xff]  ;;  %s6642_s18 = sld [smem:[#allocation21_spill]] }
 0xbe8   : > { %v2698_v36 = vadd.f32 %v4591_v53, %v6346_v14 }
 0xbe9   : > { %v2759_v26 = vpack.c.bf16 %v2758_v24, %v2758_v24 }
 0xbea   : > { %v3190_v56 = vpack.c.bf16 %v2698_v36, %v2698_v36 }
 0xbed   : > { %v5419_v22 = vld [vmem:[%s6642_s18] ss:$16 sps:$4 sm:$0xff]   ;;  %v5421_v24 = vld [vmem:[%s6642_s18 + $0x4] ss:$16 sps:$4 sm:$0xff]   ;;  %v5422_v25 = vld [vmem:[%s6642_s18 + $0x8] ss:$16 sps:$4 sm:$0xff]  }
 0xbee   : > { %v5425_v38 = vld [vmem:[%s6642_s18 + $0x20] ss:$16 sps:$4 sm:$0xff]  }
 0xbef   : > { %5081 = vmatmul.mubr.msk.bf16.vlgmr.msra.gmra.mrb[36].mxu0 %vm2217_vm13, %v2759_v26  ;;  %v5424_v26 = vld [vmem:[%s6642_s18 + $0xc] ss:$16 sps:$4 sm:$0xff]   ;;  %v5431_v63 = vld [vmem:[%s6642_s18 + $0x40] ss:$16 sps:$4 sm:$0xff]  }
 0xbf0   : > { %5091 = vmatpush3.bf16.msra.mxu0 %v2970_v27  ;;  %5092 = vmatprep.mubr.msk.bf16.mxu0 %vm5706_vm0, %v5705_v4  ;;  %v5427_v27 = vld [vmem:[%s6642_s18 + $0x24] ss:$16 sps:$4 sm:$0xff]  }
 0xbf1   : > { %5102 = vmatprep.subr.bf16.mxu0 %v5705_v4 }
 0xc6c   : > { %v2962_v28 = vpop.xlane.xlu0 %2961 }
 0xc6d   : > { %5561 = vrcp.f32 %v2962_v28  ;;  %v5430_v28 = vld [vmem:[%s6642_s18 + $0x2c] ss:$16 sps:$4 sm:$0xff]  }
 0xc74   : > { %v3066_v9 = vpop.xlane.xlu1 %3065 }
 0xc75   : > { %5563 = vrcp.f32 %v3066_v9  ;;  %v5428_v9 = vld [vmem:[%s6642_s18 + $0x28] ss:$16 sps:$4 sm:$0xff]  }
 0xc77   : > { %v5562_v30 = vpop.eup %5561 }
 0xc78   : > { %v2964_v6 = vmul.f32 %v5562_v30, %v5554_v0  ;;  %v5433_v30 = vld [vmem:[%s6642_s18 + $0x44] ss:$16 sps:$4 sm:$0xff]  }
 0xc7a   : > { %v2965_v12 = vpack.c.bf16 %v2964_v6, %v2964_v6  ;;  %v5434_v6 = vld [vmem:[%s6642_s18 + $0x48] ss:$16 sps:$4 sm:$0xff]  }
 0xc7c   : > { %5093 = vmatmul.mubr.msk.bf16.vlgmr.msra.gmra.mrb[36].mxu0 %vm2217_vm13, %v2965_v12 }
 0xc7d   : > { %5103 = vmatpush3.bf16.msra.mxu0 %v3074_v13  ;;  %5104 = vmatprep.mubr.msk.bf16.mxu0 %vm5706_vm0, %v5705_v4 }
 0xc7e   : > { %5128 = vmatprep.subr.bf16.mxu0 %v5705_v4 }
 0xc7f   : > { %v5564_v48 = vpop.eup %5563 }
 0xc80   : > { %v3068_v23 = vmul.f32 %v5564_v48, %v5558_v37 }
 0xc82   : > { %v3069_v15 = vpack.c.bf16 %v3068_v23, %v3068_v23 }
 0xc88   : > { %5105 = vmatmul.mubr.msk.bf16.vlgmr.msra.gmra.mrb[36].mxu0 %vm2217_vm13, %v3069_v15  ;;  %v5439_v15 = vld [vmem:[%s6642_s18 + $0x64] ss:$16 sps:$4 sm:$0xff]  }
 0xc89   : > { %5144 = vmatprep.mubr.msk.bf16.mxu0 %vm5706_vm0, %v5705_v4  ;;  %5129 = vmatpush3.bf16.msra.mxu0 %v5411_v54  ;;  %v5442_v54 = vld [vmem:[%s6642_s18 + $0x6c] ss:$16 sps:$4 sm:$0xff]  }
 0xc8a   : > { %5130 = vmatprep.subr.bf16.mxu0 %v5705_v4 }
 0xc8d   : > { %5131 = vmatpush3.bf16.msra.mxu0 %v5412_v32  ;;  %v5437_v32 = vld [vmem:[%s6642_s18 + $0x60] ss:$16 sps:$4 sm:$0xff]  }
 0xc8e   : > { %5132 = vmatprep.subr.bf16.mxu0 %v5705_v4 }
 0xc91   : > { %5133 = vmatpush3.bf16.msra.mxu0 %v5413_v16  ;;  %v5440_v16 = vld [vmem:[%s6642_s18 + $0x68] ss:$16 sps:$4 sm:$0xff]  }
 0xc92   : > { %5134 = vmatprep.subr.bf16.mxu0 %v5705_v4 }
 0xc95   : > { %5135 = vmatpush3.bf16.msra.mxu0 %v5414_v33  ;;  %v5445_v33 = vld [vmem:[%s6642_s18 + $0x84] ss:$16 sps:$4 sm:$0xff]  }
 0xc96   : > { %5136 = vmatprep.subr.bf16.mxu0 %v5705_v4 }
 0xc99   : > { %5137 = vmatpush3.bf16.msra.mxu0 %v5415_v35  ;;  %v5448_v35 = vld [vmem:[%s6642_s18 + $0x8c] ss:$16 sps:$4 sm:$0xff]  }
 0xc9a   : > { %5138 = vmatprep.subr.bf16.mxu0 %v5705_v4 }
 0xc9d   : > { %5139 = vmatpush3.bf16.msra.mxu0 %v5416_v11  ;;  %v5443_v11 = vld [vmem:[%s6642_s18 + $0x80] ss:$16 sps:$4 sm:$0xff]  }
 0xc9e   : > { %5140 = vmatprep.subr.bf16.mxu0 %v5705_v4 }
 0xca1   : > { %5141 = vmatpush3.bf16.msra.mxu0 %v5417_v17  ;;  %v5446_v17 = vld [vmem:[%s6642_s18 + $0x88] ss:$16 sps:$4 sm:$0xff]  }
 0xca2   : > { %5142 = vmatprep.subr.bf16.mxu0 %v5705_v4 }
 0xca5   : > { %5143 = vmatpush3.bf16.msra.mxu0 %v5418_v57  ;;  %v4621_v57 = vld [vmem:[%s6643_s7] ss:$0 sm:$0xff]  ;;  %s6647_s7 = sld [smem:[#allocation24_spill]] }
 0xca6   : > { %3619 = vmatprep.subr.bf16.mxu0 %v5421_v24  ;;  %v5481_v24 = vld [vmem:[%s6645_s3 + $0x18] sm:$0xff]  }
 0xd5b   : > { %v3110_v40 = vpop.f32.mrb[36].mxu0 }
 0xd5c   : > { %v3117_v18 = vpack.c.bf16 %v3110_v40, %v3110_v40  ;;  %v5106_v43 = vpop.f32.mrb[37].mxu0  ;;  %v5451_v40 = vld [vmem:[%s6642_s18 + $0xa4] ss:$16 sps:$4 sm:$0xff]  }
 0xd5d   : > { %v3113_v44 = vpop.f32.mrb[38].mxu0  ;;  %v5452_v43 = vld [vmem:[%s6642_s18 + $0xa8] ss:$16 sps:$4 sm:$0xff]  }
 0xd5e   : > { %v5107_v45 = vpop.f32.mrb[39].mxu0  ;;  %5125 = vmatmul.mubr.bf16.vlgmr.msra.gmra.mrb[48].mxu1 %v3117_v18  ;;  %v5449_v18 = vld [vmem:[%s6642_s18 + $0xa0] ss:$16 sps:$4 sm:$0xff]  }
 0xd5f   : > { %5149 = vmatpush3.bf16.msra.mxu1 %v5403_v41  ;;  %5164 = vmatprep.mubr.msk.bf16.mxu1 %vm5706_vm0, %v5705_v4  ;;  %v5454_v41 = vld [vmem:[%s6642_s18 + $0xac] ss:$16 sps:$4 sm:$0xff]   ;;  %v5455_v44 = vld [vmem:[%s6642_s18 + $0xc0] ss:$16 sps:$4 sm:$0xff]   ;;  %v5457_v45 = vld [vmem:[%s6642_s18 + $0xc4] ss:$16 sps:$4 sm:$0xff]  }
 0xd60   : > { %5150 = vmatprep.subr.bf16.mxu1 %v5705_v4 }
 0xd63   : > { %5151 = vmatpush3.bf16.msra.mxu1 %v5404_v46  ;;  %v5458_v46 = vld [vmem:[%s6642_s18 + $0xc8] ss:$16 sps:$4 sm:$0xff]  }
 0xd64   : > { %5152 = vmatprep.subr.bf16.mxu1 %v5705_v4 }
 0xd67   : > { %5153 = vmatpush3.bf16.msra.mxu1 %v5405_v49  ;;  %v5460_v49 = vld [vmem:[%s6642_s18 + $0xcc] ss:$16 sps:$4 sm:$0xff]  }
 0xd68   : > { %5154 = vmatprep.subr.bf16.mxu1 %v5705_v4 }
 0xd6b   : > { %5155 = vmatpush3.bf16.msra.mxu1 %v5406_v50  ;;  %v5463_v50 = vld [vmem:[%s6642_s18 + $0xe4] ss:$16 sps:$4 sm:$0xff]  }
 0xd6c   : > { %5156 = vmatprep.subr.bf16.mxu1 %v5705_v4 }
 0xd6f   : > { %5157 = vmatpush3.bf16.msra.mxu1 %v5407_v51  ;;  %v5466_v51 = vld [vmem:[%s6642_s18 + $0xec] ss:$16 sps:$4 sm:$0xff]  }
 0xd70   : > { %5158 = vmatprep.subr.bf16.mxu1 %v5705_v4 }
 0xd73   : > { %5159 = vmatpush3.bf16.msra.mxu1 %v5408_v42  ;;  %v5461_v42 = vld [vmem:[%s6642_s18 + $0xe0] ss:$16 sps:$4 sm:$0xff]  }
 0xd74   : > { %5160 = vmatprep.subr.bf16.mxu1 %v5705_v4 }
 0xd77   : > { %5161 = vmatpush3.bf16.msra.mxu1 %v5409_v52  ;;  %v5464_v52 = vld [vmem:[%s6642_s18 + $0xe8] ss:$16 sps:$4 sm:$0xff]  }
 0xd78   : > { %5162 = vmatprep.subr.bf16.mxu1 %v5705_v4 }
 0xd7b   : > { %5163 = vmatpush3.bf16.msra.mxu1 %v5410_v55 }
 0xd7c   : > { %3660 = vmatprep.subr.bf16.mxu1 %v5424_v26  ;;  %v5483_v26 = vld [vmem:[%s6645_s3 + $0x60] sm:$0xff]  }
 0xd7e   : > { %5165 = vmatmul.mubr.bf16.vlgmr.msra.gmra.mrb[52].mxu1 %v3190_v56 }
 0xd7f   : > { %3692 = vmatprep.mubr.bf16.mxu1 %v5704_v2  ;;  %3661 = vmatpush1.bf16.msra.mxu1 %v5422_v25  ;;  %v5482_v25 = vld [vmem:[%s6645_s3 + $0x98] sm:$0xff]  }
 0xd80   : > { %3662 = vmatprep.subr.bf16.mxu1 %v5430_v28  ;;  %v5485_v28 = vld [vmem:[%s6645_s3 + $0x20] sm:$0xff]  }
 0xd83   : > { %3663 = vmatpush1.bf16.msra.mxu1 %v5428_v9  ;;  %v5487_v9 = vld [vmem:[%s6645_s3 + $0x68] sm:$0xff]  }
 0xe31   : > { %v3152_v58 = vpop.f32.mrb[48].mxu1 }
 0xe32   : > { %v3153_v60 = vadd.f32 %v4591_v53, %v3152_v58  ;;  %v5126_v47 = vpop.f32.mrb[49].mxu1 }
 0xe33   : > { %v3155_v39 = vpop.f32.mrb[50].mxu1 }
 0xe34   : > { %v3191_v61 = vpack.c.bf16 %v3153_v60, %v3153_v60  ;;  %v5127_v62 = vpop.f32.mrb[51].mxu1  ;;  %v4622_v60 = vld [vmem:[%s6644_s1] ss:$0 sm:$0xff]  ;;  %s6646_s1 = sld [smem:[#allocation22_spill]] }
 0xe35   : > { %v5467_v62 = vld [vmem:[%s6645_s3 + $0x40] sm:$0xff]  }
 0xe36   : > { %5145 = vmatmul.mubr.bf16.vlgmr.msra.gmra.mrb[40].mxu0 %v3191_v61 }
 0xe37   : > { %3651 = vmatprep.mubr.bf16.mxu0 %v5704_v2  ;;  %3620 = vmatpush1.bf16.msra.mxu0 %v5419_v22  ;;  %v5480_v22 = vld [vmem:[%s6645_s3 + $0xd8] sm:$0xff]  }
 0xe38   : > { %3621 = vmatprep.subr.bf16.mxu0 %v5427_v27  ;;  %v5484_v27 = vld [vmem:[%s6645_s3 + $0xe0] sm:$0xff]  }
 0xe3b   : > { %3622 = vmatpush1.bf16.msra.mxu0 %v5425_v38  ;;  %v5486_v38 = vld [vmem:[%s6645_s3 + $0xa0] sm:$0xff]  }
 0xe3c   : > { %3623 = vmatprep.subr.bf16.mxu0 %v5433_v30  ;;  %v5488_v30 = vld [vmem:[%s6645_s3 + $0xe8] sm:$0xff]  }
 0xe3f   : > { %3624 = vmatpush1.bf16.msra.mxu0 %v5431_v63  ;;  %v5490_v63 = vld [vmem:[%s6645_s3 + $0xa8] sm:$0xff]  }
 0xe40   : > { %3625 = vmatprep.subr.bf16.mxu0 %v5439_v15  ;;  %v5496_v15 = vld [vmem:[%s6645_s3 + $0xf8] sm:$0xff]  }
 0xe43   : > { %3626 = vmatpush1.bf16.msra.mxu0 %v5437_v32  ;;  %v5498_v32 = vld [vmem:[%s6645_s3 + $0xb8] sm:$0xff]  }
 0xe44   : > { %3627 = vmatprep.subr.bf16.mxu0 %v5445_v33  ;;  %v3453_v33 = vsub.s32 3, %v5977_v29 }
 0xe47   : > { %3628 = vmatpush1.bf16.msra.mxu0 %v5443_v11 }
 0xe48   : > { %3629 = vmatprep.subr.bf16.mxu0 %v5451_v40 }
 0xe4b   : > { %3630 = vmatpush1.bf16.msra.mxu0 %v5449_v18 }
 0xe4c   : > { %3631 = vmatprep.subr.bf16.mxu0 %v5457_v45 }
 0xe4f   : > { %3632 = vmatpush1.bf16.msra.mxu0 %v5455_v44 }
 0xe50   : > { %3633 = vmatprep.subr.bf16.mxu0 %v5463_v50 }
 0xe51   : > { %v3362_v14 = vpop.f32.mrb[52].mxu1 }
 0xe52   : > { %v5166_v0 = vpop.f32.mrb[53].mxu1 }
 0xe53   : > { %v3365_v1 = vpop.f32.mrb[54].mxu1  ;;  %3634 = vmatpush1.bf16.msra.mxu0 %v5461_v42  ;;  %v5469_v0 = vld [vmem:[%s6645_s3] sm:$0xff]  }
 0xe54   : > { %v5167_v3 = vpop.f32.mrb[55].mxu1  ;;  %v5470_v1 = vld [vmem:[%s6645_s3 + $0x80] sm:$0xff]   ;;  %4822 = vmatprep.subr.bf16.mxu0 %v5467_v62 }
 0xe55   : > { %v5471_v3 = vld [vmem:[%s6645_s3 + $0x48] sm:$0xff]  }
 0xf09   : > { %v3274_v5 = vpop.f32.mrb[40].mxu0 }
 0xf0a   : > { %v3363_v8 = vadd.f32 %v3362_v14, %v3274_v5  ;;  %v5146_v19 = vpop.f32.mrb[41].mxu0  ;;  %v5468_v14 = vld [vmem:[%s6645_s3 + $0xc0] sm:$0xff]   ;;  %v5472_v5 = vld [vmem:[%s6645_s3 + $0xc8] sm:$0xff]  }
 0xf0b   : > { %v3277_v37 = vpop.f32.mrb[42].mxu0  ;;  %v5475_v19 = vld [vmem:[%s6645_s3 + $0x50] sm:$0xff]  }
 0xf0c   : > { %v3375_v20 = vadd.f32 %v4620_v7, %v3363_v8  ;;  %v5147_v21 = vpop.f32.mrb[43].mxu0  ;;  %v5473_v7 = vld [vmem:[%s6645_s3 + $0x8] sm:$0xff]   ;;  %v5476_v37 = vld [vmem:[%s6645_s3 + $0xd0] sm:$0xff]  }
 0xf0d   : > { %v5474_v8 = vld [vmem:[%s6645_s3 + $0x88] sm:$0xff]   ;;  %v5478_v21 = vld [vmem:[%s6645_s3 + $0x90] sm:$0xff]  }
 0xf0e   : > { %v3376_v2 = vadd.f32 %v3375_v20, %v6148_v10  ;;  %v5436_v10 = vld [vmem:[%s6642_s18 + $0x4c] ss:$16 sps:$4 sm:$0xff]   ;;  %v5477_v20 = vld [vmem:[%s6645_s3 + $0x10] sm:$0xff]  }
 0xf0f   : > { %3664 = vmatprep.subr.bf16.mxu1 %v5436_v10  ;;  %v5489_v10 = vld [vmem:[%s6645_s3 + $0x28] sm:$0xff]  }
 0xf10   : > { %3379 = vadd.xlane.f32.xlu0 %v3376_v2  ;;  %3665 = vmatpush1.bf16.msra.mxu1 %v5434_v6  ;;  %v5491_v6 = vld [vmem:[%s6645_s3 + $0x70] sm:$0xff]  }
 0xf11   : > { %3666 = vmatprep.subr.bf16.mxu1 %v5442_v54  ;;  %v5497_v54 = vld [vmem:[%s6645_s3 + $0x38] sm:$0xff]  }
 0xf14   : > { %3667 = vmatpush1.bf16.msra.mxu1 %v5440_v16  ;;  %v3437_v16 = vld [vmem:[%s6646_s1] sm:$0xf]  ;;  %s6648_s1 = sld [smem:[#allocation27_spill]] }
 0xf15   : > { %3668 = vmatprep.subr.bf16.mxu1 %v5448_v35  ;;  %v3442_v35 = vrot.slane %v3437_v16, %v5985_v34  ;;  %v3450_v11 = vrot.slane %v3437_v16, %v1059_v59  ;;  %v3454_v40 = vrot.slane %v3437_v16, %v3453_v33 }
 0xf18   : > { %3669 = vmatpush1.bf16.msra.mxu1 %v5446_v17  ;;  %v3446_v17 = vrot.slane %v3437_v16, %v5980_v31 }
 0xf19   : > { %3670 = vmatprep.subr.bf16.mxu1 %v5454_v41 }
 0xf1c   : > { %3671 = vmatpush1.bf16.msra.mxu1 %v5452_v43 }
 0xf1d   : > { %3672 = vmatprep.subr.bf16.mxu1 %v5460_v49 }
 0xf20   : > { %3673 = vmatpush1.bf16.msra.mxu1 %v5458_v46 }
 0xf21   : > { %3674 = vmatprep.subr.bf16.mxu1 %v5466_v51 }
 0xf24   : > { %3675 = vmatpush1.bf16.msra.mxu1 %v5464_v52 }
 0xf25   : > { %4844 = vmatprep.subr.bf16.mxu1 %v5468_v14 }
 0xf9d   : > { %v3380_v12 = vpop.xlane.xlu0 %3379 }
 0xf9e   : > { %v3381_v13 = vmul.f32 0.0078125, %v3380_v12  ;;  %v5492_v12 = vld [vmem:[%s6645_s3 + $0xf0] sm:$0xff]  }
 0xfa0   : > { %v3382_v48 = vsub.f32 %v3376_v2, %v3381_v13  ;;  %v5479_v2 = vld [vmem:[%s6645_s3 + $0x58] sm:$0xff]   ;;  %v5493_v13 = vld [vmem:[%s6645_s3 + $0x30] sm:$0xff]  }
 0xfa2   : > { %v3383_v23 = vmul.f32 %v3382_v48, %v3382_v48 }
 0xfa4   : > { %3384 = vadd.xlane.f32.xlu1 %v3383_v23  ;;  %v5495_v23 = vld [vmem:[%s6645_s3 + $0x78] sm:$0xff]  }
0x1031   : > { %v3385_v53 = vpop.xlane.xlu1 %3384 }
0x1032   : > { %v3386_v55 = vmul.f32 0.0078125, %v3385_v53 }
0x1034   : > { %v3387_v36 = vadd.f32 1e-12, %v3386_v55 }
0x1036   : > { %5565 = vrsqrt.f32 %v3387_v36 }
0x1040   : > { %v5566_v56 = vpop.eup %5565 }
0x1041   : > { %v3389_v58 = vmul.f32 %v5566_v56, %v3382_v48  ;;  %v5494_v48 = vld [vmem:[%s6645_s3 + $0xb0] sm:$0xff]   ;;  %s6528_s3 = sand.u32 1, %s5663_s23  }
0x1042   : > { %s4514_s6 = sshll.u32 %s6528_s3, 3  ;;  %s4329_s9 = scalar_lea.sflag [#allocation3], %s6528_s3 }
0x1043   : > { %v3396_v47 = vmul.f32 %v4621_v57, %v3389_v58  ;;  %s990_s8 = scalar_lea.vmem [#allocation2], %s4514_s6  ;;  %s4707_s6 = sshll.u32 %s5896_s0, 7 }
0x1045   : > { %v6450_v39 = vadd.f32 %v4622_v60, %v3396_v47 }
0x1047   : > { %v3436_v61 = vpack.c.bf16 %v6450_v39, %v6450_v39 }
0x1049   : > { %3652 = vmatmul.mubr.bf16.vlgmr.msra.gmra.mrb[44].mxu0 %v3436_v61  ;;  %3693 = vmatmul.mubr.bf16.vlgmr.msra.gmra.mrb[56].mxu1 %v3436_v61 }
0x104a   : > { %4823 = vmatpush3.bf16.msra.mxu0 %v5469_v0  ;;  %4845 = vmatpush3.bf16.msra.mxu1 %v5470_v1 }
0x104b   : > { %4824 = vmatprep.subr.bf16.mxu0 %v5471_v3  ;;  %4846 = vmatprep.subr.bf16.mxu1 %v5472_v5 }
0x104e   : > { %4825 = vmatpush3.bf16.msra.mxu0 %v5473_v7  ;;  %4847 = vmatpush3.bf16.msra.mxu1 %v5474_v8 }
0x104f   : > { %4826 = vmatprep.subr.bf16.mxu0 %v5475_v19  ;;  %4848 = vmatprep.subr.bf16.mxu1 %v5476_v37 }
0x1052   : > { %4827 = vmatpush3.bf16.msra.mxu0 %v5477_v20  ;;  %4849 = vmatpush3.bf16.msra.mxu1 %v5478_v21 }
0x1053   : > { %4828 = vmatprep.subr.bf16.mxu0 %v5479_v2  ;;  %4850 = vmatprep.subr.bf16.mxu1 %v5480_v22 }
0x1056   : > { %4829 = vmatpush3.bf16.msra.mxu0 %v5481_v24  ;;  %4851 = vmatpush3.bf16.msra.mxu1 %v5482_v25 }
0x1057   : > { %4830 = vmatprep.subr.bf16.mxu0 %v5483_v26  ;;  %4852 = vmatprep.subr.bf16.mxu1 %v5484_v27 }
0x105a   : > { %4831 = vmatpush3.bf16.msra.mxu0 %v5485_v28  ;;  %4853 = vmatpush3.bf16.msra.mxu1 %v5486_v38 }
0x105b   : > { %4832 = vmatprep.subr.bf16.mxu0 %v5487_v9  ;;  %4854 = vmatprep.subr.bf16.mxu1 %v5488_v30 }
0x105e   : > { %4833 = vmatpush3.bf16.msra.mxu0 %v5489_v10  ;;  %4855 = vmatpush3.bf16.msra.mxu1 %v5490_v63 }
0x105f   : > { %4834 = vmatprep.subr.bf16.mxu0 %v5491_v6  ;;  %4856 = vmatprep.subr.bf16.mxu1 %v5492_v12 }
0x1062   : > { %4835 = vmatpush3.bf16.msra.mxu0 %v5493_v13  ;;  %4857 = vmatpush3.bf16.msra.mxu1 %v5494_v48 }
0x1063   : > { %4836 = vmatprep.subr.bf16.mxu0 %v5495_v23  ;;  %4858 = vmatprep.subr.bf16.mxu1 %v5496_v15 }
0x1066   : > { %4837 = vmatpush3.bf16.msra.mxu0 %v5497_v54  ;;  %4859 = vmatpush3.bf16.msra.mxu1 %v5498_v32 }
0x1067   : > { %5168 = vmatprep.subr.bf16.mxu0 %v5705_v4  ;;  %5188 = vmatprep.subr.bf16.mxu1 %v5705_v4 }
0x111c   : > { %v3653_v41 = vpop.f32.mrb[44].mxu0  ;;  %v3694_v18 = vpop.f32.mrb[56].mxu1 }
0x111d   : > { %v3654_v43 = vadd.f32 %v3653_v41, %v3442_v35  ;;  %v3695_v44 = vadd.f32 %v3694_v18, %v3450_v11  ;;  %v3655_v45 = vpop.f32.mrb[45].mxu0  ;;  %v3696_v46 = vpop.f32.mrb[57].mxu1  ;;  %v4687_v18 = vld [vmem:[%s6647_s7] ss:$0 sm:$0xff]  ;;  %s6649_s7 = sld [smem:[#allocation25_spill]] }
0x111e   : > { %v3656_v49 = vadd.f32 %v3655_v45, %v3446_v17  ;;  %v3697_v50 = vadd.f32 %v3696_v46, %v3454_v40  ;;  %v3657_v51 = vpop.f32.mrb[46].mxu0  ;;  %v3698_v42 = vpop.f32.mrb[58].mxu1  ;;  %v5499_v45 = vld [vmem:[%s6648_s1] sm:$0xff]   ;;  %v5500_v46 = vld [vmem:[%s6648_s1 + $0x8] sm:$0xff]  }
0x111f   : > { %v3701_v52 = vmul.f32 %v3654_v43, %v3654_v43  ;;  %v3703_v53 = vmul.f32 %v3695_v44, %v3695_v44  ;;  %v3658_v55 = vpop.f32.mrb[47].mxu0  ;;  %v3699_v34 = vpop.f32.mrb[59].mxu1 }
0x1120   : > { %v3702_v36 = vmul.f32 %v3656_v49, %v3656_v49  ;;  %v3704_v29 = vmul.f32 %v3697_v50, %v3697_v50  ;;  %v5504_v55 = vld [vmem:[%s6648_s1 + $0x28] sm:$0xff]   ;;  %v5505_v34 = vld [vmem:[%s6648_s1 + $0x30] sm:$0xff]  }
0x1121   : > { %v3705_v59 = vmul.f32 %v3701_v52, %v3654_v43  ;;  %v3707_v56 = vmul.f32 %v3703_v53, %v3695_v44  ;;  %v5502_v52 = vld [vmem:[%s6648_s1 + $0x18] sm:$0xff]   ;;  %v5503_v53 = vld [vmem:[%s6648_s1 + $0x20] sm:$0xff]  }
0x1122   : > { %v3706_v31 = vmul.f32 %v3702_v36, %v3656_v49  ;;  %v3708_v57 = vmul.f32 %v3704_v29, %v3697_v50  ;;  %v5506_v36 = vld [vmem:[%s6648_s1 + $0x38] sm:$0xff]   ;;  %v5507_v29 = vld [vmem:[%s5858_s27] sm:$0xff]  }
0x1123   : > { %v3709_v58 = vmul.f32 0.044715, %v3705_v59  ;;  %v3711_v60 = vmul.f32 0.044715, %v3707_v56  ;;  %v5508_v59 = vld [vmem:[%s5858_s27 + $0x8] sm:$0xff]   ;;  %v5509_v56 = vld [vmem:[%s5858_s27 + $0x10] sm:$0xff]  }
0x1124   : > { %v3710_v47 = vmul.f32 0.044715, %v3706_v31  ;;  %v3712_v61 = vmul.f32 0.044715, %v3708_v57  ;;  %v5510_v31 = vld [vmem:[%s5858_s27 + $0x18] sm:$0xff]   ;;  %v5511_v57 = vld [vmem:[%s5858_s27 + $0x20] sm:$0xff]  }
0x1125   : > { %v3713_v62 = vadd.f32 %v3709_v58, %v3654_v43  ;;  %v3715_v14 = vadd.f32 %v3711_v60, %v3695_v44  ;;  %v5512_v58 = vld [vmem:[%s5858_s27 + $0x28] sm:$0xff]  }
0x1126   : > { %v3714_v0 = vadd.f32 %v3710_v47, %v3656_v49  ;;  %v3716_v1 = vadd.f32 %v3712_v61, %v3697_v50 }
0x1127   : > { %v3717_v3 = vmul.f32 0.7978846, %v3713_v62  ;;  %v3719_v5 = vmul.f32 0.7978846, %v3715_v14  ;;  %v4688_v14 = vld [vmem:[%s6649_s7] ss:$0 sm:$0xff]  ;;  %s6539_s7 = scalar_lea.hbm %s5868_s12, %s4707_s6 }
0x1128   : > { %v3718_v7 = vmul.f32 0.7978846, %v3714_v0  ;;  %v3720_v8 = vmul.f32 0.7978846, %v3716_v1 }
0x1129   : > { %5567 = vtanh.f32 %v3717_v3 }
0x112a   : > { %5569 = vtanh.f32 %v3719_v5 }
0x112b   : > { %5571 = vtanh.f32 %v3718_v7 }
0x112c   : > { %5573 = vtanh.f32 %v3720_v8  ;;  %v5513_v8 = vld [vmem:[%s5858_s27 + $0x30] sm:$0xff]  }
0x1133   : > { %v5568_v19 = vpop.eup %5567 }
0x1134   : > { %v5570_v37 = vpop.eup %5569  ;;  %v3725_v20 = vadd.f32 1.0, %v5568_v19  ;;  %v5514_v19 = vld [vmem:[%s5858_s27 + $0x38] sm:$0xff]  }
0x1135   : > { %v5572_v21 = vpop.eup %5571  ;;  %v3727_v2 = vadd.f32 1.0, %v5570_v37  ;;  %v4131_v37 = vld [vmem:[%s6651_s5] sm:$0x1]  ;;  %s5708_s5 = smov [#allocation2]  }
0x1136   : > { %v5574_v22 = vpop.eup %5573  ;;  %v3726_v24 = vadd.f32 1.0, %v5572_v21  ;;  %v3729_v25 = vmul.f32 0.5, %v3725_v20  ;;  %s5581_s13 = sshll.u32 %s5708_s5, 4  ;;  %s5582_s13 = int_to_ptr.vmem [resolvable:$false] %s5581_s13 }
0x1137   : > { %v3728_v26 = vadd.f32 1.0, %v5574_v22  ;;  %v3731_v27 = vmul.f32 0.5, %v3727_v2  ;;  %s5583_s14 = scalar_lea.vmem %s5582_s13, 256 }
0x1138   : > { %v3730_v28 = vmul.f32 0.5, %v3726_v24  ;;  %v3733_v9 = vmul.f32 %v3729_v25, %v3654_v43 }
0x1139   : > { %v3732_v38 = vmul.f32 0.5, %v3728_v26  ;;  %v3735_v10 = vmul.f32 %v3731_v27, %v3695_v44 }
0x113a   : > { %v3734_v30 = vmul.f32 %v3730_v28, %v3656_v49  ;;  %v3801_v13 = vpack.c.bf16 %v3733_v9, %v3733_v9 }
0x113b   : > { %v3736_v63 = vmul.f32 %v3732_v38, %v3697_v50  ;;  %v3803_v48 = vpack.c.bf16 %v3735_v10, %v3735_v10 }
0x113c   : > { %v3802_v6 = vpack.c.bf16 %v3734_v30, %v3734_v30 }
0x113d   : > { %v3804_v12 = vpack.c.bf16 %v3736_v63, %v3736_v63 }
0x113e   : > { %4029 = vmatprep.mubr.bf16.mxu0 %v3802_v6 }
0x113f   : > { %4069 = vmatprep.mubr.bf16.mxu1 %v3804_v12  ;;  %4030 = vmatmul.mubr.bf16.vlgmr.msra.gmra.mrb[48].mxu0 %v3801_v13 }
0x1140   : > { %4070 = vmatmul.mubr.bf16.vlgmr.msra.gmra.mrb[60].mxu1 %v3803_v48  ;;  %5184 = vmatprep.mubr.msk.bf16.mxu0 %vm5706_vm0, %v5705_v4 }
0x1141   : > { %5204 = vmatprep.mubr.msk.bf16.mxu1 %vm5706_vm0, %v5705_v4  ;;  %5169 = vmatpush3.bf16.msra.mxu0 %v5499_v45 }
0x1142   : > { %5170 = vmatprep.subr.bf16.mxu0 %v5705_v4  ;;  %5189 = vmatpush3.bf16.msra.mxu1 %v5507_v29 }
0x1143   : > { %5190 = vmatprep.subr.bf16.mxu1 %v5705_v4 }
0x1145   : > { %5171 = vmatpush3.bf16.msra.mxu0 %v5500_v46 }
0x1146   : > { %5172 = vmatprep.subr.bf16.mxu0 %v5705_v4  ;;  %5191 = vmatpush3.bf16.msra.mxu1 %v5508_v59 }
0x1147   : > { %5192 = vmatprep.subr.bf16.mxu1 %v5705_v4 }
0x114a   : > { %5193 = vmatpush3.bf16.msra.mxu1 %v5509_v56 }
0x114b   : > { %5194 = vmatprep.subr.bf16.mxu1 %v5705_v4 }
0x114e   : > { %5195 = vmatpush3.bf16.msra.mxu1 %v5510_v31 }
0x114f   : > { %5196 = vmatprep.subr.bf16.mxu1 %v5705_v4 }
0x1152   : > { %5197 = vmatpush3.bf16.msra.mxu1 %v5511_v57 }
0x1153   : > { %5198 = vmatprep.subr.bf16.mxu1 %v5705_v4 }
0x1156   : > { %5199 = vmatpush3.bf16.msra.mxu1 %v5512_v58 }
0x1157   : > { %5200 = vmatprep.subr.bf16.mxu1 %v5705_v4 }
0x115a   : > { %5201 = vmatpush3.bf16.msra.mxu1 %v5513_v8 }
0x115b   : > { %5202 = vmatprep.subr.bf16.mxu1 %v5705_v4 }
0x115e   : > { %5203 = vmatpush3.bf16.msra.mxu1 %v5514_v19 }
0x1212   : > { %v4838_v23 = vpop.f32.mrb[48].mxu0 }
0x1213   : > { %v4860_v15 = vpop.f32.mrb[60].mxu1  ;;  %v4839_v54 = vpop.f32.mrb[49].mxu0 }
0x1214   : > { %v4840_v32 = vadd.f32 %v4839_v54, %v4838_v23  ;;  %v4861_v16 = vpop.f32.mrb[61].mxu1  ;;  %v4841_v33 = vpop.f32.mrb[50].mxu0 }
0x1215   : > { %v4862_v35 = vadd.f32 %v4861_v16, %v4860_v15  ;;  %v4863_v11 = vpop.f32.mrb[62].mxu1  ;;  %v4842_v17 = vpop.f32.mrb[51].mxu0 }
0x1216   : > { %v4864_v40 = vpop.f32.mrb[63].mxu1 }
0x1217   : > { %v4072_v41 = vadd.f32 %v4862_v35, %v4840_v32 }
0x1219   : > { %v4077_v43 = vadd.f32 %v4072_v41, %v6450_v39  ;;  %v5501_v39 = vld [vmem:[%s6648_s1 + $0x10] sm:$0xff]   ;;  %s6650_s1 = sld [smem:[#allocation26_spill]] }
0x121a   : > { %5173 = vmatpush3.bf16.msra.mxu0 %v5501_v39 }
0x121b   : > { %v4085_v44 = vadd.f32 %v4687_v18, %v4077_v43  ;;  %5174 = vmatprep.subr.bf16.mxu0 %v5705_v4 }
0x121d   : > { %4088 = vadd.xlane.f32.xlu0 %v4085_v44 }
0x121e   : > { %5175 = vmatpush3.bf16.msra.mxu0 %v5502_v52 }
0x121f   : > { %5176 = vmatprep.subr.bf16.mxu0 %v5705_v4  ;;  %v4689_v1 = vld [vmem:[%s6650_s1] ss:$0 sm:$0xff]  ;;  %s4346_s1 = sshll.u32 %s990_s8, 4  ;;  %s4347_s1 = int_to_ptr.vmem [resolvable:$true] %s4346_s1 }
0x1220   : > { %s5577_s10 = scalar_lea.vmem %s4347_s1, 128  ;;  %p5584_p0 = scmp.lt.s32.totalorder %s4347_s1, %s5582_s13 }
0x1221   : > { %p5578_p11 = scmp.ne.s32.totalorder %s4347_s1, %s5577_s10  ;;  %p5585_p1 = scmp.lt.s32.totalorder %s5583_s14, %s5577_s10 }
0x1222   : > { %5177 = vmatpush3.bf16.msra.mxu0 %v5503_v53 }
0x1223   : > { %5178 = vmatprep.subr.bf16.mxu0 %v5705_v4  ;;  %p5579_p12 = pnand %p5578_p11, %p5913_p5  ;;  %p5586_p2 = por %p5585_p1, %p5584_p0 }
0x1225   : > { %p5580_p13 = pneg %p5579_p12 }
0x1226   : > { %5179 = vmatpush3.bf16.msra.mxu0 %v5504_v55 }
0x1227   : > { %5180 = vmatprep.subr.bf16.mxu0 %v5705_v4  ;;  %p5587_p3 = pnand %p5586_p2, %p5580_p13 }
0x122a   : > { %5181 = vmatpush3.bf16.msra.mxu0 %v5505_v34 }
0x122b   : > { %5182 = vmatprep.subr.bf16.mxu0 %v5705_v4 }
0x122e   : > { %5183 = vmatpush3.bf16.msra.mxu0 %v5506_v36 }
0x12aa   : > { %v4089_v49 = vpop.xlane.xlu0 %4088 }
0x12ab   : > { %v4090_v50 = vmul.f32 0.0078125, %v4089_v49 }
0x12ad   : > { %v4091_v51 = vsub.f32 %v4085_v44, %v4090_v50 }
0x12af   : > { %v4092_v42 = vmul.f32 %v4091_v51, %v4091_v51 }
0x12b1   : > { %4093 = vadd.xlane.f32.xlu1 %v4092_v42 }
0x133e   : > { %v4094_v60 = vpop.xlane.xlu1 %4093 }
0x133f   : > { %v4095_v47 = vmul.f32 0.0078125, %v4094_v60 }
0x1341   : > { %v4096_v61 = vadd.f32 1e-12, %v4095_v47 }
0x1343   : > { %5575 = vrsqrt.f32 %v4096_v61 }
0x134d   : > { %v5576_v62 = vpop.eup %5575 }
0x134e   : > { %v4098_v0 = vmul.f32 %v5576_v62, %v4091_v51 }
0x1350   : > { %v4105_v3 = vmul.f32 %v4688_v14, %v4098_v0 }
0x1352   : > { %v4112_v5 = vadd.f32 %v4689_v1, %v4105_v3 }
0x1354   : > { %v4130_v7 = vpack.c.bf16 %v4112_v5, %v4112_v5  ;;  %4113 = vst [vmem:[%s990_s8] sm:$0xff] %v4112_v5 }
0x1356   : > { %5185 = vmatmul.mubr.bf16.vlgmr.msra.gmra.mrb[52].mxu0 %v4130_v7 }
0x1429   : > { %v4214_v20 = vpop.f32.mrb[52].mxu0 }
0x142a   : > { %v4215_v21 = vadd.f32 %v4214_v20, %v4131_v37  ;;  %v5186_v2 = vpop.f32.mrb[53].mxu0 }
0x142b   : > { %v4217_v22 = vpop.f32.mrb[54].mxu0 }
0x142c   : > { %v4220_v24 = vmax.f32 %v4215_v21, 0.0  ;;  %v5187_v25 = vpop.f32.mrb[55].mxu0 }
0x142e   : > { %v4237_v26 = vpack.c.bf16 %v4220_v24, %v4220_v24 }
0x1430   : > { %5205 = vmatmul.mubr.bf16.vlgmr.msra.gmra.mrb[64].mxu1 %v4237_v26 }
0x1431   : > { %5590 = shalt.err (!%p5587_p3)
}
0x1432   : > { %s5591_s8 = scalar_lea.hbm %s6539_s7, 128  ;;  %s5595_s6 = scalar_lea.hbm %s5868_s12, 256 }
0x1433   : > { %p5592_p4 = scmp.ne.s32.totalorder %s6539_s7, %s5591_s8  ;;  %p5596_p9 = scmp.lt.u32.totalorder %s6539_s7, %s5868_s12 }
0x1434   : > { %p5597_p10 = scmp.lt.u32.totalorder %s5595_s6, %s5591_s8  ;;  %p5599_p12 = scmp.lt.u32.totalorder %s5591_s8, %s6539_s7 }
0x1435   : > { %p5593_p7 = pnand %p5592_p4, %p5913_p5 }
0x1436   : > { %p5598_p11 = por %p5597_p10, %p5596_p9 }
0x1437   : > { %p5594_p8 = pneg %p5593_p7 }
0x1438   : > { %p5600_p0 = por %p5599_p12, %p5598_p11 }
0x143a   : > { %p5601_p13 = pnand %p5600_p0, %p5594_p8 }
0x143c   : > { %5604 = shalt.err (!%p5601_p13)
}
0x143d   : > { %5244 = dma.vmem_to_hbm [thread:$0]  (%p5913_p5), %s4347_s1, 128, %s6539_s7, %s4329_s9   ;;  %v4238_v4 = vld [vmem:[%s5863_s4] sm:$0x1] }
0x143e   : > { %s4708_s13 = sshll.u32 %s5896_s0, 4  ;;  %s996_s14 = scalar_lea.vmem [#allocation4], %s6528_s3 }
0x143f   : > { %s4359_s10 = sshll.u32 %s996_s14, 4  ;;  %s6559_s5 = scalar_lea.hbm %s5873_s20, %s4708_s13  ;;  %s6561_s10 = int_to_ptr.vmem [resolvable:$true] %s4359_s10 }
0x1440   : > { %s4334_s8 = scalar_lea.sflag [#allocation5], %s6528_s3  ;;  %s5605_s9 = scalar_lea.vmem %s6561_s10, 16 }
0x1441   : > { %p5606_p1 = scmp.ne.s32.totalorder %s6561_s10, %s5605_s9  ;;  %s5709_s0 = smov [#allocation4]  }
0x1442   : > { %s5609_s1 = sshll.u32 %s5709_s0, 4  ;;  %s5610_s1 = int_to_ptr.vmem [resolvable:$false] %s5609_s1 }
0x1443   : > { %p5607_p2 = pnand %p5606_p1, %p5913_p5  ;;  %s5611_s7 = scalar_lea.vmem %s5610_s1, 32 }
0x1444   : > { %p5612_p4 = scmp.lt.s32.totalorder %s6561_s10, %s5610_s1  ;;  %p5613_p7 = scmp.lt.s32.totalorder %s5611_s7, %s5605_s9 }
0x1445   : > { %p5608_p3 = pneg %p5607_p2 }
0x1446   : > { %p5614_p8 = por %p5613_p7, %p5612_p4 }
0x1448   : > { %p5615_p9 = pnand %p5614_p8, %p5608_p3 }
0x1503   : > { %v4321_v27 = vpop.f32.mrb[64].mxu1 }
0x1504   : > { %v4322_v28 = vadd.f32 %v4321_v27, %v4238_v4  ;;  %v5206_v38 = vpop.f32.mrb[65].mxu1 }
0x1505   : > { %v4324_v9 = vpop.f32.mrb[66].mxu1 }
0x1506   : > { %4327 = vst [vmem:[%s996_s14] sm:$0x1] %v4322_v28  ;;  %v5207_v30 = vpop.f32.mrb[67].mxu1 }
0x1507   : > { %5618 = shalt.err (!%p5615_p9)
}
0x1508   : > { %s5619_s3 = scalar_lea.hbm %s6559_s5, 16  ;;  %s5623_s6 = scalar_lea.hbm %s5873_s20, 32 }
0x1509   : > { %p5620_p10 = scmp.ne.s32.totalorder %s6559_s5, %s5619_s3  ;;  %p5624_p0 = scmp.lt.u32.totalorder %s6559_s5, %s5873_s20 }
0x150a   : > { %p5625_p13 = scmp.lt.u32.totalorder %s5623_s6, %s5619_s3  ;;  %p5627_p2 = scmp.lt.u32.totalorder %s5619_s3, %s6559_s5 }
0x150b   : > { %p5621_p11 = pnand %p5620_p10, %p5913_p5 }
0x150c   : > { %p5626_p1 = por %p5625_p13, %p5624_p0 }
0x150d   : > { %p5622_p12 = pneg %p5621_p11 }
0x150e   : > { %p5628_p4 = por %p5627_p2, %p5626_p1 }
0x1510   : > { %p5629_p3 = pnand %p5628_p4, %p5622_p12 }
0x1512   : > { %5632 = shalt.err (!%p5629_p3)
}
0x1513   : > { %5245 = dma.vmem_to_hbm [thread:$0]  (%p5913_p5), %s6561_s10, 16, %s6559_s5, %s4334_s8  }
0x1514 PF: > { %p5255_p7 = scmp.ge.s32.totalorder %s5671_s28, 2  ;;  %s4371_s13 = sand.u32 1, %s5659_s22  }
0x1515   : > { %s4372_s14 = scalar_lea.sflag [#allocation3], %s4371_s13 }
0x1516   : > { %p5249_p8 = pnand %p5255_p7, %p5917_p6 }
0x1518   : > { %5650 = dma.done.wait (!%p5249_p8), %s4372_s14, 128  }
0x1519   : > { %5652 = vsyncadd (!%p5249_p8), %s4372_s14, 4294967168  ;;  %s4381_s9 = scalar_lea.sflag [#allocation5], %s4371_s13 }
0x151a   : > { %5654 = dma.done.wait (!%p5249_p8), %s4381_s9, 16  }
0x151b   : > { %5656 = vsyncadd (!%p5249_p8), %s4381_s9, 4294967280  ;;  %p77_p5 = scmp.ge.s32.totalorder %s5900_s2, 4   ;;  %s6652_s22 = smov %s5663_s23 }
0x151c   : > { %s6653_s23 = smov %s5667_s26  ;;  %s6654_s26 = smov %s5911_s11 }
0x151d   : > { %s6655_s28 = smov %s5900_s2  ;;  %79 = sbr.rel (!%p77_p5) target bundleno = 66 (0x42), region = 232 }
0x1524   :  { %4385 = vsyncpa [#allocation3], 1 }
0x1525   :  { %4387 = vsyncpa [#allocation3 + $0x1], 1 }
0x1526   :  { %4388 = vsyncpa [#allocation5], 1 }
0x1527   :  { %4390 = vsyncpa [#allocation5 + $0x1], 1 }

</bundles_post_ra>
